<compile_context>
chip_gen: v6e
topology: v6e:2x2x1
jax: 0.10.0
libtpu: 0.0.40
codegen_flags: <defaults>
</compile_context>

<pallas_src>
import functools

import jax
import jax.numpy as jnp
from jax.experimental import pallas as pl
from jax.experimental.pallas import tpu as pltpu

_OUT_PAD = 128  # lane-dense padded width for the scalar decoder output


def _l2_normalize(x, eps=1e-12):
    # F.normalize(x, p=2, dim=1) == x / max(||x||, eps) == x * rsqrt(max(||x||^2, eps^2))
    sq = jnp.sum(x * x, axis=1, keepdims=True)
    return x * jax.lax.rsqrt(jnp.maximum(sq, eps * eps))


def _compiler_params(byte_estimate):
    # Size scoped VMEM from the actual tile budget (2x headroom), capped below
    # v7x's 64 MiB physical VMEM.
    limit = int(min(48 * 1024 * 1024, max(16 * 1024 * 1024, 2 * byte_estimate)))
    return pltpu.CompilerParams(
        dimension_semantics=("parallel",),
        vmem_limit_bytes=limit,
    )


def _pick_tm(n):
    for tm in (512, 256, 128):
        if n % tm == 0:
            return tm
    return n  # fall back to a single whole-array tile


# --------------------------------------------------------------------------
# Encoder input transform: h0 = normalize(relu(x @ w0 + b0))
# --------------------------------------------------------------------------
def _encode_init_kernel(x_ref, w0_ref, b0_ref, h_out_ref, z_out_ref):
    f32 = jnp.float32
    h = jnp.dot(x_ref[...], w0_ref[...], preferred_element_type=f32) + b0_ref[...]
    h = jnp.maximum(h, 0.0)
    h = _l2_normalize(h)
    z_out_ref[...] = h                              # f32 running max (== h0)
    h_out_ref[...] = h.astype(h_out_ref.dtype)      # bf16 copy for next matmuls


def _encode_init(x, w0, b0, tm):
    n, c = x.shape
    p = w0.shape[1]
    est = 2 * (tm * c * 4 + c * p * 4 + p * 4 + tm * p * 2 + tm * p * 4)
    return pl.pallas_call(
        _encode_init_kernel,
        grid=(n // tm,),
        in_specs=[
            pl.BlockSpec((tm, c), lambda i: (i, 0)),
            pl.BlockSpec((c, p), lambda i: (0, 0)),
            pl.BlockSpec((1, p), lambda i: (0, 0)),
        ],
        out_specs=[
            pl.BlockSpec((tm, p), lambda i: (i, 0)),
            pl.BlockSpec((tm, p), lambda i: (i, 0)),
        ],
        out_shape=[
            jax.ShapeDtypeStruct((n, p), jnp.bfloat16),
            jax.ShapeDtypeStruct((n, p), jnp.float32),
        ],
        compiler_params=_compiler_params(est),
    )(x, w0, b0)


# --------------------------------------------------------------------------
# One message-passing + GRUCell layer (PyTorch gate order [r, z, n])
# --------------------------------------------------------------------------
def _gru_layer_kernel(tm, p,
                      a_ref, h_ref, z_ref, wi_ref, wh_ref, bi3_ref, bhn_ref,
                      h_out_ref, z_out_ref):
    f32 = jnp.float32
    i = pl.program_id(0)

    # aggregate(add): aggr[r] = sum_j norm(j->r) * h[j]   (bf16 in, f32 accum)
    aggr = jnp.dot(a_ref[...], h_ref[...], preferred_element_type=f32)       # (tm, p)

    # this tile's own rows of the resident full-h block
    row0 = pl.multiple_of(i * tm, tm)
    h_t = h_ref[pl.ds(row0, tm), :]                                          # (tm, p) bf16

    # fused lane-dense gate matmuls: columns [r | z | n]
    gi = jnp.dot(h_t, wi_ref[...], preferred_element_type=f32) + bi3_ref[...]  # (tm, 3p)
    gh = jnp.dot(aggr.astype(jnp.bfloat16), wh_ref[...],
                 preferred_element_type=f32)                                   # (tm, 3p)

    r = jax.nn.sigmoid(gi[:, 0 * p:1 * p] + gh[:, 0 * p:1 * p])
    u = jax.nn.sigmoid(gi[:, 1 * p:2 * p] + gh[:, 1 * p:2 * p])
    n_ = jnp.tanh(gi[:, 2 * p:3 * p] + r * (gh[:, 2 * p:3 * p] + bhn_ref[...]))
    h_new = _l2_normalize((1.0 - u) * n_ + u * aggr)

    h_out_ref[...] = h_new.astype(h_out_ref.dtype)        # bf16 for next layer
    z_out_ref[...] = jnp.maximum(z_ref[...], h_new)       # running max, f32


def _gru_layer(a_bf16, h_bf16, z, wi, wh, bi3, bhn, tm):
    n = a_bf16.shape[0]
    p = h_bf16.shape[1]
    est = (2 * tm * n * 2            # streamed A tiles (double buffered)
           + 2 * n * p * 2           # resident full h
           + 2 * tm * p * 4          # z tiles
           + 2 * 2 * p * 3 * p * 2   # fused gate weights
           + 2 * (3 * p + p) * 4     # biases
           + 2 * tm * p * 2 + 2 * tm * p * 4)  # outputs
    kernel = functools.partial(_gru_layer_kernel, tm, p)
    return pl.pallas_call(
        kernel,
        grid=(n // tm,),
        in_specs=[
            pl.BlockSpec((tm, n), lambda i: (i, 0)),       # A row tile (streamed)
            pl.BlockSpec((n, p), lambda i: (0, 0)),        # full previous h (resident)
            pl.BlockSpec((tm, p), lambda i: (i, 0)),       # running-max tile
            pl.BlockSpec((p, 3 * p), lambda i: (0, 0)),    # [wir|wiz|win]
            pl.BlockSpec((p, 3 * p), lambda i: (0, 0)),    # [whr|whz|whn]
            pl.BlockSpec((1, 3 * p), lambda i: (0, 0)),    # folded biases
            pl.BlockSpec((1, p), lambda i: (0, 0)),        # b_hn
        ],
        out_specs=[
            pl.BlockSpec((tm, p), lambda i: (i, 0)),
            pl.BlockSpec((tm, p), lambda i: (i, 0)),
        ],
        out_shape=[
            jax.ShapeDtypeStruct((n, p), jnp.bfloat16),
            jax.ShapeDtypeStruct((n, p), jnp.float32),
        ],
        compiler_params=_compiler_params(est),
    )(a_bf16, h_bf16, z, wi, wh, bi3, bhn)


# --------------------------------------------------------------------------
# Decoder: w5(relu(w4 z))  -- output padded to 128 lanes (sliced outside)
# --------------------------------------------------------------------------
def _decoder_kernel(z_ref, w4_ref, b4_ref, w5_ref, b5_ref, o_ref):
    f32 = jnp.float32
    d = jnp.dot(z_ref[...], w4_ref[...], preferred_element_type=f32) + b4_ref[...]
    d = jnp.maximum(d, 0.0)
    o_ref[...] = jnp.dot(d, w5_ref[...], preferred_element_type=f32) + b5_ref[...]


def _decode(z, w4, b4, w5p, b5p, tm):
    n, p = z.shape
    q = w4.shape[1]
    est = 2 * (tm * p * 4 + p * q * 4 + q * 4
               + q * _OUT_PAD * 4 + _OUT_PAD * 4 + tm * _OUT_PAD * 4)
    return pl.pallas_call(
        _decoder_kernel,
        grid=(n // tm,),
        in_specs=[
            pl.BlockSpec((tm, p), lambda i: (i, 0)),
            pl.BlockSpec((p, q), lambda i: (0, 0)),
            pl.BlockSpec((1, q), lambda i: (0, 0)),
            pl.BlockSpec((q, _OUT_PAD), lambda i: (0, 0)),
            pl.BlockSpec((1, _OUT_PAD), lambda i: (0, 0)),
        ],
        out_specs=pl.BlockSpec((tm, _OUT_PAD), lambda i: (i, 0)),
        out_shape=jax.ShapeDtypeStruct((n, _OUT_PAD), jnp.float32),
        compiler_params=_compiler_params(est),
    )(z, w4, b4, w5p, b5p)


# --------------------------------------------------------------------------
# Wrapper-side parameter preparation (gate fusion, bias folding, padding)
# --------------------------------------------------------------------------
def _prepare_params(params):
    bf16 = jnp.bfloat16
    q = params["w4"].shape[1]
    return {
        "w0": params["w0"], "b0": params["b0"],
        "wi": jnp.concatenate([params["wir"], params["wiz"], params["win"]],
                              axis=1).astype(bf16),
        "wh": jnp.concatenate([params["whr"], params["whz"], params["whn"]],
                              axis=1).astype(bf16),
        # b_ir+b_hr and b_iz+b_hz fold; b_in stays on the input path.
        "bi3": jnp.concatenate([params["bir"] + params["bhr"],
                                params["biz"] + params["bhz"],
                                params["bin"]], axis=1),
        "bhn": params["bhn"],
        "w4": params["w4"], "b4": params["b4"],
        "w5p": jnp.zeros((q, _OUT_PAD), jnp.float32).at[:, :1].set(params["w5"]),
        "b5p": jnp.zeros((1, _OUT_PAD), jnp.float32).at[:, :1].set(params["b5"]),
    }


def drbc_forward(x, adj, params, num_layers):
    n = x.shape[0]
    tm = _pick_tm(n)
    pp = _prepare_params(params)
    a_bf16 = adj.astype(jnp.bfloat16)

    h_bf16, z = _encode_init(x, pp["w0"], pp["b0"], tm)
    for _ in range(num_layers - 1):
        h_bf16, z = _gru_layer(a_bf16, h_bf16, z,
                               pp["wi"], pp["wh"], pp["bi3"], pp["bhn"], tm)
    out = _decode(z, pp["w4"], pp["b4"], pp["w5p"], pp["b5p"], tm)
    return out[:, :1]


def drbc_reference(x, adj, params, num_layers):
    """Pure-JAX mirror of the kernel math (same fused weights / bf16 casts)."""
    f32, bf16 = jnp.float32, jnp.bfloat16
    pp = _prepare_params(params)
    p = pp["w0"].shape[1]
    a = adj.astype(bf16)
    with jax.default_matmul_precision("float32"):
        h = jnp.maximum(x @ pp["w0"] + pp["b0"], 0.0)
        h = _l2_normalize(h)
        z = h
        h = h.astype(bf16)
        for _ in range(num_layers - 1):
            aggr = jnp.dot(a, h, preferred_element_type=f32)
            gi = jnp.dot(h, pp["wi"], preferred_element_type=f32) + pp["bi3"]
            gh = jnp.dot(aggr.astype(bf16), pp["wh"], preferred_element_type=f32)
            r = jax.nn.sigmoid(gi[:, :p] + gh[:, :p])
            u = jax.nn.sigmoid(gi[:, p:2 * p] + gh[:, p:2 * p])
            n_ = jnp.tanh(gi[:, 2 * p:] + r * (gh[:, 2 * p:] + pp["bhn"]))
            h_new = _l2_normalize((1.0 - u) * n_ + u * aggr)
            z = jnp.maximum(z, h_new)
            h = h_new.astype(bf16)
        d = jnp.maximum(z @ pp["w4"] + pp["b4"], 0.0)
        return d @ params["w5"] + params["b5"]


def build_norm_adj(row, col, num_nodes):
    # utils.degree(col) + 1 ; norm = deg^-0.5[row] * deg^-0.5[col]
    deg = jnp.zeros((num_nodes,), jnp.float32).at[col].add(1.0) + 1.0
    dis = deg ** -0.5
    norm = dis[row] * dis[col]
    # aggr_out[i] = sum_{edges with target i} norm * x[source]  ->  A @ x
    adj = jnp.zeros((num_nodes, num_nodes), jnp.float32).at[col, row].add(norm)
    return adj


def init_params(key, c, p, q):
    """Deterministic synthetic parameters (PyTorch-style uniform fan-in init).

    Linear weights stored already transposed as (in, out) so the kernel does
    x @ W (same semantics as PyTorch's x @ W.T with W of shape (out, in))."""
    ks = jax.random.split(key, 18)

    def u(k, fan_in, shape):
        b = 1.0 / (fan_in ** 0.5)
        return jax.random.uniform(k, shape, jnp.float32, -b, b)

    return {
        # encoder w_0: Linear(c -> p)
        "w0": u(ks[0], c, (c, p)), "b0": u(ks[1], c, (1, p)),
        # GRUCell(p, p): gate order [r, z, n]; stored as (p, p) per gate
        "wir": u(ks[2], p, (p, p)), "wiz": u(ks[3], p, (p, p)),
        "win": u(ks[4], p, (p, p)),
        "whr": u(ks[5], p, (p, p)), "whz": u(ks[6], p, (p, p)),
        "whn": u(ks[7], p, (p, p)),
        "bir": u(ks[8], p, (1, p)), "biz": u(ks[9], p, (1, p)),
        "bin": u(ks[10], p, (1, p)),
        "bhr": u(ks[11], p, (1, p)), "bhz": u(ks[12], p, (1, p)),
        "bhn": u(ks[13], p, (1, p)),
        # decoder w_4: Linear(p -> q), w_5: Linear(q -> 1)
        "w4": u(ks[14], p, (p, q)), "b4": u(ks[15], p, (1, q)),
        "w5": u(ks[16], q, (q, 1)), "b5": u(ks[17], q, (1, 1)),
    }


if __name__ == "__main__":
    key = jax.random.PRNGKey(0)
    N, C, P, Q = 256, 3, 128, 64      # nodes, in-features, embed dim, decoder hidden
    E, NUM_LAYERS = 1024, 4           # edges, encoder layers

    k_x, k_row, k_col, k_params = jax.random.split(key, 4)
    x = jax.random.normal(k_x, (N, C), jnp.float32)
    row = jax.random.randint(k_row, (E,), 0, N)   # source nodes j
    col = jax.random.randint(k_col, (E,), 0, N)   # target nodes i

    adj = build_norm_adj(row, col, N)             # glue: dense normalized adjacency
    params = init_params(k_params, C, P, Q)

    fwd = jax.jit(drbc_forward, static_argnums=3)
    out = fwd(x, adj, params, NUM_LAYERS)
    out = jax.block_until_ready(out)

    ref = drbc_reference(x, adj, params, NUM_LAYERS)
    assert out.shape == (N, 1)
    assert bool(jnp.all(jnp.isfinite(out)))
    assert jnp.allclose(out, ref, atol=2e-3, rtol=2e-3), \
        float(jnp.max(jnp.abs(out - ref)))

    print("KERNEL_OK")
</pallas_src>

<mosaic_0001>
module attributes {stable_mosaic.version = 11 : i64} {
  func.func @_encode_init_kernel(%arg0: i32, %arg1: memref<256x3xf32, #tpu.memory_space<vmem>>, %arg2: memref<3x128xf32, #tpu.memory_space<vmem>>, %arg3: memref<1x128xf32, #tpu.memory_space<vmem>>, %arg4: memref<256x128xbf16, #tpu.memory_space<vmem>>, %arg5: memref<256x128xf32, #tpu.memory_space<vmem>>) attributes {dimension_semantics = [#tpu.dimension_semantics<parallel>], iteration_bounds = array<i64: 1>, scalar_prefetch = 0 : i64, scratch_operands = 0 : i64, tpu.core_type = #tpu.core_type<tc>, window_params = [{transform_indices = @transform_0, window_bounds = array<i64: 256, 3>}, {pipeline_mode = #tpu.pipeline_mode<synchronous>, transform_indices = @transform_1, window_bounds = array<i64: 3, 128>}, {pipeline_mode = #tpu.pipeline_mode<synchronous>, transform_indices = @transform_2, window_bounds = array<i64: 1, 128>}, {transform_indices = @transform_3, window_bounds = array<i64: 256, 128>}, {transform_indices = @transform_4, window_bounds = array<i64: 256, 128>}]} {
    %c0 = arith.constant 0 : index
    %c0_0 = arith.constant 0 : index
    %0 = vector.load %arg1[%c0, %c0_0] : memref<256x3xf32, #tpu.memory_space<vmem>>, vector<256x3xf32>
    %c0_1 = arith.constant 0 : index
    %c0_2 = arith.constant 0 : index
    %1 = vector.load %arg2[%c0_1, %c0_2] : memref<3x128xf32, #tpu.memory_space<vmem>>, vector<3x128xf32>
    %cst = arith.constant dense<0.000000e+00> : vector<256x128xf32>
    %2 = tpu.matmul %0, %1, %cst {dimension_numbers = #tpu.dot_dimension_numbers<[1], [0], [0], [1], [0, 0, 1, 1], [], []>} : vector<256x3xf32>, vector<3x128xf32>, vector<256x128xf32> -> vector<256x128xf32>
    %c0_3 = arith.constant 0 : index
    %c0_4 = arith.constant 0 : index
    %3 = vector.load %arg3[%c0_3, %c0_4] : memref<1x128xf32, #tpu.memory_space<vmem>>, vector<1x128xf32>
    %4 = vector.broadcast %3 : vector<1x128xf32> to vector<256x128xf32>
    %5 = arith.addf %2, %4 : vector<256x128xf32>
    %cst_5 = arith.constant 0.000000e+00 : f32
    %6 = vector.broadcast %cst_5 : f32 to vector<256x128xf32>
    %7 = arith.maximumf %5, %6 : vector<256x128xf32>
    %8 = arith.mulf %7, %7 : vector<256x128xf32>
    %cst_6 = arith.constant dense<0.000000e+00> : vector<256xf32>
    %9 = vector.multi_reduction <add>, %8, %cst_6 [1] : vector<256x128xf32> to vector<256xf32>
    %10 = vector.shape_cast %9 : vector<256xf32> to vector<256x1xf32>
    %cst_7 = arith.constant 1.000000e-24 : f32
    %11 = vector.broadcast %cst_7 : f32 to vector<256x1xf32>
    %12 = arith.maximumf %10, %11 : vector<256x1xf32>
    %13 = math.rsqrt %12 : vector<256x1xf32>
    %14 = vector.broadcast %13 : vector<256x1xf32> to vector<256x128xf32>
    %15 = arith.mulf %7, %14 : vector<256x128xf32>
    %c0_8 = arith.constant 0 : index
    %c0_9 = arith.constant 0 : index
    %16 = vector.load %arg5[%c0_8, %c0_9] : memref<256x128xf32, #tpu.memory_space<vmem>>, vector<256x128xf32>
    tpu.vector_store %arg5[%c0_8, %c0_9], %15 {strides = array<i32>} : memref<256x128xf32, #tpu.memory_space<vmem>>, vector<256x128xf32>,
    %17 = arith.truncf %15 : vector<256x128xf32> to vector<256x128xbf16>
    %c0_10 = arith.constant 0 : index
    %c0_11 = arith.constant 0 : index
    %18 = vector.load %arg4[%c0_10, %c0_11] : memref<256x128xbf16, #tpu.memory_space<vmem>>, vector<256x128xbf16>
    tpu.vector_store %arg4[%c0_10, %c0_11], %17 {strides = array<i32>} : memref<256x128xbf16, #tpu.memory_space<vmem>>, vector<256x128xbf16>,
    return
  }
  func.func @transform_0(%arg0: i32) -> (i32, i32) {
    %c0_i32 = arith.constant 0 : i32
    %c0_i32_0 = arith.constant 0 : i32
    return %arg0, %c0_i32 : i32, i32
  }
  func.func @transform_1(%arg0: i32) -> (i32, i32) {
    %c0_i32 = arith.constant 0 : i32
    %c0_i32_0 = arith.constant 0 : i32
    %c0_i32_1 = arith.constant 0 : i32
    return %c0_i32, %c0_i32_0 : i32, i32
  }
  func.func @transform_2(%arg0: i32) -> (i32, i32) {
    %c0_i32 = arith.constant 0 : i32
    %c0_i32_0 = arith.constant 0 : i32
    %c0_i32_1 = arith.constant 0 : i32
    return %c0_i32, %c0_i32_0 : i32, i32
  }
  func.func @transform_3(%arg0: i32) -> (i32, i32) {
    %c0_i32 = arith.constant 0 : i32
    %c0_i32_0 = arith.constant 0 : i32
    return %arg0, %c0_i32 : i32, i32
  }
  func.func @transform_4(%arg0: i32) -> (i32, i32) {
    %c0_i32 = arith.constant 0 : i32
    %c0_i32_0 = arith.constant 0 : i32
    return %arg0, %c0_i32 : i32, i32
  }
}

module attributes {stable_mosaic.version = 11 : i64} {
  func.func @_gru_layer_kernel(%arg0: i32, %arg1: memref<256x256xbf16, #tpu.memory_space<vmem>>, %arg2: memref<256x128xbf16, #tpu.memory_space<vmem>>, %arg3: memref<256x128xf32, #tpu.memory_space<vmem>>, %arg4: memref<128x384xbf16, #tpu.memory_space<vmem>>, %arg5: memref<128x384xbf16, #tpu.memory_space<vmem>>, %arg6: memref<1x384xf32, #tpu.memory_space<vmem>>, %arg7: memref<1x128xf32, #tpu.memory_space<vmem>>, %arg8: memref<256x128xbf16, #tpu.memory_space<vmem>>, %arg9: memref<256x128xf32, #tpu.memory_space<vmem>>) attributes {dimension_semantics = [#tpu.dimension_semantics<parallel>], iteration_bounds = array<i64: 1>, scalar_prefetch = 0 : i64, scratch_operands = 0 : i64, tpu.core_type = #tpu.core_type<tc>, window_params = [{transform_indices = @transform_0, window_bounds = array<i64: 256, 256>}, {pipeline_mode = #tpu.pipeline_mode<synchronous>, transform_indices = @transform_1, window_bounds = array<i64: 256, 128>}, {transform_indices = @transform_2, window_bounds = array<i64: 256, 128>}, {pipeline_mode = #tpu.pipeline_mode<synchronous>, transform_indices = @transform_3, window_bounds = array<i64: 128, 384>}, {pipeline_mode = #tpu.pipeline_mode<synchronous>, transform_indices = @transform_4, window_bounds = array<i64: 128, 384>}, {pipeline_mode = #tpu.pipeline_mode<synchronous>, transform_indices = @transform_5, window_bounds = array<i64: 1, 384>}, {pipeline_mode = #tpu.pipeline_mode<synchronous>, transform_indices = @transform_6, window_bounds = array<i64: 1, 128>}, {transform_indices = @transform_7, window_bounds = array<i64: 256, 128>}, {transform_indices = @transform_8, window_bounds = array<i64: 256, 128>}]} {
    %c0 = arith.constant 0 : index
    %c0_0 = arith.constant 0 : index
    %0 = vector.load %arg1[%c0, %c0_0] : memref<256x256xbf16, #tpu.memory_space<vmem>>, vector<256x256xbf16>
    %c0_1 = arith.constant 0 : index
    %c0_2 = arith.constant 0 : index
    %1 = vector.load %arg2[%c0_1, %c0_2] : memref<256x128xbf16, #tpu.memory_space<vmem>>, vector<256x128xbf16>
    %cst = arith.constant dense<0.000000e+00> : vector<256x128xf32>
    %2 = tpu.matmul %0, %1, %cst {dimension_numbers = #tpu.dot_dimension_numbers<[1], [0], [0], [1], [0, 0, 1, 1], [], []>} : vector<256x256xbf16>, vector<256x128xbf16>, vector<256x128xf32> -> vector<256x128xf32>
    %c256_i32 = arith.constant 256 : i32
    %3 = arith.muli %arg0, %c256_i32 : i32
    %4 = tpu.assume_multiple %3, 256 : i32
    %5 = arith.index_cast %4 : i32 to index
    %c0_3 = arith.constant 0 : index
    %6 = vector.load %arg2[%5, %c0_3] : memref<256x128xbf16, #tpu.memory_space<vmem>>, vector<256x128xbf16>
    %c0_4 = arith.constant 0 : index
    %c0_5 = arith.constant 0 : index
    %7 = vector.load %arg4[%c0_4, %c0_5] : memref<128x384xbf16, #tpu.memory_space<vmem>>, vector<128x384xbf16>
    %cst_6 = arith.constant dense<0.000000e+00> : vector<256x384xf32>
    %8 = tpu.matmul %6, %7, %cst_6 {dimension_numbers = #tpu.dot_dimension_numbers<[1], [0], [0], [1], [0, 0, 1, 1], [], []>} : vector<256x128xbf16>, vector<128x384xbf16>, vector<256x384xf32> -> vector<256x384xf32>
    %c0_7 = arith.constant 0 : index
    %c0_8 = arith.constant 0 : index
    %9 = vector.load %arg6[%c0_7, %c0_8] : memref<1x384xf32, #tpu.memory_space<vmem>>, vector<1x384xf32>
    %10 = vector.broadcast %9 : vector<1x384xf32> to vector<256x384xf32>
    %11 = arith.addf %8, %10 : vector<256x384xf32>
    %12 = arith.truncf %2 : vector<256x128xf32> to vector<256x128xbf16>
    %c0_9 = arith.constant 0 : index
    %c0_10 = arith.constant 0 : index
    %13 = vector.load %arg5[%c0_9, %c0_10] : memref<128x384xbf16, #tpu.memory_space<vmem>>, vector<128x384xbf16>
    %cst_11 = arith.constant dense<0.000000e+00> : vector<256x384xf32>
    %14 = tpu.matmul %12, %13, %cst_11 {dimension_numbers = #tpu.dot_dimension_numbers<[1], [0], [0], [1], [0, 0, 1, 1], [], []>} : vector<256x128xbf16>, vector<128x384xbf16>, vector<256x384xf32> -> vector<256x384xf32>
    %15 = vector.extract_strided_slice %11 {offsets = [0, 0], sizes = [256, 128], strides = [1, 1]} : vector<256x384xf32> to vector<256x128xf32>
    %16 = vector.extract_strided_slice %14 {offsets = [0, 0], sizes = [256, 128], strides = [1, 1]} : vector<256x384xf32> to vector<256x128xf32>
    %17 = arith.addf %15, %16 : vector<256x128xf32>
    %18 = arith.negf %17 : vector<256x128xf32>
    %19 = math.exp %18 : vector<256x128xf32>
    %cst_12 = arith.constant 1.000000e+00 : f32
    %20 = vector.broadcast %cst_12 : f32 to vector<256x128xf32>
    %21 = arith.addf %20, %19 : vector<256x128xf32>
    %22 = arith.divf %20, %21 : vector<256x128xf32>
    %23 = vector.extract_strided_slice %11 {offsets = [0, 128], sizes = [256, 128], strides = [1, 1]} : vector<256x384xf32> to vector<256x128xf32>
    %24 = vector.extract_strided_slice %14 {offsets = [0, 128], sizes = [256, 128], strides = [1, 1]} : vector<256x384xf32> to vector<256x128xf32>
    %25 = arith.addf %23, %24 : vector<256x128xf32>
    %26 = arith.negf %25 : vector<256x128xf32>
    %27 = math.exp %26 : vector<256x128xf32>
    %cst_13 = arith.constant 1.000000e+00 : f32
    %28 = vector.broadcast %cst_13 : f32 to vector<256x128xf32>
    %29 = arith.addf %28, %27 : vector<256x128xf32>
    %30 = arith.divf %28, %29 : vector<256x128xf32>
    %31 = vector.extract_strided_slice %11 {offsets = [0, 256], sizes = [256, 128], strides = [1, 1]} : vector<256x384xf32> to vector<256x128xf32>
    %32 = vector.extract_strided_slice %14 {offsets = [0, 256], sizes = [256, 128], strides = [1, 1]} : vector<256x384xf32> to vector<256x128xf32>
    %c0_14 = arith.constant 0 : index
    %c0_15 = arith.constant 0 : index
    %33 = vector.load %arg7[%c0_14, %c0_15] : memref<1x128xf32, #tpu.memory_space<vmem>>, vector<1x128xf32>
    %34 = vector.broadcast %33 : vector<1x128xf32> to vector<256x128xf32>
    %35 = arith.addf %32, %34 : vector<256x128xf32>
    %36 = arith.mulf %22, %35 : vector<256x128xf32>
    %37 = arith.addf %31, %36 : vector<256x128xf32>
    %38 = math.tanh %37 : vector<256x128xf32>
    %cst_16 = arith.constant 1.000000e+00 : f32
    %39 = vector.broadcast %cst_16 : f32 to vector<256x128xf32>
    %40 = arith.subf %39, %30 : vector<256x128xf32>
    %41 = arith.mulf %40, %38 : vector<256x128xf32>
    %42 = arith.mulf %30, %2 : vector<256x128xf32>
    %43 = arith.addf %41, %42 : vector<256x128xf32>
    %44 = arith.mulf %43, %43 : vector<256x128xf32>
    %cst_17 = arith.constant dense<0.000000e+00> : vector<256xf32>
    %45 = vector.multi_reduction <add>, %44, %cst_17 [1] : vector<256x128xf32> to vector<256xf32>
    %46 = vector.shape_cast %45 : vector<256xf32> to vector<256x1xf32>
    %cst_18 = arith.constant 1.000000e-24 : f32
    %47 = vector.broadcast %cst_18 : f32 to vector<256x1xf32>
    %48 = arith.maximumf %46, %47 : vector<256x1xf32>
    %49 = math.rsqrt %48 : vector<256x1xf32>
    %50 = vector.broadcast %49 : vector<256x1xf32> to vector<256x128xf32>
    %51 = arith.mulf %43, %50 : vector<256x128xf32>
    %52 = arith.truncf %51 : vector<256x128xf32> to vector<256x128xbf16>
    %c0_19 = arith.constant 0 : index
    %c0_20 = arith.constant 0 : index
    %53 = vector.load %arg8[%c0_19, %c0_20] : memref<256x128xbf16, #tpu.memory_space<vmem>>, vector<256x128xbf16>
    tpu.vector_store %arg8[%c0_19, %c0_20], %52 {strides = array<i32>} : memref<256x128xbf16, #tpu.memory_space<vmem>>, vector<256x128xbf16>,
    %c0_21 = arith.constant 0 : index
    %c0_22 = arith.constant 0 : index
    %54 = vector.load %arg3[%c0_21, %c0_22] : memref<256x128xf32, #tpu.memory_space<vmem>>, vector<256x128xf32>
    %55 = arith.maximumf %54, %51 : vector<256x128xf32>
    %c0_23 = arith.constant 0 : index
    %c0_24 = arith.constant 0 : index
    %56 = vector.load %arg9[%c0_23, %c0_24] : memref<256x128xf32, #tpu.memory_space<vmem>>, vector<256x128xf32>
    tpu.vector_store %arg9[%c0_23, %c0_24], %55 {strides = array<i32>} : memref<256x128xf32, #tpu.memory_space<vmem>>, vector<256x128xf32>,
    return
  }
  func.func @transform_0(%arg0: i32) -> (i32, i32) {
    %c0_i32 = arith.constant 0 : i32
    %c0_i32_0 = arith.constant 0 : i32
    return %arg0, %c0_i32 : i32, i32
  }
  func.func @transform_1(%arg0: i32) -> (i32, i32) {
    %c0_i32 = arith.constant 0 : i32
    %c0_i32_0 = arith.constant 0 : i32
    %c0_i32_1 = arith.constant 0 : i32
    return %c0_i32, %c0_i32_0 : i32, i32
  }
  func.func @transform_2(%arg0: i32) -> (i32, i32) {
    %c0_i32 = arith.constant 0 : i32
    %c0_i32_0 = arith.constant 0 : i32
    return %arg0, %c0_i32 : i32, i32
  }
  func.func @transform_3(%arg0: i32) -> (i32, i32) {
    %c0_i32 = arith.constant 0 : i32
    %c0_i32_0 = arith.constant 0 : i32
    %c0_i32_1 = arith.constant 0 : i32
    return %c0_i32, %c0_i32_0 : i32, i32
  }
  func.func @transform_4(%arg0: i32) -> (i32, i32) {
    %c0_i32 = arith.constant 0 : i32
    %c0_i32_0 = arith.constant 0 : i32
    %c0_i32_1 = arith.constant 0 : i32
    return %c0_i32, %c0_i32_0 : i32, i32
  }
  func.func @transform_5(%arg0: i32) -> (i32, i32) {
    %c0_i32 = arith.constant 0 : i32
    %c0_i32_0 = arith.constant 0 : i32
    %c0_i32_1 = arith.constant 0 : i32
    return %c0_i32, %c0_i32_0 : i32, i32
  }
  func.func @transform_6(%arg0: i32) -> (i32, i32) {
    %c0_i32 = arith.constant 0 : i32
    %c0_i32_0 = arith.constant 0 : i32
    %c0_i32_1 = arith.constant 0 : i32
    return %c0_i32, %c0_i32_0 : i32, i32
  }
  func.func @transform_7(%arg0: i32) -> (i32, i32) {
    %c0_i32 = arith.constant 0 : i32
    %c0_i32_0 = arith.constant 0 : i32
    return %arg0, %c0_i32 : i32, i32
  }
  func.func @transform_8(%arg0: i32) -> (i32, i32) {
    %c0_i32 = arith.constant 0 : i32
    %c0_i32_0 = arith.constant 0 : i32
    return %arg0, %c0_i32 : i32, i32
  }
}

module attributes {stable_mosaic.version = 11 : i64} {
  func.func @_gru_layer_kernel(%arg0: i32, %arg1: memref<256x256xbf16, #tpu.memory_space<vmem>>, %arg2: memref<256x128xbf16, #tpu.memory_space<vmem>>, %arg3: memref<256x128xf32, #tpu.memory_space<vmem>>, %arg4: memref<128x384xbf16, #tpu.memory_space<vmem>>, %arg5: memref<128x384xbf16, #tpu.memory_space<vmem>>, %arg6: memref<1x384xf32, #tpu.memory_space<vmem>>, %arg7: memref<1x128xf32, #tpu.memory_space<vmem>>, %arg8: memref<256x128xbf16, #tpu.memory_space<vmem>>, %arg9: memref<256x128xf32, #tpu.memory_space<vmem>>) attributes {dimension_semantics = [#tpu.dimension_semantics<parallel>], iteration_bounds = array<i64: 1>, scalar_prefetch = 0 : i64, scratch_operands = 0 : i64, tpu.core_type = #tpu.core_type<tc>, window_params = [{transform_indices = @transform_0, window_bounds = array<i64: 256, 256>}, {pipeline_mode = #tpu.pipeline_mode<synchronous>, transform_indices = @transform_1, window_bounds = array<i64: 256, 128>}, {transform_indices = @transform_2, window_bounds = array<i64: 256, 128>}, {pipeline_mode = #tpu.pipeline_mode<synchronous>, transform_indices = @transform_3, window_bounds = array<i64: 128, 384>}, {pipeline_mode = #tpu.pipeline_mode<synchronous>, transform_indices = @transform_4, window_bounds = array<i64: 128, 384>}, {pipeline_mode = #tpu.pipeline_mode<synchronous>, transform_indices = @transform_5, window_bounds = array<i64: 1, 384>}, {pipeline_mode = #tpu.pipeline_mode<synchronous>, transform_indices = @transform_6, window_bounds = array<i64: 1, 128>}, {transform_indices = @transform_7, window_bounds = array<i64: 256, 128>}, {transform_indices = @transform_8, window_bounds = array<i64: 256, 128>}]} {
    %c0 = arith.constant 0 : index
    %c0_0 = arith.constant 0 : index
    %0 = vector.load %arg1[%c0, %c0_0] : memref<256x256xbf16, #tpu.memory_space<vmem>>, vector<256x256xbf16>
    %c0_1 = arith.constant 0 : index
    %c0_2 = arith.constant 0 : index
    %1 = vector.load %arg2[%c0_1, %c0_2] : memref<256x128xbf16, #tpu.memory_space<vmem>>, vector<256x128xbf16>
    %cst = arith.constant dense<0.000000e+00> : vector<256x128xf32>
    %2 = tpu.matmul %0, %1, %cst {dimension_numbers = #tpu.dot_dimension_numbers<[1], [0], [0], [1], [0, 0, 1, 1], [], []>} : vector<256x256xbf16>, vector<256x128xbf16>, vector<256x128xf32> -> vector<256x128xf32>
    %c256_i32 = arith.constant 256 : i32
    %3 = arith.muli %arg0, %c256_i32 : i32
    %4 = tpu.assume_multiple %3, 256 : i32
    %5 = arith.index_cast %4 : i32 to index
    %c0_3 = arith.constant 0 : index
    %6 = vector.load %arg2[%5, %c0_3] : memref<256x128xbf16, #tpu.memory_space<vmem>>, vector<256x128xbf16>
    %c0_4 = arith.constant 0 : index
    %c0_5 = arith.constant 0 : index
    %7 = vector.load %arg4[%c0_4, %c0_5] : memref<128x384xbf16, #tpu.memory_space<vmem>>, vector<128x384xbf16>
    %cst_6 = arith.constant dense<0.000000e+00> : vector<256x384xf32>
    %8 = tpu.matmul %6, %7, %cst_6 {dimension_numbers = #tpu.dot_dimension_numbers<[1], [0], [0], [1], [0, 0, 1, 1], [], []>} : vector<256x128xbf16>, vector<128x384xbf16>, vector<256x384xf32> -> vector<256x384xf32>
    %c0_7 = arith.constant 0 : index
    %c0_8 = arith.constant 0 : index
    %9 = vector.load %arg6[%c0_7, %c0_8] : memref<1x384xf32, #tpu.memory_space<vmem>>, vector<1x384xf32>
    %10 = vector.broadcast %9 : vector<1x384xf32> to vector<256x384xf32>
    %11 = arith.addf %8, %10 : vector<256x384xf32>
    %12 = arith.truncf %2 : vector<256x128xf32> to vector<256x128xbf16>
    %c0_9 = arith.constant 0 : index
    %c0_10 = arith.constant 0 : index
    %13 = vector.load %arg5[%c0_9, %c0_10] : memref<128x384xbf16, #tpu.memory_space<vmem>>, vector<128x384xbf16>
    %cst_11 = arith.constant dense<0.000000e+00> : vector<256x384xf32>
    %14 = tpu.matmul %12, %13, %cst_11 {dimension_numbers = #tpu.dot_dimension_numbers<[1], [0], [0], [1], [0, 0, 1, 1], [], []>} : vector<256x128xbf16>, vector<128x384xbf16>, vector<256x384xf32> -> vector<256x384xf32>
    %15 = vector.extract_strided_slice %11 {offsets = [0, 0], sizes = [256, 128], strides = [1, 1]} : vector<256x384xf32> to vector<256x128xf32>
    %16 = vector.extract_strided_slice %14 {offsets = [0, 0], sizes = [256, 128], strides = [1, 1]} : vector<256x384xf32> to vector<256x128xf32>
    %17 = arith.addf %15, %16 : vector<256x128xf32>
    %18 = arith.negf %17 : vector<256x128xf32>
    %19 = math.exp %18 : vector<256x128xf32>
    %cst_12 = arith.constant 1.000000e+00 : f32
    %20 = vector.broadcast %cst_12 : f32 to vector<256x128xf32>
    %21 = arith.addf %20, %19 : vector<256x128xf32>
    %22 = arith.divf %20, %21 : vector<256x128xf32>
    %23 = vector.extract_strided_slice %11 {offsets = [0, 128], sizes = [256, 128], strides = [1, 1]} : vector<256x384xf32> to vector<256x128xf32>
    %24 = vector.extract_strided_slice %14 {offsets = [0, 128], sizes = [256, 128], strides = [1, 1]} : vector<256x384xf32> to vector<256x128xf32>
    %25 = arith.addf %23, %24 : vector<256x128xf32>
    %26 = arith.negf %25 : vector<256x128xf32>
    %27 = math.exp %26 : vector<256x128xf32>
    %cst_13 = arith.constant 1.000000e+00 : f32
    %28 = vector.broadcast %cst_13 : f32 to vector<256x128xf32>
    %29 = arith.addf %28, %27 : vector<256x128xf32>
    %30 = arith.divf %28, %29 : vector<256x128xf32>
    %31 = vector.extract_strided_slice %11 {offsets = [0, 256], sizes = [256, 128], strides = [1, 1]} : vector<256x384xf32> to vector<256x128xf32>
    %32 = vector.extract_strided_slice %14 {offsets = [0, 256], sizes = [256, 128], strides = [1, 1]} : vector<256x384xf32> to vector<256x128xf32>
    %c0_14 = arith.constant 0 : index
    %c0_15 = arith.constant 0 : index
    %33 = vector.load %arg7[%c0_14, %c0_15] : memref<1x128xf32, #tpu.memory_space<vmem>>, vector<1x128xf32>
    %34 = vector.broadcast %33 : vector<1x128xf32> to vector<256x128xf32>
    %35 = arith.addf %32, %34 : vector<256x128xf32>
    %36 = arith.mulf %22, %35 : vector<256x128xf32>
    %37 = arith.addf %31, %36 : vector<256x128xf32>
    %38 = math.tanh %37 : vector<256x128xf32>
    %cst_16 = arith.constant 1.000000e+00 : f32
    %39 = vector.broadcast %cst_16 : f32 to vector<256x128xf32>
    %40 = arith.subf %39, %30 : vector<256x128xf32>
    %41 = arith.mulf %40, %38 : vector<256x128xf32>
    %42 = arith.mulf %30, %2 : vector<256x128xf32>
    %43 = arith.addf %41, %42 : vector<256x128xf32>
    %44 = arith.mulf %43, %43 : vector<256x128xf32>
    %cst_17 = arith.constant dense<0.000000e+00> : vector<256xf32>
    %45 = vector.multi_reduction <add>, %44, %cst_17 [1] : vector<256x128xf32> to vector<256xf32>
    %46 = vector.shape_cast %45 : vector<256xf32> to vector<256x1xf32>
    %cst_18 = arith.constant 1.000000e-24 : f32
    %47 = vector.broadcast %cst_18 : f32 to vector<256x1xf32>
    %48 = arith.maximumf %46, %47 : vector<256x1xf32>
    %49 = math.rsqrt %48 : vector<256x1xf32>
    %50 = vector.broadcast %49 : vector<256x1xf32> to vector<256x128xf32>
    %51 = arith.mulf %43, %50 : vector<256x128xf32>
    %52 = arith.truncf %51 : vector<256x128xf32> to vector<256x128xbf16>
    %c0_19 = arith.constant 0 : index
    %c0_20 = arith.constant 0 : index
    %53 = vector.load %arg8[%c0_19, %c0_20] : memref<256x128xbf16, #tpu.memory_space<vmem>>, vector<256x128xbf16>
    tpu.vector_store %arg8[%c0_19, %c0_20], %52 {strides = array<i32>} : memref<256x128xbf16, #tpu.memory_space<vmem>>, vector<256x128xbf16>,
    %c0_21 = arith.constant 0 : index
    %c0_22 = arith.constant 0 : index
    %54 = vector.load %arg3[%c0_21, %c0_22] : memref<256x128xf32, #tpu.memory_space<vmem>>, vector<256x128xf32>
    %55 = arith.maximumf %54, %51 : vector<256x128xf32>
    %c0_23 = arith.constant 0 : index
    %c0_24 = arith.constant 0 : index
    %56 = vector.load %arg9[%c0_23, %c0_24] : memref<256x128xf32, #tpu.memory_space<vmem>>, vector<256x128xf32>
    tpu.vector_store %arg9[%c0_23, %c0_24], %55 {strides = array<i32>} : memref<256x128xf32, #tpu.memory_space<vmem>>, vector<256x128xf32>,
    return
  }
  func.func @transform_0(%arg0: i32) -> (i32, i32) {
    %c0_i32 = arith.constant 0 : i32
    %c0_i32_0 = arith.constant 0 : i32
    return %arg0, %c0_i32 : i32, i32
  }
  func.func @transform_1(%arg0: i32) -> (i32, i32) {
    %c0_i32 = arith.constant 0 : i32
    %c0_i32_0 = arith.constant 0 : i32
    %c0_i32_1 = arith.constant 0 : i32
    return %c0_i32, %c0_i32_0 : i32, i32
  }
  func.func @transform_2(%arg0: i32) -> (i32, i32) {
    %c0_i32 = arith.constant 0 : i32
    %c0_i32_0 = arith.constant 0 : i32
    return %arg0, %c0_i32 : i32, i32
  }
  func.func @transform_3(%arg0: i32) -> (i32, i32) {
    %c0_i32 = arith.constant 0 : i32
    %c0_i32_0 = arith.constant 0 : i32
    %c0_i32_1 = arith.constant 0 : i32
    return %c0_i32, %c0_i32_0 : i32, i32
  }
  func.func @transform_4(%arg0: i32) -> (i32, i32) {
    %c0_i32 = arith.constant 0 : i32
    %c0_i32_0 = arith.constant 0 : i32
    %c0_i32_1 = arith.constant 0 : i32
    return %c0_i32, %c0_i32_0 : i32, i32
  }
  func.func @transform_5(%arg0: i32) -> (i32, i32) {
    %c0_i32 = arith.constant 0 : i32
    %c0_i32_0 = arith.constant 0 : i32
    %c0_i32_1 = arith.constant 0 : i32
    return %c0_i32, %c0_i32_0 : i32, i32
  }
  func.func @transform_6(%arg0: i32) -> (i32, i32) {
    %c0_i32 = arith.constant 0 : i32
    %c0_i32_0 = arith.constant 0 : i32
    %c0_i32_1 = arith.constant 0 : i32
    return %c0_i32, %c0_i32_0 : i32, i32
  }
  func.func @transform_7(%arg0: i32) -> (i32, i32) {
    %c0_i32 = arith.constant 0 : i32
    %c0_i32_0 = arith.constant 0 : i32
    return %arg0, %c0_i32 : i32, i32
  }
  func.func @transform_8(%arg0: i32) -> (i32, i32) {
    %c0_i32 = arith.constant 0 : i32
    %c0_i32_0 = arith.constant 0 : i32
    return %arg0, %c0_i32 : i32, i32
  }
}

module attributes {stable_mosaic.version = 11 : i64} {
  func.func @_decoder_kernel(%arg0: i32, %arg1: memref<256x128xf32, #tpu.memory_space<vmem>>, %arg2: memref<128x64xf32, #tpu.memory_space<vmem>>, %arg3: memref<1x64xf32, #tpu.memory_space<vmem>>, %arg4: memref<64x128xf32, #tpu.memory_space<vmem>>, %arg5: memref<1x128xf32, #tpu.memory_space<vmem>>, %arg6: memref<256x128xf32, #tpu.memory_space<vmem>>) attributes {dimension_semantics = [#tpu.dimension_semantics<parallel>], iteration_bounds = array<i64: 1>, scalar_prefetch = 0 : i64, scratch_operands = 0 : i64, tpu.core_type = #tpu.core_type<tc>, window_params = [{transform_indices = @transform_0, window_bounds = array<i64: 256, 128>}, {pipeline_mode = #tpu.pipeline_mode<synchronous>, transform_indices = @transform_1, window_bounds = array<i64: 128, 64>}, {pipeline_mode = #tpu.pipeline_mode<synchronous>, transform_indices = @transform_2, window_bounds = array<i64: 1, 64>}, {pipeline_mode = #tpu.pipeline_mode<synchronous>, transform_indices = @transform_3, window_bounds = array<i64: 64, 128>}, {pipeline_mode = #tpu.pipeline_mode<synchronous>, transform_indices = @transform_4, window_bounds = array<i64: 1, 128>}, {transform_indices = @transform_5, window_bounds = array<i64: 256, 128>}]} {
    %c0 = arith.constant 0 : index
    %c0_0 = arith.constant 0 : index
    %0 = vector.load %arg1[%c0, %c0_0] : memref<256x128xf32, #tpu.memory_space<vmem>>, vector<256x128xf32>
    %c0_1 = arith.constant 0 : index
    %c0_2 = arith.constant 0 : index
    %1 = vector.load %arg2[%c0_1, %c0_2] : memref<128x64xf32, #tpu.memory_space<vmem>>, vector<128x64xf32>
    %cst = arith.constant dense<0.000000e+00> : vector<256x64xf32>
    %2 = tpu.matmul %0, %1, %cst {dimension_numbers = #tpu.dot_dimension_numbers<[1], [0], [0], [1], [0, 0, 1, 1], [], []>} : vector<256x128xf32>, vector<128x64xf32>, vector<256x64xf32> -> vector<256x64xf32>
    %c0_3 = arith.constant 0 : index
    %c0_4 = arith.constant 0 : index
    %3 = vector.load %arg3[%c0_3, %c0_4] : memref<1x64xf32, #tpu.memory_space<vmem>>, vector<1x64xf32>
    %4 = vector.broadcast %3 : vector<1x64xf32> to vector<256x64xf32>
    %5 = arith.addf %2, %4 : vector<256x64xf32>
    %cst_5 = arith.constant 0.000000e+00 : f32
    %6 = vector.broadcast %cst_5 : f32 to vector<256x64xf32>
    %7 = arith.maximumf %5, %6 : vector<256x64xf32>
    %c0_6 = arith.constant 0 : index
    %c0_7 = arith.constant 0 : index
    %8 = vector.load %arg4[%c0_6, %c0_7] : memref<64x128xf32, #tpu.memory_space<vmem>>, vector<64x128xf32>
    %cst_8 = arith.constant dense<0.000000e+00> : vector<256x128xf32>
    %9 = tpu.matmul %7, %8, %cst_8 {dimension_numbers = #tpu.dot_dimension_numbers<[1], [0], [0], [1], [0, 0, 1, 1], [], []>} : vector<256x64xf32>, vector<64x128xf32>, vector<256x128xf32> -> vector<256x128xf32>
    %c0_9 = arith.constant 0 : index
    %c0_10 = arith.constant 0 : index
    %10 = vector.load %arg5[%c0_9, %c0_10] : memref<1x128xf32, #tpu.memory_space<vmem>>, vector<1x128xf32>
    %11 = vector.broadcast %10 : vector<1x128xf32> to vector<256x128xf32>
    %12 = arith.addf %9, %11 : vector<256x128xf32>
    %c0_11 = arith.constant 0 : index
    %c0_12 = arith.constant 0 : index
    %13 = vector.load %arg6[%c0_11, %c0_12] : memref<256x128xf32, #tpu.memory_space<vmem>>, vector<256x128xf32>
    tpu.vector_store %arg6[%c0_11, %c0_12], %12 {strides = array<i32>} : memref<256x128xf32, #tpu.memory_space<vmem>>, vector<256x128xf32>,
    return
  }
  func.func @transform_0(%arg0: i32) -> (i32, i32) {
    %c0_i32 = arith.constant 0 : i32
    %c0_i32_0 = arith.constant 0 : i32
    return %arg0, %c0_i32 : i32, i32
  }
  func.func @transform_1(%arg0: i32) -> (i32, i32) {
    %c0_i32 = arith.constant 0 : i32
    %c0_i32_0 = arith.constant 0 : i32
    %c0_i32_1 = arith.constant 0 : i32
    return %c0_i32, %c0_i32_0 : i32, i32
  }
  func.func @transform_2(%arg0: i32) -> (i32, i32) {
    %c0_i32 = arith.constant 0 : i32
    %c0_i32_0 = arith.constant 0 : i32
    %c0_i32_1 = arith.constant 0 : i32
    return %c0_i32, %c0_i32_0 : i32, i32
  }
  func.func @transform_3(%arg0: i32) -> (i32, i32) {
    %c0_i32 = arith.constant 0 : i32
    %c0_i32_0 = arith.constant 0 : i32
    %c0_i32_1 = arith.constant 0 : i32
    return %c0_i32, %c0_i32_0 : i32, i32
  }
  func.func @transform_4(%arg0: i32) -> (i32, i32) {
    %c0_i32 = arith.constant 0 : i32
    %c0_i32_0 = arith.constant 0 : i32
    %c0_i32_1 = arith.constant 0 : i32
    return %c0_i32, %c0_i32_0 : i32, i32
  }
  func.func @transform_5(%arg0: i32) -> (i32, i32) {
    %c0_i32 = arith.constant 0 : i32
    %c0_i32_0 = arith.constant 0 : i32
    return %arg0, %c0_i32 : i32, i32
  }
}

</mosaic_0001>

<bundles_post_ra>
// kernel: drbc_forward.5
= control target key start
LH: loop header
LB: loop body
LE: loop exit
PB: predicated region body
PF: predicated region fallthrough
CT: control target
= control target key end

     0   :  { %vm153_vm0 = vcmask 1042432   ;;  %vm56_vm1 = vcmask 23552   ;;  %s1645_s1 = inlined_call_operand.vmem [shape: f32[3,128], index: 1, kind: input, shape index: {}]   ;;  %s1646_s0 = inlined_call_operand.vmem [shape: f32[256,3], index: 0, kind: input, shape index: {}]   ;;  %s1647_s2 = inlined_call_operand.vmem [shape: f32[1,128], index: 2, kind: input, shape index: {}]   ;;  %s1648_s4 = inlined_call_operand.vmem [shape: f32[256,128], index: 4, kind: output, shape index: {1}]   ;;  %s1649_s3 = inlined_call_operand.vmem [shape: bf16[256,128], index: 3, kind: output, shape index: {0}]  }
   0x1   :  { %v48_v0 = vld [vmem:[%s1645_s1] sm:$0x7]  ;;  %v17_v3 = vld [vmem:[%s1646_s0 + $0x8] sm:$0xff]  ;;  %v18_v5 = vld [vmem:[%s1646_s0 + $0x10] sm:$0xff] }
   0x2   :  { %v16_v1 = vld [vmem:[%s1646_s0] sm:$0xff]  ;;  %1032 = vmatprep.subr.msk.mxu0 %vm153_vm0, %v48_v0  ;;  %1082 = vmatprep.subr.msk.mxu1 %vm153_vm0, %v48_v0  ;;  %v33_v4 = vld [vmem:[%s1646_s0 + $0x88] sm:$0xff]  ;;  %v34_v6 = vld [vmem:[%s1646_s0 + $0x90] sm:$0xff] }
   0x3   :  { %v32_v2 = vld [vmem:[%s1646_s0 + $0x80] sm:$0xff]  ;;  %1033 = vmatpush3.msk.msra.mxu0 %vm153_vm0, %v48_v0  ;;  %1083 = vmatpush3.msk.msra.mxu1 %vm153_vm0, %v48_v0  ;;  %v19_v7 = vld [vmem:[%s1646_s0 + $0x18] sm:$0xff]  ;;  %v21_v11 = vld [vmem:[%s1646_s0 + $0x28] sm:$0xff] }
   0x4   :  { %1034 = vmatprep.mubr.msk.f32.mxu0 %vm56_vm1, %v16_v1  ;;  %1058 = vmatprep.mubr.msk.f32.mxu1 %vm56_vm1, %v32_v2  ;;  %v35_v8 = vld [vmem:[%s1646_s0 + $0x98] sm:$0xff]  ;;  %v20_v9 = vld [vmem:[%s1646_s0 + $0x20] sm:$0xff]  ;;  %v37_v12 = vld [vmem:[%s1646_s0 + $0xa8] sm:$0xff] }
   0x5   :  { %1035 = vmatmul.mubr.msk.f32.vlgmr.msra.gmra.mxu0 %vm56_vm1, %v17_v3  ;;  %1059 = vmatmul.mubr.msk.f32.vlgmr.msra.gmra.mxu1 %vm56_vm1, %v33_v4  ;;  %v36_v10 = vld [vmem:[%s1646_s0 + $0xa0] sm:$0xff]  ;;  %v22_v13 = vld [vmem:[%s1646_s0 + $0x30] sm:$0xff]  ;;  %v23_v15 = vld [vmem:[%s1646_s0 + $0x38] sm:$0xff] }
   0x6   :  { %1037 = vmatprep.mubr.msk.f32.mxu0 %vm56_vm1, %v18_v5  ;;  %1061 = vmatprep.mubr.msk.f32.mxu1 %vm56_vm1, %v34_v6  ;;  %v38_v14 = vld [vmem:[%s1646_s0 + $0xb0] sm:$0xff]  ;;  %v39_v16 = vld [vmem:[%s1646_s0 + $0xb8] sm:$0xff]  ;;  %v24_v17 = vld [vmem:[%s1646_s0 + $0x40] sm:$0xff] }
   0x7   :  { %v40_v18 = vld [vmem:[%s1646_s0 + $0xc0] sm:$0xff]  ;;  %v25_v19 = vld [vmem:[%s1646_s0 + $0x48] sm:$0xff]  ;;  %v26_v21 = vld [vmem:[%s1646_s0 + $0x50] sm:$0xff] }
   0x8   :  { %v41_v20 = vld [vmem:[%s1646_s0 + $0xc8] sm:$0xff]  ;;  %v42_v22 = vld [vmem:[%s1646_s0 + $0xd0] sm:$0xff]  ;;  %v27_v23 = vld [vmem:[%s1646_s0 + $0x58] sm:$0xff] }
   0x9   :  { %1038 = vmatmul.mubr.msk.f32.gmra.mxu0 %vm56_vm1, %v19_v7  ;;  %1062 = vmatmul.mubr.msk.f32.gmra.mxu1 %vm56_vm1, %v35_v8  ;;  %v43_v24 = vld [vmem:[%s1646_s0 + $0xd8] sm:$0xff]  ;;  %v28_v25 = vld [vmem:[%s1646_s0 + $0x60] sm:$0xff]  ;;  %v29_v27 = vld [vmem:[%s1646_s0 + $0x68] sm:$0xff] }
   0xa   :  { %1040 = vmatprep.mubr.msk.f32.mxu0 %vm56_vm1, %v20_v9  ;;  %1064 = vmatprep.mubr.msk.f32.mxu1 %vm56_vm1, %v36_v10  ;;  %v44_v26 = vld [vmem:[%s1646_s0 + $0xe0] sm:$0xff]  ;;  %v45_v28 = vld [vmem:[%s1646_s0 + $0xe8] sm:$0xff]  ;;  %v30_v29 = vld [vmem:[%s1646_s0 + $0x70] sm:$0xff] }
   0xb   :  { %v46_v30 = vld [vmem:[%s1646_s0 + $0xf0] sm:$0xff]  ;;  %v31_v31 = vld [vmem:[%s1646_s0 + $0x78] sm:$0xff]  ;;  %v1307_v33 = vld [vmem:[%s1647_s2] ss:$0 sm:$0xff] }
   0xc   :  { %v47_v32 = vld [vmem:[%s1646_s0 + $0xf8] sm:$0xff] }
   0xd   :  { %1041 = vmatmul.mubr.msk.f32.gmra.mxu0 %vm56_vm1, %v21_v11  ;;  %1065 = vmatmul.mubr.msk.f32.gmra.mxu1 %vm56_vm1, %v37_v12 }
   0xe   :  { %1043 = vmatprep.mubr.msk.f32.mxu0 %vm56_vm1, %v22_v13  ;;  %1067 = vmatprep.mubr.msk.f32.mxu1 %vm56_vm1, %v38_v14 }
  0x11   :  { %1044 = vmatmul.mubr.msk.f32.gmra.mxu0 %vm56_vm1, %v23_v15  ;;  %1068 = vmatmul.mubr.msk.f32.gmra.mxu1 %vm56_vm1, %v39_v16 }
  0x12   :  { %1046 = vmatprep.mubr.msk.f32.mxu0 %vm56_vm1, %v24_v17  ;;  %1070 = vmatprep.mubr.msk.f32.mxu1 %vm56_vm1, %v40_v18 }
  0x15   :  { %1047 = vmatmul.mubr.msk.f32.gmra.mxu0 %vm56_vm1, %v25_v19  ;;  %1071 = vmatmul.mubr.msk.f32.gmra.mxu1 %vm56_vm1, %v41_v20 }
  0x16   :  { %1049 = vmatprep.mubr.msk.f32.mxu0 %vm56_vm1, %v26_v21  ;;  %1073 = vmatprep.mubr.msk.f32.mxu1 %vm56_vm1, %v42_v22 }
  0x19   :  { %1050 = vmatmul.mubr.msk.f32.gmra.mxu0 %vm56_vm1, %v27_v23  ;;  %1074 = vmatmul.mubr.msk.f32.gmra.mxu1 %vm56_vm1, %v43_v24 }
  0x1a   :  { %1052 = vmatprep.mubr.msk.f32.mxu0 %vm56_vm1, %v28_v25  ;;  %1076 = vmatprep.mubr.msk.f32.mxu1 %vm56_vm1, %v44_v26 }
  0x1d   :  { %1053 = vmatmul.mubr.msk.f32.gmra.mxu0 %vm56_vm1, %v29_v27  ;;  %1077 = vmatmul.mubr.msk.f32.gmra.mxu1 %vm56_vm1, %v45_v28 }
  0x1e   :  { %1055 = vmatprep.mubr.msk.f32.mxu0 %vm56_vm1, %v30_v29  ;;  %1079 = vmatprep.mubr.msk.f32.mxu1 %vm56_vm1, %v46_v30 }
  0x21   :  { %1056 = vmatmul.mubr.msk.f32.gmra.mxu0 %vm56_vm1, %v31_v31  ;;  %1080 = vmatmul.mubr.msk.f32.gmra.mxu1 %vm56_vm1, %v47_v32 }
  0xc5   :  { %v1036_v34 = vpop.f32.mrf.mxu0  ;;  %v1060_v35 = vpop.f32.mrf.mxu1 }
  0xc6   :  { %v229_v36 = vadd.f32 %v1036_v34, %v1307_v33  ;;  %v309_v37 = vadd.f32 %v1060_v35, %v1307_v33 }
  0xc7   :  { %v223_v38 = vpop.f32.mrf.mxu0  ;;  %v303_v39 = vpop.f32.mrf.mxu1 }
  0xc8   :  { %v1311_v40 = vmax.f32 %v229_v36, 0.0  ;;  %v1313_v41 = vmax.f32 %v309_v37, 0.0  ;;  %v224_v42 = vadd.f32 %v1307_v33, %v223_v38  ;;  %v304_v45 = vadd.f32 %v1307_v33, %v303_v39 }
  0xc9   :  { %v1039_v43 = vpop.f32.mrf.mxu0  ;;  %v1063_v44 = vpop.f32.mrf.mxu1 }
  0xca   :  { %v239_v46 = vadd.f32 %v1039_v43, %v1307_v33  ;;  %v319_v47 = vadd.f32 %v1063_v44, %v1307_v33  ;;  %v1319_v48 = vmax.f32 %v224_v42, 0.0  ;;  %v431_v50 = vmul.f32 %v1313_v41, %v1313_v41 }
  0xcb   :  { %v233_v49 = vpop.f32.mrf.mxu0  ;;  %v415_v51 = vmul.f32 %v1311_v40, %v1311_v40  ;;  %v313_v53 = vpop.f32.mrf.mxu1  ;;  %v1329_v56 = vmax.f32 %v304_v45, 0.0 }
  0xcc   :  { %v1325_v52 = vmax.f32 %v239_v46, 0.0  ;;  %v1327_v54 = vmax.f32 %v319_v47, 0.0  ;;  %480 = vadd.xlane.f32.xlu1 %v431_v50  ;;  %v234_v58 = vadd.f32 %v1307_v33, %v233_v49  ;;  %v314_v59 = vadd.f32 %v1307_v33, %v313_v53 }
  0xcd   :  { %448 = vadd.xlane.f32.xlu0 %v415_v51  ;;  %v1042_v55 = vpop.f32.mrf.mxu0  ;;  %v414_v60 = vmul.f32 %v1319_v48, %v1319_v48  ;;  %v1066_v61 = vpop.f32.mrf.mxu1  ;;  %v430_v0 = vmul.f32 %v1329_v56, %v1329_v56 }
  0xce   :  { %v417_v57 = vmul.f32 %v1325_v52, %v1325_v52  ;;  %v433_v63 = vmul.f32 %v1327_v54, %v1327_v54  ;;  %v1341_v1 = vmax.f32 %v234_v58, 0.0  ;;  %v1343_v2 = vmax.f32 %v314_v59, 0.0 }
  0xcf   :  { %v243_v62 = vpop.f32.mrf.mxu0  ;;  %v249_v3 = vadd.f32 %v1042_v55, %v1307_v33  ;;  %v323_v5 = vpop.f32.mrf.mxu1  ;;  %v329_v7 = vadd.f32 %v1066_v61, %v1307_v33 }
  0xd0   :  { %452 = vadd.xlane.f32.xlu1 %v417_v57  ;;  %v244_v4 = vadd.f32 %v1307_v33, %v243_v62  ;;  %v324_v8 = vadd.f32 %v1307_v33, %v323_v5  ;;  %v416_v11 = vmul.f32 %v1341_v1, %v1341_v1  ;;  %v432_v12 = vmul.f32 %v1343_v2, %v1343_v2 }
  0xd1   :  { %446 = vadd.xlane.f32.xlu0 %v414_v60  ;;  %v1045_v6 = vpop.f32.mrf.mxu0  ;;  %v1349_v9 = vmax.f32 %v249_v3, 0.0  ;;  %v1069_v13 = vpop.f32.mrf.mxu1  ;;  %v1357_v15 = vmax.f32 %v329_v7, 0.0 }
  0xd2   :  { %v1351_v10 = vmax.f32 %v244_v4, 0.0  ;;  %v1359_v16 = vmax.f32 %v324_v8, 0.0  ;;  %v259_v17 = vadd.f32 %v1045_v6, %v1307_v33  ;;  %v339_v23 = vadd.f32 %v1069_v13, %v1307_v33 }
  0xd3   :  { %v253_v14 = vpop.f32.mrf.mxu0  ;;  %v419_v19 = vmul.f32 %v1349_v9, %v1349_v9  ;;  %v333_v21 = vpop.f32.mrf.mxu1  ;;  %v435_v27 = vmul.f32 %v1357_v15, %v1357_v15 }
  0xd4   :  { %484 = vadd.xlane.f32.xlu1 %v433_v63  ;;  %v254_v18 = vadd.f32 %v1307_v33, %v253_v14  ;;  %v418_v20 = vmul.f32 %v1351_v10, %v1351_v10  ;;  %v334_v24 = vadd.f32 %v1307_v33, %v333_v21  ;;  %v1369_v25 = vmax.f32 %v259_v17, 0.0 }
  0xd5   :  { %478 = vadd.xlane.f32.xlu0 %v430_v0  ;;  %v1048_v22 = vpop.f32.mrf.mxu0  ;;  %v434_v28 = vmul.f32 %v1359_v16, %v1359_v16  ;;  %v1072_v29 = vpop.f32.mrf.mxu1  ;;  %v1377_v31 = vmax.f32 %v339_v23, 0.0 }
  0xd6   :  { %v1371_v26 = vmax.f32 %v254_v18, 0.0  ;;  %v1379_v32 = vmax.f32 %v334_v24, 0.0  ;;  %v269_v34 = vadd.f32 %v1048_v22, %v1307_v33  ;;  %v421_v36 = vmul.f32 %v1369_v25, %v1369_v25 }
  0xd7   :  { %v263_v30 = vpop.f32.mrf.mxu0  ;;  %v343_v38 = vpop.f32.mrf.mxu1  ;;  %v349_v42 = vadd.f32 %v1072_v29, %v1307_v33  ;;  %v437_v46 = vmul.f32 %v1377_v31, %v1377_v31 }
  0xd8   :  { %450 = vadd.xlane.f32.xlu1 %v416_v11  ;;  %v264_v35 = vadd.f32 %v1307_v33, %v263_v30  ;;  %v420_v37 = vmul.f32 %v1371_v26, %v1371_v26  ;;  %v344_v43 = vadd.f32 %v1307_v33, %v343_v38  ;;  %v1389_v44 = vmax.f32 %v269_v34, 0.0 }
  0xd9   :  { %482 = vadd.xlane.f32.xlu0 %v432_v12  ;;  %v1051_v39 = vpop.f32.mrf.mxu0  ;;  %v436_v47 = vmul.f32 %v1379_v32, %v1379_v32  ;;  %v1075_v49 = vpop.f32.mrf.mxu1  ;;  %v1397_v51 = vmax.f32 %v349_v42, 0.0 }
  0xda   :  { %v1391_v45 = vmax.f32 %v264_v35, 0.0  ;;  %v1399_v53 = vmax.f32 %v344_v43, 0.0  ;;  %v279_v55 = vadd.f32 %v1051_v39, %v1307_v33  ;;  %v423_v58 = vmul.f32 %v1389_v44, %v1389_v44 }
  0xdb   :  { %v273_v50 = vpop.f32.mrf.mxu0  ;;  %v353_v60 = vpop.f32.mrf.mxu1  ;;  %v359_v62 = vadd.f32 %v1075_v49, %v1307_v33  ;;  %v439_v4 = vmul.f32 %v1397_v51, %v1397_v51 }
  0xdc   :  { %456 = vadd.xlane.f32.xlu1 %v419_v19  ;;  %v274_v57 = vadd.f32 %v1307_v33, %v273_v50  ;;  %v422_v59 = vmul.f32 %v1391_v45, %v1391_v45  ;;  %v354_v63 = vadd.f32 %v1307_v33, %v353_v60  ;;  %v1409_v0 = vmax.f32 %v279_v55, 0.0 }
  0xdd   :  { %454 = vadd.xlane.f32.xlu0 %v418_v20  ;;  %v1054_v61 = vpop.f32.mrf.mxu0  ;;  %v438_v5 = vmul.f32 %v1399_v53, %v1399_v53  ;;  %v1078_v6 = vpop.f32.mrf.mxu1  ;;  %v1417_v8 = vmax.f32 %v359_v62, 0.0 }
  0xde   :  { %v1411_v3 = vmax.f32 %v274_v57, 0.0  ;;  %v1419_v11 = vmax.f32 %v354_v63, 0.0  ;;  %v289_v12 = vadd.f32 %v1054_v61, %v1307_v33  ;;  %v425_v14 = vmul.f32 %v1409_v0, %v1409_v0 }
  0xdf   :  { %v283_v7 = vpop.f32.mrf.mxu0  ;;  %v363_v18 = vpop.f32.mrf.mxu1  ;;  %v369_v20 = vadd.f32 %v1078_v6, %v1307_v33  ;;  %v441_v24 = vmul.f32 %v1417_v8, %v1417_v8 }
  0xe0   :  { %488 = vadd.xlane.f32.xlu1 %v435_v27  ;;  %v284_v13 = vadd.f32 %v1307_v33, %v283_v7  ;;  %v424_v17 = vmul.f32 %v1411_v3, %v1411_v3  ;;  %v364_v21 = vadd.f32 %v1307_v33, %v363_v18  ;;  %v1429_v22 = vmax.f32 %v289_v12, 0.0 }
  0xe1   :  { %486 = vadd.xlane.f32.xlu0 %v434_v28  ;;  %v1057_v19 = vpop.f32.mrf.mxu0  ;;  %v440_v27 = vmul.f32 %v1419_v11, %v1419_v11  ;;  %v1081_v29 = vpop.f32.mrf.mxu1  ;;  %v1437_v30 = vmax.f32 %v369_v20, 0.0 }
  0xe2   :  { %v1431_v23 = vmax.f32 %v284_v13, 0.0  ;;  %v1439_v34 = vmax.f32 %v364_v21, 0.0  ;;  %v299_v35 = vadd.f32 %v1057_v19, %v1307_v33  ;;  %v379_v42 = vadd.f32 %v1081_v29, %v1307_v33 }
  0xe3   :  { %v293_v28 = vpop.f32.mrf.mxu0  ;;  %v373_v39 = vpop.f32.mrf.mxu1  ;;  %v443_v43 = vmul.f32 %v1437_v30, %v1437_v30 }
  0xe4   :  { %460 = vadd.xlane.f32.xlu1 %v421_v36  ;;  %v294_v36 = vadd.f32 %v1307_v33, %v293_v28  ;;  %v426_v38 = vmul.f32 %v1431_v23, %v1431_v23  ;;  %v374_v49 = vadd.f32 %v1307_v33, %v373_v39  ;;  %v442_v50 = vmul.f32 %v1439_v34, %v1439_v34 }
  0xe5   :  { %458 = vadd.xlane.f32.xlu0 %v420_v37  ;;  %v427_v37 = vmul.f32 %v1429_v22, %v1429_v22  ;;  %v1457_v55 = vmax.f32 %v379_v42, 0.0 }
  0xe6   :  { %v1459_v57 = vmax.f32 %v374_v49, 0.0 }
  0xe7   :  { %v445_v33 = vmul.f32 %v1457_v55, %v1457_v55 }
  0xe8   :  { %492 = vadd.xlane.f32.xlu1 %v437_v46  ;;  %v1450_v46 = vmax.f32 %v299_v35, 0.0  ;;  %v444_v60 = vmul.f32 %v1459_v57, %v1459_v57 }
  0xe9   :  { %490 = vadd.xlane.f32.xlu0 %v436_v47  ;;  %v1452_v47 = vmax.f32 %v294_v36, 0.0 }
  0xec   :  { %464 = vadd.xlane.f32.xlu1 %v423_v58  ;;  %v429_v58 = vmul.f32 %v1450_v46, %v1450_v46 }
  0xed   :  { %462 = vadd.xlane.f32.xlu0 %v422_v59  ;;  %v428_v59 = vmul.f32 %v1452_v47, %v1452_v47 }
  0xf0   :  { %496 = vadd.xlane.f32.xlu1 %v439_v4 }
  0xf1   :  { %494 = vadd.xlane.f32.xlu0 %v438_v5 }
  0xf4   :  { %468 = vadd.xlane.f32.xlu1 %v425_v14 }
  0xf5   :  { %466 = vadd.xlane.f32.xlu0 %v424_v17 }
  0xf8   :  { %500 = vadd.xlane.f32.xlu1 %v441_v24 }
  0xf9   :  { %498 = vadd.xlane.f32.xlu0 %v440_v27 }
  0xfc   :  { %472 = vadd.xlane.f32.xlu1 %v427_v37 }
  0xfd   :  { %470 = vadd.xlane.f32.xlu0 %v426_v38 }
 0x100   :  { %504 = vadd.xlane.f32.xlu1 %v443_v43 }
 0x101   :  { %502 = vadd.xlane.f32.xlu0 %v442_v50 }
 0x104   :  { %476 = vadd.xlane.f32.xlu1 %v429_v58 }
 0x105   :  { %474 = vadd.xlane.f32.xlu0 %v428_v59 }
 0x108   :  { %508 = vadd.xlane.f32.xlu1 %v445_v33 }
 0x109   :  { %506 = vadd.xlane.f32.xlu0 %v444_v60 }
 0x155   :  { %v481_v61 = vpop.xlane.xlu1 %480 }
 0x156   :  { %v449_v62 = vpop.xlane.xlu0 %448  ;;  %v527_v63 = vmax.f32 %v481_v61, 1e-24 }
 0x157   :  { %v511_v4 = vmax.f32 %v449_v62, 1e-24 }
 0x158   :  { %1084 = vrsqrt.f32 %v527_v63 }
 0x159   :  { %1086 = vrsqrt.f32 %v511_v4  ;;  %v453_v5 = vpop.xlane.xlu1 %452 }
 0x15a   :  { %v447_v6 = vpop.xlane.xlu0 %446  ;;  %v513_v7 = vmax.f32 %v453_v5, 1e-24 }
 0x15b   :  { %v510_v12 = vmax.f32 %v447_v6, 1e-24 }
 0x15c   :  { %1088 = vrsqrt.f32 %v513_v7 }
 0x15d   :  { %1090 = vrsqrt.f32 %v510_v12  ;;  %v485_v13 = vpop.xlane.xlu1 %484 }
 0x15e   :  { %v479_v14 = vpop.xlane.xlu0 %478  ;;  %v529_v17 = vmax.f32 %v485_v13, 1e-24 }
 0x15f   :  { %v526_v18 = vmax.f32 %v479_v14, 1e-24 }
 0x160   :  { %1092 = vrsqrt.f32 %v529_v17 }
 0x161   :  { %1094 = vrsqrt.f32 %v526_v18  ;;  %v451_v19 = vpop.xlane.xlu1 %450 }
 0x162   :  { %v483_v20 = vpop.xlane.xlu0 %482  ;;  %v512_v21 = vmax.f32 %v451_v19, 1e-24 }
 0x163   :  { %v528_v24 = vmax.f32 %v483_v20, 1e-24 }
 0x164   :  { %1096 = vrsqrt.f32 %v512_v21 }
 0x165   :  { %v1085_v27 = vpop.eup %1084  ;;  %1098 = vrsqrt.f32 %v528_v24  ;;  %v457_v28 = vpop.xlane.xlu1 %456 }
 0x166   :  { %v455_v29 = vpop.xlane.xlu0 %454  ;;  %v1087_v35 = vpop.eup %1086  ;;  %v591_v36 = vmul.f32 %v1085_v27, %v1313_v41  ;;  %v515_v37 = vmax.f32 %v457_v28, 1e-24 }
 0x167   :  { %v514_v38 = vmax.f32 %v455_v29, 1e-24  ;;  %v575_v39 = vmul.f32 %v1087_v35, %v1311_v40 }
 0x168   :  { %623 = vst [vmem:[%s1648_s4 + $0x88] sm:$0xff] %v591_v36  ;;  %1100 = vrsqrt.f32 %v515_v37 }
 0x169   :  { %v1089_v42 = vpop.eup %1088  ;;  %607 = vst [vmem:[%s1648_s4 + $0x8] sm:$0xff] %v575_v39  ;;  %1102 = vrsqrt.f32 %v514_v38  ;;  %v489_v43 = vpop.xlane.xlu1 %488 }
 0x16a   :  { %v487_v49 = vpop.xlane.xlu0 %486  ;;  %v1091_v50 = vpop.eup %1090  ;;  %v577_v41 = vmul.f32 %v1089_v42, %v1325_v52  ;;  %v531_v58 = vmax.f32 %v489_v43, 1e-24 }
 0x16b   :  { %v530_v59 = vmax.f32 %v487_v49, 1e-24  ;;  %v574_v40 = vmul.f32 %v1091_v50, %v1319_v48 }
 0x16c   :  { %609 = vst [vmem:[%s1648_s4 + $0x18] sm:$0xff] %v577_v41  ;;  %1104 = vrsqrt.f32 %v531_v58 }
 0x16d   :  { %v1093_v33 = vpop.eup %1092  ;;  %606 = vst [vmem:[%s1648_s4] sm:$0xff] %v574_v40  ;;  %v907_v60 = vpack.c.bf16 %v575_v39, %v574_v40  ;;  %1106 = vrsqrt.f32 %v530_v59  ;;  %v461_v61 = vpop.xlane.xlu1 %460 }
 0x16e   :  { %v459_v62 = vpop.xlane.xlu0 %458  ;;  %v1095_v63 = vpop.eup %1094  ;;  %v593_v52 = vmul.f32 %v1093_v33, %v1327_v54  ;;  %v517_v4 = vmax.f32 %v461_v61, 1e-24 }
 0x16f   :  { %v516_v5 = vmax.f32 %v459_v62, 1e-24  ;;  %908 = vst [vmem:[%s1649_s3] sm:$0xff] %v907_v60   ;;  %v590_v48 = vmul.f32 %v1095_v63, %v1329_v56 }
 0x170   :  { %625 = vst [vmem:[%s1648_s4 + $0x98] sm:$0xff] %v593_v52  ;;  %1108 = vrsqrt.f32 %v517_v4 }
 0x171   :  { %v1097_v6 = vpop.eup %1096  ;;  %622 = vst [vmem:[%s1648_s4 + $0x80] sm:$0xff] %v590_v48  ;;  %v947_v7 = vpack.c.bf16 %v591_v36, %v590_v48  ;;  %1110 = vrsqrt.f32 %v516_v5  ;;  %v493_v54 = vpop.xlane.xlu1 %492 }
 0x172   :  { %v491_v12 = vpop.xlane.xlu0 %490  ;;  %v1099_v13 = vpop.eup %1098  ;;  %v576_v14 = vmul.f32 %v1097_v6, %v1341_v1  ;;  %v533_v17 = vmax.f32 %v493_v54, 1e-24 }
 0x173   :  { %v532_v18 = vmax.f32 %v491_v12, 1e-24  ;;  %991 = vst [vmem:[%s1649_s3 + $0x40] sm:$0xff] %v947_v7   ;;  %v592_v56 = vmul.f32 %v1099_v13, %v1343_v2 }
 0x174   :  { %608 = vst [vmem:[%s1648_s4 + $0x10] sm:$0xff] %v576_v14  ;;  %v912_v19 = vpack.c.bf16 %v577_v41, %v576_v14  ;;  %1112 = vrsqrt.f32 %v533_v17 }
 0x175   :  { %v1101_v20 = vpop.eup %1100  ;;  %624 = vst [vmem:[%s1648_s4 + $0x90] sm:$0xff] %v592_v56  ;;  %v952_v1 = vpack.c.bf16 %v593_v52, %v592_v56  ;;  %1114 = vrsqrt.f32 %v532_v18  ;;  %v465_v21 = vpop.xlane.xlu1 %464 }
 0x176   :  { %v463_v24 = vpop.xlane.xlu0 %462  ;;  %v1103_v27 = vpop.eup %1102  ;;  %984 = vst [vmem:[%s1649_s3 + $0x8] sm:$0xff] %v912_v19   ;;  %v579_v2 = vmul.f32 %v1101_v20, %v1349_v9  ;;  %v519_v28 = vmax.f32 %v465_v21, 1e-24 }
 0x177   :  { %v518_v29 = vmax.f32 %v463_v24, 1e-24  ;;  %992 = vst [vmem:[%s1649_s3 + $0x48] sm:$0xff] %v952_v1   ;;  %v578_v35 = vmul.f32 %v1103_v27, %v1351_v10 }
 0x178   :  { %611 = vst [vmem:[%s1648_s4 + $0x28] sm:$0xff] %v579_v2  ;;  %1116 = vrsqrt.f32 %v519_v28 }
 0x179   :  { %v1105_v36 = vpop.eup %1104  ;;  %610 = vst [vmem:[%s1648_s4 + $0x20] sm:$0xff] %v578_v35  ;;  %v917_v37 = vpack.c.bf16 %v579_v2, %v578_v35  ;;  %1118 = vrsqrt.f32 %v518_v29  ;;  %v497_v9 = vpop.xlane.xlu1 %496 }
 0x17a   :  { %v495_v38 = vpop.xlane.xlu0 %494  ;;  %v1107_v39 = vpop.eup %1106  ;;  %v595_v42 = vmul.f32 %v1105_v36, %v1357_v15  ;;  %v535_v43 = vmax.f32 %v497_v9, 1e-24 }
 0x17b   :  { %v534_v49 = vmax.f32 %v495_v38, 1e-24  ;;  %985 = vst [vmem:[%s1649_s3 + $0x10] sm:$0xff] %v917_v37   ;;  %v594_v10 = vmul.f32 %v1107_v39, %v1359_v16 }
 0x17c   :  { %627 = vst [vmem:[%s1648_s4 + $0xa8] sm:$0xff] %v595_v42  ;;  %1120 = vrsqrt.f32 %v535_v43 }
 0x17d   :  { %v1109_v50 = vpop.eup %1108  ;;  %626 = vst [vmem:[%s1648_s4 + $0xa0] sm:$0xff] %v594_v10  ;;  %v957_v41 = vpack.c.bf16 %v595_v42, %v594_v10  ;;  %1122 = vrsqrt.f32 %v534_v49  ;;  %v469_v15 = vpop.xlane.xlu1 %468 }
 0x17e   :  { %v467_v58 = vpop.xlane.xlu0 %466  ;;  %v1111_v59 = vpop.eup %1110  ;;  %v581_v40 = vmul.f32 %v1109_v50, %v1369_v25  ;;  %v521_v33 = vmax.f32 %v469_v15, 1e-24 }
 0x17f   :  { %v520_v60 = vmax.f32 %v467_v58, 1e-24  ;;  %993 = vst [vmem:[%s1649_s3 + $0x50] sm:$0xff] %v957_v41   ;;  %v580_v16 = vmul.f32 %v1111_v59, %v1371_v26 }
 0x180   :  { %613 = vst [vmem:[%s1648_s4 + $0x38] sm:$0xff] %v581_v40  ;;  %1124 = vrsqrt.f32 %v521_v33 }
 0x181   :  { %v1113_v61 = vpop.eup %1112  ;;  %612 = vst [vmem:[%s1648_s4 + $0x30] sm:$0xff] %v580_v16  ;;  %v922_v62 = vpack.c.bf16 %v581_v40, %v580_v16  ;;  %1126 = vrsqrt.f32 %v520_v60  ;;  %v501_v25 = vpop.xlane.xlu1 %500 }
 0x182   :  { %v499_v63 = vpop.xlane.xlu0 %498  ;;  %v1115_v52 = vpop.eup %1114  ;;  %v597_v4 = vmul.f32 %v1113_v61, %v1377_v31  ;;  %v537_v5 = vmax.f32 %v501_v25, 1e-24 }
 0x183   :  { %v536_v48 = vmax.f32 %v499_v63, 1e-24  ;;  %986 = vst [vmem:[%s1649_s3 + $0x18] sm:$0xff] %v922_v62   ;;  %v596_v26 = vmul.f32 %v1115_v52, %v1379_v32 }
 0x184   :  { %629 = vst [vmem:[%s1648_s4 + $0xb8] sm:$0xff] %v597_v4  ;;  %1128 = vrsqrt.f32 %v537_v5 }
 0x185   :  { %v1117_v6 = vpop.eup %1116  ;;  %628 = vst [vmem:[%s1648_s4 + $0xb0] sm:$0xff] %v596_v26  ;;  %v962_v7 = vpack.c.bf16 %v597_v4, %v596_v26  ;;  %1130 = vrsqrt.f32 %v536_v48  ;;  %v473_v31 = vpop.xlane.xlu1 %472 }
 0x186   :  { %v471_v54 = vpop.xlane.xlu0 %470  ;;  %v1119_v12 = vpop.eup %1118  ;;  %v583_v13 = vmul.f32 %v1117_v6, %v1389_v44  ;;  %v523_v14 = vmax.f32 %v473_v31, 1e-24 }
 0x187   :  { %v522_v17 = vmax.f32 %v471_v54, 1e-24  ;;  %994 = vst [vmem:[%s1649_s3 + $0x58] sm:$0xff] %v962_v7   ;;  %v582_v32 = vmul.f32 %v1119_v12, %v1391_v45 }
 0x188   :  { %615 = vst [vmem:[%s1648_s4 + $0x48] sm:$0xff] %v583_v13  ;;  %1132 = vrsqrt.f32 %v523_v14 }
 0x189   :  { %v1121_v18 = vpop.eup %1120  ;;  %614 = vst [vmem:[%s1648_s4 + $0x40] sm:$0xff] %v582_v32  ;;  %v927_v56 = vpack.c.bf16 %v583_v13, %v582_v32  ;;  %1134 = vrsqrt.f32 %v522_v17  ;;  %v505_v44 = vpop.xlane.xlu1 %504 }
 0x18a   :  { %v503_v19 = vpop.xlane.xlu0 %502  ;;  %v1123_v20 = vpop.eup %1122  ;;  %v599_v1 = vmul.f32 %v1121_v18, %v1397_v51  ;;  %v539_v21 = vmax.f32 %v505_v44, 1e-24 }
 0x18b   :  { %v538_v24 = vmax.f32 %v503_v19, 1e-24  ;;  %987 = vst [vmem:[%s1649_s3 + $0x20] sm:$0xff] %v927_v56   ;;  %v598_v45 = vmul.f32 %v1123_v20, %v1399_v53 }
 0x18c   :  { %631 = vst [vmem:[%s1648_s4 + $0xc8] sm:$0xff] %v599_v1  ;;  %1136 = vrsqrt.f32 %v539_v21 }
 0x18d   :  { %v1125_v27 = vpop.eup %1124  ;;  %630 = vst [vmem:[%s1648_s4 + $0xc0] sm:$0xff] %v598_v45  ;;  %v967_v2 = vpack.c.bf16 %v599_v1, %v598_v45  ;;  %1138 = vrsqrt.f32 %v538_v24  ;;  %v477_v51 = vpop.xlane.xlu1 %476 }
 0x18e   :  { %v475_v28 = vpop.xlane.xlu0 %474  ;;  %v1127_v29 = vpop.eup %1126  ;;  %v585_v35 = vmul.f32 %v1125_v27, %v1409_v0  ;;  %v525_v36 = vmax.f32 %v477_v51, 1e-24 }
 0x18f   :  { %v524_v37 = vmax.f32 %v475_v28, 1e-24  ;;  %995 = vst [vmem:[%s1649_s3 + $0x60] sm:$0xff] %v967_v2   ;;  %v584_v53 = vmul.f32 %v1127_v29, %v1411_v3 }
 0x190   :  { %617 = vst [vmem:[%s1648_s4 + $0x58] sm:$0xff] %v585_v35  ;;  %1140 = vrsqrt.f32 %v525_v36 }
 0x191   :  { %v1129_v9 = vpop.eup %1128  ;;  %616 = vst [vmem:[%s1648_s4 + $0x50] sm:$0xff] %v584_v53  ;;  %v932_v38 = vpack.c.bf16 %v585_v35, %v584_v53  ;;  %1142 = vrsqrt.f32 %v524_v37  ;;  %v509_v0 = vpop.xlane.xlu1 %508 }
 0x192   :  { %v507_v39 = vpop.xlane.xlu0 %506  ;;  %v1131_v42 = vpop.eup %1130  ;;  %v601_v43 = vmul.f32 %v1129_v9, %v1417_v8  ;;  %v541_v49 = vmax.f32 %v509_v0, 1e-24 }
 0x193   :  { %v540_v10 = vmax.f32 %v507_v39, 1e-24  ;;  %988 = vst [vmem:[%s1649_s3 + $0x28] sm:$0xff] %v932_v38   ;;  %v600_v3 = vmul.f32 %v1131_v42, %v1419_v11 }
 0x194   :  { %633 = vst [vmem:[%s1648_s4 + $0xd8] sm:$0xff] %v601_v43  ;;  %1144 = vrsqrt.f32 %v541_v49 }
 0x195   :  { %v1133_v50 = vpop.eup %1132  ;;  %632 = vst [vmem:[%s1648_s4 + $0xd0] sm:$0xff] %v600_v3  ;;  %v972_v41 = vpack.c.bf16 %v601_v43, %v600_v3  ;;  %1146 = vrsqrt.f32 %v540_v10 }
 0x196   :  { %v1135_v8 = vpop.eup %1134  ;;  %v587_v15 = vmul.f32 %v1133_v50, %v1429_v22 }
 0x197   :  { %996 = vst [vmem:[%s1649_s3 + $0x68] sm:$0xff] %v972_v41   ;;  %v586_v11 = vmul.f32 %v1135_v8, %v1431_v23 }
 0x198   :  { %619 = vst [vmem:[%s1648_s4 + $0x68] sm:$0xff] %v587_v15 }
 0x199   :  { %v1137_v58 = vpop.eup %1136  ;;  %618 = vst [vmem:[%s1648_s4 + $0x60] sm:$0xff] %v586_v11  ;;  %v937_v59 = vpack.c.bf16 %v587_v15, %v586_v11 }
 0x19a   :  { %v1139_v40 = vpop.eup %1138  ;;  %v603_v33 = vmul.f32 %v1137_v58, %v1437_v30 }
 0x19b   :  { %989 = vst [vmem:[%s1649_s3 + $0x30] sm:$0xff] %v937_v59   ;;  %v602_v22 = vmul.f32 %v1139_v40, %v1439_v34 }
 0x19c   :  { %635 = vst [vmem:[%s1648_s4 + $0xe8] sm:$0xff] %v603_v33 }
 0x19d   :  { %v1141_v23 = vpop.eup %1140  ;;  %634 = vst [vmem:[%s1648_s4 + $0xe0] sm:$0xff] %v602_v22  ;;  %v977_v60 = vpack.c.bf16 %v603_v33, %v602_v22 }
 0x19e   :  { %v1143_v16 = vpop.eup %1142  ;;  %v589_v61 = vmul.f32 %v1141_v23, %v1450_v46 }
 0x19f   :  { %997 = vst [vmem:[%s1649_s3 + $0x70] sm:$0xff] %v977_v60   ;;  %v588_v30 = vmul.f32 %v1143_v16, %v1452_v47 }
 0x1a0   :  { %621 = vst [vmem:[%s1648_s4 + $0x78] sm:$0xff] %v589_v61 }
 0x1a1   :  { %v1145_v34 = vpop.eup %1144  ;;  %620 = vst [vmem:[%s1648_s4 + $0x70] sm:$0xff] %v588_v30  ;;  %v942_v62 = vpack.c.bf16 %v589_v61, %v588_v30 }
 0x1a2   :  { %v1147_v25 = vpop.eup %1146  ;;  %v605_v63 = vmul.f32 %v1145_v34, %v1457_v55 }
 0x1a3   :  { %990 = vst [vmem:[%s1649_s3 + $0x38] sm:$0xff] %v942_v62   ;;  %v604_v46 = vmul.f32 %v1147_v25, %v1459_v57 }
 0x1a4   :  { %637 = vst [vmem:[%s1648_s4 + $0xf8] sm:$0xff] %v605_v63 }
 0x1a5   :  { %636 = vst [vmem:[%s1648_s4 + $0xf0] sm:$0xff] %v604_v46  ;;  %v982_v47 = vpack.c.bf16 %v605_v63, %v604_v46 }
 0x1a7   :  { %998 = vst [vmem:[%s1649_s3 + $0x78] sm:$0xff] %v982_v47  }

// kernel: drbc_forward.9
= control target key start
LH: loop header
LB: loop body
LE: loop exit
PB: predicated region body
PF: predicated region fallthrough
CT: control target
= control target key end

     0   :  { %vm347_vm0 = vcmask 523264   ;;  %s1371_s1 = inlined_call_operand.vmem [shape: f32[128,64], index: 1, kind: input, shape index: {}]   ;;  %s1372_s0 = inlined_call_operand.vmem [shape: f32[256,128], index: 0, kind: input, shape index: {}]   ;;  %s1373_s3 = inlined_call_operand.vmem [shape: f32[64,128], index: 3, kind: input, shape index: {}]   ;;  %s1374_s2 = inlined_call_operand.vmem [shape: f32[1,64], index: 2, kind: input, shape index: {}]   ;;  %s1375_s4 = inlined_call_operand.vmem [shape: f32[1,128], index: 4, kind: input, shape index: {}]   ;;  %s1376_s5 = inlined_call_operand.vmem [shape: f32[256,128], index: 5, kind: output, shape index: {}]  }
   0x1   :  { %v67_v0 = vld [vmem:[%s1371_s1 + $0x78] sm:$0xff]  ;;  %v66_v1 = vld [vmem:[%s1371_s1 + $0x70] sm:$0xff]  ;;  %v65_v2 = vld [vmem:[%s1371_s1 + $0x68] sm:$0xff] }
   0x2   :  { %827 = vmatprep.subr.mxu0 %v67_v0  ;;  %v64_v3 = vld [vmem:[%s1371_s1 + $0x60] sm:$0xff]  ;;  %v63_v5 = vld [vmem:[%s1371_s1 + $0x58] sm:$0xff]  ;;  %v62_v6 = vld [vmem:[%s1371_s1 + $0x50] sm:$0xff] }
   0x3   :  { %828 = vmatpush3.msra.mxu0 %v67_v0  ;;  %v20_v4 = vld [vmem:[%s1372_s0] sm:$0xff]  ;;  %v61_v7 = vld [vmem:[%s1371_s1 + $0x48] sm:$0xff]  ;;  %v59_v9 = vld [vmem:[%s1371_s1 + $0x38] sm:$0xff] }
   0x4   :  { %829 = vmatprep.subr.mxu0 %v66_v1  ;;  %859 = vmatprep.mubr.f32.mxu0 %v20_v4  ;;  %v60_v8 = vld [vmem:[%s1371_s1 + $0x40] sm:$0xff]  ;;  %v58_v10 = vld [vmem:[%s1371_s1 + $0x30] sm:$0xff]  ;;  %v339_v11 = vld [vmem:[%s1373_s3 + $0x38] sm:$0xff] }
   0x5   :  { %830 = vmatpush3.msra.mxu0 %v66_v1  ;;  %v338_v12 = vld [vmem:[%s1373_s3 + $0x30] sm:$0xff]  ;;  %907 = vmatprep.subr.mxu1 %v339_v11  ;;  %v57_v13 = vld [vmem:[%s1371_s1 + $0x28] sm:$0xff]  ;;  %v56_v15 = vld [vmem:[%s1371_s1 + $0x20] sm:$0xff] }
   0x6   :  { %831 = vmatprep.subr.mxu0 %v65_v2  ;;  %908 = vmatpush3.msra.mxu1 %v339_v11  ;;  %v337_v14 = vld [vmem:[%s1373_s3 + $0x28] sm:$0xff]  ;;  %v336_v16 = vld [vmem:[%s1373_s3 + $0x20] sm:$0xff]  ;;  %v55_v17 = vld [vmem:[%s1371_s1 + $0x18] sm:$0xff] }
   0x7   :  { %832 = vmatpush3.msra.mxu0 %v65_v2  ;;  %909 = vmatprep.subr.mxu1 %v338_v12  ;;  %v54_v18 = vld [vmem:[%s1371_s1 + $0x10] sm:$0xff]  ;;  %v53_v19 = vld [vmem:[%s1371_s1 + $0x8] sm:$0xff]  ;;  %v52_v20 = vld [vmem:[%s1371_s1] sm:$0xff] }
   0x8   :  { %833 = vmatprep.subr.mxu0 %v64_v3  ;;  %910 = vmatpush3.msra.mxu1 %v338_v12  ;;  %v21_v21 = vld [vmem:[%s1372_s0 + $0x8] sm:$0xff]  ;;  %v22_v22 = vld [vmem:[%s1372_s0 + $0x10] sm:$0xff]  ;;  %v23_v23 = vld [vmem:[%s1372_s0 + $0x18] sm:$0xff] }
   0x9   :  { %834 = vmatpush3.msra.mxu0 %v64_v3  ;;  %911 = vmatprep.subr.mxu1 %v337_v14  ;;  %v24_v24 = vld [vmem:[%s1372_s0 + $0x20] sm:$0xff]  ;;  %v25_v25 = vld [vmem:[%s1372_s0 + $0x28] sm:$0xff]  ;;  %v26_v26 = vld [vmem:[%s1372_s0 + $0x30] sm:$0xff] }
   0xa   :  { %835 = vmatprep.subr.mxu0 %v63_v5  ;;  %912 = vmatpush3.msra.mxu1 %v337_v14  ;;  %v27_v27 = vld [vmem:[%s1372_s0 + $0x38] sm:$0xff]  ;;  %v28_v28 = vld [vmem:[%s1372_s0 + $0x40] sm:$0xff]  ;;  %v29_v29 = vld [vmem:[%s1372_s0 + $0x48] sm:$0xff] }
   0xb   :  { %836 = vmatpush3.msra.mxu0 %v63_v5  ;;  %913 = vmatprep.subr.mxu1 %v336_v16  ;;  %v30_v30 = vld [vmem:[%s1372_s0 + $0x50] sm:$0xff]  ;;  %v31_v31 = vld [vmem:[%s1372_s0 + $0x58] sm:$0xff]  ;;  %v32_v32 = vld [vmem:[%s1372_s0 + $0x60] sm:$0xff] }
   0xc   :  { %837 = vmatprep.subr.mxu0 %v62_v6  ;;  %914 = vmatpush3.msra.mxu1 %v336_v16  ;;  %v33_v33 = vld [vmem:[%s1372_s0 + $0x68] sm:$0xff]  ;;  %v34_v34 = vld [vmem:[%s1372_s0 + $0x70] sm:$0xff]  ;;  %v35_v35 = vld [vmem:[%s1372_s0 + $0x78] sm:$0xff] }
   0xd   :  { %838 = vmatpush3.msra.mxu0 %v62_v6  ;;  %v36_v36 = vld [vmem:[%s1372_s0 + $0x80] sm:$0xff]  ;;  %v37_v37 = vld [vmem:[%s1372_s0 + $0x88] sm:$0xff]  ;;  %v38_v38 = vld [vmem:[%s1372_s0 + $0x90] sm:$0xff] }
   0xe   :  { %839 = vmatprep.subr.mxu0 %v61_v7  ;;  %v39_v39 = vld [vmem:[%s1372_s0 + $0x98] sm:$0xff]  ;;  %v40_v40 = vld [vmem:[%s1372_s0 + $0xa0] sm:$0xff]  ;;  %v41_v41 = vld [vmem:[%s1372_s0 + $0xa8] sm:$0xff] }
   0xf   :  { %840 = vmatpush3.msra.mxu0 %v61_v7  ;;  %v42_v42 = vld [vmem:[%s1372_s0 + $0xb0] sm:$0xff]  ;;  %v43_v43 = vld [vmem:[%s1372_s0 + $0xb8] sm:$0xff]  ;;  %v44_v44 = vld [vmem:[%s1372_s0 + $0xc0] sm:$0xff] }
  0x10   :  { %841 = vmatprep.subr.mxu0 %v60_v8  ;;  %v45_v45 = vld [vmem:[%s1372_s0 + $0xc8] sm:$0xff]  ;;  %v46_v46 = vld [vmem:[%s1372_s0 + $0xd0] sm:$0xff]  ;;  %v47_v47 = vld [vmem:[%s1372_s0 + $0xd8] sm:$0xff] }
  0x11   :  { %842 = vmatpush3.msra.mxu0 %v60_v8  ;;  %v48_v48 = vld [vmem:[%s1372_s0 + $0xe0] sm:$0xff]  ;;  %v49_v49 = vld [vmem:[%s1372_s0 + $0xe8] sm:$0xff]  ;;  %v50_v50 = vld [vmem:[%s1372_s0 + $0xf0] sm:$0xff] }
  0x12   :  { %843 = vmatprep.subr.mxu0 %v59_v9  ;;  %v51_v51 = vld [vmem:[%s1372_s0 + $0xf8] sm:$0xff]  ;;  %v334_v53 = vld [vmem:[%s1373_s3 + $0x10] sm:$0xff]  ;;  %v333_v54 = vld [vmem:[%s1373_s3 + $0x8] sm:$0xff] }
  0x13   :  { %844 = vmatpush3.msra.mxu0 %v59_v9  ;;  %v335_v52 = vld [vmem:[%s1373_s3 + $0x18] sm:$0xff]  ;;  %v332_v55 = vld [vmem:[%s1373_s3] sm:$0xff] }
  0x14   :  { %845 = vmatprep.subr.mxu0 %v58_v10  ;;  %915 = vmatprep.subr.mxu1 %v335_v52  ;;  %v1172_v56 = vld [vmem:[%s1374_s2] ss:$0 sm:$0xff] }
  0x15   :  { %846 = vmatpush3.msra.mxu0 %v58_v10  ;;  %916 = vmatpush3.msra.mxu1 %v335_v52 }
  0x16   :  { %847 = vmatprep.subr.mxu0 %v57_v13  ;;  %917 = vmatprep.subr.mxu1 %v334_v53 }
  0x17   :  { %848 = vmatpush3.msra.mxu0 %v57_v13  ;;  %918 = vmatpush3.msra.mxu1 %v334_v53 }
  0x18   :  { %849 = vmatprep.subr.mxu0 %v56_v15  ;;  %919 = vmatprep.subr.mxu1 %v333_v54 }
  0x19   :  { %850 = vmatpush3.msra.mxu0 %v56_v15  ;;  %920 = vmatpush3.msra.mxu1 %v333_v54 }
  0x1a   :  { %851 = vmatprep.subr.mxu0 %v55_v17  ;;  %921 = vmatprep.subr.mxu1 %v332_v55 }
  0x1b   :  { %852 = vmatpush3.msra.mxu0 %v55_v17  ;;  %922 = vmatpush3.msra.mxu1 %v332_v55 }
  0x1c   :  { %853 = vmatprep.subr.mxu0 %v54_v18 }
  0x1d   :  { %854 = vmatpush3.msra.mxu0 %v54_v18 }
  0x1e   :  { %855 = vmatprep.subr.mxu0 %v53_v19 }
  0x1f   :  { %856 = vmatpush3.msra.mxu0 %v53_v19 }
  0x20   :  { %857 = vmatprep.subr.mxu0 %v52_v20 }
  0x21   :  { %858 = vmatpush3.msra.mxu0 %v52_v20 }
  0x22   :  { %860 = vmatmul.mubr.f32.vlgmr.msra.gmra.mxu0 %v21_v21 }
  0x23   :  { %862 = vmatprep.mubr.f32.mxu0 %v22_v22 }
  0x26   :  { %863 = vmatmul.mubr.f32.gmra.mxu0 %v23_v23 }
  0x27   :  { %865 = vmatprep.mubr.f32.mxu0 %v24_v24 }
  0x2a   :  { %866 = vmatmul.mubr.f32.gmra.mxu0 %v25_v25 }
  0x2b   :  { %868 = vmatprep.mubr.f32.mxu0 %v26_v26 }
  0x2e   :  { %869 = vmatmul.mubr.f32.gmra.mxu0 %v27_v27 }
  0x2f   :  { %871 = vmatprep.mubr.f32.mxu0 %v28_v28 }
  0x32   :  { %872 = vmatmul.mubr.f32.gmra.mxu0 %v29_v29 }
  0x33   :  { %874 = vmatprep.mubr.f32.mxu0 %v30_v30 }
  0x36   :  { %875 = vmatmul.mubr.f32.gmra.mxu0 %v31_v31 }
  0x37   :  { %877 = vmatprep.mubr.f32.mxu0 %v32_v32 }
  0x3a   :  { %878 = vmatmul.mubr.f32.gmra.mxu0 %v33_v33 }
  0x3b   :  { %880 = vmatprep.mubr.f32.mxu0 %v34_v34 }
  0x3e   :  { %881 = vmatmul.mubr.f32.gmra.mxu0 %v35_v35 }
  0x3f   :  { %883 = vmatprep.mubr.f32.mxu0 %v36_v36 }
  0x42   :  { %884 = vmatmul.mubr.f32.gmra.mxu0 %v37_v37 }
  0x43   :  { %886 = vmatprep.mubr.f32.mxu0 %v38_v38 }
  0x46   :  { %887 = vmatmul.mubr.f32.gmra.mxu0 %v39_v39 }
  0x47   :  { %889 = vmatprep.mubr.f32.mxu0 %v40_v40 }
  0x4a   :  { %890 = vmatmul.mubr.f32.gmra.mxu0 %v41_v41 }
  0x4b   :  { %892 = vmatprep.mubr.f32.mxu0 %v42_v42 }
  0x4e   :  { %893 = vmatmul.mubr.f32.gmra.mxu0 %v43_v43 }
  0x4f   :  { %895 = vmatprep.mubr.f32.mxu0 %v44_v44 }
  0x52   :  { %896 = vmatmul.mubr.f32.gmra.mxu0 %v45_v45 }
  0x53   :  { %898 = vmatprep.mubr.f32.mxu0 %v46_v46 }
  0x56   :  { %899 = vmatmul.mubr.f32.gmra.mxu0 %v47_v47 }
  0x57   :  { %901 = vmatprep.mubr.f32.mxu0 %v48_v48 }
  0x5a   :  { %902 = vmatmul.mubr.f32.gmra.mxu0 %v49_v49 }
  0x5b   :  { %904 = vmatprep.mubr.f32.mxu0 %v50_v50 }
  0x5e   :  { %905 = vmatmul.mubr.f32.gmra.mxu0 %v51_v51 }
  0xe2   :  { %v861_v57 = vpop.f32.mrf.mxu0 }
  0xe3   :  { %v147_v58 = vadd.f32 %v861_v57, %v1172_v56 }
  0xe4   :  { %v141_v59 = vpop.f32.mrf.mxu0 }
  0xe5   :  { %v142_v60 = vadd.f32 %v1172_v56, %v141_v59  ;;  %v301_v63 = vmax.f32 %v147_v58, 0.0 }
  0xe6   :  { %v864_v61 = vpop.f32.mrf.mxu0 }
  0xe7   :  { %v300_v62 = vmax.f32 %v142_v60, 0.0  ;;  %v157_v0 = vadd.f32 %v864_v61, %v1172_v56 }
  0xe8   :  { %v151_v1 = vpop.f32.mrf.mxu0 }
  0xe9   :  { %v152_v2 = vadd.f32 %v1172_v56, %v151_v1  ;;  %923 = vmatprep.mubr.msk.f32.mxu1 %vm347_vm0, %v300_v62  ;;  %v303_v5 = vmax.f32 %v157_v0, 0.0 }
  0xea   :  { %v867_v3 = vpop.f32.mrf.mxu0  ;;  %924 = vmatmul.mubr.msk.f32.vlgmr.msra.gmra.mxu1 %vm347_vm0, %v301_v63 }
  0xeb   :  { %v302_v4 = vmax.f32 %v152_v2, 0.0  ;;  %v167_v6 = vadd.f32 %v867_v3, %v1172_v56 }
  0xec   :  { %v161_v7 = vpop.f32.mrf.mxu0 }
  0xed   :  { %v162_v8 = vadd.f32 %v1172_v56, %v161_v7  ;;  %926 = vmatprep.mubr.msk.f32.mxu1 %vm347_vm0, %v302_v4  ;;  %v305_v11 = vmax.f32 %v167_v6, 0.0 }
  0xee   :  { %v870_v9 = vpop.f32.mrf.mxu0  ;;  %927 = vmatmul.mubr.msk.f32.gmra.mxu1 %vm347_vm0, %v303_v5 }
  0xef   :  { %v304_v10 = vmax.f32 %v162_v8, 0.0  ;;  %v177_v12 = vadd.f32 %v870_v9, %v1172_v56 }
  0xf0   :  { %v171_v13 = vpop.f32.mrf.mxu0 }
  0xf1   :  { %v172_v14 = vadd.f32 %v1172_v56, %v171_v13  ;;  %929 = vmatprep.mubr.msk.f32.mxu1 %vm347_vm0, %v304_v10  ;;  %v307_v17 = vmax.f32 %v177_v12, 0.0 }
  0xf2   :  { %v873_v15 = vpop.f32.mrf.mxu0  ;;  %930 = vmatmul.mubr.msk.f32.gmra.mxu1 %vm347_vm0, %v305_v11 }
  0xf3   :  { %v306_v16 = vmax.f32 %v172_v14, 0.0  ;;  %v187_v18 = vadd.f32 %v873_v15, %v1172_v56 }
  0xf4   :  { %v181_v19 = vpop.f32.mrf.mxu0 }
  0xf5   :  { %v182_v20 = vadd.f32 %v1172_v56, %v181_v19  ;;  %932 = vmatprep.mubr.msk.f32.mxu1 %vm347_vm0, %v306_v16  ;;  %v309_v23 = vmax.f32 %v187_v18, 0.0 }
  0xf6   :  { %v876_v21 = vpop.f32.mrf.mxu0  ;;  %933 = vmatmul.mubr.msk.f32.gmra.mxu1 %vm347_vm0, %v307_v17 }
  0xf7   :  { %v308_v22 = vmax.f32 %v182_v20, 0.0  ;;  %v197_v24 = vadd.f32 %v876_v21, %v1172_v56 }
  0xf8   :  { %v191_v25 = vpop.f32.mrf.mxu0 }
  0xf9   :  { %v192_v26 = vadd.f32 %v1172_v56, %v191_v25  ;;  %935 = vmatprep.mubr.msk.f32.mxu1 %vm347_vm0, %v308_v22  ;;  %v311_v29 = vmax.f32 %v197_v24, 0.0 }
  0xfa   :  { %v879_v27 = vpop.f32.mrf.mxu0  ;;  %936 = vmatmul.mubr.msk.f32.gmra.mxu1 %vm347_vm0, %v309_v23 }
  0xfb   :  { %v310_v28 = vmax.f32 %v192_v26, 0.0  ;;  %v207_v30 = vadd.f32 %v879_v27, %v1172_v56  ;;  %v1241_v26 = vld [vmem:[%s1375_s4] ss:$0 sm:$0xff] }
  0xfc   :  { %v201_v31 = vpop.f32.mrf.mxu0 }
  0xfd   :  { %v202_v32 = vadd.f32 %v1172_v56, %v201_v31  ;;  %938 = vmatprep.mubr.msk.f32.mxu1 %vm347_vm0, %v310_v28  ;;  %v313_v35 = vmax.f32 %v207_v30, 0.0 }
  0xfe   :  { %v882_v33 = vpop.f32.mrf.mxu0  ;;  %939 = vmatmul.mubr.msk.f32.gmra.mxu1 %vm347_vm0, %v311_v29 }
  0xff   :  { %v312_v34 = vmax.f32 %v202_v32, 0.0  ;;  %v217_v36 = vadd.f32 %v882_v33, %v1172_v56 }
 0x100   :  { %v211_v37 = vpop.f32.mrf.mxu0 }
 0x101   :  { %v212_v38 = vadd.f32 %v1172_v56, %v211_v37  ;;  %941 = vmatprep.mubr.msk.f32.mxu1 %vm347_vm0, %v312_v34  ;;  %v315_v41 = vmax.f32 %v217_v36, 0.0 }
 0x102   :  { %v885_v39 = vpop.f32.mrf.mxu0  ;;  %942 = vmatmul.mubr.msk.f32.gmra.mxu1 %vm347_vm0, %v313_v35 }
 0x103   :  { %v314_v40 = vmax.f32 %v212_v38, 0.0  ;;  %v227_v42 = vadd.f32 %v885_v39, %v1172_v56 }
 0x104   :  { %v221_v43 = vpop.f32.mrf.mxu0 }
 0x105   :  { %v222_v44 = vadd.f32 %v1172_v56, %v221_v43  ;;  %944 = vmatprep.mubr.msk.f32.mxu1 %vm347_vm0, %v314_v40  ;;  %v317_v47 = vmax.f32 %v227_v42, 0.0 }
 0x106   :  { %v888_v45 = vpop.f32.mrf.mxu0  ;;  %945 = vmatmul.mubr.msk.f32.gmra.mxu1 %vm347_vm0, %v315_v41 }
 0x107   :  { %v316_v46 = vmax.f32 %v222_v44, 0.0  ;;  %v237_v48 = vadd.f32 %v888_v45, %v1172_v56 }
 0x108   :  { %v231_v49 = vpop.f32.mrf.mxu0 }
 0x109   :  { %v232_v50 = vadd.f32 %v1172_v56, %v231_v49  ;;  %947 = vmatprep.mubr.msk.f32.mxu1 %vm347_vm0, %v316_v46  ;;  %v319_v53 = vmax.f32 %v237_v48, 0.0 }
 0x10a   :  { %v891_v51 = vpop.f32.mrf.mxu0  ;;  %948 = vmatmul.mubr.msk.f32.gmra.mxu1 %vm347_vm0, %v317_v47 }
 0x10b   :  { %v318_v52 = vmax.f32 %v232_v50, 0.0  ;;  %v247_v54 = vadd.f32 %v891_v51, %v1172_v56 }
 0x10c   :  { %v241_v55 = vpop.f32.mrf.mxu0 }
 0x10d   :  { %v242_v57 = vadd.f32 %v1172_v56, %v241_v55  ;;  %950 = vmatprep.mubr.msk.f32.mxu1 %vm347_vm0, %v318_v52  ;;  %v321_v60 = vmax.f32 %v247_v54, 0.0 }
 0x10e   :  { %v894_v58 = vpop.f32.mrf.mxu0  ;;  %951 = vmatmul.mubr.msk.f32.gmra.mxu1 %vm347_vm0, %v319_v53 }
 0x10f   :  { %v320_v59 = vmax.f32 %v242_v57, 0.0  ;;  %v257_v61 = vadd.f32 %v894_v58, %v1172_v56 }
 0x110   :  { %v251_v62 = vpop.f32.mrf.mxu0 }
 0x111   :  { %v252_v63 = vadd.f32 %v1172_v56, %v251_v62  ;;  %953 = vmatprep.mubr.msk.f32.mxu1 %vm347_vm0, %v320_v59  ;;  %v323_v2 = vmax.f32 %v257_v61, 0.0 }
 0x112   :  { %v897_v0 = vpop.f32.mrf.mxu0  ;;  %954 = vmatmul.mubr.msk.f32.gmra.mxu1 %vm347_vm0, %v321_v60 }
 0x113   :  { %v322_v1 = vmax.f32 %v252_v63, 0.0  ;;  %v267_v3 = vadd.f32 %v897_v0, %v1172_v56 }
 0x114   :  { %v261_v4 = vpop.f32.mrf.mxu0 }
 0x115   :  { %v262_v5 = vadd.f32 %v1172_v56, %v261_v4  ;;  %956 = vmatprep.mubr.msk.f32.mxu1 %vm347_vm0, %v322_v1  ;;  %v325_v8 = vmax.f32 %v267_v3, 0.0 }
 0x116   :  { %v900_v6 = vpop.f32.mrf.mxu0  ;;  %957 = vmatmul.mubr.msk.f32.gmra.mxu1 %vm347_vm0, %v323_v2 }
 0x117   :  { %v324_v7 = vmax.f32 %v262_v5, 0.0  ;;  %v277_v9 = vadd.f32 %v900_v6, %v1172_v56 }
 0x118   :  { %v271_v10 = vpop.f32.mrf.mxu0 }
 0x119   :  { %v272_v11 = vadd.f32 %v1172_v56, %v271_v10  ;;  %959 = vmatprep.mubr.msk.f32.mxu1 %vm347_vm0, %v324_v7  ;;  %v327_v14 = vmax.f32 %v277_v9, 0.0 }
 0x11a   :  { %v903_v12 = vpop.f32.mrf.mxu0  ;;  %960 = vmatmul.mubr.msk.f32.gmra.mxu1 %vm347_vm0, %v325_v8 }
 0x11b   :  { %v326_v13 = vmax.f32 %v272_v11, 0.0  ;;  %v287_v15 = vadd.f32 %v903_v12, %v1172_v56 }
 0x11c   :  { %v281_v16 = vpop.f32.mrf.mxu0 }
 0x11d   :  { %v282_v17 = vadd.f32 %v1172_v56, %v281_v16  ;;  %962 = vmatprep.mubr.msk.f32.mxu1 %vm347_vm0, %v326_v13  ;;  %v329_v20 = vmax.f32 %v287_v15, 0.0 }
 0x11e   :  { %v906_v18 = vpop.f32.mrf.mxu0  ;;  %963 = vmatmul.mubr.msk.f32.gmra.mxu1 %vm347_vm0, %v327_v14 }
 0x11f   :  { %v328_v19 = vmax.f32 %v282_v17, 0.0  ;;  %v297_v21 = vadd.f32 %v906_v18, %v1172_v56 }
 0x120   :  { %v291_v22 = vpop.f32.mrf.mxu0 }
 0x121   :  { %v292_v23 = vadd.f32 %v1172_v56, %v291_v22  ;;  %965 = vmatprep.mubr.msk.f32.mxu1 %vm347_vm0, %v328_v19  ;;  %v331_v25 = vmax.f32 %v297_v21, 0.0 }
 0x122   :  { %966 = vmatmul.mubr.msk.f32.gmra.mxu1 %vm347_vm0, %v329_v20 }
 0x123   :  { %v330_v24 = vmax.f32 %v292_v23, 0.0 }
 0x125   :  { %968 = vmatprep.mubr.msk.f32.mxu1 %vm347_vm0, %v330_v24 }
 0x126   :  { %969 = vmatmul.mubr.msk.f32.gmra.mxu1 %vm347_vm0, %v331_v25 }
 0x1aa   :  { %v925_v27 = vpop.f32.mrf.mxu1 }
 0x1ab   :  { %v516_v28 = vadd.f32 %v925_v27, %v1241_v26 }
 0x1ac   :  { %v510_v29 = vpop.f32.mrf.mxu1 }
 0x1ad   :  { %670 = vst [vmem:[%s1376_s5 + $0x8] sm:$0xff] %v516_v28  ;;  %v511_v56 = vadd.f32 %v1241_v26, %v510_v29 }
 0x1ae   :  { %v928_v30 = vpop.f32.mrf.mxu1 }
 0x1af   :  { %669 = vst [vmem:[%s1376_s5] sm:$0xff] %v511_v56  ;;  %v526_v31 = vadd.f32 %v928_v30, %v1241_v26 }
 0x1b0   :  { %v520_v32 = vpop.f32.mrf.mxu1 }
 0x1b1   :  { %672 = vst [vmem:[%s1376_s5 + $0x18] sm:$0xff] %v526_v31  ;;  %v521_v33 = vadd.f32 %v1241_v26, %v520_v32 }
 0x1b2   :  { %v931_v34 = vpop.f32.mrf.mxu1 }
 0x1b3   :  { %671 = vst [vmem:[%s1376_s5 + $0x10] sm:$0xff] %v521_v33  ;;  %v536_v35 = vadd.f32 %v931_v34, %v1241_v26 }
 0x1b4   :  { %v530_v36 = vpop.f32.mrf.mxu1 }
 0x1b5   :  { %674 = vst [vmem:[%s1376_s5 + $0x28] sm:$0xff] %v536_v35  ;;  %v531_v37 = vadd.f32 %v1241_v26, %v530_v36 }
 0x1b6   :  { %v934_v38 = vpop.f32.mrf.mxu1 }
 0x1b7   :  { %673 = vst [vmem:[%s1376_s5 + $0x20] sm:$0xff] %v531_v37  ;;  %v546_v39 = vadd.f32 %v934_v38, %v1241_v26 }
 0x1b8   :  { %v540_v40 = vpop.f32.mrf.mxu1 }
 0x1b9   :  { %676 = vst [vmem:[%s1376_s5 + $0x38] sm:$0xff] %v546_v39  ;;  %v541_v41 = vadd.f32 %v1241_v26, %v540_v40 }
 0x1ba   :  { %v937_v42 = vpop.f32.mrf.mxu1 }
 0x1bb   :  { %675 = vst [vmem:[%s1376_s5 + $0x30] sm:$0xff] %v541_v41  ;;  %v556_v43 = vadd.f32 %v937_v42, %v1241_v26 }
 0x1bc   :  { %v550_v44 = vpop.f32.mrf.mxu1 }
 0x1bd   :  { %678 = vst [vmem:[%s1376_s5 + $0x48] sm:$0xff] %v556_v43  ;;  %v551_v45 = vadd.f32 %v1241_v26, %v550_v44 }
 0x1be   :  { %v940_v46 = vpop.f32.mrf.mxu1 }
 0x1bf   :  { %677 = vst [vmem:[%s1376_s5 + $0x40] sm:$0xff] %v551_v45  ;;  %v566_v47 = vadd.f32 %v940_v46, %v1241_v26 }
 0x1c0   :  { %v560_v48 = vpop.f32.mrf.mxu1 }
 0x1c1   :  { %680 = vst [vmem:[%s1376_s5 + $0x58] sm:$0xff] %v566_v47  ;;  %v561_v49 = vadd.f32 %v1241_v26, %v560_v48 }
 0x1c2   :  { %v943_v50 = vpop.f32.mrf.mxu1 }
 0x1c3   :  { %679 = vst [vmem:[%s1376_s5 + $0x50] sm:$0xff] %v561_v49  ;;  %v576_v51 = vadd.f32 %v943_v50, %v1241_v26 }
 0x1c4   :  { %v570_v52 = vpop.f32.mrf.mxu1 }
 0x1c5   :  { %682 = vst [vmem:[%s1376_s5 + $0x68] sm:$0xff] %v576_v51  ;;  %v571_v53 = vadd.f32 %v1241_v26, %v570_v52 }
 0x1c6   :  { %v946_v54 = vpop.f32.mrf.mxu1 }
 0x1c7   :  { %681 = vst [vmem:[%s1376_s5 + $0x60] sm:$0xff] %v571_v53  ;;  %v586_v55 = vadd.f32 %v946_v54, %v1241_v26 }
 0x1c8   :  { %v580_v57 = vpop.f32.mrf.mxu1 }
 0x1c9   :  { %684 = vst [vmem:[%s1376_s5 + $0x78] sm:$0xff] %v586_v55  ;;  %v581_v58 = vadd.f32 %v1241_v26, %v580_v57 }
 0x1ca   :  { %v949_v59 = vpop.f32.mrf.mxu1 }
 0x1cb   :  { %683 = vst [vmem:[%s1376_s5 + $0x70] sm:$0xff] %v581_v58  ;;  %v596_v60 = vadd.f32 %v949_v59, %v1241_v26 }
 0x1cc   :  { %v590_v61 = vpop.f32.mrf.mxu1 }
 0x1cd   :  { %686 = vst [vmem:[%s1376_s5 + $0x88] sm:$0xff] %v596_v60  ;;  %v591_v62 = vadd.f32 %v1241_v26, %v590_v61 }
 0x1ce   :  { %v952_v63 = vpop.f32.mrf.mxu1 }
 0x1cf   :  { %685 = vst [vmem:[%s1376_s5 + $0x80] sm:$0xff] %v591_v62  ;;  %v606_v0 = vadd.f32 %v952_v63, %v1241_v26 }
 0x1d0   :  { %v600_v1 = vpop.f32.mrf.mxu1 }
 0x1d1   :  { %688 = vst [vmem:[%s1376_s5 + $0x98] sm:$0xff] %v606_v0  ;;  %v601_v2 = vadd.f32 %v1241_v26, %v600_v1 }
 0x1d2   :  { %v955_v3 = vpop.f32.mrf.mxu1 }
 0x1d3   :  { %687 = vst [vmem:[%s1376_s5 + $0x90] sm:$0xff] %v601_v2  ;;  %v616_v4 = vadd.f32 %v955_v3, %v1241_v26 }
 0x1d4   :  { %v610_v5 = vpop.f32.mrf.mxu1 }
 0x1d5   :  { %690 = vst [vmem:[%s1376_s5 + $0xa8] sm:$0xff] %v616_v4  ;;  %v611_v6 = vadd.f32 %v1241_v26, %v610_v5 }
 0x1d6   :  { %v958_v7 = vpop.f32.mrf.mxu1 }
 0x1d7   :  { %689 = vst [vmem:[%s1376_s5 + $0xa0] sm:$0xff] %v611_v6  ;;  %v626_v8 = vadd.f32 %v958_v7, %v1241_v26 }
 0x1d8   :  { %v620_v9 = vpop.f32.mrf.mxu1 }
 0x1d9   :  { %692 = vst [vmem:[%s1376_s5 + $0xb8] sm:$0xff] %v626_v8  ;;  %v621_v10 = vadd.f32 %v1241_v26, %v620_v9 }
 0x1da   :  { %v961_v11 = vpop.f32.mrf.mxu1 }
 0x1db   :  { %691 = vst [vmem:[%s1376_s5 + $0xb0] sm:$0xff] %v621_v10  ;;  %v636_v12 = vadd.f32 %v961_v11, %v1241_v26 }
 0x1dc   :  { %v630_v13 = vpop.f32.mrf.mxu1 }
 0x1dd   :  { %694 = vst [vmem:[%s1376_s5 + $0xc8] sm:$0xff] %v636_v12  ;;  %v631_v14 = vadd.f32 %v1241_v26, %v630_v13 }
 0x1de   :  { %v964_v15 = vpop.f32.mrf.mxu1 }
 0x1df   :  { %693 = vst [vmem:[%s1376_s5 + $0xc0] sm:$0xff] %v631_v14  ;;  %v646_v16 = vadd.f32 %v964_v15, %v1241_v26 }
 0x1e0   :  { %v640_v17 = vpop.f32.mrf.mxu1 }
 0x1e1   :  { %696 = vst [vmem:[%s1376_s5 + $0xd8] sm:$0xff] %v646_v16  ;;  %v641_v18 = vadd.f32 %v1241_v26, %v640_v17 }
 0x1e2   :  { %v967_v19 = vpop.f32.mrf.mxu1 }
 0x1e3   :  { %695 = vst [vmem:[%s1376_s5 + $0xd0] sm:$0xff] %v641_v18  ;;  %v656_v20 = vadd.f32 %v967_v19, %v1241_v26 }
 0x1e4   :  { %v650_v21 = vpop.f32.mrf.mxu1 }
 0x1e5   :  { %698 = vst [vmem:[%s1376_s5 + $0xe8] sm:$0xff] %v656_v20  ;;  %v651_v22 = vadd.f32 %v1241_v26, %v650_v21 }
 0x1e6   :  { %v970_v23 = vpop.f32.mrf.mxu1 }
 0x1e7   :  { %697 = vst [vmem:[%s1376_s5 + $0xe0] sm:$0xff] %v651_v22  ;;  %v666_v24 = vadd.f32 %v970_v23, %v1241_v26 }
 0x1e8   :  { %v660_v25 = vpop.f32.mrf.mxu1 }
 0x1e9   :  { %700 = vst [vmem:[%s1376_s5 + $0xf8] sm:$0xff] %v666_v24  ;;  %v661_v27 = vadd.f32 %v1241_v26, %v660_v25 }
 0x1eb   :  { %699 = vst [vmem:[%s1376_s5 + $0xf0] sm:$0xff] %v661_v27 }

// kernel: drbc_forward.6
= control target key start
LH: loop header
LB: loop body
LE: loop exit
PB: predicated region body
PF: predicated region fallthrough
CT: control target
= control target key end

     0   :  { %v5753_v1 = vmov 0   ;;  %s5743_s1 = inlined_call_operand.vmem [shape: bf16[256,128], index: 1, kind: input, shape index: {}]   ;;  %s5744_s0 = inlined_call_operand.vmem [shape: bf16[256,256], index: 0, kind: input, shape index: {}]   ;;  %s5745_s3 = inlined_call_operand.vmem [shape: bf16[128,384], index: 3, kind: input, shape index: {}]   ;;  %s5746_s4 = inlined_call_operand.vmem [shape: bf16[128,384], index: 4, kind: input, shape index: {}]   ;;  %s5747_s5 = inlined_call_operand.vmem [shape: f32[1,384], index: 5, kind: input, shape index: {}]   ;;  %s5748_s6 = inlined_call_operand.vmem [shape: f32[1,128], index: 6, kind: input, shape index: {}]   ;;  %s5749_s2 = inlined_call_operand.vmem [shape: f32[256,128], index: 2, kind: input, shape index: {}]   ;;  %s5750_s8 = inlined_call_operand.vmem [shape: f32[256,128], index: 8, kind: output, shape index: {1}]   ;;  %s5751_s7 = inlined_call_operand.vmem [shape: bf16[256,128], index: 7, kind: output, shape index: {0}]  }
   0x1   :  { %v3466_v0 = vld [vmem:[%s5743_s1 + $0x78] sm:$0xff]   ;;  %852 = vmatprep.mubr.bf16.mxu1 %v5753_v1  ;;  %v3468_v3 = vld [vmem:[%s5743_s1 + $0x70] sm:$0xff]   ;;  %v3470_v5 = vld [vmem:[%s5743_s1 + $0x68] sm:$0xff]  }
   0x2   :  { %v3467_v2 = vld [vmem:[%s5743_s1 + $0x38] sm:$0xff]   ;;  %3209 = vmatprep.subr.bf16.mxu0 %v3466_v0  ;;  %v3469_v4 = vld [vmem:[%s5743_s1 + $0x30] sm:$0xff]   ;;  %v3471_v6 = vld [vmem:[%s5743_s1 + $0x28] sm:$0xff]  }
   0x3   :  { %3210 = vmatpush3.bf16.msra.mxu0 %v3467_v2  ;;  %v3472_v7 = vld [vmem:[%s5743_s1 + $0x60] sm:$0xff]   ;;  %v3474_v9 = vld [vmem:[%s5743_s1 + $0x58] sm:$0xff]   ;;  %v3476_v11 = vld [vmem:[%s5743_s1 + $0x50] sm:$0xff]  }
   0x4   :  { %3211 = vmatprep.subr.bf16.mxu0 %v3468_v3  ;;  %v3473_v8 = vld [vmem:[%s5743_s1 + $0x20] sm:$0xff]   ;;  %v3475_v10 = vld [vmem:[%s5743_s1 + $0x18] sm:$0xff]   ;;  %v3477_v13 = vld [vmem:[%s5743_s1 + $0x10] sm:$0xff]  }
   0x5   :  { %v3484_v12 = vld [vmem:[%s5744_s0 + $0x4] ss:$8 sps:$4 sm:$0xff]   ;;  %v3499_v17 = vld [vmem:[%s5745_s3 + $0xa8] ss:$12 sps:$4 sm:$0xff]   ;;  %v3505_v20 = vld [vmem:[%s5745_s3 + $0x90] ss:$12 sps:$4 sm:$0xff]  }
   0x6   :  { %381 = vmatprep.mubr.bf16.mxu0 %v3484_v12  ;;  %v3478_v14 = vld [vmem:[%s5743_s1 + $0x48] sm:$0xff]   ;;  %v3480_v18 = vld [vmem:[%s5743_s1 + $0x40] sm:$0xff]   ;;  %v3485_v25 = vld [vmem:[%s5744_s0 + $0x14] ss:$8 sps:$4 sm:$0xff]  }
   0x7   :  { %3212 = vmatpush3.bf16.msra.mxu0 %v3469_v4  ;;  %v3479_v15 = vld [vmem:[%s5743_s1 + $0x8] sm:$0xff]   ;;  %v3503_v19 = vld [vmem:[%s5745_s3 + $0x94] ss:$12 sps:$4 sm:$0xff]   ;;  %v3508_v24 = vld [vmem:[%s5745_s3 + $0x78] ss:$12 sps:$4 sm:$0xff]  }
   0x8   :  { %3213 = vmatprep.subr.bf16.mxu0 %v3470_v5  ;;  %v3497_v16 = vld [vmem:[%s5745_s3 + $0xac] ss:$12 sps:$4 sm:$0xff]   ;;  %v3481_v21 = vld [vmem:[%s5743_s1] sm:$0xff]   ;;  %v3506_v22 = vld [vmem:[%s5745_s3 + $0x7c] ss:$12 sps:$4 sm:$0xff]  }
   0x9   :  { %820 = vmatprep.subr.bf16.mxu1 %v3497_v16  ;;  %v3482_v23 = vld [vmem:[%s5744_s0] ss:$8 sps:$4 sm:$0xff]   ;;  %v3512_v26 = vld [vmem:[%s5745_s3 + $0x64] ss:$12 sps:$4 sm:$0xff]   ;;  %v3515_v28 = vld [vmem:[%s5745_s3 + $0x4c] ss:$12 sps:$4 sm:$0xff]  }
   0xa   :  { %821 = vmatpush1.bf16.msra.mxu1 %v3499_v17  ;;  %v3514_v27 = vld [vmem:[%s5745_s3 + $0x60] ss:$12 sps:$4 sm:$0xff]   ;;  %v3487_v29 = vld [vmem:[%s5744_s0 + $0x10] ss:$8 sps:$4 sm:$0xff]   ;;  %v3517_v31 = vld [vmem:[%s5745_s3 + $0x48] ss:$12 sps:$4 sm:$0xff]  }
   0xb   :  { %3214 = vmatpush3.bf16.msra.mxu0 %v3471_v6  ;;  %822 = vmatprep.subr.bf16.mxu1 %v3503_v19  ;;  %v3488_v30 = vld [vmem:[%s5744_s0 + $0x24] ss:$8 sps:$4 sm:$0xff]   ;;  %v3521_v32 = vld [vmem:[%s5745_s3 + $0x34] ss:$12 sps:$4 sm:$0xff]   ;;  %v3523_v33 = vld [vmem:[%s5745_s3 + $0x30] ss:$12 sps:$4 sm:$0xff]  }
   0xc   :  { %3215 = vmatprep.subr.bf16.mxu0 %v3472_v7  ;;  %v3524_v34 = vld [vmem:[%s5745_s3 + $0x1c] ss:$12 sps:$4 sm:$0xff]   ;;  %v3526_v37 = vld [vmem:[%s5745_s3 + $0x18] ss:$12 sps:$4 sm:$0xff]   ;;  %v3532_v39 = vld [vmem:[%s5745_s3] ss:$12 sps:$4 sm:$0xff]  }
   0xd   :  { %v3490_v35 = vld [vmem:[%s5744_s0 + $0x20] ss:$8 sps:$4 sm:$0xff]   ;;  %v3491_v36 = vld [vmem:[%s5744_s0 + $0x34] ss:$8 sps:$4 sm:$0xff]   ;;  %v3530_v38 = vld [vmem:[%s5745_s3 + $0x4] ss:$12 sps:$4 sm:$0xff]  }
   0xe   :  { %823 = vmatpush1.bf16.msra.mxu1 %v3505_v20  ;;  %v3539_v40 = vld [vmem:[%s5746_s4 + $0xac] ss:$12 sps:$4 sm:$0xff]   ;;  %v3555_v41 = vld [vmem:[%s5745_s3 + $0xb0] ss:$12 sps:$4 sm:$0xff]   ;;  %v4171_v43 = vld [vmem:[%s5743_s1] sm:$0xff]  }
   0xf   :  { %3216 = vmatpush3.bf16.msra.mxu0 %v3473_v8  ;;  %824 = vmatprep.subr.bf16.mxu1 %v3506_v22  ;;  %v3493_v42 = vld [vmem:[%s5744_s0 + $0x30] ss:$8 sps:$4 sm:$0xff]   ;;  %v3537_v44 = vld [vmem:[%s5746_s4 + $0xa8] ss:$12 sps:$4 sm:$0xff]   ;;  %v3494_v45 = vld [vmem:[%s5744_s0 + $0x44] ss:$8 sps:$4 sm:$0xff]  }
  0x10   :  { %3217 = vmatprep.subr.bf16.mxu0 %v3474_v9  ;;  %v3550_v46 = vld [vmem:[%s5746_s4 + $0x94] ss:$12 sps:$4 sm:$0xff]   ;;  %v3548_v47 = vld [vmem:[%s5746_s4 + $0x90] ss:$12 sps:$4 sm:$0xff]   ;;  %v3567_v48 = vld [vmem:[%s5745_s3 + $0x98] ss:$12 sps:$4 sm:$0xff]  }
  0x11   :  { %v3562_v49 = vld [vmem:[%s5746_s4 + $0x7c] ss:$12 sps:$4 sm:$0xff]   ;;  %v3572_v52 = vld [vmem:[%s5745_s3 + $0x80] ss:$12 sps:$4 sm:$0xff]   ;;  %v3560_v54 = vld [vmem:[%s5746_s4 + $0x78] ss:$12 sps:$4 sm:$0xff]  }
  0x12   :  { %825 = vmatpush1.bf16.msra.mxu1 %v3508_v24  ;;  %v3496_v50 = vld [vmem:[%s5744_s0 + $0x40] ss:$8 sps:$4 sm:$0xff]   ;;  %v3500_v53 = vld [vmem:[%s5744_s0 + $0x54] ss:$8 sps:$4 sm:$0xff]   ;;  %v3575_v55 = vld [vmem:[%s5746_s4 + $0x64] ss:$12 sps:$4 sm:$0xff]  }
  0x13   :  { %3218 = vmatpush3.bf16.msra.mxu0 %v3475_v10  ;;  %826 = vmatprep.subr.bf16.mxu1 %v3512_v26  ;;  %v4199_v51 = vld [vmem:[%s5743_s1 + $0x8] sm:$0xff]   ;;  %v3578_v57 = vld [vmem:[%s5745_s3 + $0x50] ss:$12 sps:$4 sm:$0xff]   ;;  %v3580_v63 = vld [vmem:[%s5745_s3 + $0x38] ss:$12 sps:$4 sm:$0xff]  }
  0x14   :  { %3219 = vmatprep.subr.bf16.mxu0 %v3476_v11  ;;  %v3577_v56 = vld [vmem:[%s5745_s3 + $0x68] ss:$12 sps:$4 sm:$0xff]   ;;  %v3573_v58 = vld [vmem:[%s5746_s4 + $0x60] ss:$12 sps:$4 sm:$0xff]   ;;  %v3502_v59 = vld [vmem:[%s5744_s0 + $0x50] ss:$8 sps:$4 sm:$0xff]  }
  0x15   :  { %v4230_v60 = vld [vmem:[%s5743_s1 + $0x10] sm:$0xff]   ;;  %v3509_v61 = vld [vmem:[%s5744_s0 + $0x64] ss:$8 sps:$4 sm:$0xff]   ;;  %v3511_v4 = vld [vmem:[%s5744_s0 + $0x60] ss:$8 sps:$4 sm:$0xff]  }
  0x16   :  { %827 = vmatpush1.bf16.msra.mxu1 %v3514_v27  ;;  %v3584_v62 = vld [vmem:[%s5746_s4 + $0x4c] ss:$12 sps:$4 sm:$0xff]   ;;  %v3582_v0 = vld [vmem:[%s5746_s4 + $0x48] ss:$12 sps:$4 sm:$0xff]   ;;  %v3588_v5 = vld [vmem:[%s5746_s4 + $0x30] ss:$12 sps:$4 sm:$0xff]  }
  0x17   :  { %3220 = vmatpush3.bf16.msra.mxu0 %v3477_v13  ;;  %828 = vmatprep.subr.bf16.mxu1 %v3515_v28  ;;  %v3581_v2 = vld [vmem:[%s5745_s3 + $0x20] ss:$12 sps:$4 sm:$0xff]   ;;  %v4261_v6 = vld [vmem:[%s5743_s1 + $0x18] sm:$0xff]   ;;  %v3586_v8 = vld [vmem:[%s5745_s3 + $0x8] ss:$12 sps:$4 sm:$0xff]  }
  0x18   :  { %3221 = vmatprep.subr.bf16.mxu0 %v3478_v14  ;;  %v3590_v3 = vld [vmem:[%s5746_s4 + $0x34] ss:$12 sps:$4 sm:$0xff]   ;;  %v3595_v9 = vld [vmem:[%s5746_s4 + $0x1c] ss:$12 sps:$4 sm:$0xff]   ;;  %v3593_v10 = vld [vmem:[%s5746_s4 + $0x18] ss:$12 sps:$4 sm:$0xff]  }
  0x19   :  { %v3518_v7 = vld [vmem:[%s5744_s0 + $0x74] ss:$8 sps:$4 sm:$0xff]   ;;  %v3602_v12 = vld [vmem:[%s5746_s4 + $0x4] ss:$12 sps:$4 sm:$0xff]   ;;  %v3600_v16 = vld [vmem:[%s5746_s4] ss:$12 sps:$4 sm:$0xff]  }
  0x1a   :  { %829 = vmatpush1.bf16.msra.mxu1 %v3517_v31  ;;  %v4280_v11 = vld [vmem:[%s5746_s4 + $0xb0] ss:$12 sps:$4 sm:$0xff]   ;;  %v3527_v14 = vld [vmem:[%s5744_s0 + $0x84] ss:$8 sps:$4 sm:$0xff]   ;;  %v3543_v24 = vld [vmem:[%s5744_s0 + $0xa0] ss:$8 sps:$4 sm:$0xff]  }
  0x1b   :  { %3222 = vmatpush3.bf16.msra.mxu0 %v3479_v15  ;;  %830 = vmatprep.subr.bf16.mxu1 %v3521_v32  ;;  %v3520_v13 = vld [vmem:[%s5744_s0 + $0x70] ss:$8 sps:$4 sm:$0xff]   ;;  %v4294_v15 = vld [vmem:[%s5743_s1 + $0x20] sm:$0xff]   ;;  %v4305_v17 = vld [vmem:[%s5743_s1 + $0x28] sm:$0xff]  }
  0x1c   :  { %3223 = vmatprep.subr.bf16.mxu0 %v3480_v18  ;;  %v3529_v18 = vld [vmem:[%s5744_s0 + $0x80] ss:$8 sps:$4 sm:$0xff]   ;;  %v3534_v19 = vld [vmem:[%s5744_s0 + $0x94] ss:$8 sps:$4 sm:$0xff]   ;;  %v3541_v22 = vld [vmem:[%s5744_s0 + $0xa4] ss:$8 sps:$4 sm:$0xff]  }
  0x1d   :  { %v4318_v20 = vld [vmem:[%s5743_s1 + $0x30] sm:$0xff]   ;;  %v4344_v26 = vld [vmem:[%s5743_s1 + $0x40] sm:$0xff]  }
  0x1e   :  { %831 = vmatpush1.bf16.msra.mxu1 %v3523_v33  ;;  %v3547_v27 = vld [vmem:[%s5744_s0 + $0xb0] ss:$8 sps:$4 sm:$0xff]   ;;  %v3552_v28 = vld [vmem:[%s5744_s0 + $0xc4] ss:$8 sps:$4 sm:$0xff]   ;;  %v3557_v31 = vld [vmem:[%s5744_s0 + $0xd4] ss:$8 sps:$4 sm:$0xff]  }
  0x1f   :  { %3224 = vmatpush3.bf16.msra.mxu0 %v3481_v21  ;;  %832 = vmatprep.subr.bf16.mxu1 %v3524_v34  ;;  %v3536_v21 = vld [vmem:[%s5744_s0 + $0x90] ss:$8 sps:$4 sm:$0xff]   ;;  %v3564_v34 = vld [vmem:[%s5744_s0 + $0xe4] ss:$8 sps:$4 sm:$0xff]  }
  0x20   :  { %3369 = vmatprep.subr.bf16.mxu0 %v3555_v41  ;;  %v3587_v32 = vld [vmem:[%s5743_s1 + $0x50] sm:$0xff]  }
  0x21   :  { %v3559_v33 = vld [vmem:[%s5744_s0 + $0xd0] ss:$8 sps:$4 sm:$0xff]  }
  0x22   :  { %382 = vmatmul.mubr.bf16.vlgmr.msra.gmra.mxu0 %v3482_v23  ;;  %833 = vmatpush1.bf16.msra.mxu1 %v3526_v37  ;;  %v4331_v23 = vld [vmem:[%s5743_s1 + $0x38] sm:$0xff]  }
  0x23   :  { %389 = vmatprep.mubr.bf16.mxu0 %v3485_v25  ;;  %834 = vmatprep.subr.bf16.mxu1 %v3530_v38  ;;  %v3545_v25 = vld [vmem:[%s5744_s0 + $0xb4] ss:$8 sps:$4 sm:$0xff]   ;;  %v3592_v38 = vld [vmem:[%s5743_s1 + $0x60] sm:$0xff]  }
  0x24   :  { %3370 = vmatpush3.bf16.msra.mxu0 %v3555_v41  ;;  %v3569_v37 = vld [vmem:[%s5744_s0 + $0xf4] ss:$8 sps:$4 sm:$0xff]   ;;  %v3599_v41 = vld [vmem:[%s5746_s4 + $0x98] ss:$12 sps:$4 sm:$0xff]  }
  0x25   :  { %3371 = vmatprep.subr.bf16.mxu0 %v3567_v48 }
  0x26   :  { %835 = vmatpush1.bf16.msra.mxu1 %v3532_v39  ;;  %v3571_v39 = vld [vmem:[%s5744_s0 + $0xf0] ss:$8 sps:$4 sm:$0xff]  }
  0x27   :  { %1350 = vmatprep.subr.bf16.mxu1 %v3539_v40  ;;  %v3596_v40 = vld [vmem:[%s5743_s1 + $0x68] sm:$0xff]  }
  0x28   :  { %3372 = vmatpush3.bf16.msra.mxu0 %v3567_v48  ;;  %v3608_v48 = vld [vmem:[%s5746_s4 + $0x20] ss:$12 sps:$4 sm:$0xff]  }
  0x29   :  { %853 = vmatmul.mubr.bf16.vlgmr.msra.gmra.mxu1 %v4171_v43  ;;  %3373 = vmatprep.subr.bf16.mxu0 %v3572_v52 }
  0x2a   :  { %390 = vmatmul.mubr.bf16.gmra.mxu0 %v3487_v29  ;;  %1351 = vmatpush1.bf16.msra.mxu1 %v3537_v44  ;;  %v4357_v29 = vld [vmem:[%s5743_s1 + $0x48] sm:$0xff]  }
  0x2b   :  { %397 = vmatprep.mubr.bf16.mxu0 %v3488_v30  ;;  %862 = vmatprep.mubr.bf16.mxu1 %v5753_v1  ;;  %v3554_v30 = vld [vmem:[%s5744_s0 + $0xc0] ss:$8 sps:$4 sm:$0xff]  }
  0x2c   :  { %1352 = vmatprep.subr.bf16.mxu1 %v3550_v46  ;;  %3374 = vmatpush3.bf16.msra.mxu0 %v3572_v52  ;;  %v3605_v44 = vld [vmem:[%s5746_s4 + $0x68] ss:$12 sps:$4 sm:$0xff]   ;;  %v3604_v46 = vld [vmem:[%s5743_s1 + $0x78] sm:$0xff]  }
  0x2d   :  { %3375 = vmatprep.subr.bf16.mxu0 %v3577_v56 }
  0x2e   :  { %1353 = vmatpush1.bf16.msra.mxu1 %v3548_v47  ;;  %v3607_v47 = vld [vmem:[%s5746_s4 + $0x38] ss:$12 sps:$4 sm:$0xff]  }
  0x2f   :  { %1354 = vmatprep.subr.bf16.mxu1 %v3562_v49  ;;  %v3609_v49 = vld [vmem:[%s5746_s4 + $0x8] ss:$12 sps:$4 sm:$0xff]  }
  0x30   :  { %3376 = vmatpush3.bf16.msra.mxu0 %v3577_v56 }
  0x31   :  { %863 = vmatmul.mubr.bf16.gmra.mxu1 %v4199_v51  ;;  %3377 = vmatprep.subr.bf16.mxu0 %v3578_v57 }
  0x32   :  { %398 = vmatmul.mubr.bf16.gmra.mxu0 %v3490_v35  ;;  %872 = vmatprep.mubr.bf16.mxu1 %v5753_v1  ;;  %v3591_v35 = vld [vmem:[%s5743_s1 + $0x58] sm:$0xff]  }
  0x33   :  { %405 = vmatprep.mubr.bf16.mxu0 %v3491_v36  ;;  %1355 = vmatpush1.bf16.msra.mxu1 %v3560_v54  ;;  %v3566_v36 = vld [vmem:[%s5744_s0 + $0xe0] ss:$8 sps:$4 sm:$0xff]  }
  0x34   :  { %1356 = vmatprep.subr.bf16.mxu1 %v3575_v55  ;;  %3378 = vmatpush3.bf16.msra.mxu0 %v3578_v57 }
  0x35   :  { %3379 = vmatprep.subr.bf16.mxu0 %v3580_v63 }
  0x37   :  { %1357 = vmatpush1.bf16.msra.mxu1 %v3573_v58 }
  0x38   :  { %1358 = vmatprep.subr.bf16.mxu1 %v3584_v62  ;;  %3380 = vmatpush3.bf16.msra.mxu0 %v3580_v63 }
  0x39   :  { %873 = vmatmul.mubr.bf16.gmra.mxu1 %v4230_v60  ;;  %3381 = vmatprep.subr.bf16.mxu0 %v3581_v2 }
  0x3a   :  { %406 = vmatmul.mubr.bf16.gmra.mxu0 %v3493_v42  ;;  %882 = vmatprep.mubr.bf16.mxu1 %v5753_v1  ;;  %v3603_v42 = vld [vmem:[%s5746_s4 + $0x80] ss:$12 sps:$4 sm:$0xff]  }
  0x3b   :  { %413 = vmatprep.mubr.bf16.mxu0 %v3494_v45  ;;  %1359 = vmatpush1.bf16.msra.mxu1 %v3582_v0  ;;  %v3606_v45 = vld [vmem:[%s5746_s4 + $0x50] ss:$12 sps:$4 sm:$0xff]  }
  0x3c   :  { %1360 = vmatprep.subr.bf16.mxu1 %v3590_v3  ;;  %3382 = vmatpush3.bf16.msra.mxu0 %v3581_v2 }
  0x3d   :  { %3383 = vmatprep.subr.bf16.mxu0 %v3586_v8 }
  0x3f   :  { %1361 = vmatpush1.bf16.msra.mxu1 %v3588_v5 }
  0x40   :  { %1362 = vmatprep.subr.bf16.mxu1 %v3595_v9  ;;  %3384 = vmatpush3.bf16.msra.mxu0 %v3586_v8 }
  0x41   :  { %883 = vmatmul.mubr.bf16.gmra.mxu1 %v4261_v6  ;;  %3417 = vmatprep.subr.bf16.mxu0 %v4280_v11 }
  0x42   :  { %414 = vmatmul.mubr.bf16.gmra.mxu0 %v3496_v50  ;;  %892 = vmatprep.mubr.bf16.mxu1 %v5753_v1 }
  0x43   :  { %421 = vmatprep.mubr.bf16.mxu0 %v3500_v53  ;;  %1363 = vmatpush1.bf16.msra.mxu1 %v3593_v10 }
  0x44   :  { %1364 = vmatprep.subr.bf16.mxu1 %v3602_v12 }
  0x47   :  { %1365 = vmatpush1.bf16.msra.mxu1 %v3600_v16 }
  0x49   :  { %893 = vmatmul.mubr.bf16.gmra.mxu1 %v4294_v15 }
  0x4a   :  { %422 = vmatmul.mubr.bf16.gmra.mxu0 %v3502_v59  ;;  %902 = vmatprep.mubr.bf16.mxu1 %v5753_v1 }
  0x4b   :  { %429 = vmatprep.mubr.bf16.mxu0 %v3509_v61 }
  0x51   :  { %903 = vmatmul.mubr.bf16.gmra.mxu1 %v4305_v17 }
  0x52   :  { %430 = vmatmul.mubr.bf16.gmra.mxu0 %v3511_v4  ;;  %912 = vmatprep.mubr.bf16.mxu1 %v5753_v1 }
  0x53   :  { %437 = vmatprep.mubr.bf16.mxu0 %v3518_v7 }
  0x59   :  { %913 = vmatmul.mubr.bf16.gmra.mxu1 %v4318_v20 }
  0x5a   :  { %438 = vmatmul.mubr.bf16.gmra.mxu0 %v3520_v13  ;;  %922 = vmatprep.mubr.bf16.mxu1 %v5753_v1 }
  0x5b   :  { %445 = vmatprep.mubr.bf16.mxu0 %v3527_v14 }
  0x61   :  { %923 = vmatmul.mubr.bf16.gmra.mxu1 %v4331_v23 }
  0x62   :  { %446 = vmatmul.mubr.bf16.gmra.mxu0 %v3529_v18  ;;  %932 = vmatprep.mubr.bf16.mxu1 %v5753_v1 }
  0x63   :  { %453 = vmatprep.mubr.bf16.mxu0 %v3534_v19 }
  0x69   :  { %933 = vmatmul.mubr.bf16.gmra.mxu1 %v4344_v26 }
  0x6a   :  { %454 = vmatmul.mubr.bf16.gmra.mxu0 %v3536_v21  ;;  %942 = vmatprep.mubr.bf16.mxu1 %v5753_v1 }
  0x6b   :  { %461 = vmatprep.mubr.bf16.mxu0 %v3541_v22 }
  0x71   :  { %943 = vmatmul.mubr.bf16.gmra.mxu1 %v4357_v29 }
  0x72   :  { %462 = vmatmul.mubr.bf16.gmra.mxu0 %v3543_v24  ;;  %952 = vmatprep.mubr.bf16.mxu1 %v5753_v1 }
  0x73   :  { %469 = vmatprep.mubr.bf16.mxu0 %v3545_v25 }
  0x79   :  { %953 = vmatmul.mubr.bf16.gmra.mxu1 %v3587_v32 }
  0x7a   :  { %470 = vmatmul.mubr.bf16.gmra.mxu0 %v3547_v27  ;;  %962 = vmatprep.mubr.bf16.mxu1 %v5753_v1 }
  0x7b   :  { %477 = vmatprep.mubr.bf16.mxu0 %v3552_v28 }
  0x81   :  { %963 = vmatmul.mubr.bf16.gmra.mxu1 %v3591_v35 }
  0x82   :  { %478 = vmatmul.mubr.bf16.gmra.mxu0 %v3554_v30  ;;  %972 = vmatprep.mubr.bf16.mxu1 %v5753_v1 }
  0x83   :  { %485 = vmatprep.mubr.bf16.mxu0 %v3557_v31 }
  0x89   :  { %973 = vmatmul.mubr.bf16.gmra.mxu1 %v3592_v38 }
  0x8a   :  { %486 = vmatmul.mubr.bf16.gmra.mxu0 %v3559_v33  ;;  %982 = vmatprep.mubr.bf16.mxu1 %v5753_v1 }
  0x8b   :  { %493 = vmatprep.mubr.bf16.mxu0 %v3564_v34 }
  0x91   :  { %983 = vmatmul.mubr.bf16.gmra.mxu1 %v3596_v40 }
  0x92   :  { %494 = vmatmul.mubr.bf16.gmra.mxu0 %v3566_v36  ;;  %992 = vmatprep.mubr.bf16.mxu1 %v5753_v1 }
  0x93   :  { %501 = vmatprep.mubr.bf16.mxu0 %v3569_v37 }
  0x9a   :  { %502 = vmatmul.mubr.bf16.gmra.mxu0 %v3571_v39 }
  0x9b   :  { %3385 = vmatprep.mubr.bf16.mxu0 %v4171_v43  ;;  %v3598_v43 = vld [vmem:[%s5743_s1 + $0x70] sm:$0xff]  }
  0x9c   :  { %993 = vmatmul.mubr.bf16.gmra.mxu1 %v3598_v43 }
  0x9d   :  { %1002 = vmatprep.mubr.bf16.mxu1 %v5753_v1 }
  0xa2   :  { %3386 = vmatmul.mubr.bf16.vlgmr.msra.gmra.mxu0 %v4199_v51 }
  0xa3   :  { %3389 = vmatprep.mubr.bf16.mxu0 %v4230_v60  ;;  %3418 = vmatpush3.bf16.msra.mxu0 %v4280_v11 }
  0xa4   :  { %3419 = vmatprep.subr.bf16.mxu0 %v3599_v41  ;;  %1003 = vmatmul.mubr.bf16.gmra.mxu1 %v3604_v46 }
  0xa5   :  { %1382 = vmatprep.mubr.bf16.mxu1 %v5753_v1 }
  0xa7   :  { %3420 = vmatpush3.bf16.msra.mxu0 %v3599_v41 }
  0xa8   :  { %3421 = vmatprep.subr.bf16.mxu0 %v3603_v42 }
  0xaa   :  { %3390 = vmatmul.mubr.bf16.gmra.mxu0 %v4261_v6 }
  0xab   :  { %3393 = vmatprep.mubr.bf16.mxu0 %v4294_v15  ;;  %3422 = vmatpush3.bf16.msra.mxu0 %v3603_v42 }
  0xac   :  { %3423 = vmatprep.subr.bf16.mxu0 %v3605_v44 }
  0xaf   :  { %3424 = vmatpush3.bf16.msra.mxu0 %v3605_v44 }
  0xb0   :  { %3425 = vmatprep.subr.bf16.mxu0 %v3606_v45 }
  0xb2   :  { %3394 = vmatmul.mubr.bf16.gmra.mxu0 %v4305_v17 }
  0xb3   :  { %3397 = vmatprep.mubr.bf16.mxu0 %v4318_v20  ;;  %3426 = vmatpush3.bf16.msra.mxu0 %v3606_v45 }
  0xb4   :  { %3427 = vmatprep.subr.bf16.mxu0 %v3607_v47 }
  0xb7   :  { %3428 = vmatpush3.bf16.msra.mxu0 %v3607_v47 }
  0xb8   :  { %3429 = vmatprep.subr.bf16.mxu0 %v3608_v48 }
  0xba   :  { %3398 = vmatmul.mubr.bf16.gmra.mxu0 %v4331_v23 }
  0xbb   :  { %3401 = vmatprep.mubr.bf16.mxu0 %v4344_v26  ;;  %3430 = vmatpush3.bf16.msra.mxu0 %v3608_v48 }
  0xbc   :  { %3431 = vmatprep.subr.bf16.mxu0 %v3609_v49 }
  0xbf   :  { %3432 = vmatpush3.bf16.msra.mxu0 %v3609_v49 }
  0xc2   :  { %3402 = vmatmul.mubr.bf16.gmra.mxu0 %v4357_v29 }
  0xc3   :  { %3405 = vmatprep.mubr.bf16.mxu0 %v3587_v32 }
  0xca   :  { %3406 = vmatmul.mubr.bf16.gmra.mxu0 %v3591_v35 }
  0xcb   :  { %3409 = vmatprep.mubr.bf16.mxu0 %v3592_v38 }
  0xd2   :  { %3410 = vmatmul.mubr.bf16.gmra.mxu0 %v3596_v40 }
  0xd3   :  { %3413 = vmatprep.mubr.bf16.mxu0 %v3598_v43 }
  0xda   :  { %3414 = vmatmul.mubr.bf16.gmra.mxu0 %v3604_v46 }
  0xe2   :  { %v3225_v50 = vpop.f32.mrf.mxu0 }
  0xe4   :  { %v3226_v51 = vpop.f32.mrf.mxu0 }
  0xe5   :  { %v4438_v54 = vadd.f32 %v3226_v51, %v3225_v50 }
  0xe6   :  { %v3228_v52 = vpop.f32.mrf.mxu0 }
  0xe7   :  { %5786 = vst [vmem:[#allocation2_spill] sm:$0xff] %v4438_v54 }
  0xe8   :  { %v3229_v53 = vpop.f32.mrf.mxu0 }
  0xe9   :  { %v4440_v55 = vadd.f32 %v3229_v53, %v3228_v52  ;;  %v4456_v7 = vpop.f32.mrf.mxu1 }
  0xea   :  { %v3231_v56 = vpop.f32.mrf.mxu0 }
  0xeb   :  { %5787 = vst [vmem:[#allocation3_spill] sm:$0xff] %v4440_v55  ;;  %v1174_v57 = vpack.c.bf16 %v4440_v55, %v4438_v54  ;;  %v4460_v10 = vpop.f32.mrf.mxu1 }
  0xec   :  { %v3232_v58 = vpop.f32.mrf.mxu0 }
  0xed   :  { %1383 = vmatmul.mubr.bf16.vlgmr.msra.gmra.mxu1 %v1174_v57  ;;  %3433 = vmatprep.mubr.bf16.mxu0 %v1174_v57  ;;  %v4445_v61 = vadd.f32 %v3232_v58, %v3231_v56  ;;  %v4462_v12 = vpop.f32.mrf.mxu1 }
  0xee   :  { %v3234_v59 = vpop.f32.mrf.mxu0  ;;  %1392 = vmatprep.mubr.bf16.mxu1 %v5753_v1 }
  0xef   :  { %5788 = vst [vmem:[#allocation4_spill] sm:$0xff] %v4445_v61  ;;  %v4465_v14 = vpop.f32.mrf.mxu1 }
  0xf0   :  { %v3235_v60 = vpop.f32.mrf.mxu0 }
  0xf1   :  { %v4447_v62 = vadd.f32 %v3235_v60, %v3234_v59  ;;  %v4471_v18 = vpop.f32.mrf.mxu1 }
  0xf2   :  { %v3237_v63 = vpop.f32.mrf.mxu0 }
  0xf3   :  { %5789 = vst [vmem:[#allocation5_spill] sm:$0xff] %v4447_v62  ;;  %v1175_v0 = vpack.c.bf16 %v4447_v62, %v4445_v61  ;;  %v4475_v21 = vpop.f32.mrf.mxu1 }
  0xf4   :  { %v3238_v2 = vpop.f32.mrf.mxu0 }
  0xf5   :  { %1393 = vmatmul.mubr.bf16.gmra.mxu1 %v1175_v0  ;;  %3434 = vmatmul.mubr.bf16.vlgmr.msra.gmra.mxu0 %v1175_v0  ;;  %v4452_v5 = vadd.f32 %v3238_v2, %v3237_v63  ;;  %v4477_v23 = vpop.f32.mrf.mxu1 }
  0xf6   :  { %v3240_v3 = vpop.f32.mrf.mxu0  ;;  %1402 = vmatprep.mubr.bf16.mxu1 %v5753_v1 }
  0xf7   :  { %5790 = vst [vmem:[#allocation6_spill] sm:$0xff] %v4452_v5  ;;  %v4480_v25 = vpop.f32.mrf.mxu1 }
  0xf8   :  { %v3241_v4 = vpop.f32.mrf.mxu0 }
  0xf9   :  { %v4454_v6 = vadd.f32 %v3241_v4, %v3240_v3  ;;  %v4486_v29 = vpop.f32.mrf.mxu1 }
  0xfa   :  { %v3243_v8 = vpop.f32.mrf.mxu0 }
  0xfb   :  { %5791 = vst [vmem:[#allocation7_spill] sm:$0xff] %v4454_v6  ;;  %v1176_v9 = vpack.c.bf16 %v4454_v6, %v4452_v5  ;;  %v4490_v32 = vpop.f32.mrf.mxu1 }
  0xfc   :  { %v3244_v11 = vpop.f32.mrf.mxu0 }
  0xfd   :  { %1403 = vmatmul.mubr.bf16.gmra.mxu1 %v1176_v9  ;;  %3437 = vmatprep.mubr.bf16.mxu0 %v1176_v9  ;;  %v4467_v16 = vadd.f32 %v3244_v11, %v3243_v8  ;;  %v4492_v34 = vpop.f32.mrf.mxu1 }
  0xfe   :  { %v3246_v13 = vpop.f32.mrf.mxu0  ;;  %1412 = vmatprep.mubr.bf16.mxu1 %v5753_v1 }
  0xff   :  { %5792 = vst [vmem:[#allocation8_spill] sm:$0xff] %v4467_v16  ;;  %v4495_v36 = vpop.f32.mrf.mxu1 }
 0x100   :  { %v3247_v15 = vpop.f32.mrf.mxu0 }
 0x101   :  { %v4469_v17 = vadd.f32 %v3247_v15, %v3246_v13  ;;  %v4501_v40 = vpop.f32.mrf.mxu1 }
 0x102   :  { %v3249_v19 = vpop.f32.mrf.mxu0 }
 0x103   :  { %5793 = vst [vmem:[#allocation9_spill] sm:$0xff] %v4469_v17  ;;  %v1177_v20 = vpack.c.bf16 %v4469_v17, %v4467_v16  ;;  %v4505_v43 = vpop.f32.mrf.mxu1 }
 0x104   :  { %v3250_v22 = vpop.f32.mrf.mxu0 }
 0x105   :  { %1413 = vmatmul.mubr.bf16.gmra.mxu1 %v1177_v20  ;;  %3438 = vmatmul.mubr.bf16.gmra.mxu0 %v1177_v20  ;;  %v4482_v27 = vadd.f32 %v3250_v22, %v3249_v19  ;;  %v4507_v45 = vpop.f32.mrf.mxu1 }
 0x106   :  { %v3252_v24 = vpop.f32.mrf.mxu0  ;;  %1422 = vmatprep.mubr.bf16.mxu1 %v5753_v1 }
 0x107   :  { %5794 = vst [vmem:[#allocation10_spill] sm:$0xff] %v4482_v27  ;;  %v4510_v47 = vpop.f32.mrf.mxu1 }
 0x108   :  { %v3253_v26 = vpop.f32.mrf.mxu0 }
 0x109   :  { %v4484_v28 = vadd.f32 %v3253_v26, %v3252_v24  ;;  %v4516_v51 = vpop.f32.mrf.mxu1 }
 0x10a   :  { %v3255_v30 = vpop.f32.mrf.mxu0 }
 0x10b   :  { %5795 = vst [vmem:[#allocation11_spill] sm:$0xff] %v4484_v28  ;;  %v1178_v31 = vpack.c.bf16 %v4484_v28, %v4482_v27  ;;  %v4520_v56 = vpop.f32.mrf.mxu1 }
 0x10c   :  { %v3256_v33 = vpop.f32.mrf.mxu0 }
 0x10d   :  { %1423 = vmatmul.mubr.bf16.gmra.mxu1 %v1178_v31  ;;  %3441 = vmatprep.mubr.bf16.mxu0 %v1178_v31  ;;  %v4497_v38 = vadd.f32 %v3256_v33, %v3255_v30  ;;  %v4522_v58 = vpop.f32.mrf.mxu1 }
 0x10e   :  { %v3258_v35 = vpop.f32.mrf.mxu0  ;;  %1432 = vmatprep.mubr.bf16.mxu1 %v5753_v1 }
 0x10f   :  { %5796 = vst [vmem:[#allocation12_spill] sm:$0xff] %v4497_v38  ;;  %v4525_v60 = vpop.f32.mrf.mxu1 }
 0x110   :  { %v3259_v37 = vpop.f32.mrf.mxu0 }
 0x111   :  { %v4499_v39 = vadd.f32 %v3259_v37, %v3258_v35  ;;  %v4531_v3 = vpop.f32.mrf.mxu1 }
 0x112   :  { %v3261_v41 = vpop.f32.mrf.mxu0 }
 0x113   :  { %5797 = vst [vmem:[#allocation13_spill] sm:$0xff] %v4499_v39  ;;  %v1179_v42 = vpack.c.bf16 %v4499_v39, %v4497_v38  ;;  %v4535_v9 = vpop.f32.mrf.mxu1 }
 0x114   :  { %v3262_v44 = vpop.f32.mrf.mxu0 }
 0x115   :  { %1433 = vmatmul.mubr.bf16.gmra.mxu1 %v1179_v42  ;;  %3442 = vmatmul.mubr.bf16.gmra.mxu0 %v1179_v42  ;;  %v4512_v49 = vadd.f32 %v3262_v44, %v3261_v41  ;;  %v4537_v13 = vpop.f32.mrf.mxu1 }
 0x116   :  { %v3264_v46 = vpop.f32.mrf.mxu0  ;;  %1442 = vmatprep.mubr.bf16.mxu1 %v5753_v1 }
 0x117   :  { %5798 = vst [vmem:[#allocation14_spill] sm:$0xff] %v4512_v49  ;;  %v4540_v19 = vpop.f32.mrf.mxu1 }
 0x118   :  { %v3265_v48 = vpop.f32.mrf.mxu0 }
 0x119   :  { %v4514_v50 = vadd.f32 %v3265_v48, %v3264_v46  ;;  %v4546_v26 = vpop.f32.mrf.mxu1 }
 0x11a   :  { %v3267_v52 = vpop.f32.mrf.mxu0 }
 0x11b   :  { %5799 = vst [vmem:[#allocation15_spill] sm:$0xff] %v4514_v50  ;;  %v1180_v53 = vpack.c.bf16 %v4514_v50, %v4512_v49  ;;  %v4550_v33 = vpop.f32.mrf.mxu1 }
 0x11c   :  { %v3268_v57 = vpop.f32.mrf.mxu0 }
 0x11d   :  { %1443 = vmatmul.mubr.bf16.gmra.mxu1 %v1180_v53  ;;  %3445 = vmatprep.mubr.bf16.mxu0 %v1180_v53  ;;  %v4527_v0 = vadd.f32 %v3268_v57, %v3267_v52  ;;  %v4552_v37 = vpop.f32.mrf.mxu1 }
 0x11e   :  { %v3270_v59 = vpop.f32.mrf.mxu0  ;;  %1452 = vmatprep.mubr.bf16.mxu1 %v5753_v1 }
 0x11f   :  { %5800 = vst [vmem:[#allocation16_spill] sm:$0xff] %v4527_v0  ;;  %v4555_v42 = vpop.f32.mrf.mxu1 }
 0x120   :  { %v3271_v63 = vpop.f32.mrf.mxu0 }
 0x121   :  { %v4529_v2 = vadd.f32 %v3271_v63, %v3270_v59  ;;  %v4561_v52 = vpop.f32.mrf.mxu1 }
 0x122   :  { %v3273_v4 = vpop.f32.mrf.mxu0 }
 0x123   :  { %5801 = vst [vmem:[#allocation17_spill] sm:$0xff] %v4529_v2  ;;  %v1181_v8 = vpack.c.bf16 %v4529_v2, %v4527_v0  ;;  %v4565_v59 = vpop.f32.mrf.mxu1 }
 0x124   :  { %v3274_v11 = vpop.f32.mrf.mxu0 }
 0x125   :  { %1453 = vmatmul.mubr.bf16.gmra.mxu1 %v1181_v8  ;;  %3446 = vmatmul.mubr.bf16.gmra.mxu0 %v1181_v8  ;;  %v4542_v22 = vadd.f32 %v3274_v11, %v3273_v4  ;;  %v4567_v4 = vpop.f32.mrf.mxu1 }
 0x126   :  { %v3276_v15 = vpop.f32.mrf.mxu0  ;;  %1462 = vmatprep.mubr.bf16.mxu1 %v5753_v1 }
 0x127   :  { %5802 = vst [vmem:[#allocation18_spill] sm:$0xff] %v4542_v22  ;;  %v4570_v11 = vpop.f32.mrf.mxu1 }
 0x128   :  { %v3277_v20 = vpop.f32.mrf.mxu0 }
 0x129   :  { %v4544_v24 = vadd.f32 %v3277_v20, %v3276_v15 }
 0x12a   :  { %v3279_v30 = vpop.f32.mrf.mxu0 }
 0x12b   :  { %5803 = vst [vmem:[#allocation19_spill] sm:$0xff] %v4544_v24  ;;  %v1182_v31 = vpack.c.bf16 %v4544_v24, %v4542_v22 }
 0x12c   :  { %v3280_v35 = vpop.f32.mrf.mxu0 }
 0x12d   :  { %1463 = vmatmul.mubr.bf16.gmra.mxu1 %v1182_v31  ;;  %3449 = vmatprep.mubr.bf16.mxu0 %v1182_v31  ;;  %v4557_v46 = vadd.f32 %v3280_v35, %v3279_v30  ;;  %v4576_v31 = vpop.f32.mrf.mxu1 }
 0x12e   :  { %v3282_v41 = vpop.f32.mrf.mxu0  ;;  %1472 = vmatprep.mubr.bf16.mxu1 %v5753_v1 }
 0x12f   :  { %5804 = vst [vmem:[#allocation20_spill] sm:$0xff] %v4557_v46 }
 0x130   :  { %v3283_v44 = vpop.f32.mrf.mxu0 }
 0x131   :  { %v4559_v48 = vadd.f32 %v3283_v44, %v3282_v41  ;;  %v4580_v44 = vpop.f32.mrf.mxu1 }
 0x132   :  { %v3285_v53 = vpop.f32.mrf.mxu0 }
 0x133   :  { %5805 = vst [vmem:[#allocation21_spill] sm:$0xff] %v4559_v48  ;;  %v1183_v57 = vpack.c.bf16 %v4559_v48, %v4557_v46  ;;  %v4582_v48 = vpop.f32.mrf.mxu1  ;;  %v5808_v46 = vmov 0  }
 0x134   :  { %v3286_v63 = vpop.f32.mrf.mxu0 }
 0x135   :  { %1473 = vmatmul.mubr.bf16.gmra.mxu1 %v1183_v57  ;;  %3450 = vmatmul.mubr.bf16.gmra.mxu0 %v1183_v57  ;;  %v4572_v20 = vadd.f32 %v3286_v63, %v3285_v53  ;;  %v4585_v53 = vpop.f32.mrf.mxu1 }
 0x136   :  { %v3288_v8 = vpop.f32.mrf.mxu0  ;;  %1482 = vmatprep.mubr.bf16.mxu1 %v5753_v1 }
 0x137   :  { %5806 = vst [vmem:[#allocation22_spill] sm:$0xff] %v4572_v20  ;;  %v4591_v24 = vpop.f32.mrf.mxu1 }
 0x138   :  { %v3289_v15 = vpop.f32.mrf.mxu0 }
 0x139   :  { %v4574_v30 = vadd.f32 %v3289_v15, %v3288_v8  ;;  %v4595_v22 = vpop.f32.mrf.mxu1 }
 0x13a   :  { %v3291_v35 = vpop.f32.mrf.mxu0 }
 0x13b   :  { %5807 = vst [vmem:[#allocation23_spill] sm:$0xff] %v4574_v30  ;;  %v1184_v41 = vpack.c.bf16 %v4574_v30, %v4572_v20  ;;  %v4598_v0 = vpop.f32.mrf.mxu1 }
 0x13c   :  { %v3292_v57 = vpop.f32.mrf.mxu0 }
 0x13d   :  { %1483 = vmatmul.mubr.bf16.gmra.mxu1 %v1184_v41  ;;  %3453 = vmatprep.mubr.bf16.mxu0 %v1184_v41  ;;  %v4587_v8 = vadd.f32 %v3292_v57, %v3291_v35 }
 0x13e   :  { %v3294_v1 = vpop.f32.mrf.mxu0  ;;  %1492 = vmatprep.mubr.bf16.mxu1 %v5808_v46 }
 0x13f   :  { %5809 = vst [vmem:[#allocation24_spill] sm:$0xff] %v4587_v8 }
 0x140   :  { %v3295_v63 = vpop.f32.mrf.mxu0 }
 0x141   :  { %v4589_v15 = vadd.f32 %v3295_v63, %v3294_v1 }
 0x142   :  { %v3297_v30 = vpop.f32.mrf.mxu0 }
 0x143   :  { %5810 = vst [vmem:[#allocation25_spill] sm:$0xff] %v4589_v15  ;;  %v1185_v20 = vpack.c.bf16 %v4589_v15, %v4587_v8  ;;  %v4606_v15 = vpop.f32.mrf.mxu1 }
 0x144   :  { %v3298_v41 = vpop.f32.mrf.mxu0 }
 0x145   :  { %1493 = vmatmul.mubr.bf16.gmra.mxu1 %v1185_v20  ;;  %3454 = vmatmul.mubr.bf16.gmra.mxu0 %v1185_v20  ;;  %v4600_v57 = vadd.f32 %v3298_v41, %v3297_v30  ;;  %v4609_v49 = vpop.f32.mrf.mxu1 }
 0x146   :  { %v3300_v2 = vpop.f32.mrf.mxu0  ;;  %1502 = vmatprep.mubr.bf16.mxu1 %v5808_v46 }
 0x147   :  { %5811 = vst [vmem:[#allocation26_spill] sm:$0xff] %v4600_v57 }
 0x148   :  { %v3301_v35 = vpop.f32.mrf.mxu0 }
 0x149   :  { %v4602_v1 = vadd.f32 %v3301_v35, %v3300_v2  ;;  %v4617_v35 = vpop.f32.mrf.mxu1 }
 0x14a   :  { %v3303_v63 = vpop.f32.mrf.mxu0 }
 0x14b   :  { %5812 = vst [vmem:[#allocation27_spill] sm:$0xff] %v4602_v1  ;;  %v1186_v50 = vpack.c.bf16 %v4602_v1, %v4600_v57  ;;  %v4620_v57 = vpop.f32.mrf.mxu1 }
 0x14c   :  { %v3304_v8 = vpop.f32.mrf.mxu0 }
 0x14d   :  { %1503 = vmatmul.mubr.bf16.gmra.mxu1 %v1186_v50  ;;  %3457 = vmatprep.mubr.bf16.mxu0 %v1186_v50  ;;  %v4611_v38 = vadd.f32 %v3304_v8, %v3303_v63 }
 0x14e   :  { %v3306_v20 = vpop.f32.mrf.mxu0  ;;  %1512 = vmatprep.mubr.bf16.mxu1 %v5808_v46 }
 0x14f   :  { %5813 = vst [vmem:[#allocation28_spill] sm:$0xff] %v4611_v38 }
 0x150   :  { %v3307_v39 = vpop.f32.mrf.mxu0 }
 0x151   :  { %v4613_v30 = vadd.f32 %v3307_v39, %v3306_v20  ;;  %v4628_v20 = vpop.f32.mrf.mxu1 }
 0x152   :  { %v3309_v2 = vpop.f32.mrf.mxu0 }
 0x153   :  { %5814 = vst [vmem:[#allocation29_spill] sm:$0xff] %v4613_v30  ;;  %v1187_v41 = vpack.c.bf16 %v4613_v30, %v4611_v38  ;;  %v4631_v38 = vpop.f32.mrf.mxu1 }
 0x154   :  { %v3310_v1 = vpop.f32.mrf.mxu0 }
 0x155   :  { %1513 = vmatmul.mubr.bf16.gmra.mxu1 %v1187_v41  ;;  %3458 = vmatmul.mubr.bf16.gmra.mxu0 %v1187_v41  ;;  %v4622_v27 = vadd.f32 %v3310_v1, %v3309_v2 }
 0x156   :  { %v3312_v50 = vpop.f32.mrf.mxu0  ;;  %1522 = vmatprep.mubr.bf16.mxu1 %v5808_v46 }
 0x157   :  { %5815 = vst [vmem:[#allocation30_spill] sm:$0xff] %v4622_v27 }
 0x158   :  { %v3313_v28 = vpop.f32.mrf.mxu0 }
 0x159   :  { %v4624_v8 = vadd.f32 %v3313_v28, %v3312_v50  ;;  %v4641_v50 = vpop.f32.mrf.mxu1 }
 0x15a   :  { %v3315_v39 = vpop.f32.mrf.mxu0 }
 0x15b   :  { %5816 = vst [vmem:[#allocation31_spill] sm:$0xff] %v4624_v8  ;;  %v1188_v63 = vpack.c.bf16 %v4624_v8, %v4622_v27 }
 0x15c   :  { %v3316_v30 = vpop.f32.mrf.mxu0 }
 0x15d   :  { %1523 = vmatmul.mubr.bf16.gmra.mxu1 %v1188_v63  ;;  %3461 = vmatprep.mubr.bf16.mxu0 %v1188_v63  ;;  %v4633_v16 = vadd.f32 %v3316_v30, %v3315_v39 }
 0x15e   :  { %v3318_v41 = vpop.f32.mrf.mxu0  ;;  %1532 = vmatprep.mubr.bf16.mxu1 %v5808_v46  ;;  %v4647_v46 = vpop.f32.mrf.mxu1 }
 0x15f   :  { %5817 = vst [vmem:[#allocation32_spill] sm:$0xff] %v4633_v16  ;;  %5821 = vst [vmem:[#allocation36_spill] sm:$0xff] %v4647_v46 }
 0x160   :  { %v3319_v17 = vpop.f32.mrf.mxu0 }
 0x161   :  { %v4635_v1 = vadd.f32 %v3319_v17, %v3318_v41  ;;  %v4653_v17 = vpop.f32.mrf.mxu1 }
 0x162   :  { %v4637_v28 = vpop.f32.mrf.mxu0  ;;  %5823 = vst [vmem:[#allocation38_spill] sm:$0xff] %v4653_v17 }
 0x163   :  { %5818 = vst [vmem:[#allocation33_spill] sm:$0xff] %v4635_v1  ;;  %5819 = vst [vmem:[#allocation34_spill] sm:$0xff] %v4637_v28  ;;  %v1189_v2 = vpack.c.bf16 %v4635_v1, %v4633_v16  ;;  %v581_v1 = vlaneseq  ;;  %v4659_v16 = vpop.f32.mrf.mxu1 }
 0x164   :  { %v4643_v8 = vpop.f32.mrf.mxu0  ;;  %5826 = vst [vmem:[#allocation41_spill] sm:$0xff] %v4659_v16 }
 0x165   :  { %1533 = vmatmul.mubr.bf16.gmra.mxu1 %v1189_v2  ;;  %3462 = vmatmul.mubr.bf16.gmra.mxu0 %v1189_v2  ;;  %v4665_v5 = vshrl.u32 %v581_v1, 7  ;;  %v4667_v62 = vpop.f32.mrf.mxu1 }
 0x166   :  { %v4645_v63 = vpop.f32.mrf.mxu0  ;;  %5829 = vst [vmem:[#allocation44_spill] sm:$0xff] %v4667_v62 }
 0x167   :  { %5820 = vst [vmem:[#allocation35_spill] sm:$0xff] %v4645_v63  ;;  %v591_v55 = vsub.s32 2, %v4665_v5 }
 0x168   :  { %v4649_v27 = vpop.f32.mrf.mxu0 }
 0x16a   :  { %v4651_v30 = vpop.f32.mrf.mxu0 }
 0x16b   :  { %5822 = vst [vmem:[#allocation37_spill] sm:$0xff] %v4651_v30 }
 0x16c   :  { %v4655_v39 = vpop.f32.mrf.mxu0 }
 0x16d   :  { %5824 = vst [vmem:[#allocation39_spill] sm:$0xff] %v4655_v39  ;;  %v4674_v39 = vpop.f32.mrf.mxu1 }
 0x16e   :  { %v4657_v41 = vpop.f32.mrf.mxu0  ;;  %5832 = vst [vmem:[#allocation47_spill] sm:$0xff] %v4674_v39 }
 0x16f   :  { %5825 = vst [vmem:[#allocation40_spill] sm:$0xff] %v4657_v41  ;;  %v579_v41 = vld [vmem:[%s5747_s5] sm:$0x7] }
 0x170   :  { %v4661_v6 = vpop.f32.mrf.mxu0 }
 0x171   :  { %5827 = vst [vmem:[#allocation42_spill] sm:$0xff] %v4661_v6  ;;  %v4681_v6 = vrot.slane %v579_v41, %v591_v55 }
 0x172   :  { %v4663_v2 = vpop.f32.mrf.mxu0 }
 0x173   :  { %5828 = vst [vmem:[#allocation43_spill] sm:$0xff] %v4663_v2  ;;  %v4683_v2 = vpop.f32.mrf.mxu1 }
 0x174   :  { %v4669_v61 = vpop.f32.mrf.mxu0  ;;  %5834 = vst [vmem:[#allocation49_spill] sm:$0xff] %v4683_v2 }
 0x175   :  { %5830 = vst [vmem:[#allocation45_spill] sm:$0xff] %v4669_v61 }
 0x176   :  { %v4672_v54 = vpop.f32.mrf.mxu0 }
 0x177   :  { %5831 = vst [vmem:[#allocation46_spill] sm:$0xff] %v4672_v54  ;;  %v4690_v54 = vpop.f32.mrf.mxu1 }
 0x178   :  { %v4679_v30 = vpop.f32.mrf.mxu0  ;;  %5837 = vst [vmem:[#allocation52_spill] sm:$0xff] %v4690_v54 }
 0x179   :  { %5833 = vst [vmem:[#allocation48_spill] sm:$0xff] %v4679_v30  ;;  %v4697_v30 = vpop.f32.mrf.mxu1 }
 0x17a   :  { %v3399_v1 = vpop.f32.mrf.mxu0  ;;  %5840 = vst [vmem:[#allocation55_spill] sm:$0xff] %v4697_v30 }
 0x17b   :  { %v4686_v63 = vadd.f32 %v3399_v1, %v4681_v6 }
 0x17c   :  { %v4688_v61 = vpop.f32.mrf.mxu0 }
 0x17d   :  { %5835 = vst [vmem:[#allocation50_spill] sm:$0xff] %v4686_v63  ;;  %5836 = vst [vmem:[#allocation51_spill] sm:$0xff] %v4688_v61  ;;  %v4705_v61 = vpop.f32.mrf.mxu1 }
 0x17e   :  { %v3400_v62 = vpop.f32.mrf.mxu0  ;;  %5843 = vst [vmem:[#allocation58_spill] sm:$0xff] %v4705_v61 }
 0x17f   :  { %v4693_v39 = vadd.f32 %v3400_v62, %v4681_v6  ;;  %v4713_v17 = vpop.f32.mrf.mxu1 }
 0x180   :  { %v4695_v28 = vpop.f32.mrf.mxu0  ;;  %5846 = vst [vmem:[#allocation61_spill] sm:$0xff] %v4713_v17 }
 0x181   :  { %5838 = vst [vmem:[#allocation53_spill] sm:$0xff] %v4693_v39  ;;  %5839 = vst [vmem:[#allocation54_spill] sm:$0xff] %v4695_v28 }
 0x182   :  { %v3403_v16 = vpop.f32.mrf.mxu0 }
 0x183   :  { %v4700_v55 = vadd.f32 %v3403_v16, %v4681_v6 }
 0x184   :  { %v1111_v2 = vpop.f32.mrf.mxu0 }
 0x185   :  { %5841 = vst [vmem:[#allocation56_spill] sm:$0xff] %v4700_v55  ;;  %v4703_v1 = vadd.f32 %v1111_v2, %v4681_v6 }
 0x186   :  { %v3404_v63 = vpop.f32.mrf.mxu0 }
 0x187   :  { %5842 = vst [vmem:[#allocation57_spill] sm:$0xff] %v4703_v1  ;;  %v4708_v54 = vadd.f32 %v3404_v63, %v4681_v6  ;;  %v4721_v1 = vpop.f32.mrf.mxu1 }
 0x188   :  { %v1114_v62 = vpop.f32.mrf.mxu0  ;;  %5849 = vst [vmem:[#allocation64_spill] sm:$0xff] %v4721_v1 }
 0x189   :  { %5844 = vst [vmem:[#allocation59_spill] sm:$0xff] %v4708_v54  ;;  %v4711_v39 = vadd.f32 %v1114_v62, %v4681_v6 }
 0x18a   :  { %v3407_v28 = vpop.f32.mrf.mxu0 }
 0x18b   :  { %5845 = vst [vmem:[#allocation60_spill] sm:$0xff] %v4711_v39  ;;  %v4716_v16 = vadd.f32 %v3407_v28, %v4681_v6  ;;  %v4729_v39 = vpop.f32.mrf.mxu1 }
 0x18c   :  { %v1127_v55 = vpop.f32.mrf.mxu0  ;;  %5852 = vst [vmem:[#allocation67_spill] sm:$0xff] %v4729_v39 }
 0x18d   :  { %5847 = vst [vmem:[#allocation62_spill] sm:$0xff] %v4716_v16  ;;  %v4719_v2 = vadd.f32 %v1127_v55, %v4681_v6  ;;  %v4737_v17 = vpop.f32.mrf.mxu1 }
 0x18e   :  { %v3408_v30 = vpop.f32.mrf.mxu0  ;;  %5855 = vst [vmem:[#allocation70_spill] sm:$0xff] %v4737_v17 }
 0x18f   :  { %5848 = vst [vmem:[#allocation63_spill] sm:$0xff] %v4719_v2  ;;  %v4724_v63 = vadd.f32 %v3408_v30, %v4681_v6  ;;  %v4745_v1 = vpop.f32.mrf.mxu1 }
 0x190   :  { %v1130_v54 = vpop.f32.mrf.mxu0  ;;  %5858 = vst [vmem:[#allocation73_spill] sm:$0xff] %v4745_v1  ;;  %v583_v1 = vsub.s32 0, %v4665_v5 }
 0x191   :  { %5850 = vst [vmem:[#allocation65_spill] sm:$0xff] %v4724_v63  ;;  %v4727_v62 = vadd.f32 %v1130_v54, %v4681_v6  ;;  %v4753_v39 = vpop.f32.mrf.mxu1 }
 0x192   :  { %v3411_v61 = vpop.f32.mrf.mxu0  ;;  %5861 = vst [vmem:[#allocation76_spill] sm:$0xff] %v4753_v39 }
 0x193   :  { %5851 = vst [vmem:[#allocation66_spill] sm:$0xff] %v4727_v62  ;;  %v4732_v28 = vadd.f32 %v3411_v61, %v4681_v6 }
 0x194   :  { %v1143_v16 = vpop.f32.mrf.mxu0 }
 0x195   :  { %5853 = vst [vmem:[#allocation68_spill] sm:$0xff] %v4732_v28  ;;  %v4735_v55 = vadd.f32 %v1143_v16, %v4681_v6 }
 0x196   :  { %v3412_v2 = vpop.f32.mrf.mxu0 }
 0x197   :  { %5854 = vst [vmem:[#allocation69_spill] sm:$0xff] %v4735_v55  ;;  %v4740_v30 = vadd.f32 %v3412_v2, %v4681_v6 }
 0x198   :  { %v1146_v63 = vpop.f32.mrf.mxu0 }
 0x199   :  { %5856 = vst [vmem:[#allocation71_spill] sm:$0xff] %v4740_v30  ;;  %v4743_v54 = vadd.f32 %v1146_v63, %v4681_v6 }
 0x19a   :  { %v3415_v62 = vpop.f32.mrf.mxu0 }
 0x19b   :  { %5857 = vst [vmem:[#allocation72_spill] sm:$0xff] %v4743_v54  ;;  %v4748_v61 = vadd.f32 %v3415_v62, %v4681_v6  ;;  %v4761_v54 = vpop.f32.mrf.mxu1  ;;  %v587_v62 = vsub.s32 1, %v4665_v5 }
 0x19c   :  { %v1159_v28 = vpop.f32.mrf.mxu0  ;;  %5864 = vst [vmem:[#allocation79_spill] sm:$0xff] %v4761_v54 }
 0x19d   :  { %5859 = vst [vmem:[#allocation74_spill] sm:$0xff] %v4748_v61  ;;  %v4751_v16 = vadd.f32 %v1159_v28, %v4681_v6  ;;  %v4765_v61 = vpop.f32.mrf.mxu1  ;;  %v4767_v28 = vrot.slane %v579_v41, %v583_v1 }
 0x19e   :  { %v3416_v55 = vpop.f32.mrf.mxu0  ;;  %5865 = vst [vmem:[#allocation80_spill] sm:$0xff] %v4765_v61 }
 0x19f   :  { %5860 = vst [vmem:[#allocation75_spill] sm:$0xff] %v4751_v16  ;;  %v4756_v2 = vadd.f32 %v3416_v55, %v4681_v6  ;;  %v4769_v16 = vrot.slane %v579_v41, %v587_v62  ;;  %v4771_v39 = vpop.f32.mrf.mxu1  ;;  %v855_v55 = vadd.f32 %v4456_v7, %v4767_v28  ;;  %v859_v5 = vadd.f32 %v4462_v12, %v4767_v28 }
 0x1a0   :  { %v1162_v30 = vpop.f32.mrf.mxu0  ;;  %5866 = vst [vmem:[#allocation81_spill] sm:$0xff] %v4771_v39  ;;  %v865_v7 = vadd.f32 %v4471_v18, %v4767_v28 }
 0x1a1   :  { %5862 = vst [vmem:[#allocation77_spill] sm:$0xff] %v4756_v2  ;;  %v4759_v63 = vadd.f32 %v1162_v30, %v4681_v6  ;;  %v857_v30 = vadd.f32 %v4460_v10, %v4769_v16  ;;  %v861_v41 = vadd.f32 %v4465_v14, %v4769_v16  ;;  %v867_v12 = vadd.f32 %v4475_v21, %v4769_v16 }
 0x1a2   :  { %v869_v14 = vadd.f32 %v4477_v23, %v4767_v28  ;;  %v871_v18 = vadd.f32 %v4480_v25, %v4769_v16  ;;  %v875_v21 = vadd.f32 %v4486_v29, %v4767_v28  ;;  %v877_v23 = vadd.f32 %v4490_v32, %v4769_v16 }
 0x1a3   :  { %5863 = vst [vmem:[#allocation78_spill] sm:$0xff] %v4759_v63  ;;  %v889_v32 = vadd.f32 %v4507_v45, %v4767_v28  ;;  %v4817_v45 = vadd.f32 %v4522_v58, %v4767_v28  ;;  %v4833_v58 = vadd.f32 %v4537_v13, %v4767_v28  ;;  %v4847_v13 = vadd.f32 %v4550_v33, %v4769_v16 }
 0x1a4   :  { %v4863_v33 = vadd.f32 %v4565_v59, %v4769_v16  ;;  %v4875_v59 = vadd.f32 %v4576_v31, %v4767_v28  ;;  %v4891_v31 = vadd.f32 %v4591_v24, %v4767_v28  ;;  %v4906_v24 = vadd.f32 %v4606_v15, %v4769_v16 }
 0x1a5   :  { %v4921_v15 = vadd.f32 %v4617_v35, %v4769_v16 }
 0x1ad   :  { %v1384_v2 = vpop.f32.mrf.mxu1 }
 0x1ae   :  { %v1704_v63 = vadd.f32 %v1384_v2, %v855_v55 }
 0x1af   :  { %v1386_v54 = vpop.f32.mrf.mxu1 }
 0x1b0   :  { %v2985_v17 = vmul.f32 -1.442695, %v1704_v63  ;;  %v1928_v61 = vadd.f32 %v1386_v54, %v857_v30 }
 0x1b1   :  { %v1388_v1 = vpop.f32.mrf.mxu1 }
 0x1b2   :  { %3610 = vpow2.f32 %v2985_v17  ;;  %v3017_v62 = vmul.f32 -1.442695, %v1928_v61  ;;  %v1705_v39 = vadd.f32 %v1388_v1, %v859_v5 }
 0x1b3   :  { %v1390_v46 = vpop.f32.mrf.mxu1 }
 0x1b4   :  { %3612 = vpow2.f32 %v3017_v62  ;;  %v2986_v10 = vmul.f32 -1.442695, %v1705_v39  ;;  %v1929_v2 = vadd.f32 %v1390_v46, %v861_v41 }
 0x1b5   :  { %v1394_v55 = vpop.f32.mrf.mxu1 }
 0x1b6   :  { %3614 = vpow2.f32 %v2986_v10  ;;  %v3018_v54 = vmul.f32 -1.442695, %v1929_v2  ;;  %v1706_v63 = vadd.f32 %v1394_v55, %v865_v7  ;;  %v879_v7 = vadd.f32 %v4492_v34, %v4767_v28 }
 0x1b7   :  { %v1396_v30 = vpop.f32.mrf.mxu1  ;;  %v881_v10 = vadd.f32 %v4495_v36, %v4769_v16  ;;  %v885_v2 = vadd.f32 %v4501_v40, %v4767_v28  ;;  %v4805_v34 = vadd.f32 %v4510_v47, %v4769_v16  ;;  %v4809_v36 = vadd.f32 %v4516_v51, %v4767_v28 }
 0x1b8   :  { %3616 = vpow2.f32 %v3018_v54  ;;  %v2987_v17 = vmul.f32 -1.442695, %v1706_v63  ;;  %v1930_v61 = vadd.f32 %v1396_v30, %v867_v12  ;;  %v887_v54 = vadd.f32 %v4505_v43, %v4769_v16 }
 0x1b9   :  { %v1398_v5 = vpop.f32.mrf.mxu1  ;;  %v4813_v40 = vadd.f32 %v4520_v56, %v4769_v16  ;;  %v4821_v47 = vadd.f32 %v4525_v60, %v4769_v16  ;;  %v4825_v51 = vadd.f32 %v4531_v3, %v4767_v28  ;;  %v4837_v60 = vadd.f32 %v4540_v19, %v4769_v16  ;;  %v4839_v3 = vpop.f32.mrf.mxu0 }
 0x1ba   :  { %3618 = vpow2.f32 %v2987_v17  ;;  %v3019_v46 = vmul.f32 -1.442695, %v1930_v61  ;;  %v1707_v39 = vadd.f32 %v1398_v5, %v869_v14  ;;  %v4851_v19 = vadd.f32 %v4552_v37, %v4767_v28 }
 0x1bb   :  { %v1400_v1 = vpop.f32.mrf.mxu1  ;;  %v1577_v37 = vpop.f32.mrf.mxu0 }
 0x1bc   :  { %3620 = vpow2.f32 %v3019_v46  ;;  %v2988_v41 = vmul.f32 -1.442695, %v1707_v39  ;;  %v1931_v62 = vadd.f32 %v1400_v1, %v871_v18  ;;  %v4829_v39 = vadd.f32 %v4535_v9, %v4769_v16 }
 0x1bd   :  { %v1404_v25 = vpop.f32.mrf.mxu1  ;;  %v4843_v9 = vadd.f32 %v4546_v26, %v4767_v28  ;;  %v4859_v26 = vadd.f32 %v4561_v52, %v4767_v28  ;;  %v4871_v52 = vadd.f32 %v4570_v11, %v4769_v16  ;;  %v4887_v11 = vadd.f32 %v4585_v53, %v4769_v16 }
 0x1be   :  { %3622 = vpow2.f32 %v2988_v41  ;;  %v3020_v55 = vmul.f32 -1.442695, %v1931_v62  ;;  %v1708_v12 = vadd.f32 %v1404_v25, %v875_v21  ;;  %v4902_v53 = vadd.f32 %v4598_v0, %v4767_v28 }
 0x1bf   :  { %v3611_v29 = vpop.eup %3610  ;;  %v1406_v63 = vpop.f32.mrf.mxu1 }
 0x1c0   :  { %v1832_v30 = vadd.f32 1.0, %v3611_v29  ;;  %v2989_v14 = vmul.f32 -1.442695, %v1708_v12  ;;  %v1932_v17 = vadd.f32 %v1406_v63, %v877_v23  ;;  %3624 = vpow2.f32 %v3020_v55 }
 0x1c1   :  { %v3613_v43 = vpop.eup %3612  ;;  %v1408_v61 = vpop.f32.mrf.mxu1  ;;  %v4855_v29 = vadd.f32 %v4555_v42, %v4769_v16  ;;  %v4867_v42 = vadd.f32 %v4567_v4, %v4767_v28  ;;  %v4883_v4 = vadd.f32 %v4582_v48, %v4767_v28  ;;  %v4898_v48 = vadd.f32 %v4595_v22, %v4769_v16 }
 0x1c2   :  { %3626 = vrcp.f32 %v1832_v30  ;;  %v2056_v56 = vadd.f32 1.0, %v3613_v43  ;;  %v3021_v5 = vmul.f32 -1.442695, %v1932_v17  ;;  %v1709_v18 = vadd.f32 %v1408_v61, %v879_v7 }
 0x1c3   :  { %v3615_v46 = vpop.eup %3614  ;;  %3628 = vpow2.f32 %v2989_v14  ;;  %v1410_v1 = vpop.f32.mrf.mxu1  ;;  %v4879_v61 = vadd.f32 %v4580_v44, %v4769_v16 }
 0x1c4   :  { %3630 = vrcp.f32 %v2056_v56  ;;  %v1833_v21 = vadd.f32 1.0, %v3615_v46  ;;  %v2990_v41 = vmul.f32 -1.442695, %v1709_v18  ;;  %v1933_v62 = vadd.f32 %v1410_v1, %v881_v10  ;;  %v4893_v18 = vpop.f32.mrf.mxu0 }
 0x1c5   :  { %v3617_v23 = vpop.eup %3616  ;;  %3632 = vpow2.f32 %v3021_v5  ;;  %v1414_v7 = vpop.f32.mrf.mxu1 }
 0x1c6   :  { %3634 = vrcp.f32 %v1833_v21  ;;  %v2057_v25 = vadd.f32 1.0, %v3617_v23  ;;  %v3022_v55 = vmul.f32 -1.442695, %v1933_v62  ;;  %v1710_v12 = vadd.f32 %v1414_v7, %v885_v2 }
 0x1c7   :  { %v3619_v10 = vpop.eup %3618  ;;  %3636 = vpow2.f32 %v2990_v41  ;;  %v1416_v63 = vpop.f32.mrf.mxu1  ;;  %v4911_v41 = vld [vmem:[%s5748_s6] ss:$0 sm:$0xff] }
 0x1c8   :  { %3638 = vrcp.f32 %v2057_v25  ;;  %v1834_v30 = vadd.f32 1.0, %v3619_v10  ;;  %v2991_v14 = vmul.f32 -1.442695, %v1710_v12  ;;  %v1934_v2 = vadd.f32 %v1416_v63, %v887_v54  ;;  %v1580_v12 = vpop.f32.mrf.mxu0 }
 0x1c9   :  { %v3621_v17 = vpop.eup %3620  ;;  %3640 = vpow2.f32 %v3022_v55  ;;  %v1418_v43 = vpop.f32.mrf.mxu1  ;;  %v2159_v23 = vadd.f32 %v4911_v41, %v1577_v37  ;;  %v4917_v25 = vadd.f32 %v4609_v49, %v4767_v28  ;;  %v4925_v55 = vadd.f32 %v4620_v57, %v4767_v28 }
 0x1ca   :  { %3642 = vrcp.f32 %v1834_v30  ;;  %v3023_v54 = vmul.f32 -1.442695, %v1934_v2  ;;  %v1711_v56 = vadd.f32 %v1418_v43, %v889_v32  ;;  %v2058_v46 = vadd.f32 1.0, %v3621_v17 }
 0x1cb   :  { %v3623_v5 = vpop.eup %3622  ;;  %3644 = vpow2.f32 %v2991_v14  ;;  %v1420_v44 = vpop.f32.mrf.mxu1 }
 0x1cc   :  { %v1835_v1 = vadd.f32 1.0, %v3623_v5  ;;  %v2992_v32 = vmul.f32 -1.442695, %v1711_v56  ;;  %v1935_v21 = vadd.f32 %v1420_v44, %v4805_v34  ;;  %3646 = vpow2.f32 %v3023_v54  ;;  %v4933_v56 = vpop.f32.mrf.mxu0 }
 0x1cd   :  { %v1424_v62 = vpop.f32.mrf.mxu1  ;;  %v3625_v34 = vpop.eup %3624  ;;  %v2160_v54 = vadd.f32 %v4911_v41, %v1580_v12  ;;  %v4938_v44 = vadd.f32 %v4628_v20, %v4769_v16  ;;  %v2161_v20 = vadd.f32 %v4839_v3, %v4911_v41  ;;  %v5869_v3 = vld [vmem:[#allocation41_spill] sm:$0xff] }
 0x1ce   :  { %3648 = vrcp.f32 %v1835_v1  ;;  %v3024_v22 = vmul.f32 -1.442695, %v1935_v21  ;;  %v1712_v7 = vadd.f32 %v1424_v62, %v4809_v36  ;;  %v1048_v36 = vadd.f32 %v4643_v8, %v4681_v6  ;;  %v1593_v12 = vpop.f32.mrf.mxu0 }
 0x1cf   :  { %v3627_v0 = vpop.eup %3626  ;;  %3650 = vpow2.f32 %v2992_v32  ;;  %v1426_v10 = vpop.f32.mrf.mxu1  ;;  %v2059_v14 = vadd.f32 1.0, %v3625_v34  ;;  %v1051_v21 = vadd.f32 %v4649_v27, %v4681_v6  ;;  %v4948_v62 = vadd.f32 %v4641_v50, %v4769_v16 }
 0x1d0   :  { %v3629_v37 = vpop.eup %3628  ;;  %3652 = vrcp.f32 %v2058_v46  ;;  %v2191_v63 = vmul.f32 %v3627_v0, %v2159_v23  ;;  %v2993_v30 = vmul.f32 -1.442695, %v1712_v7  ;;  %v1936_v35 = vadd.f32 %v1426_v10, %v4813_v40 }
 0x1d1   :  { %v4929_v49 = vpop.eup %3630  ;;  %v1836_v2 = vadd.f32 1.0, %v3629_v37  ;;  %3654 = vpow2.f32 %v3024_v22  ;;  %v1428_v17 = vpop.f32.mrf.mxu1  ;;  %v4942_v46 = vadd.f32 %v4631_v38, %v4767_v28  ;;  %v5867_v37 = vld [vmem:[#allocation36_spill] sm:$0xff] }
 0x1d2   :  { %v3633_v57 = vpop.eup %3632  ;;  %v2223_v43 = vadd.f32 %v2191_v63, %v1048_v36  ;;  %3656 = vpow2.f32 %v2993_v30  ;;  %v1713_v8 = vadd.f32 %v1428_v17, %v4817_v45  ;;  %v3025_v23 = vmul.f32 -1.442695, %v1936_v35  ;;  %v5868_v63 = vld [vmem:[#allocation38_spill] sm:$0xff] }
 0x1d3   :  { %v3635_v5 = vpop.eup %3634  ;;  %3658 = vrcp.f32 %v1836_v2  ;;  %v2060_v40 = vadd.f32 1.0, %v3633_v57  ;;  %v1430_v1 = vpop.f32.mrf.mxu1  ;;  %v4957_v36 = vadd.f32 %v5867_v37, %v4767_v28  ;;  %v4961_v30 = vadd.f32 %v5868_v63, %v4769_v16  ;;  %v5870_v17 = vld [vmem:[#allocation34_spill] sm:$0xff] }
 0x1d4   :  { %v3637_v32 = vpop.eup %3636  ;;  %3660 = vtanh.f32 %v2223_v43  ;;  %v2192_v45 = vmul.f32 %v3635_v5, %v2160_v54  ;;  %v2994_v27 = vmul.f32 -1.442695, %v1713_v8  ;;  %v1937_v10 = vadd.f32 %v1430_v1, %v4821_v47  ;;  %v5871_v47 = vld [vmem:[#allocation44_spill] sm:$0xff]  ;;  %v5873_v8 = vld [vmem:[#allocation35_spill] sm:$0xff]  ;;  %v3440_v37 = vpop.f32.mrf.mxu0 }
 0x1d5   :  { %v4950_v34 = vpop.eup %3638  ;;  %3662 = vrcp.f32 %v2059_v14  ;;  %v1837_v38 = vadd.f32 1.0, %v3637_v32  ;;  %v1434_v22 = vpop.f32.mrf.mxu1  ;;  %v4965_v14 = vadd.f32 %v5869_v3, %v4767_v28  ;;  %v1056_v57 = vadd.f32 %v5870_v17, %v4681_v6  ;;  %v5874_v17 = vld [vmem:[#allocation37_spill] sm:$0xff] }
 0x1d6   :  { %v3641_v7 = vpop.eup %3640  ;;  %v2224_v0 = vadd.f32 %v2192_v45, %v1051_v21  ;;  %3664 = vrcp.f32 %v2060_v40  ;;  %v4971_v43 = vadd.f32 %v5871_v47, %v4769_v16  ;;  %v1059_v5 = vadd.f32 %v5873_v8, %v4681_v6 }
 0x1d7   :  { %v3643_v50 = vpop.eup %3642  ;;  %3666 = vrcp.f32 %v1837_v38  ;;  %v1436_v2 = vpop.f32.mrf.mxu1  ;;  %v2061_v40 = vadd.f32 1.0, %v3641_v7  ;;  %v2162_v38 = vadd.f32 %v4893_v18, %v4911_v41  ;;  %v3026_v63 = vmul.f32 -1.442695, %v1937_v10 }
 0x1d8   :  { %v3645_v35 = vpop.eup %3644  ;;  %5872 = vst [vmem:[#allocation36_spill] sm:$0xff] %v4971_v43  ;;  %v2193_v54 = vmul.f32 %v3643_v50, %v2161_v20  ;;  %3668 = vtanh.f32 %v2224_v0  ;;  %v4979_v20 = vadd.f32 %v5874_v17, %v4681_v6  ;;  %v5875_v0 = vld [vmem:[#allocation39_spill] sm:$0xff]  ;;  %v2165_v43 = vadd.f32 %v4933_v56, %v4911_v41 }
 0x1d9   :  { %v1838_v1 = vadd.f32 1.0, %v3645_v35  ;;  %3670 = vpow2.f32 %v3025_v23  ;;  %v1438_v32 = vpop.f32.mrf.mxu1  ;;  %v3647_v21 = vpop.eup %3646  ;;  %v1064_v50 = vadd.f32 %v5875_v0, %v4681_v6  ;;  %v1714_v23 = vadd.f32 %v1434_v22, %v4825_v51 }
 0x1da   :  { %v2225_v45 = vadd.f32 %v2193_v54, %v1056_v57  ;;  %3672 = vpow2.f32 %v2994_v27  ;;  %v5876_v57 = vld [vmem:[#allocation40_spill] sm:$0xff]  ;;  %v1938_v27 = vadd.f32 %v1436_v2, %v4829_v39  ;;  %v5877_v54 = vld [vmem:[#allocation42_spill] sm:$0xff]  ;;  %v2062_v17 = vadd.f32 1.0, %v3647_v21 }
 0x1db   :  { %v3649_v3 = vpop.eup %3648  ;;  %3674 = vrcp.f32 %v1838_v1  ;;  %v1440_v7 = vpop.f32.mrf.mxu1  ;;  %v4986_v47 = vadd.f32 %v5876_v57, %v4681_v6  ;;  %v1067_v8 = vadd.f32 %v5877_v54, %v4681_v6  ;;  %v2163_v57 = vadd.f32 %v4911_v41, %v1593_v12 }
 0x1dc   :  { %v3651_v35 = vpop.eup %3650  ;;  %3676 = vtanh.f32 %v2225_v45  ;;  %v2194_v18 = vmul.f32 %v3649_v3, %v2162_v38  ;;  %v1596_v45 = vpop.f32.mrf.mxu0  ;;  %v2995_v39 = vmul.f32 -1.442695, %v1714_v23  ;;  %v1715_v2 = vadd.f32 %v1438_v32, %v4833_v58 }
 0x1dd   :  { %v4989_v10 = vpop.eup %3652  ;;  %3678 = vrcp.f32 %v2061_v40  ;;  %v1839_v1 = vadd.f32 1.0, %v3651_v35  ;;  %v1444_v0 = vpop.f32.mrf.mxu1  ;;  %v2287_v40 = vsub.f32 1.0, %v4929_v49  ;;  %v3027_v54 = vmul.f32 -1.442695, %v1938_v27 }
 0x1de   :  { %v3655_v51 = vpop.eup %3654  ;;  %v2226_v22 = vadd.f32 %v2194_v18, %v1059_v5  ;;  %3680 = vpow2.f32 %v3026_v63  ;;  %v1939_v5 = vadd.f32 %v1440_v7, %v4837_v60  ;;  %v5000_v12 = vadd.f32 %v3440_v37, %v4911_v41 }
 0x1df   :  { %v3657_v38 = vpop.eup %3656  ;;  %3682 = vrcp.f32 %v1839_v1  ;;  %v1446_v3 = vpop.f32.mrf.mxu1  ;;  %v2164_v63 = vadd.f32 %v4911_v41, %v1596_v45  ;;  %v2063_v58 = vadd.f32 1.0, %v3655_v51  ;;  %v1716_v32 = vadd.f32 %v1444_v0, %v4843_v9 }
 0x1e0   :  { %v3659_v21 = vpop.eup %3658  ;;  %3684 = vtanh.f32 %v2226_v22  ;;  %v1840_v35 = vadd.f32 1.0, %v3657_v38  ;;  %v2996_v60 = vmul.f32 -1.442695, %v1715_v2  ;;  %v3028_v45 = vmul.f32 -1.442695, %v1939_v5 }
 0x1e1   :  { %v3661_v18 = vpop.eup %3660  ;;  %3686 = vrcp.f32 %v2062_v17  ;;  %v2195_v56 = vmul.f32 %v3659_v21, %v2163_v57  ;;  %v1448_v23 = vpop.f32.mrf.mxu1  ;;  %v5878_v17 = vld [vmem:[#allocation2_spill] sm:$0xff]  ;;  %v1940_v21 = vadd.f32 %v1446_v3, %v4847_v13  ;;  %v2288_v51 = vsub.f32 1.0, %v4950_v34 }
 0x1e2   :  { %v5003_v1 = vpop.eup %3662  ;;  %3688 = vrcp.f32 %v1840_v35  ;;  %v2319_v22 = vmul.f32 %v3661_v18, %v2287_v40  ;;  %v2351_v37 = vmul.f32 %v4929_v49, %v5878_v17  ;;  %v5016_v18 = vpop.f32.mrf.mxu0  ;;  %v2997_v49 = vmul.f32 -1.442695, %v1716_v32 }
 0x1e3   :  { %v5006_v38 = vpop.eup %3664  ;;  %v2227_v27 = vadd.f32 %v2195_v56, %v1064_v50  ;;  %3690 = vpow2.f32 %v2995_v39  ;;  %v1450_v7 = vpop.f32.mrf.mxu1  ;;  %v5879_v50 = vld [vmem:[#allocation3_spill] sm:$0xff]  ;;  %v2289_v13 = vsub.f32 1.0, %v4989_v10 }
 0x1e4   :  { %v3667_v57 = vpop.eup %3666  ;;  %3692 = vpow2.f32 %v3027_v54  ;;  %v5012_v40 = vadd.f32 %v2351_v37, %v2319_v22  ;;  %v2352_v39 = vmul.f32 %v4950_v34, %v5879_v50  ;;  %v1717_v54 = vadd.f32 %v1448_v23, %v4851_v19 }
 0x1e5   :  { %v3669_v35 = vpop.eup %3668  ;;  %3694 = vtanh.f32 %v2227_v27  ;;  %v2196_v9 = vmul.f32 %v3667_v57, %v2164_v63  ;;  %v1454_v0 = vpop.f32.mrf.mxu1  ;;  %v3029_v34 = vmul.f32 -1.442695, %v1940_v21 }
 0x1e6   :  { %v3671_v2 = vpop.eup %3670  ;;  %3696 = vrcp.f32 %v2063_v58  ;;  %v2415_v63 = vmul.f32 %v5012_v40, %v5012_v40  ;;  %v2320_v22 = vmul.f32 %v3669_v35, %v2288_v51  ;;  %v1941_v58 = vadd.f32 %v1450_v7, %v4855_v29  ;;  %v1609_v51 = vpop.f32.mrf.mxu0 }
 0x1e7   :  { %v3673_v3 = vpop.eup %3672  ;;  %v2228_v5 = vadd.f32 %v2196_v9, %v1067_v8  ;;  %3698 = vpow2.f32 %v2996_v60  ;;  %v1456_v56 = vpop.f32.mrf.mxu1  ;;  %v5880_v8 = vld [vmem:[#allocation4_spill] sm:$0xff]  ;;  %v2064_v9 = vadd.f32 1.0, %v3671_v2  ;;  %v2998_v35 = vmul.f32 -1.442695, %v1717_v54 }
 0x1e8   :  { %v3675_v27 = vpop.eup %3674  ;;  %v1841_v17 = vadd.f32 1.0, %v3673_v3  ;;  %3700 = vpow2.f32 %v3028_v45  ;;  %2447 = vadd.xlane.f32.xlu0 %v2415_v63  ;;  %v5023_v23 = vadd.f32 %v2352_v39, %v2320_v22  ;;  %v2353_v60 = vmul.f32 %v4989_v10, %v5880_v8  ;;  %v5881_v10 = vld [vmem:[#allocation45_spill] sm:$0xff] }
 0x1e9   :  { %v3677_v37 = vpop.eup %3676  ;;  %v2197_v32 = vmul.f32 %v3675_v27, %v2165_v43  ;;  %3702 = vtanh.f32 %v2228_v5  ;;  %v1458_v19 = vpop.f32.mrf.mxu1  ;;  %v1718_v45 = vadd.f32 %v1454_v0, %v4859_v26  ;;  %v1080_v3 = vadd.f32 %v5881_v10, %v4681_v6 }
 0x1ea   :  { %v5027_v57 = vpop.eup %3678  ;;  %3704 = vrcp.f32 %v1841_v17  ;;  %v2416_v7 = vmul.f32 %v5023_v23, %v5023_v23  ;;  %v2321_v50 = vmul.f32 %v3677_v37, %v2289_v13  ;;  %v3030_v2 = vmul.f32 -1.442695, %v1941_v58  ;;  %v5044_v58 = vpop.f32.mrf.mxu0 }
 0x1eb   :  { %v3681_v21 = vpop.eup %3680  ;;  %v2229_v29 = vadd.f32 %v2197_v32, %v4979_v20  ;;  %3706 = vpow2.f32 %v2997_v49  ;;  %v1460_v43 = vpop.f32.mrf.mxu1  ;;  %v2290_v5 = vsub.f32 1.0, %v5003_v1  ;;  %v2167_v20 = vadd.f32 %v4911_v41, %v1609_v51  ;;  %v5882_v32 = vld [vmem:[#allocation5_spill] sm:$0xff] }
 0x1ec   :  { %v3683_v39 = vpop.eup %3682  ;;  %3708 = vpow2.f32 %v3029_v34  ;;  %2449 = vadd.xlane.f32.xlu0 %v2416_v7  ;;  %v5038_v49 = vadd.f32 %v2353_v60, %v2321_v50  ;;  %v2999_v13 = vmul.f32 -1.442695, %v1718_v45  ;;  %v1942_v22 = vadd.f32 %v1456_v56, %v4863_v33  ;;  %v1612_v10 = vpop.f32.mrf.mxu0 }
 0x1ed   :  { %v3685_v54 = vpop.eup %3684  ;;  %3710 = vtanh.f32 %v2229_v29  ;;  %v2198_v26 = vmul.f32 %v3683_v39, %v5000_v12  ;;  %v1464_v0 = vpop.f32.mrf.mxu1  ;;  %v2354_v8 = vmul.f32 %v5003_v1, %v5882_v32  ;;  %v2065_v51 = vadd.f32 1.0, %v3681_v21 }
 0x1ee   :  { %v5040_v63 = vpop.eup %3686  ;;  %3712 = vrcp.f32 %v2064_v9  ;;  %v2322_v27 = vmul.f32 %v3685_v54, %v2290_v5  ;;  %v2417_v37 = vmul.f32 %v5038_v49, %v5038_v49  ;;  %v1719_v33 = vadd.f32 %v1458_v19, %v4867_v42  ;;  %v5883_v5 = vld [vmem:[#allocation6_spill] sm:$0xff] }
 0x1ef   :  { %v3689_v17 = vpop.eup %3688  ;;  %v2230_v34 = vadd.f32 %v2198_v26, %v4986_v47  ;;  %3714 = vpow2.f32 %v2998_v35  ;;  %v1466_v12 = vpop.f32.mrf.mxu1  ;;  %v2291_v35 = vsub.f32 1.0, %v5006_v38  ;;  %v3031_v39 = vmul.f32 -1.442695, %v1942_v22 }
 0x1f0   :  { %v3691_v60 = vpop.eup %3690  ;;  %v2199_v9 = vmul.f32 %v3689_v17, %v2167_v20  ;;  %3716 = vpow2.f32 %v3030_v2  ;;  %2451 = vadd.xlane.f32.xlu1 %v2417_v37  ;;  %v5051_v29 = vadd.f32 %v2354_v8, %v2322_v27  ;;  %v1943_v1 = vadd.f32 %v1460_v43, %v4871_v52 }
 0x1f1   :  { %v3693_v56 = vpop.eup %3692  ;;  %3718 = vtanh.f32 %v2230_v34  ;;  %v1842_v45 = vadd.f32 1.0, %v3691_v60  ;;  %v1468_v47 = vpop.f32.mrf.mxu1  ;;  %v2355_v54 = vmul.f32 %v5006_v38, %v5883_v5  ;;  %v2292_v17 = vsub.f32 1.0, %v5027_v57 }
 0x1f2   :  { %v3695_v7 = vpop.eup %3694  ;;  %v2231_v50 = vadd.f32 %v2199_v9, %v1080_v3  ;;  %3720 = vpow2.f32 %v2999_v13  ;;  %v2418_v19 = vmul.f32 %v5051_v29, %v5051_v29  ;;  %v2066_v20 = vadd.f32 1.0, %v3693_v56  ;;  %v5885_v56 = vld [vmem:[#allocation48_spill] sm:$0xff] }
 0x1f3   :  { %v5055_v21 = vpop.eup %3696  ;;  %3722 = vrcp.f32 %v1842_v45  ;;  %v1470_v42 = vpop.f32.mrf.mxu1  ;;  %v2323_v2 = vmul.f32 %v3695_v7, %v2291_v35  ;;  %v3000_v3 = vmul.f32 -1.442695, %v1719_v33  ;;  %v1720_v13 = vadd.f32 %v1464_v0, %v4875_v59 }
 0x1f4   :  { %v3699_v26 = vpop.eup %3698  ;;  %3724 = vrcp.f32 %v2065_v51  ;;  %2453 = vadd.xlane.f32.xlu1 %v2418_v19  ;;  %v2168_v37 = vadd.f32 %v4911_v41, %v1612_v10  ;;  %v3032_v38 = vmul.f32 -1.442695, %v1943_v1  ;;  %v1944_v32 = vadd.f32 %v1466_v12, %v4879_v61  ;;  %v5884_v51 = vld [vmem:[#allocation7_spill] sm:$0xff] }
 0x1f5   :  { %v3701_v22 = vpop.eup %3700  ;;  %3726 = vtanh.f32 %v2231_v50  ;;  %v1843_v52 = vadd.f32 1.0, %v3699_v26  ;;  %v1474_v43 = vpop.f32.mrf.mxu1  ;;  %v5062_v27 = vadd.f32 %v2355_v54, %v2323_v2  ;;  %v2356_v9 = vmul.f32 %v5027_v57, %v5884_v51  ;;  %v5886_v54 = vld [vmem:[#allocation43_spill] sm:$0xff] }
 0x1f6   :  { %v3703_v34 = vpop.eup %3702  ;;  %3728 = vpow2.f32 %v3031_v39  ;;  %v1083_v45 = vadd.f32 %v5885_v56, %v4681_v6  ;;  %v3001_v7 = vmul.f32 -1.442695, %v1720_v13  ;;  %v2067_v61 = vadd.f32 1.0, %v3701_v22 }
 0x1f7   :  { %v3705_v8 = vpop.eup %3704  ;;  %3730 = vrcp.f32 %v1843_v52  ;;  %v5067_v60 = vpop.f32.mrf.mxu1  ;;  %v2419_v59 = vmul.f32 %v5062_v27, %v5062_v27  ;;  %v2324_v0 = vmul.f32 %v3703_v34, %v2292_v17  ;;  %v1721_v57 = vadd.f32 %v1468_v47, %v4883_v4 }
 0x1f8   :  { %v3707_v33 = vpop.eup %3706  ;;  %3732 = vrcp.f32 %v2066_v20  ;;  %v2200_v35 = vmul.f32 %v3705_v8, %v2168_v37  ;;  %v2293_v2 = vsub.f32 1.0, %v5040_v63  ;;  %v1088_v26 = vadd.f32 %v5886_v54, %v4681_v6  ;;  %v5085_v20 = vpop.f32.mrf.mxu0  ;;  %v5887_v8 = vld [vmem:[#allocation8_spill] sm:$0xff] }
 0x1f9   :  { %v3709_v50 = vpop.eup %3708  ;;  %v1844_v12 = vadd.f32 1.0, %v3707_v33  ;;  %3734 = vpow2.f32 %v3000_v3  ;;  %2455 = vadd.xlane.f32.xlu0 %v2419_v59  ;;  %v5075_v39 = vpop.f32.mrf.mxu1  ;;  %v5077_v1 = vadd.f32 %v2356_v9, %v2324_v0  ;;  %v3033_v3 = vmul.f32 -1.442695, %v1944_v32 }
 0x1fa   :  { %v3711_v10 = vpop.eup %3710  ;;  %v2232_v19 = vadd.f32 %v2200_v35, %v1083_v45  ;;  %3736 = vpow2.f32 %v3032_v38  ;;  %v2068_v17 = vadd.f32 1.0, %v3709_v50  ;;  %v1945_v4 = vadd.f32 %v1470_v42, %v4887_v11  ;;  %v1625_v33 = vpop.f32.mrf.mxu0  ;;  %v5888_v50 = vld [vmem:[#allocation9_spill] sm:$0xff] }
 0x1fb   :  { %v5081_v5 = vpop.eup %3712  ;;  %3738 = vrcp.f32 %v1844_v12  ;;  %v5087_v13 = vpop.f32.mrf.mxu1  ;;  %v2420_v22 = vmul.f32 %v5077_v1, %v5077_v1  ;;  %v2325_v47 = vmul.f32 %v3711_v10, %v2293_v2  ;;  %v2357_v32 = vmul.f32 %v5040_v63, %v5887_v8 }
 0x1fc   :  { %v3715_v52 = vpop.eup %3714  ;;  %3740 = vtanh.f32 %v2232_v19  ;;  %v2294_v59 = vsub.f32 1.0, %v5055_v21  ;;  %v2169_v51 = vadd.f32 %v5016_v18, %v4911_v41  ;;  %v3002_v9 = vmul.f32 -1.442695, %v1721_v57 }
 0x1fd   :  { %v3717_v34 = vpop.eup %3716  ;;  %3742 = vrcp.f32 %v2067_v61  ;;  %v1845_v37 = vadd.f32 1.0, %v3715_v52  ;;  %2457 = vadd.xlane.f32.xlu1 %v2420_v22  ;;  %v5092_v38 = vpop.f32.mrf.mxu1  ;;  %v1722_v11 = vadd.f32 %v1474_v43, %v4891_v31  ;;  %v5102_v45 = vadd.f32 %v2357_v32, %v2325_v47 }
 0x1fe   :  { %v3719_v0 = vpop.eup %3718  ;;  %3744 = vpow2.f32 %v3001_v7  ;;  %v2358_v63 = vmul.f32 %v5055_v21, %v5888_v50  ;;  %v2170_v12 = vadd.f32 %v5044_v58, %v4911_v41  ;;  %v3034_v7 = vmul.f32 -1.442695, %v1945_v4 }
 0x1ff   :  { %v3721_v42 = vpop.eup %3720  ;;  %3746 = vrcp.f32 %v1845_v37  ;;  %v5100_v56 = vpop.f32.mrf.mxu1  ;;  %v2326_v35 = vmul.f32 %v3719_v0, %v2294_v59  ;;  %v2421_v43 = vmul.f32 %v5102_v45, %v5102_v45  ;;  %v2069_v21 = vadd.f32 1.0, %v3717_v34  ;;  %v5889_v34 = vld [vmem:[#allocation46_spill] sm:$0xff] }
 0x200   :  { %v3723_v61 = vpop.eup %3722  ;;  %3748 = vrcp.f32 %v2068_v17  ;;  %v1846_v18 = vadd.f32 1.0, %v3721_v42  ;;  %v3003_v54 = vmul.f32 -1.442695, %v1722_v11  ;;  %v1946_v58 = vadd.f32 %v5067_v60, %v4898_v48  ;;  %v5118_v17 = vpop.f32.mrf.mxu0  ;;  %v5891_v42 = vld [vmem:[#allocation47_spill] sm:$0xff] }
 0x201   :  { %v5108_v10 = vpop.eup %3724  ;;  %v2201_v31 = vmul.f32 %v3723_v61, %v2169_v51  ;;  %3750 = vpow2.f32 %v3033_v3  ;;  %v5112_v19 = vpop.f32.mrf.mxu1  ;;  %v5114_v57 = vadd.f32 %v2358_v63, %v2326_v35  ;;  %2459 = vadd.xlane.f32.xlu0 %v2421_v43  ;;  %v2295_v47 = vsub.f32 1.0, %v5081_v5  ;;  %v5890_v51 = vld [vmem:[#allocation10_spill] sm:$0xff] }
 0x202   :  { %v3727_v2 = vpop.eup %3726  ;;  %3752 = vrcp.f32 %v1846_v18  ;;  %v1091_v8 = vadd.f32 %v5889_v34, %v4681_v6  ;;  %v1723_v48 = vadd.f32 %v5075_v39, %v4902_v53  ;;  %v5137_v35 = vadd.f32 %v5891_v42, %v4767_v28 }
 0x203   :  { %v3729_v22 = vpop.eup %3728  ;;  %v2233_v52 = vadd.f32 %v2201_v31, %v1088_v26  ;;  %3754 = vpow2.f32 %v3002_v9  ;;  %v5120_v3 = vpop.f32.mrf.mxu1  ;;  %v2422_v4 = vmul.f32 %v5114_v57, %v5114_v57  ;;  %v2327_v0 = vmul.f32 %v3727_v2, %v2295_v47 }
 0x204   :  { %v3731_v37 = vpop.eup %3730  ;;  %v2070_v32 = vadd.f32 1.0, %v3729_v22  ;;  %3756 = vpow2.f32 %v3034_v7  ;;  %v2359_v9 = vmul.f32 %v5081_v5, %v5890_v51  ;;  %v2171_v50 = vadd.f32 %v4911_v41, %v1625_v33  ;;  %v5892_v5 = vld [vmem:[#allocation51_spill] sm:$0xff] }
 0x205   :  { %v5129_v60 = vpop.eup %3732  ;;  %3758 = vtanh.f32 %v2233_v52  ;;  %v2202_v26 = vmul.f32 %v3731_v37, %v2170_v12  ;;  %2461 = vadd.xlane.f32.xlu1 %v2422_v4  ;;  %v5131_v59 = vpop.f32.mrf.mxu1  ;;  %v3035_v53 = vmul.f32 -1.442695, %v1946_v58  ;;  %v1096_v43 = vadd.f32 %v5892_v5, %v4681_v6 }
 0x206   :  { %v3735_v11 = vpop.eup %3734  ;;  %3760 = vrcp.f32 %v2069_v21  ;;  %v1628_v12 = vpop.f32.mrf.mxu0  ;;  %v5142_v7 = vadd.f32 %v2359_v9, %v2327_v0  ;;  %v3004_v2 = vmul.f32 -1.442695, %v1723_v48  ;;  %v1724_v21 = vadd.f32 %v5092_v38, %v4917_v25  ;;  %v5893_v48 = vld [vmem:[#allocation11_spill] sm:$0xff] }
 0x207   :  { %v3737_v39 = vpop.eup %3736  ;;  %v2234_v63 = vadd.f32 %v2202_v26, %v1091_v8  ;;  %v1847_v61 = vadd.f32 1.0, %v3735_v11  ;;  %3762 = vpow2.f32 %v3003_v54  ;;  %v5140_v18 = vpop.f32.mrf.mxu1  ;;  %v2296_v52 = vsub.f32 1.0, %v5108_v10 }
 0x208   :  { %v3739_v31 = vpop.eup %3738  ;;  %3764 = vrcp.f32 %v2070_v32  ;;  %v2423_v22 = vmul.f32 %v5142_v7, %v5142_v7  ;;  %v2071_v47 = vadd.f32 1.0, %v3737_v39  ;;  %v2172_v37 = vadd.f32 %v4911_v41, %v1628_v12 }
 0x209   :  { %v3741_v33 = vpop.eup %3740  ;;  %3766 = vtanh.f32 %v2234_v63  ;;  %v2203_v58 = vmul.f32 %v3739_v31, %v2171_v50  ;;  %v5150_v54 = vpop.f32.mrf.mxu1  ;;  %v1947_v34 = vadd.f32 %v5087_v13, %v4906_v24  ;;  %v2360_v26 = vmul.f32 %v5108_v10, %v5893_v48  ;;  %v5894_v24 = vld [vmem:[#allocation54_spill] sm:$0xff] }
 0x20a   :  { %v5153_v4 = vpop.eup %3742  ;;  %3768 = vrcp.f32 %v1847_v61  ;;  %2463 = vadd.xlane.f32.xlu0 %v2423_v22  ;;  %v2328_v32 = vmul.f32 %v3741_v33, %v2296_v52  ;;  %v3005_v9 = vmul.f32 -1.442695, %v1724_v21  ;;  %v1948_v11 = vadd.f32 %v5100_v56, %v4921_v15  ;;  %v5895_v61 = vld [vmem:[#allocation49_spill] sm:$0xff]  ;;  %v5897_v48 = vld [vmem:[#allocation50_spill] sm:$0xff] }
 0x20b   :  { %v3745_v25 = vpop.eup %3744  ;;  %v2235_v38 = vadd.f32 %v2203_v58, %v1096_v43  ;;  %3770 = vpow2.f32 %v3035_v53  ;;  %v5158_v8 = vpop.f32.mrf.mxu1  ;;  %v1099_v13 = vadd.f32 %v5894_v24, %v4681_v6  ;;  %v5176_v12 = vadd.f32 %v5895_v61, %v4769_v16  ;;  %v5896_v6 = vld [vmem:[#allocation52_spill] sm:$0xff] }
 0x20c   :  { %v3747_v0 = vpop.eup %3746  ;;  %v1848_v51 = vadd.f32 1.0, %v3745_v25  ;;  %3772 = vpow2.f32 %v3004_v2  ;;  %v5168_v53 = vpop.f32.mrf.mxu0  ;;  %v5170_v39 = vadd.f32 %v2360_v26, %v2328_v32  ;;  %v2173_v15 = vadd.f32 %v5085_v20, %v4911_v41 }
 0x20d   :  { %v5164_v42 = vpop.eup %3748  ;;  %3774 = vtanh.f32 %v2235_v38  ;;  %v2204_v50 = vmul.f32 %v3747_v0, %v2172_v37  ;;  %v5172_v63 = vpop.f32.mrf.mxu1  ;;  %v3036_v56 = vmul.f32 -1.442695, %v1947_v34  ;;  %v5182_v5 = vadd.f32 %v5896_v6, %v4767_v28 }
 0x20e   :  { %v3751_v10 = vpop.eup %3750  ;;  %3776 = vrcp.f32 %v1848_v51  ;;  %v2424_v2 = vmul.f32 %v5170_v39, %v5170_v39  ;;  %v3037_v22 = vmul.f32 -1.442695, %v1948_v11  ;;  %v1725_v20 = vadd.f32 %v5112_v19, %v4925_v55  ;;  %v1641_v25 = vpop.f32.mrf.mxu0  ;;  %v5898_v11 = vld [vmem:[#allocation12_spill] sm:$0xff] }
 0x20f   :  { %v3753_v31 = vpop.eup %3752  ;;  %3778 = vrcp.f32 %v2071_v47  ;;  %v2236_v43 = vadd.f32 %v2204_v50, %v1099_v13  ;;  %v5186_v21 = vpop.f32.mrf.mxu1  ;;  %v2072_v37 = vadd.f32 1.0, %v3751_v10  ;;  %v2297_v47 = vsub.f32 1.0, %v5129_v60 }
 0x210   :  { %v3755_v33 = vpop.eup %3754  ;;  %v2205_v58 = vmul.f32 %v3753_v31, %v2173_v15  ;;  %3780 = vpow2.f32 %v3005_v9  ;;  %2465 = vadd.xlane.f32.xlu1 %v2424_v2  ;;  %v1949_v0 = vadd.f32 %v5120_v3, %v4938_v44  ;;  %v1726_v55 = vadd.f32 %v5131_v59, %v4942_v46  ;;  %v5210_v59 = vpop.f32.mrf.mxu0 }
 0x211   :  { %v3757_v52 = vpop.eup %3756  ;;  %3782 = vtanh.f32 %v2236_v43  ;;  %v1849_v34 = vadd.f32 1.0, %v3755_v33  ;;  %v5191_v38 = vpop.f32.mrf.mxu1  ;;  %v2174_v51 = vadd.f32 %v5118_v17, %v4911_v41  ;;  %v2361_v24 = vmul.f32 %v5129_v60, %v5898_v11  ;;  %v5899_v33 = vld [vmem:[#allocation13_spill] sm:$0xff] }
 0x212   :  { %v3759_v32 = vpop.eup %3758  ;;  %v2237_v26 = vadd.f32 %v2205_v58, %v5897_v48  ;;  %3784 = vpow2.f32 %v3036_v56  ;;  %v2073_v10 = vadd.f32 1.0, %v3757_v52  ;;  %v3006_v61 = vmul.f32 -1.442695, %v1725_v20 }
 0x213   :  { %v5198_v19 = vpop.eup %3760  ;;  %3786 = vrcp.f32 %v1849_v34  ;;  %v2329_v9 = vmul.f32 %v3759_v32, %v2297_v47  ;;  %v5204_v13 = vpop.f32.mrf.mxu1  ;;  %v1950_v44 = vadd.f32 %v5140_v18, %v4948_v62  ;;  %v2298_v15 = vsub.f32 1.0, %v5153_v4 }
 0x214   :  { %v3763_v50 = vpop.eup %3762  ;;  %3788 = vtanh.f32 %v2237_v26  ;;  %v2175_v31 = vadd.f32 %v4911_v41, %v1641_v25  ;;  %v3038_v6 = vmul.f32 -1.442695, %v1949_v0  ;;  %v3007_v43 = vmul.f32 -1.442695, %v1726_v55  ;;  %v5900_v0 = vld [vmem:[#allocation53_spill] sm:$0xff] }
 0x215   :  { %v5208_v46 = vpop.eup %3764  ;;  %3790 = vrcp.f32 %v2072_v37  ;;  %v1850_v3 = vadd.f32 1.0, %v3763_v50  ;;  %v5212_v17 = vadd.f32 %v2361_v24, %v2329_v9  ;;  %v5215_v60 = vpop.f32.mrf.mxu1  ;;  %v2362_v58 = vmul.f32 %v5153_v4, %v5899_v33  ;;  %v5901_v9 = vld [vmem:[#allocation14_spill] sm:$0xff] }
 0x216   :  { %v3767_v56 = vpop.eup %3766  ;;  %3792 = vpow2.f32 %v3037_v22  ;;  %v3039_v37 = vmul.f32 -1.442695, %v1950_v44  ;;  %v1727_v34 = vadd.f32 %v5150_v54, %v4957_v36  ;;  %v1644_v22 = vpop.f32.mrf.mxu0  ;;  %v1951_v47 = vadd.f32 %v5158_v8, %v4961_v30 }
 0x217   :  { %v3769_v2 = vpop.eup %3768  ;;  %3794 = vrcp.f32 %v1850_v3  ;;  %v2425_v62 = vmul.f32 %v5212_v17, %v5212_v17  ;;  %v2330_v18 = vmul.f32 %v3767_v56, %v2298_v15  ;;  %v5228_v48 = vpop.f32.mrf.mxu1  ;;  %v2299_v4 = vsub.f32 1.0, %v5164_v42 }
 0x218   :  { %v3771_v20 = vpop.eup %3770  ;;  %v2206_v52 = vmul.f32 %v3769_v2, %v2174_v51  ;;  %3796 = vrcp.f32 %v2073_v10  ;;  %v2363_v36 = vmul.f32 %v5164_v42, %v5901_v9  ;;  %v2176_v10 = vadd.f32 %v4911_v41, %v1644_v22 }
 0x219   :  { %v3773_v25 = vpop.eup %3772  ;;  %3798 = vpow2.f32 %v3006_v61  ;;  %2467 = vadd.xlane.f32.xlu0 %v2425_v62  ;;  %v5226_v32 = vadd.f32 %v2362_v58, %v2330_v18  ;;  %v2074_v11 = vadd.f32 1.0, %v3771_v20  ;;  %v1728_v61 = vadd.f32 %v5172_v63, %v4965_v14  ;;  %v5243_v15 = vpop.f32.mrf.mxu1 }
 0x21a   :  { %v3775_v26 = vpop.eup %3774  ;;  %v2238_v55 = vadd.f32 %v2206_v52, %v5900_v0  ;;  %v1851_v51 = vadd.f32 1.0, %v3773_v25  ;;  %3800 = vpow2.f32 %v3038_v6  ;;  %v3008_v3 = vmul.f32 -1.442695, %v1727_v34  ;;  %v5904_v25 = vld [vmem:[#allocation15_spill] sm:$0xff] }
 0x21b   :  { %v3777_v54 = vpop.eup %3776  ;;  %3802 = vpow2.f32 %v3007_v43  ;;  %v2426_v30 = vmul.f32 %v5226_v32, %v5226_v32  ;;  %v2331_v8 = vmul.f32 %v3775_v26, %v2299_v4  ;;  %v2300_v56 = vsub.f32 1.0, %v5198_v19  ;;  %v5902_v43 = vld [vmem:[#allocation57_spill] sm:$0xff] }
 0x21c   :  { %v5236_v24 = vpop.eup %3778  ;;  %3804 = vtanh.f32 %v2238_v55  ;;  %v2207_v50 = vmul.f32 %v3777_v54, %v2175_v31  ;;  %v5903_v31 = vld [vmem:[#allocation36_spill] sm:$0xff]  ;;  %v3040_v14 = vmul.f32 -1.442695, %v1951_v47  ;;  %v3009_v52 = vmul.f32 -1.442695, %v1728_v61  ;;  %v5257_v47 = vpop.f32.mrf.mxu1 }
 0x21d   :  { %v3781_v44 = vpop.eup %3780  ;;  %3806 = vrcp.f32 %v1851_v51  ;;  %2469 = vadd.xlane.f32.xlu1 %v2426_v30  ;;  %v5241_v42 = vadd.f32 %v2363_v36, %v2331_v8  ;;  %v1952_v18 = vadd.f32 %v5186_v21, %v5903_v31  ;;  %v1729_v34 = vadd.f32 %v5191_v38, %v5137_v35  ;;  %v5269_v8 = vpop.f32.mrf.mxu0 }
 0x21e   :  { %v3783_v6 = vpop.eup %3782  ;;  %v2239_v2 = vadd.f32 %v2207_v50, %v5902_v43  ;;  %v1852_v62 = vadd.f32 1.0, %v3781_v44  ;;  %3808 = vpow2.f32 %v3039_v37  ;;  %v2364_v22 = vmul.f32 %v5198_v19, %v5904_v25  ;;  %v5905_v19 = vld [vmem:[#allocation60_spill] sm:$0xff]  ;;  %v5908_v44 = vld [vmem:[#allocation58_spill] sm:$0xff] }
 0x21f   :  { %v3785_v33 = vpop.eup %3784  ;;  %3810 = vrcp.f32 %v2074_v11  ;;  %v2427_v63 = vmul.f32 %v5241_v42, %v5241_v42  ;;  %v2332_v58 = vmul.f32 %v3783_v6, %v2300_v56  ;;  %v2177_v21 = vadd.f32 %v5168_v53, %v4911_v41  ;;  %v5906_v41 = vld [vmem:[#allocation16_spill] sm:$0xff]  ;;  %v5907_v11 = vld [vmem:[#allocation55_spill] sm:$0xff]  ;;  %v5277_v6 = vpop.f32.mrf.mxu1 }
 0x220   :  { %v3787_v20 = vpop.eup %3786  ;;  %3812 = vtanh.f32 %v2239_v2  ;;  %v2301_v26 = vsub.f32 1.0, %v5208_v46  ;;  %v2075_v55 = vadd.f32 1.0, %v3785_v33  ;;  %v3041_v51 = vmul.f32 -1.442695, %v1952_v18  ;;  %v5909_v33 = vld [vmem:[#allocation56_spill] sm:$0xff] }
 0x221   :  { %v3789_v37 = vpop.eup %3788  ;;  %v2208_v4 = vmul.f32 %v3787_v20, %v2176_v10  ;;  %3814 = vrcp.f32 %v1852_v62  ;;  %2471 = vadd.xlane.f32.xlu0 %v2427_v63  ;;  %v5262_v35 = vadd.f32 %v2364_v22, %v2332_v58  ;;  %v2365_v53 = vmul.f32 %v5208_v46, %v5906_v41  ;;  %v5911_v25 = vld [vmem:[#allocation64_spill] sm:$0xff]  ;;  %v5298_v22 = vld [vmem:[%s5748_s6] ss:$0 sm:$0xff] }
 0x222   :  { %v5260_v0 = vpop.eup %3790  ;;  %3816 = vpow2.f32 %v3008_v3  ;;  %v2333_v36 = vmul.f32 %v3789_v37, %v2301_v26  ;;  %v987_v30 = vadd.f32 %v5907_v11, %v4769_v16  ;;  %v3010_v50 = vmul.f32 -1.442695, %v1729_v34  ;;  %v5302_v26 = vpop.f32.mrf.mxu1 }
 0x223   :  { %v3793_v38 = vpop.eup %3792  ;;  %v2240_v9 = vadd.f32 %v2208_v4, %v5905_v19  ;;  %3818 = vpow2.f32 %v3040_v14  ;;  %v2428_v10 = vmul.f32 %v5262_v35, %v5262_v35  ;;  %v989_v3 = vadd.f32 %v5908_v44, %v4767_v28  ;;  %v5912_v19 = vld [vmem:[#allocation17_spill] sm:$0xff] }
 0x224   :  { %v3795_v54 = vpop.eup %3794  ;;  %3820 = vpow2.f32 %v3009_v52  ;;  %v5279_v46 = vadd.f32 %v2365_v53, %v2333_v36  ;;  %v2076_v2 = vadd.f32 1.0, %v3793_v38  ;;  %v1953_v62 = vadd.f32 %v5204_v13, %v5176_v12  ;;  %v5910_v52 = vld [vmem:[#allocation61_spill] sm:$0xff]  ;;  %v1657_v13 = vpop.f32.mrf.mxu0 }
 0x225   :  { %v5273_v61 = vpop.eup %3796  ;;  %v2209_v56 = vmul.f32 %v3795_v54, %v2177_v21  ;;  %3822 = vtanh.f32 %v2240_v9  ;;  %v1730_v31 = vadd.f32 %v5215_v60, %v5182_v5  ;;  %2473 = vadd.xlane.f32.xlu1 %v2428_v10  ;;  %v5290_v34 = vadd.f32 %v5910_v52, %v4769_v16  ;;  %v5916_v52 = vld [vmem:[#allocation70_spill] sm:$0xff] }
 0x226   :  { %v3799_v43 = vpop.eup %3798  ;;  %3824 = vrcp.f32 %v2075_v55  ;;  %v2429_v58 = vmul.f32 %v5279_v46, %v5279_v46  ;;  %v995_v12 = vadd.f32 %v5911_v25, %v4767_v28  ;;  %v2302_v5 = vsub.f32 1.0, %v5236_v24 }
 0x227   :  { %v3801_v18 = vpop.eup %3800  ;;  %v2241_v14 = vadd.f32 %v2209_v56, %v5909_v33  ;;  %v1853_v63 = vadd.f32 1.0, %v3799_v43  ;;  %3826 = vpow2.f32 %v3041_v51  ;;  %v2178_v37 = vadd.f32 %v5298_v22, %v5210_v59  ;;  %v5913_v56 = vld [vmem:[#allocation59_spill] sm:$0xff] }
 0x228   :  { %v3803_v20 = vpop.eup %3802  ;;  %3828 = vpow2.f32 %v3010_v50  ;;  %v2077_v21 = vadd.f32 1.0, %v3801_v18  ;;  %2475 = vadd.xlane.f32.xlu0 %v2429_v58  ;;  %v3042_v51 = vmul.f32 -1.442695, %v1953_v62  ;;  %v2366_v9 = vmul.f32 %v5236_v24, %v5912_v19  ;;  %v5314_v62 = vpop.f32.mrf.mxu0  ;;  %v5915_v58 = vld [vmem:[#allocation67_spill] sm:$0xff] }
 0x229   :  { %v3805_v60 = vpop.eup %3804  ;;  %3830 = vtanh.f32 %v2241_v14  ;;  %v1854_v4 = vadd.f32 1.0, %v3803_v20  ;;  %v2179_v53 = vadd.f32 %v5298_v22, %v1657_v13  ;;  %v3011_v54 = vmul.f32 -1.442695, %v1730_v31  ;;  %v1528_v18 = vpop.f32.mrf.mxu1 }
 0x22a   :  { %v3807_v55 = vpop.eup %3806  ;;  %3832 = vrcp.f32 %v1853_v63  ;;  %v2334_v38 = vmul.f32 %v3805_v60, %v2302_v5  ;;  %v1954_v59 = vadd.f32 %v5228_v48, %v987_v30  ;;  %v2303_v10 = vsub.f32 1.0, %v5260_v0  ;;  %v5914_v30 = vld [vmem:[#allocation18_spill] sm:$0xff] }
 0x22b   :  { %v3809_v36 = vpop.eup %3808  ;;  %v2210_v41 = vmul.f32 %v3807_v55, %v2178_v37  ;;  %3834 = vrcp.f32 %v2076_v2  ;;  %v1731_v2 = vadd.f32 %v5243_v15, %v989_v3  ;;  %v2367_v14 = vmul.f32 %v5260_v0, %v5914_v30 }
 0x22c   :  { %v5307_v11 = vpop.eup %3810  ;;  %3836 = vrcp.f32 %v1854_v4  ;;  %v5310_v50 = vadd.f32 %v2366_v9, %v2334_v38  ;;  %v2078_v24 = vadd.f32 1.0, %v3809_v36  ;;  %v997_v20 = vadd.f32 %v5915_v58, %v4769_v16  ;;  %v1660_v4 = vpop.f32.mrf.mxu0 }
 0x22d   :  { %v3813_v44 = vpop.eup %3812  ;;  %v2242_v43 = vadd.f32 %v2210_v41, %v5913_v56  ;;  %3838 = vrcp.f32 %v2077_v21  ;;  %v999_v25 = vadd.f32 %v5916_v52, %v4767_v28  ;;  %v3043_v5 = vmul.f32 -1.442695, %v1954_v59  ;;  %v5917_v21 = vld [vmem:[#allocation63_spill] sm:$0xff] }
 0x22e   :  { %v3815_v31 = vpop.eup %3814  ;;  %3840 = vpow2.f32 %v3042_v51  ;;  %v2430_v33 = vmul.f32 %v5310_v50, %v5310_v50  ;;  %v2335_v48 = vmul.f32 %v3813_v44, %v2303_v10  ;;  %v3012_v55 = vmul.f32 -1.442695, %v1731_v2  ;;  %v1530_v51 = vpop.f32.mrf.mxu1  ;;  %v5919_v44 = vld [vmem:[#allocation19_spill] sm:$0xff] }
 0x22f   :  { %v3817_v63 = vpop.eup %3816  ;;  %3842 = vtanh.f32 %v2242_v43  ;;  %v2211_v13 = vmul.f32 %v3815_v31, %v2179_v53  ;;  %v2304_v38 = vsub.f32 1.0, %v5273_v61  ;;  %v1732_v36 = vadd.f32 %v5277_v6, %v995_v12 }
 0x230   :  { %v3819_v15 = vpop.eup %3818  ;;  %v1855_v3 = vadd.f32 1.0, %v3817_v63  ;;  %3844 = vpow2.f32 %v3011_v54  ;;  %2477 = vadd.xlane.f32.xlu1 %v2430_v33  ;;  %v5325_v60 = vadd.f32 %v2367_v14, %v2335_v48  ;;  %v5918_v54 = vld [vmem:[#allocation73_spill] sm:$0xff]  ;;  %v2368_v56 = vmul.f32 %v5273_v61, %v5919_v44  ;;  %v5343_v48 = vpop.f32.mrf.mxu0 }
 0x231   :  { %v3821_v37 = vpop.eup %3820  ;;  %3846 = vrcp.f32 %v2078_v24  ;;  %v2243_v0 = vadd.f32 %v2211_v13, %v5917_v21  ;;  %v1001_v59 = vadd.f32 %v5918_v54, %v4769_v16  ;;  %v5920_v24 = vld [vmem:[#allocation76_spill] sm:$0xff]  ;;  %v2180_v31 = vadd.f32 %v5298_v22, %v1660_v4  ;;  %v1534_v30 = vpop.f32.mrf.mxu1 }
 0x232   :  { %v3823_v19 = vpop.eup %3822  ;;  %3848 = vrcp.f32 %v1855_v3  ;;  %v1856_v9 = vadd.f32 1.0, %v3821_v37  ;;  %v2431_v41 = vmul.f32 %v5325_v60, %v5325_v60  ;;  %v1005_v2 = vadd.f32 %v5920_v24, %v4767_v28  ;;  %v5924_v24 = vld [vmem:[#allocation62_spill] sm:$0xff] }
 0x233   :  { %v5332_v53 = vpop.eup %3824  ;;  %3850 = vtanh.f32 %v2243_v0  ;;  %v2336_v10 = vmul.f32 %v3823_v19, %v2304_v38  ;;  %v1955_v6 = vadd.f32 %v5257_v47, %v5290_v34  ;;  %v2079_v33 = vadd.f32 1.0, %v3819_v15  ;;  %v5921_v15 = vld [vmem:[#allocation20_spill] sm:$0xff] }
 0x234   :  { %v3827_v43 = vpop.eup %3826  ;;  %3852 = vpow2.f32 %v3043_v5  ;;  %2479 = vadd.xlane.f32.xlu0 %v2431_v41  ;;  %v2305_v61 = vsub.f32 1.0, %v5307_v11  ;;  %v3013_v52 = vmul.f32 -1.442695, %v1732_v36  ;;  %v1733_v13 = vadd.f32 %v1528_v18, %v999_v25  ;;  %v5922_v0 = vld [vmem:[#allocation80_spill] sm:$0xff]  ;;  %v1673_v18 = vpop.f32.mrf.mxu0 }
 0x235   :  { %v3829_v12 = vpop.eup %3828  ;;  %3854 = vrcp.f32 %v1856_v9  ;;  %v5345_v14 = vadd.f32 %v2368_v56, %v2336_v10  ;;  %v2080_v5 = vadd.f32 1.0, %v3827_v43  ;;  %v2369_v37 = vmul.f32 %v5307_v11, %v5921_v15  ;;  %v5357_v36 = vpop.f32.mrf.mxu1 }
 0x236   :  { %v3831_v63 = vpop.eup %3830  ;;  %v1857_v58 = vadd.f32 1.0, %v3829_v12  ;;  %3856 = vpow2.f32 %v3012_v55  ;;  %v1009_v4 = vadd.f32 %v5922_v0, %v4767_v28  ;;  %v2181_v38 = vadd.f32 %v5298_v22, %v5269_v8  ;;  %v5923_v28 = vld [vmem:[#allocation66_spill] sm:$0xff] }
 0x237   :  { %v3833_v3 = vpop.eup %3832  ;;  %v2432_v47 = vmul.f32 %v5345_v14, %v5345_v14  ;;  %v2337_v34 = vmul.f32 %v3831_v63, %v2305_v61  ;;  %v3044_v25 = vmul.f32 -1.442695, %v1955_v6  ;;  %v1956_v9 = vadd.f32 %v5302_v26, %v997_v20  ;;  %v5370_v61 = vpop.f32.mrf.mxu0 }
 0x238   :  { %v3835_v21 = vpop.eup %3834  ;;  %v2212_v19 = vmul.f32 %v3833_v3, %v2180_v31  ;;  %3858 = vrcp.f32 %v1857_v58  ;;  %v3014_v8 = vmul.f32 -1.442695, %v1733_v13  ;;  %v1734_v56 = vadd.f32 %v1534_v30, %v1005_v2  ;;  %v1538_v58 = vpop.f32.mrf.mxu1  ;;  %v5925_v30 = vld [vmem:[#allocation21_spill] sm:$0xff] }
 0x239   :  { %v3837_v55 = vpop.eup %3836  ;;  %3860 = vrcp.f32 %v2079_v33  ;;  %2481 = vadd.xlane.f32.xlu1 %v2432_v47  ;;  %v5359_v41 = vadd.f32 %v2369_v37, %v2337_v34  ;;  %v2306_v26 = vsub.f32 1.0, %v5332_v53  ;;  %v2182_v6 = vadd.f32 %v5298_v22, %v5314_v62 }
 0x23a   :  { %v5361_v11 = vpop.eup %3838  ;;  %v2213_v54 = vmul.f32 %v3837_v55, %v2181_v38  ;;  %v2244_v10 = vadd.f32 %v2212_v19, %v5923_v28  ;;  %3862 = vpow2.f32 %v3013_v52  ;;  %v1957_v12 = vadd.f32 %v1530_v51, %v1001_v59  ;;  %v5927_v28 = vld [vmem:[#allocation65_spill] sm:$0xff] }
 0x23b   :  { %v3841_v44 = vpop.eup %3840  ;;  %3864 = vrcp.f32 %v2080_v5  ;;  %v2433_v43 = vmul.f32 %v5359_v41, %v5359_v41  ;;  %v3045_v63 = vmul.f32 -1.442695, %v1956_v9  ;;  %v2370_v52 = vmul.f32 %v5332_v53, %v5925_v30  ;;  %v1676_v53 = vpop.f32.mrf.mxu0  ;;  %v5926_v9 = vld [vmem:[#allocation22_spill] sm:$0xff] }
 0x23c   :  { %v3843_v20 = vpop.eup %3842  ;;  %v2245_v31 = vadd.f32 %v2213_v54, %v5924_v24  ;;  %3866 = vtanh.f32 %v2244_v10  ;;  %v2081_v3 = vadd.f32 1.0, %v3841_v44  ;;  %v2183_v62 = vadd.f32 %v5298_v22, %v1673_v18  ;;  %v5928_v44 = vld [vmem:[#allocation79_spill] sm:$0xff] }
 0x23d   :  { %v3845_v33 = vpop.eup %3844  ;;  %3868 = vpow2.f32 %v3044_v25  ;;  %2483 = vadd.xlane.f32.xlu0 %v2433_v43  ;;  %v2338_v2 = vmul.f32 %v3843_v20, %v2306_v26  ;;  %v3015_v51 = vmul.f32 -1.442695, %v1734_v56  ;;  %v2307_v34 = vsub.f32 1.0, %v3835_v21 }
 0x23e   :  { %v5374_v13 = vpop.eup %3846  ;;  %3870 = vtanh.f32 %v2245_v31  ;;  %v1858_v5 = vadd.f32 1.0, %v3845_v33  ;;  %v3046_v0 = vmul.f32 -1.442695, %v1957_v12  ;;  %v1735_v38 = vadd.f32 %v1538_v58, %v1009_v4 }
 0x23f   :  { %v3849_v47 = vpop.eup %3848  ;;  %3872 = vpow2.f32 %v3014_v8  ;;  %v5377_v59 = vadd.f32 %v2370_v52, %v2338_v2  ;;  %v2371_v18 = vmul.f32 %v3835_v21, %v5926_v9  ;;  %v1007_v56 = vadd.f32 %v5928_v44, %v4769_v16  ;;  %v5929_v21 = vld [vmem:[#allocation69_spill] sm:$0xff]  ;;  %v5930_v52 = vld [vmem:[#allocation72_spill] sm:$0xff] }
 0x240   :  { %v3851_v15 = vpop.eup %3850  ;;  %v2214_v37 = vmul.f32 %v3849_v47, %v2182_v6  ;;  %3874 = vrcp.f32 %v1858_v5  ;;  %v2184_v20 = vadd.f32 %v5298_v22, %v1676_v53  ;;  %v3016_v24 = vmul.f32 -1.442695, %v1735_v38  ;;  %v5932_v53 = vld [vmem:[#allocation23_spill] sm:$0xff] }
 0x241   :  { %v3853_v19 = vpop.eup %3852  ;;  %3876 = vpow2.f32 %v3045_v63  ;;  %v2434_v55 = vmul.f32 %v5377_v59, %v5377_v59  ;;  %v2339_v25 = vmul.f32 %v3851_v15, %v2307_v34  ;;  %v1958_v12 = vadd.f32 %v5357_v36, %v1007_v56  ;;  %v5931_v36 = vld [vmem:[#allocation81_spill] sm:$0xff] }
 0x242   :  { %v3855_v54 = vpop.eup %3854  ;;  %v2246_v10 = vadd.f32 %v2214_v37, %v5927_v28  ;;  %3878 = vrcp.f32 %v2081_v3  ;;  %v2308_v47 = vsub.f32 1.0, %v5361_v11  ;;  %v1011_v34 = vadd.f32 %v5931_v36, %v4769_v16 }
 0x243   :  { %v3857_v8 = vpop.eup %3856  ;;  %v2215_v43 = vmul.f32 %v3855_v54, %v2183_v62  ;;  %3880 = vpow2.f32 %v3015_v51  ;;  %2485 = vadd.xlane.f32.xlu1 %v2434_v55  ;;  %v5385_v4 = vadd.f32 %v2371_v18, %v2339_v25  ;;  %v1540_v62 = vpop.f32.mrf.mxu1  ;;  %v2082_v15 = vadd.f32 1.0, %v3853_v19 }
 0x244   :  { %3882 = vtanh.f32 %v2246_v10  ;;  %v1859_v26 = vadd.f32 1.0, %v3857_v8  ;;  %v3047_v37 = vmul.f32 -1.442695, %v1958_v12  ;;  %v2372_v55 = vmul.f32 %v5361_v11, %v5932_v53  ;;  %v5401_v10 = vpop.f32.mrf.mxu0  ;;  %v5933_v8 = vld [vmem:[#allocation24_spill] sm:$0xff] }
 0x245   :  { %v3859_v31 = vpop.eup %3858  ;;  %v2247_v6 = vadd.f32 %v2215_v43, %v5929_v21  ;;  %3884 = vpow2.f32 %v3046_v0  ;;  %v2435_v33 = vmul.f32 %v5385_v4, %v5385_v4  ;;  %v2309_v25 = vsub.f32 1.0, %v5374_v13  ;;  %v5934_v12 = vld [vmem:[#allocation68_spill] sm:$0xff] }
 0x246   :  { %v3861_v63 = vpop.eup %3860  ;;  %3886 = vrcp.f32 %v1859_v26  ;;  %v2216_v58 = vmul.f32 %v3859_v31, %v2184_v20  ;;  %v1959_v18 = vadd.f32 %v1540_v62, %v1011_v34  ;;  %v2185_v28 = vadd.f32 %v5298_v22, %v5343_v48 }
 0x247   :  { %v3863_v2 = vpop.eup %3862  ;;  %3888 = vtanh.f32 %v2247_v6  ;;  %2487 = vadd.xlane.f32.xlu0 %v2435_v33  ;;  %v2373_v44 = vmul.f32 %v5374_v13, %v5933_v8  ;;  %v2186_v62 = vadd.f32 %v5298_v22, %v5370_v61 }
 0x248   :  { %v3865_v30 = vpop.eup %3864  ;;  %v2248_v3 = vadd.f32 %v2216_v58, %v5930_v52  ;;  %v1860_v5 = vadd.f32 1.0, %v3863_v2  ;;  %3890 = vpow2.f32 %v3016_v24  ;;  %v3048_v21 = vmul.f32 -1.442695, %v1959_v18  ;;  %v1689_v58 = vpop.f32.mrf.mxu0  ;;  %v5936_v18 = vld [vmem:[#allocation26_spill] sm:$0xff] }
 0x249   :  { %v3867_v51 = vpop.eup %3866  ;;  %v2310_v2 = vsub.f32 1.0, %v3861_v63 }
 0x24a   :  { %v3869_v0 = vpop.eup %3868  ;;  %3892 = vtanh.f32 %v2248_v3  ;;  %v2340_v38 = vmul.f32 %v3867_v51, %v2308_v47  ;;  %v5935_v51 = vld [vmem:[#allocation25_spill] sm:$0xff]  ;;  %v3464_v53 = vpop.f32.mrf.mxu0 }
 0x24b   :  { %v3871_v9 = vpop.eup %3870  ;;  %3894 = vrcp.f32 %v1860_v5  ;;  %v2083_v11 = vadd.f32 1.0, %v3869_v0  ;;  %v2374_v36 = vmul.f32 %v3861_v63, %v5935_v51 }
 0x24c   :  { %v3873_v54 = vpop.eup %3872  ;;  %v5403_v16 = vadd.f32 %v2372_v55, %v2340_v38  ;;  %v2341_v19 = vmul.f32 %v3871_v9, %v2309_v25  ;;  %3896 = vrcp.f32 %v2082_v15 }
 0x24d   :  { %v3875_v56 = vpop.eup %3874  ;;  %v1861_v43 = vadd.f32 1.0, %v3873_v54  ;;  %3898 = vpow2.f32 %v3047_v37  ;;  %v2311_v37 = vsub.f32 1.0, %v3865_v30  ;;  %v2375_v54 = vmul.f32 %v3865_v30, %v5936_v18  ;;  %v5938_v30 = vld [vmem:[#allocation27_spill] sm:$0xff] }
 0x24e   :  { %v3877_v26 = vpop.eup %3876  ;;  %v2217_v20 = vmul.f32 %v3875_v56, %v2185_v28  ;;  %v2436_v24 = vmul.f32 %v5403_v16, %v5403_v16  ;;  %v5409_v31 = vadd.f32 %v2373_v44, %v2341_v19  ;;  %v5937_v28 = vld [vmem:[#allocation71_spill] sm:$0xff]  ;;  %v2187_v56 = vadd.f32 %v5298_v22, %v1689_v58 }
 0x24f   :  { %v3879_v48 = vpop.eup %3878  ;;  %3900 = vrcp.f32 %v1861_v43  ;;  %v2084_v15 = vadd.f32 1.0, %v3877_v26  ;;  %v5939_v58 = vld [vmem:[#allocation75_spill] sm:$0xff] }
 0x250   :  { %v3881_v6 = vpop.eup %3880  ;;  %v2249_v33 = vadd.f32 %v2217_v20, %v5934_v12  ;;  %2489 = vadd.xlane.f32.xlu1 %v2436_v24  ;;  %v2437_v13 = vmul.f32 %v5409_v31, %v5409_v31  ;;  %3902 = vrcp.f32 %v2083_v11  ;;  %v2312_v8 = vsub.f32 1.0, %v3879_v48  ;;  %v1692_v20 = vpop.f32.mrf.mxu0 }
 0x251   :  { %v3883_v52 = vpop.eup %3882  ;;  %v1862_v3 = vadd.f32 1.0, %v3881_v6 }
 0x252   :  { %v3885_v5 = vpop.eup %3884  ;;  %3904 = vtanh.f32 %v2249_v33  ;;  %2491 = vadd.xlane.f32.xlu0 %v2437_v13  ;;  %v2342_v47 = vmul.f32 %v3883_v52, %v2310_v2 }
 0x253   :  { %v3887_v34 = vpop.eup %3886  ;;  %3906 = vpow2.f32 %v3048_v21  ;;  %v2085_v26 = vadd.f32 1.0, %v3885_v5  ;;  %v2376_v21 = vmul.f32 %v3879_v48, %v5938_v30  ;;  %v5943_v30 = vld [vmem:[#allocation29_spill] sm:$0xff] }
 0x254   :  { %v3889_v0 = vpop.eup %3888  ;;  %v2218_v38 = vmul.f32 %v3887_v34, %v2186_v62  ;;  %3908 = vrcp.f32 %v1862_v3  ;;  %v5417_v55 = vadd.f32 %v2374_v36, %v2342_v47  ;;  %v2188_v3 = vadd.f32 %v5298_v22, %v1692_v20 }
 0x255   :  { %v3891_v25 = vpop.eup %3890  ;;  %v2343_v9 = vmul.f32 %v3889_v0, %v2311_v37  ;;  %3910 = vrcp.f32 %v2084_v15  ;;  %v5940_v15 = vld [vmem:[#allocation78_spill] sm:$0xff] }
 0x256   :  { %v2250_v61 = vadd.f32 %v2218_v38, %v5937_v28  ;;  %v1863_v19 = vadd.f32 1.0, %v3891_v25  ;;  %v2438_v63 = vmul.f32 %v5417_v55, %v5417_v55  ;;  %v2189_v38 = vadd.f32 %v5298_v22, %v5401_v10 }
 0x257   :  { %v3893_v44 = vpop.eup %3892  ;;  %v5424_v11 = vadd.f32 %v2375_v54, %v2343_v9  ;;  %v5941_v9 = vld [vmem:[#allocation28_spill] sm:$0xff]  ;;  %v2190_v10 = vadd.f32 %v5298_v22, %v3464_v53  ;;  %v5945_v53 = vld [vmem:[#allocation30_spill] sm:$0xff] }
 0x258   :  { %v3895_v43 = vpop.eup %3894  ;;  %3912 = vtanh.f32 %v2250_v61  ;;  %2493 = vadd.xlane.f32.xlu1 %v2438_v63  ;;  %v2344_v24 = vmul.f32 %v3893_v44, %v2312_v8  ;;  %v5942_v8 = vld [vmem:[#allocation74_spill] sm:$0xff] }
 0x259   :  { %v2219_v6 = vmul.f32 %v3895_v43, %v2187_v56  ;;  %3914 = vrcp.f32 %v1863_v19  ;;  %v2439_v12 = vmul.f32 %v5424_v11, %v5424_v11  ;;  %v3897_v33 = vpop.eup %3896 }
 0x25a   :  { %v5429_v13 = vadd.f32 %v2376_v21, %v2344_v24  ;;  %v3899_v2 = vpop.eup %3898  ;;  %3916 = vrcp.f32 %v2085_v26  ;;  %v2313_v36 = vsub.f32 1.0, %v3897_v33  ;;  %v2377_v18 = vmul.f32 %v3897_v33, %v5941_v9 }
 0x25b   :  { %v2251_v52 = vadd.f32 %v2219_v6, %v5939_v58  ;;  %2495 = vadd.xlane.f32.xlu0 %v2439_v12  ;;  %v2086_v51 = vadd.f32 1.0, %v3899_v2  ;;  %v5944_v2 = vld [vmem:[#allocation77_spill] sm:$0xff] }
 0x25c   :  { %v3901_v5 = vpop.eup %3900  ;;  %v2440_v62 = vmul.f32 %v5429_v13, %v5429_v13 }
 0x25d   :  { %3918 = vtanh.f32 %v2251_v52  ;;  %v2220_v48 = vmul.f32 %v3901_v5, %v2188_v3  ;;  %v3903_v47 = vpop.eup %3902 }
 0x25e   :  { %2497 = vadd.xlane.f32.xlu1 %v2440_v62  ;;  %v2314_v43 = vsub.f32 1.0, %v3903_v47  ;;  %v2378_v21 = vmul.f32 %v3903_v47, %v5943_v30 }
 0x25f   :  { %v3905_v34 = vpop.eup %3904  ;;  %v2252_v37 = vadd.f32 %v2220_v48, %v5940_v15 }
 0x260   :  { %v3907_v0 = vpop.eup %3906  ;;  %v2345_v25 = vmul.f32 %v3905_v34, %v2313_v36 }
 0x261   :  { %v3909_v54 = vpop.eup %3908  ;;  %3920 = vtanh.f32 %v2252_v37  ;;  %v2087_v19 = vadd.f32 1.0, %v3907_v0  ;;  %v5946_v37 = vld [vmem:[#allocation31_spill] sm:$0xff] }
 0x262   :  { %v2221_v28 = vmul.f32 %v3909_v54, %v2189_v38  ;;  %3922 = vrcp.f32 %v2086_v51  ;;  %v5439_v61 = vadd.f32 %v2377_v18, %v2345_v25  ;;  %v3911_v63 = vpop.eup %3910 }
 0x263   :  { %v2315_v52 = vsub.f32 1.0, %v3911_v63  ;;  %v2379_v62 = vmul.f32 %v3911_v63, %v5945_v53  ;;  %v2767_v53 = vld [vmem:[%s5749_s2] sm:$0xff] }
 0x264   :  { %v2253_v44 = vadd.f32 %v2221_v28, %v5942_v8  ;;  %v2441_v56 = vmul.f32 %v5439_v61, %v5439_v61  ;;  %v5947_v8 = vld [vmem:[#allocation32_spill] sm:$0xff] }
 0x265   :  { %v3913_v26 = vpop.eup %3912 }
 0x266   :  { %v3915_v20 = vpop.eup %3914  ;;  %3924 = vtanh.f32 %v2253_v44  ;;  %2499 = vadd.xlane.f32.xlu0 %v2441_v56  ;;  %v2346_v24 = vmul.f32 %v3913_v26, %v2314_v43 }
 0x267   :  { %v2222_v6 = vmul.f32 %v3915_v20, %v2190_v10  ;;  %3926 = vrcp.f32 %v2087_v19  ;;  %v3917_v33 = vpop.eup %3916 }
 0x268   :  { %v5446_v12 = vadd.f32 %v2378_v21, %v2346_v24  ;;  %v2316_v47 = vsub.f32 1.0, %v3917_v33  ;;  %v2380_v0 = vmul.f32 %v3917_v33, %v5946_v37  ;;  %v5948_v21 = vld [vmem:[#allocation33_spill] sm:$0xff] }
 0x269   :  { %v2254_v58 = vadd.f32 %v2222_v6, %v5944_v2 }
 0x26a   :  { %v3919_v3 = vpop.eup %3918  ;;  %v2442_v5 = vmul.f32 %v5446_v12, %v5446_v12 }
 0x26b   :  { %3928 = vtanh.f32 %v2254_v58  ;;  %v2347_v22 = vmul.f32 %v3919_v3, %v2315_v52 }
 0x26c   :  { %2501 = vadd.xlane.f32.xlu1 %v2442_v5 }
 0x26d   :  { %v5452_v48 = vadd.f32 %v2379_v62, %v2347_v22 }
 0x26e   :  { %v3921_v51 = vpop.eup %3920 }
 0x26f   :  { %v3923_v36 = vpop.eup %3922  ;;  %v2443_v34 = vmul.f32 %v5452_v48, %v5452_v48  ;;  %v2348_v15 = vmul.f32 %v3921_v51, %v2316_v47 }
 0x270   :  { %v2317_v25 = vsub.f32 1.0, %v3923_v36  ;;  %v2381_v44 = vmul.f32 %v3923_v36, %v5947_v8 }
 0x271   :  { %2503 = vadd.xlane.f32.xlu0 %v2443_v34  ;;  %v5457_v38 = vadd.f32 %v2380_v0, %v2348_v15  ;;  %v2448_v9 = vpop.xlane.xlu0 %2447  ;;  %v2768_v15 = vld [vmem:[%s5749_s2 + $0x8] sm:$0xff] }
 0x272   :  { %v2511_v28 = vmax.f32 %v2448_v9, 1e-24 }
 0x273   :  { %v3925_v18 = vpop.eup %3924  ;;  %v2444_v54 = vmul.f32 %v5457_v38, %v5457_v38 }
 0x274   :  { %v3927_v19 = vpop.eup %3926  ;;  %v2349_v63 = vmul.f32 %v3925_v18, %v2317_v25  ;;  %3930 = vrsqrt.f32 %v2511_v28 }
 0x275   :  { %2505 = vadd.xlane.f32.xlu1 %v2444_v54  ;;  %v2450_v43 = vpop.xlane.xlu0 %2449  ;;  %v2318_v26 = vsub.f32 1.0, %v3927_v19  ;;  %v2382_v6 = vmul.f32 %v3927_v19, %v5948_v21  ;;  %v2769_v54 = vld [vmem:[%s5749_s2 + $0x10] sm:$0xff] }
 0x276   :  { %v5462_v56 = vadd.f32 %v2381_v44, %v2349_v63  ;;  %v2512_v10 = vmax.f32 %v2450_v43, 1e-24  ;;  %v2770_v44 = vld [vmem:[%s5749_s2 + $0x18] sm:$0xff] }
 0x278   :  { %v3929_v20 = vpop.eup %3928  ;;  %v2445_v24 = vmul.f32 %v5462_v56, %v5462_v56  ;;  %3932 = vrsqrt.f32 %v2512_v10 }
 0x279   :  { %v2350_v30 = vmul.f32 %v3929_v20, %v2318_v26  ;;  %v2452_v33 = vpop.xlane.xlu1 %2451 }
 0x27a   :  { %2507 = vadd.xlane.f32.xlu0 %v2445_v24  ;;  %v2513_v58 = vmax.f32 %v2452_v33, 1e-24 }
 0x27b   :  { %v5467_v2 = vadd.f32 %v2382_v6, %v2350_v30  ;;  %v2771_v30 = vld [vmem:[%s5749_s2 + $0x20] sm:$0xff] }
 0x27c   :  { %3934 = vrsqrt.f32 %v2513_v58 }
 0x27d   :  { %v2446_v52 = vmul.f32 %v5467_v2, %v5467_v2  ;;  %v2454_v3 = vpop.xlane.xlu1 %2453 }
 0x27e   :  { %v2514_v5 = vmax.f32 %v2454_v3, 1e-24 }
 0x27f   :  { %2509 = vadd.xlane.f32.xlu1 %v2446_v52  ;;  %v2772_v52 = vld [vmem:[%s5749_s2 + $0x28] sm:$0xff] }
 0x280   :  { %3936 = vrsqrt.f32 %v2514_v5 }
 0x281   :  { %v3931_v22 = vpop.eup %3930 }
 0x282   :  { %v2456_v62 = vpop.xlane.xlu0 %2455  ;;  %v2575_v47 = vmul.f32 %v3931_v22, %v5012_v40 }
 0x283   :  { %v2515_v51 = vmax.f32 %v2456_v62, 1e-24 }
 0x284   :  { %v2799_v36 = vmax.f32 %v2767_v53, %v2575_v47 }
 0x285   :  { %3938 = vrsqrt.f32 %v2515_v51  ;;  %v3933_v34 = vpop.eup %3932 }
 0x286   :  { %v2458_v37 = vpop.xlane.xlu1 %2457  ;;  %2831 = vst [vmem:[%s5750_s8] sm:$0xff] %v2799_v36  ;;  %v2576_v0 = vmul.f32 %v3933_v34, %v5023_v23  ;;  %v2774_v36 = vld [vmem:[%s5749_s2 + $0x38] sm:$0xff] }
 0x287   :  { %v2516_v25 = vmax.f32 %v2458_v37, 1e-24 }
 0x288   :  { %v3117_v9 = vpack.c.bf16 %v2576_v0, %v2575_v47  ;;  %v2800_v18 = vmax.f32 %v2768_v15, %v2576_v0  ;;  %v2773_v47 = vld [vmem:[%s5749_s2 + $0x30] sm:$0xff] }
 0x289   :  { %3940 = vrsqrt.f32 %v2516_v25  ;;  %v3935_v40 = vpop.eup %3934 }
 0x28a   :  { %3118 = vst [vmem:[%s5751_s7] sm:$0xff] %v3117_v9   ;;  %2832 = vst [vmem:[%s5750_s8 + $0x8] sm:$0xff] %v2800_v18  ;;  %v2577_v28 = vmul.f32 %v3935_v40, %v5038_v49  ;;  %v2460_v23 = vpop.xlane.xlu0 %2459 }
 0x28b   :  { %v2517_v63 = vmax.f32 %v2460_v23, 1e-24 }
 0x28c   :  { %v2801_v19 = vmax.f32 %v2769_v54, %v2577_v28 }
 0x28d   :  { %v3937_v8 = vpop.eup %3936  ;;  %3942 = vrsqrt.f32 %v2517_v63 }
 0x28e   :  { %v2462_v43 = vpop.xlane.xlu1 %2461  ;;  %2833 = vst [vmem:[%s5750_s8 + $0x10] sm:$0xff] %v2801_v19  ;;  %v2578_v26 = vmul.f32 %v3937_v8, %v5051_v29  ;;  %v2776_v19 = vld [vmem:[%s5749_s2 + $0x48] sm:$0xff] }
 0x28f   :  { %v2518_v10 = vmax.f32 %v2462_v43, 1e-24 }
 0x290   :  { %v3122_v20 = vpack.c.bf16 %v2578_v26, %v2577_v28  ;;  %v2802_v24 = vmax.f32 %v2770_v44, %v2578_v26 }
 0x291   :  { %3944 = vrsqrt.f32 %v2518_v10 }
 0x292   :  { %v3939_v49 = vpop.eup %3938  ;;  %3194 = vst [vmem:[%s5751_s7 + $0x8] sm:$0xff] %v3122_v20   ;;  %2834 = vst [vmem:[%s5750_s8 + $0x18] sm:$0xff] %v2802_v24  ;;  %v2777_v24 = vld [vmem:[%s5749_s2 + $0x50] sm:$0xff] }
 0x293   :  { %v2579_v29 = vmul.f32 %v3939_v49, %v5062_v27  ;;  %v2464_v21 = vpop.xlane.xlu0 %2463 }
 0x294   :  { %v2519_v33 = vmax.f32 %v2464_v21, 1e-24 }
 0x295   :  { %v2803_v6 = vmax.f32 %v2771_v30, %v2579_v29 }
 0x296   :  { %v3941_v58 = vpop.eup %3940  ;;  %3946 = vrsqrt.f32 %v2519_v33 }
 0x297   :  { %2835 = vst [vmem:[%s5750_s8 + $0x20] sm:$0xff] %v2803_v6  ;;  %v2580_v3 = vmul.f32 %v3941_v58, %v5077_v1  ;;  %v2778_v6 = vld [vmem:[%s5749_s2 + $0x58] sm:$0xff] }
 0x299   :  { %v3127_v5 = vpack.c.bf16 %v2580_v3, %v2579_v29  ;;  %v2804_v22 = vmax.f32 %v2772_v52, %v2580_v3  ;;  %v2466_v53 = vpop.xlane.xlu1 %2465 }
 0x29a   :  { %v2520_v27 = vmax.f32 %v2466_v53, 1e-24  ;;  %v3943_v62 = vpop.eup %3942 }
 0x29b   :  { %3195 = vst [vmem:[%s5751_s7 + $0x10] sm:$0xff] %v3127_v5   ;;  %2836 = vst [vmem:[%s5750_s8 + $0x28] sm:$0xff] %v2804_v22  ;;  %v2581_v1 = vmul.f32 %v3943_v62, %v5102_v45 }
 0x29c   :  { %3948 = vrsqrt.f32 %v2520_v27 }
 0x29d   :  { %v2805_v34 = vmax.f32 %v2773_v47, %v2581_v1 }
 0x29e   :  { %v3945_v51 = vpop.eup %3944 }
 0x29f   :  { %v2582_v15 = vmul.f32 %v3945_v51, %v5114_v57  ;;  %2837 = vst [vmem:[%s5750_s8 + $0x30] sm:$0xff] %v2805_v34  ;;  %v2775_v57 = vld [vmem:[%s5749_s2 + $0x40] sm:$0xff] }
 0x2a1   :  { %v3132_v37 = vpack.c.bf16 %v2582_v15, %v2581_v1  ;;  %v2806_v0 = vmax.f32 %v2774_v36, %v2582_v15  ;;  %v2780_v1 = vld [vmem:[%s5749_s2 + $0x68] sm:$0xff] }
 0x2a2   :  { %v2468_v25 = vpop.xlane.xlu0 %2467 }
 0x2a3   :  { %3196 = vst [vmem:[%s5751_s7 + $0x18] sm:$0xff] %v3132_v37   ;;  %2838 = vst [vmem:[%s5750_s8 + $0x38] sm:$0xff] %v2806_v0  ;;  %v2521_v45 = vmax.f32 %v2468_v25, 1e-24  ;;  %v3947_v9 = vpop.eup %3946 }
 0x2a4   :  { %v2583_v18 = vmul.f32 %v3947_v9, %v5142_v7 }
 0x2a5   :  { %3950 = vrsqrt.f32 %v2521_v45 }
 0x2a6   :  { %v2470_v40 = vpop.xlane.xlu1 %2469  ;;  %v2807_v54 = vmax.f32 %v2775_v57, %v2583_v18 }
 0x2a7   :  { %v2522_v28 = vmax.f32 %v2470_v40, 1e-24 }
 0x2a8   :  { %2839 = vst [vmem:[%s5750_s8 + $0x40] sm:$0xff] %v2807_v54 }
 0x2a9   :  { %3952 = vrsqrt.f32 %v2522_v28  ;;  %v3949_v23 = vpop.eup %3948 }
 0x2aa   :  { %v2472_v63 = vpop.xlane.xlu0 %2471  ;;  %v2584_v8 = vmul.f32 %v3949_v23, %v5170_v39 }
 0x2ab   :  { %v2523_v44 = vmax.f32 %v2472_v63, 1e-24 }
 0x2ac   :  { %v3137_v43 = vpack.c.bf16 %v2584_v8, %v2583_v18  ;;  %v2808_v7 = vmax.f32 %v2776_v19, %v2584_v8  ;;  %v2783_v19 = vld [vmem:[%s5749_s2 + $0x80] sm:$0xff] }
 0x2ad   :  { %3954 = vrsqrt.f32 %v2523_v44 }
 0x2ae   :  { %3197 = vst [vmem:[%s5751_s7 + $0x20] sm:$0xff] %v3137_v43   ;;  %2840 = vst [vmem:[%s5750_s8 + $0x48] sm:$0xff] %v2808_v7  ;;  %v2474_v26 = vpop.xlane.xlu1 %2473 }
 0x2af   :  { %v2524_v10 = vmax.f32 %v2474_v26, 1e-24  ;;  %v2784_v26 = vld [vmem:[%s5749_s2 + $0x88] sm:$0xff] }
 0x2b1   :  { %3956 = vrsqrt.f32 %v2524_v10  ;;  %v2476_v39 = vpop.xlane.xlu0 %2475 }
 0x2b2   :  { %v3951_v20 = vpop.eup %3950  ;;  %v2525_v30 = vmax.f32 %v2476_v39, 1e-24 }
 0x2b3   :  { %v2585_v49 = vmul.f32 %v3951_v20, %v5212_v17  ;;  %v2779_v17 = vld [vmem:[%s5749_s2 + $0x60] sm:$0xff] }
 0x2b4   :  { %3958 = vrsqrt.f32 %v2525_v30 }
 0x2b5   :  { %v2809_v29 = vmax.f32 %v2777_v24, %v2585_v49 }
 0x2b6   :  { %v3953_v21 = vpop.eup %3952 }
 0x2b7   :  { %2841 = vst [vmem:[%s5750_s8 + $0x50] sm:$0xff] %v2809_v29  ;;  %v2586_v33 = vmul.f32 %v3953_v21, %v5226_v32 }
 0x2b9   :  { %v3142_v58 = vpack.c.bf16 %v2586_v33, %v2585_v49  ;;  %v2810_v52 = vmax.f32 %v2778_v6, %v2586_v33  ;;  %v2478_v3 = vpop.xlane.xlu1 %2477  ;;  %v2786_v33 = vld [vmem:[%s5749_s2 + $0x98] sm:$0xff] }
 0x2ba   :  { %v3955_v5 = vpop.eup %3954  ;;  %v2526_v22 = vmax.f32 %v2478_v3, 1e-24 }
 0x2bb   :  { %3198 = vst [vmem:[%s5751_s7 + $0x28] sm:$0xff] %v3142_v58   ;;  %2842 = vst [vmem:[%s5750_s8 + $0x58] sm:$0xff] %v2810_v52  ;;  %v2587_v53 = vmul.f32 %v3955_v5, %v5241_v42  ;;  %v2781_v42 = vld [vmem:[%s5749_s2 + $0x70] sm:$0xff] }
 0x2bc   :  { %3960 = vrsqrt.f32 %v2526_v22 }
 0x2bd   :  { %v2811_v32 = vmax.f32 %v2779_v17, %v2587_v53  ;;  %v2480_v27 = vpop.xlane.xlu0 %2479  ;;  %v2787_v17 = vld [vmem:[%s5749_s2 + $0xa0] sm:$0xff] }
 0x2be   :  { %v2527_v62 = vmax.f32 %v2480_v27, 1e-24  ;;  %v3957_v47 = vpop.eup %3956 }
 0x2bf   :  { %2843 = vst [vmem:[%s5750_s8 + $0x60] sm:$0xff] %v2811_v32  ;;  %v2588_v51 = vmul.f32 %v3957_v47, %v5262_v35 }
 0x2c0   :  { %3962 = vrsqrt.f32 %v2527_v62 }
 0x2c1   :  { %v3959_v36 = vpop.eup %3958  ;;  %v3147_v34 = vpack.c.bf16 %v2588_v51, %v2587_v53  ;;  %v2812_v15 = vmax.f32 %v2780_v1, %v2588_v51 }
 0x2c2   :  { %v2482_v37 = vpop.xlane.xlu1 %2481  ;;  %v2589_v0 = vmul.f32 %v3959_v36, %v5279_v46  ;;  %v2782_v46 = vld [vmem:[%s5749_s2 + $0x78] sm:$0xff]  ;;  %v2788_v36 = vld [vmem:[%s5749_s2 + $0xa8] sm:$0xff] }
 0x2c3   :  { %v2528_v25 = vmax.f32 %v2482_v37, 1e-24  ;;  %3199 = vst [vmem:[%s5751_s7 + $0x30] sm:$0xff] %v3147_v34   ;;  %2844 = vst [vmem:[%s5750_s8 + $0x68] sm:$0xff] %v2812_v15  ;;  %v2789_v15 = vld [vmem:[%s5749_s2 + $0xb0] sm:$0xff] }
 0x2c4   :  { %v2813_v35 = vmax.f32 %v2781_v42, %v2589_v0 }
 0x2c5   :  { %3964 = vrsqrt.f32 %v2528_v25 }
 0x2c6   :  { %v2484_v45 = vpop.xlane.xlu0 %2483  ;;  %2845 = vst [vmem:[%s5750_s8 + $0x70] sm:$0xff] %v2813_v35 }
 0x2c7   :  { %v2529_v9 = vmax.f32 %v2484_v45, 1e-24 }
 0x2c9   :  { %v3961_v57 = vpop.eup %3960  ;;  %3966 = vrsqrt.f32 %v2529_v9 }
 0x2ca   :  { %v2590_v18 = vmul.f32 %v3961_v57, %v5310_v50 }
 0x2cc   :  { %v3152_v40 = vpack.c.bf16 %v2590_v18, %v2589_v0  ;;  %v2814_v54 = vmax.f32 %v2782_v46, %v2590_v18  ;;  %v2486_v28 = vpop.xlane.xlu1 %2485 }
 0x2cd   :  { %v3963_v23 = vpop.eup %3962  ;;  %v2530_v63 = vmax.f32 %v2486_v28, 1e-24 }
 0x2ce   :  { %3200 = vst [vmem:[%s5751_s7 + $0x38] sm:$0xff] %v3152_v40   ;;  %2846 = vst [vmem:[%s5750_s8 + $0x78] sm:$0xff] %v2814_v54  ;;  %v2591_v8 = vmul.f32 %v3963_v23, %v5325_v60  ;;  %v2785_v60 = vld [vmem:[%s5749_s2 + $0x90] sm:$0xff]  ;;  %v2791_v40 = vld [vmem:[%s5749_s2 + $0xc0] sm:$0xff] }
 0x2cf   :  { %3968 = vrsqrt.f32 %v2530_v63  ;;  %v2792_v63 = vld [vmem:[%s5749_s2 + $0xc8] sm:$0xff] }
 0x2d0   :  { %v2815_v50 = vmax.f32 %v2783_v19, %v2591_v8  ;;  %v2488_v44 = vpop.xlane.xlu0 %2487 }
 0x2d1   :  { %v2531_v43 = vmax.f32 %v2488_v44, 1e-24 }
 0x2d2   :  { %v3965_v7 = vpop.eup %3964  ;;  %2847 = vst [vmem:[%s5750_s8 + $0x80] sm:$0xff] %v2815_v50 }
 0x2d3   :  { %v2592_v10 = vmul.f32 %v3965_v7, %v5345_v14  ;;  %3970 = vrsqrt.f32 %v2531_v43 }
 0x2d5   :  { %v3157_v20 = vpack.c.bf16 %v2592_v10, %v2591_v8  ;;  %v2816_v24 = vmax.f32 %v2784_v26, %v2592_v10  ;;  %v2793_v26 = vld [vmem:[%s5749_s2 + $0xd0] sm:$0xff] }
 0x2d6   :  { %v3967_v39 = vpop.eup %3966 }
 0x2d7   :  { %3201 = vst [vmem:[%s5751_s7 + $0x40] sm:$0xff] %v3157_v20   ;;  %2848 = vst [vmem:[%s5750_s8 + $0x88] sm:$0xff] %v2816_v24  ;;  %v2593_v49 = vmul.f32 %v3967_v39, %v5359_v41 }
 0x2d9   :  { %v2817_v30 = vmax.f32 %v2785_v60, %v2593_v49  ;;  %v2490_v14 = vpop.xlane.xlu1 %2489 }
 0x2da   :  { %v2532_v29 = vmax.f32 %v2490_v14, 1e-24 }
 0x2db   :  { %2849 = vst [vmem:[%s5750_s8 + $0x90] sm:$0xff] %v2817_v30  ;;  %v2492_v21 = vpop.xlane.xlu0 %2491  ;;  %v2794_v30 = vld [vmem:[%s5749_s2 + $0xd8] sm:$0xff] }
 0x2dc   :  { %v3969_v6 = vpop.eup %3968  ;;  %3972 = vrsqrt.f32 %v2532_v29  ;;  %v2533_v58 = vmax.f32 %v2492_v21, 1e-24 }
 0x2dd   :  { %v2594_v52 = vmul.f32 %v3969_v6, %v5377_v59 }
 0x2de   :  { %3974 = vrsqrt.f32 %v2533_v58  ;;  %v2795_v58 = vld [vmem:[%s5749_s2 + $0xe0] sm:$0xff] }
 0x2df   :  { %v3162_v3 = vpack.c.bf16 %v2594_v52, %v2593_v49  ;;  %v2818_v41 = vmax.f32 %v2786_v33, %v2594_v52 }
 0x2e0   :  { %v3971_v5 = vpop.eup %3970 }
 0x2e1   :  { %3202 = vst [vmem:[%s5751_s7 + $0x48] sm:$0xff] %v3162_v3   ;;  %2850 = vst [vmem:[%s5750_s8 + $0x98] sm:$0xff] %v2818_v41  ;;  %v2595_v22 = vmul.f32 %v3971_v5, %v5385_v4  ;;  %v2494_v53 = vpop.xlane.xlu1 %2493  ;;  %v2796_v41 = vld [vmem:[%s5749_s2 + $0xe8] sm:$0xff] }
 0x2e2   :  { %v2534_v59 = vmax.f32 %v2494_v53, 1e-24 }
 0x2e3   :  { %v2819_v32 = vmax.f32 %v2787_v17, %v2595_v22 }
 0x2e4   :  { %3976 = vrsqrt.f32 %v2534_v59  ;;  %v2496_v27 = vpop.xlane.xlu0 %2495 }
 0x2e5   :  { %2851 = vst [vmem:[%s5750_s8 + $0xa0] sm:$0xff] %v2819_v32  ;;  %v2535_v62 = vmax.f32 %v2496_v27, 1e-24 }
 0x2e7   :  { %3978 = vrsqrt.f32 %v2535_v62  ;;  %v2498_v47 = vpop.xlane.xlu1 %2497 }
 0x2e8   :  { %v2536_v1 = vmax.f32 %v2498_v47, 1e-24 }
 0x2e9   :  { %v3973_v51 = vpop.eup %3972 }
 0x2ea   :  { %v2596_v4 = vmul.f32 %v3973_v51, %v5403_v16  ;;  %3980 = vrsqrt.f32 %v2536_v1 }
 0x2eb   :  { %v3975_v34 = vpop.eup %3974 }
 0x2ec   :  { %v3167_v42 = vpack.c.bf16 %v2596_v4, %v2595_v22  ;;  %v2820_v37 = vmax.f32 %v2788_v36, %v2596_v4  ;;  %v2597_v0 = vmul.f32 %v3975_v34, %v5409_v31  ;;  %v2790_v31 = vld [vmem:[%s5749_s2 + $0xb8] sm:$0xff] }
 0x2ee   :  { %3203 = vst [vmem:[%s5751_s7 + $0x50] sm:$0xff] %v3167_v42   ;;  %2852 = vst [vmem:[%s5750_s8 + $0xa8] sm:$0xff] %v2820_v37  ;;  %v2821_v25 = vmax.f32 %v2789_v15, %v2597_v0 }
 0x2ef   :  { %v2500_v16 = vpop.xlane.xlu0 %2499 }
 0x2f0   :  { %2853 = vst [vmem:[%s5750_s8 + $0xb0] sm:$0xff] %v2821_v25  ;;  %v2537_v35 = vmax.f32 %v2500_v16, 1e-24 }
 0x2f1   :  { %v3977_v45 = vpop.eup %3976 }
 0x2f2   :  { %v2598_v9 = vmul.f32 %v3977_v45, %v5417_v55  ;;  %3982 = vrsqrt.f32 %v2537_v35 }
 0x2f4   :  { %v3979_v57 = vpop.eup %3978  ;;  %v3172_v46 = vpack.c.bf16 %v2598_v9, %v2597_v0  ;;  %v2822_v18 = vmax.f32 %v2790_v31, %v2598_v9 }
 0x2f5   :  { %v2599_v54 = vmul.f32 %v3979_v57, %v5424_v11  ;;  %v2502_v28 = vpop.xlane.xlu1 %2501 }
 0x2f6   :  { %3204 = vst [vmem:[%s5751_s7 + $0x58] sm:$0xff] %v3172_v46   ;;  %2854 = vst [vmem:[%s5750_s8 + $0xb8] sm:$0xff] %v2822_v18  ;;  %v2538_v55 = vmax.f32 %v2502_v28, 1e-24 }
 0x2f7   :  { %v3981_v23 = vpop.eup %3980  ;;  %v2823_v19 = vmax.f32 %v2791_v40, %v2599_v54 }
 0x2f8   :  { %v2600_v8 = vmul.f32 %v3981_v23, %v5429_v13  ;;  %3984 = vrsqrt.f32 %v2538_v55 }
 0x2f9   :  { %2855 = vst [vmem:[%s5750_s8 + $0xc0] sm:$0xff] %v2823_v19 }
 0x2fa   :  { %v3177_v11 = vpack.c.bf16 %v2600_v8, %v2599_v54  ;;  %v2824_v50 = vmax.f32 %v2792_v63, %v2600_v8  ;;  %v2504_v44 = vpop.xlane.xlu0 %2503 }
 0x2fb   :  { %v2539_v43 = vmax.f32 %v2504_v44, 1e-24 }
 0x2fc   :  { %3205 = vst [vmem:[%s5751_s7 + $0x60] sm:$0xff] %v3177_v11   ;;  %2856 = vst [vmem:[%s5750_s8 + $0xc8] sm:$0xff] %v2824_v50 }
 0x2fd   :  { %3986 = vrsqrt.f32 %v2539_v43 }
 0x2fe   :  { %v2506_v7 = vpop.xlane.xlu1 %2505 }
 0x2ff   :  { %v3983_v13 = vpop.eup %3982  ;;  %v2540_v10 = vmax.f32 %v2506_v7, 1e-24 }
 0x300   :  { %v2601_v20 = vmul.f32 %v3983_v13, %v5439_v61 }
 0x301   :  { %3988 = vrsqrt.f32 %v2540_v10 }
 0x302   :  { %v2825_v24 = vmax.f32 %v2793_v26, %v2601_v20 }
 0x303   :  { %v2508_v39 = vpop.xlane.xlu0 %2507 }
 0x304   :  { %2857 = vst [vmem:[%s5750_s8 + $0xd0] sm:$0xff] %v2825_v24  ;;  %v2541_v60 = vmax.f32 %v2508_v39, 1e-24 }
 0x305   :  { %v3985_v49 = vpop.eup %3984 }
 0x306   :  { %v2602_v14 = vmul.f32 %v3985_v49, %v5446_v12  ;;  %3990 = vrsqrt.f32 %v2541_v60 }
 0x308   :  { %v3182_v29 = vpack.c.bf16 %v2602_v14, %v2601_v20  ;;  %v2826_v21 = vmax.f32 %v2794_v30, %v2602_v14  ;;  %v2510_v6 = vpop.xlane.xlu1 %2509 }
 0x309   :  { %v2542_v61 = vmax.f32 %v2510_v6, 1e-24 }
 0x30a   :  { %v3987_v33 = vpop.eup %3986  ;;  %3206 = vst [vmem:[%s5751_s7 + $0x68] sm:$0xff] %v3182_v29   ;;  %2858 = vst [vmem:[%s5750_s8 + $0xd8] sm:$0xff] %v2826_v21 }
 0x30b   :  { %v2603_v12 = vmul.f32 %v3987_v33, %v5452_v48  ;;  %3992 = vrsqrt.f32 %v2542_v61  ;;  %v2797_v48 = vld [vmem:[%s5749_s2 + $0xf0] sm:$0xff] }
 0x30d   :  { %v2827_v52 = vmax.f32 %v2795_v58, %v2603_v12 }
 0x30e   :  { %v3989_v3 = vpop.eup %3988 }
 0x30f   :  { %2859 = vst [vmem:[%s5750_s8 + $0xe0] sm:$0xff] %v2827_v52  ;;  %v2604_v5 = vmul.f32 %v3989_v3, %v5457_v38  ;;  %v2798_v38 = vld [vmem:[%s5749_s2 + $0xf8] sm:$0xff] }
 0x311   :  { %v3187_v17 = vpack.c.bf16 %v2604_v5, %v2603_v12  ;;  %v2828_v22 = vmax.f32 %v2796_v41, %v2604_v5 }
 0x313   :  { %v3991_v53 = vpop.eup %3990  ;;  %3207 = vst [vmem:[%s5751_s7 + $0x70] sm:$0xff] %v3187_v17   ;;  %2860 = vst [vmem:[%s5750_s8 + $0xe8] sm:$0xff] %v2828_v22 }
 0x314   :  { %v2605_v59 = vmul.f32 %v3991_v53, %v5462_v56 }
 0x316   :  { %v2829_v32 = vmax.f32 %v2797_v48, %v2605_v59 }
 0x318   :  { %v3993_v27 = vpop.eup %3992  ;;  %2861 = vst [vmem:[%s5750_s8 + $0xf0] sm:$0xff] %v2829_v32 }
 0x319   :  { %v2606_v62 = vmul.f32 %v3993_v27, %v5467_v2 }
 0x31b   :  { %v3192_v47 = vpack.c.bf16 %v2606_v62, %v2605_v59  ;;  %v2830_v1 = vmax.f32 %v2798_v38, %v2606_v62 }
 0x31d   :  { %3208 = vst [vmem:[%s5751_s7 + $0x78] sm:$0xff] %v3192_v47   ;;  %2862 = vst [vmem:[%s5750_s8 + $0xf8] sm:$0xff] %v2830_v1 }

// kernel: drbc_forward.8
= control target key start
LH: loop header
LB: loop body
LE: loop exit
PB: predicated region body
PF: predicated region fallthrough
CT: control target
= control target key end

     0   :  { %v5749_v2 = vmov 0   ;;  %s5739_s0 = inlined_call_operand.vmem [shape: bf16[256,256], index: 0, kind: input, shape index: {}]   ;;  %s5740_s1 = inlined_call_operand.vmem [shape: bf16[256,128], index: 1, kind: input, shape index: {}]   ;;  %s5741_s2 = inlined_call_operand.vmem [shape: f32[256,128], index: 2, kind: input, shape index: {}]   ;;  %s5742_s3 = inlined_call_operand.vmem [shape: bf16[128,384], index: 3, kind: input, shape index: {}]   ;;  %s5743_s4 = inlined_call_operand.vmem [shape: bf16[128,384], index: 4, kind: input, shape index: {}]   ;;  %s5744_s5 = inlined_call_operand.vmem [shape: f32[1,384], index: 5, kind: input, shape index: {}]   ;;  %s5745_s6 = inlined_call_operand.vmem [shape: f32[1,128], index: 6, kind: input, shape index: {}]   ;;  %s5746_s7 = inlined_call_operand.hbm [shape: bf16[256,128], index: 7, kind: output, shape index: {0}]   ;;  %s5747_s8 = inlined_call_operand.vmem [shape: f32[256,128], index: 8, kind: output, shape index: {1}]  }
   0x1   :  { %v3482_v0 = vld [vmem:[%s5740_s1 + $0x78] sm:$0xff]   ;;  %853 = vmatprep.mubr.bf16.mxu1 %v5749_v2  ;;  %v3484_v3 = vld [vmem:[%s5740_s1 + $0x70] sm:$0xff]   ;;  %v3486_v5 = vld [vmem:[%s5740_s1 + $0x68] sm:$0xff]  }
   0x2   :  { %v3483_v1 = vld [vmem:[%s5740_s1 + $0x38] sm:$0xff]   ;;  %3222 = vmatprep.subr.bf16.mxu0 %v3482_v0  ;;  %v3485_v4 = vld [vmem:[%s5740_s1 + $0x30] sm:$0xff]   ;;  %v3487_v6 = vld [vmem:[%s5740_s1 + $0x28] sm:$0xff]  }
   0x3   :  { %3223 = vmatpush3.bf16.msra.mxu0 %v3483_v1  ;;  %v3488_v7 = vld [vmem:[%s5740_s1 + $0x60] sm:$0xff]   ;;  %v3490_v9 = vld [vmem:[%s5740_s1 + $0x58] sm:$0xff]   ;;  %v3492_v11 = vld [vmem:[%s5740_s1 + $0x50] sm:$0xff]  }
   0x4   :  { %3224 = vmatprep.subr.bf16.mxu0 %v3484_v3  ;;  %v3489_v8 = vld [vmem:[%s5740_s1 + $0x20] sm:$0xff]   ;;  %v3491_v10 = vld [vmem:[%s5740_s1 + $0x18] sm:$0xff]   ;;  %v3493_v13 = vld [vmem:[%s5740_s1 + $0x10] sm:$0xff]  }
   0x5   :  { %v3500_v12 = vld [vmem:[%s5739_s0 + $0x4] ss:$8 sps:$4 sm:$0xff]   ;;  %v3515_v17 = vld [vmem:[%s5742_s3 + $0xa8] ss:$12 sps:$4 sm:$0xff]   ;;  %v3521_v20 = vld [vmem:[%s5742_s3 + $0x90] ss:$12 sps:$4 sm:$0xff]  }
   0x6   :  { %382 = vmatprep.mubr.bf16.mxu0 %v3500_v12  ;;  %v3494_v14 = vld [vmem:[%s5740_s1 + $0x48] sm:$0xff]   ;;  %v3496_v18 = vld [vmem:[%s5740_s1 + $0x40] sm:$0xff]   ;;  %v3501_v25 = vld [vmem:[%s5739_s0 + $0x14] ss:$8 sps:$4 sm:$0xff]  }
   0x7   :  { %3225 = vmatpush3.bf16.msra.mxu0 %v3485_v4  ;;  %v3495_v15 = vld [vmem:[%s5740_s1 + $0x8] sm:$0xff]   ;;  %v3519_v19 = vld [vmem:[%s5742_s3 + $0x94] ss:$12 sps:$4 sm:$0xff]   ;;  %v3524_v24 = vld [vmem:[%s5742_s3 + $0x78] ss:$12 sps:$4 sm:$0xff]  }
   0x8   :  { %3226 = vmatprep.subr.bf16.mxu0 %v3486_v5  ;;  %v3513_v16 = vld [vmem:[%s5742_s3 + $0xac] ss:$12 sps:$4 sm:$0xff]   ;;  %v3497_v21 = vld [vmem:[%s5740_s1] sm:$0xff]   ;;  %v3522_v22 = vld [vmem:[%s5742_s3 + $0x7c] ss:$12 sps:$4 sm:$0xff]  }
   0x9   :  { %821 = vmatprep.subr.bf16.mxu1 %v3513_v16  ;;  %v3498_v23 = vld [vmem:[%s5739_s0] ss:$8 sps:$4 sm:$0xff]   ;;  %v3528_v26 = vld [vmem:[%s5742_s3 + $0x64] ss:$12 sps:$4 sm:$0xff]   ;;  %v3531_v28 = vld [vmem:[%s5742_s3 + $0x4c] ss:$12 sps:$4 sm:$0xff]  }
   0xa   :  { %822 = vmatpush1.bf16.msra.mxu1 %v3515_v17  ;;  %v3530_v27 = vld [vmem:[%s5742_s3 + $0x60] ss:$12 sps:$4 sm:$0xff]   ;;  %v3503_v29 = vld [vmem:[%s5739_s0 + $0x10] ss:$8 sps:$4 sm:$0xff]   ;;  %v3533_v31 = vld [vmem:[%s5742_s3 + $0x48] ss:$12 sps:$4 sm:$0xff]  }
   0xb   :  { %3227 = vmatpush3.bf16.msra.mxu0 %v3487_v6  ;;  %823 = vmatprep.subr.bf16.mxu1 %v3519_v19  ;;  %v3504_v30 = vld [vmem:[%s5739_s0 + $0x24] ss:$8 sps:$4 sm:$0xff]   ;;  %v3537_v32 = vld [vmem:[%s5742_s3 + $0x34] ss:$12 sps:$4 sm:$0xff]   ;;  %v3539_v33 = vld [vmem:[%s5742_s3 + $0x30] ss:$12 sps:$4 sm:$0xff]  }
   0xc   :  { %3228 = vmatprep.subr.bf16.mxu0 %v3488_v7  ;;  %v3540_v34 = vld [vmem:[%s5742_s3 + $0x1c] ss:$12 sps:$4 sm:$0xff]   ;;  %v3542_v37 = vld [vmem:[%s5742_s3 + $0x18] ss:$12 sps:$4 sm:$0xff]   ;;  %v3548_v39 = vld [vmem:[%s5742_s3] ss:$12 sps:$4 sm:$0xff]  }
   0xd   :  { %v3506_v35 = vld [vmem:[%s5739_s0 + $0x20] ss:$8 sps:$4 sm:$0xff]   ;;  %v3507_v36 = vld [vmem:[%s5739_s0 + $0x34] ss:$8 sps:$4 sm:$0xff]   ;;  %v3546_v38 = vld [vmem:[%s5742_s3 + $0x4] ss:$12 sps:$4 sm:$0xff]  }
   0xe   :  { %824 = vmatpush1.bf16.msra.mxu1 %v3521_v20  ;;  %v3555_v40 = vld [vmem:[%s5743_s4 + $0xac] ss:$12 sps:$4 sm:$0xff]   ;;  %v3571_v41 = vld [vmem:[%s5742_s3 + $0xb0] ss:$12 sps:$4 sm:$0xff]   ;;  %v4212_v43 = vld [vmem:[%s5740_s1] sm:$0xff]  }
   0xf   :  { %3229 = vmatpush3.bf16.msra.mxu0 %v3489_v8  ;;  %825 = vmatprep.subr.bf16.mxu1 %v3522_v22  ;;  %v3509_v42 = vld [vmem:[%s5739_s0 + $0x30] ss:$8 sps:$4 sm:$0xff]   ;;  %v3553_v44 = vld [vmem:[%s5743_s4 + $0xa8] ss:$12 sps:$4 sm:$0xff]   ;;  %v3510_v45 = vld [vmem:[%s5739_s0 + $0x44] ss:$8 sps:$4 sm:$0xff]  }
  0x10   :  { %3230 = vmatprep.subr.bf16.mxu0 %v3490_v9  ;;  %v3566_v46 = vld [vmem:[%s5743_s4 + $0x94] ss:$12 sps:$4 sm:$0xff]   ;;  %v3564_v47 = vld [vmem:[%s5743_s4 + $0x90] ss:$12 sps:$4 sm:$0xff]   ;;  %v3583_v48 = vld [vmem:[%s5742_s3 + $0x98] ss:$12 sps:$4 sm:$0xff]  }
  0x11   :  { %v3578_v49 = vld [vmem:[%s5743_s4 + $0x7c] ss:$12 sps:$4 sm:$0xff]   ;;  %v3588_v52 = vld [vmem:[%s5742_s3 + $0x80] ss:$12 sps:$4 sm:$0xff]   ;;  %v3576_v54 = vld [vmem:[%s5743_s4 + $0x78] ss:$12 sps:$4 sm:$0xff]  }
  0x12   :  { %826 = vmatpush1.bf16.msra.mxu1 %v3524_v24  ;;  %v3512_v50 = vld [vmem:[%s5739_s0 + $0x40] ss:$8 sps:$4 sm:$0xff]   ;;  %v3516_v53 = vld [vmem:[%s5739_s0 + $0x54] ss:$8 sps:$4 sm:$0xff]   ;;  %v3591_v55 = vld [vmem:[%s5743_s4 + $0x64] ss:$12 sps:$4 sm:$0xff]  }
  0x13   :  { %3231 = vmatpush3.bf16.msra.mxu0 %v3491_v10  ;;  %827 = vmatprep.subr.bf16.mxu1 %v3528_v26  ;;  %v4240_v51 = vld [vmem:[%s5740_s1 + $0x8] sm:$0xff]   ;;  %v3594_v57 = vld [vmem:[%s5742_s3 + $0x50] ss:$12 sps:$4 sm:$0xff]   ;;  %v3596_v63 = vld [vmem:[%s5742_s3 + $0x38] ss:$12 sps:$4 sm:$0xff]  }
  0x14   :  { %3232 = vmatprep.subr.bf16.mxu0 %v3492_v11  ;;  %v3593_v56 = vld [vmem:[%s5742_s3 + $0x68] ss:$12 sps:$4 sm:$0xff]   ;;  %v3589_v58 = vld [vmem:[%s5743_s4 + $0x60] ss:$12 sps:$4 sm:$0xff]   ;;  %v3518_v59 = vld [vmem:[%s5739_s0 + $0x50] ss:$8 sps:$4 sm:$0xff]  }
  0x15   :  { %v4271_v60 = vld [vmem:[%s5740_s1 + $0x10] sm:$0xff]   ;;  %v3525_v61 = vld [vmem:[%s5739_s0 + $0x64] ss:$8 sps:$4 sm:$0xff]   ;;  %v3527_v4 = vld [vmem:[%s5739_s0 + $0x60] ss:$8 sps:$4 sm:$0xff]  }
  0x16   :  { %828 = vmatpush1.bf16.msra.mxu1 %v3530_v27  ;;  %v3600_v62 = vld [vmem:[%s5743_s4 + $0x4c] ss:$12 sps:$4 sm:$0xff]   ;;  %v3598_v0 = vld [vmem:[%s5743_s4 + $0x48] ss:$12 sps:$4 sm:$0xff]   ;;  %v3604_v5 = vld [vmem:[%s5743_s4 + $0x30] ss:$12 sps:$4 sm:$0xff]  }
  0x17   :  { %3233 = vmatpush3.bf16.msra.mxu0 %v3493_v13  ;;  %829 = vmatprep.subr.bf16.mxu1 %v3531_v28  ;;  %v3597_v1 = vld [vmem:[%s5742_s3 + $0x20] ss:$12 sps:$4 sm:$0xff]   ;;  %v4302_v6 = vld [vmem:[%s5740_s1 + $0x18] sm:$0xff]   ;;  %v3602_v8 = vld [vmem:[%s5742_s3 + $0x8] ss:$12 sps:$4 sm:$0xff]  }
  0x18   :  { %3234 = vmatprep.subr.bf16.mxu0 %v3494_v14  ;;  %v3606_v3 = vld [vmem:[%s5743_s4 + $0x34] ss:$12 sps:$4 sm:$0xff]   ;;  %v3611_v9 = vld [vmem:[%s5743_s4 + $0x1c] ss:$12 sps:$4 sm:$0xff]   ;;  %v3609_v10 = vld [vmem:[%s5743_s4 + $0x18] ss:$12 sps:$4 sm:$0xff]  }
  0x19   :  { %v3534_v7 = vld [vmem:[%s5739_s0 + $0x74] ss:$8 sps:$4 sm:$0xff]   ;;  %v3618_v12 = vld [vmem:[%s5743_s4 + $0x4] ss:$12 sps:$4 sm:$0xff]   ;;  %v3616_v16 = vld [vmem:[%s5743_s4] ss:$12 sps:$4 sm:$0xff]  }
  0x1a   :  { %830 = vmatpush1.bf16.msra.mxu1 %v3533_v31  ;;  %v4321_v11 = vld [vmem:[%s5743_s4 + $0xb0] ss:$12 sps:$4 sm:$0xff]   ;;  %v3543_v14 = vld [vmem:[%s5739_s0 + $0x84] ss:$8 sps:$4 sm:$0xff]  }
  0x1b   :  { %3235 = vmatpush3.bf16.msra.mxu0 %v3495_v15  ;;  %831 = vmatprep.subr.bf16.mxu1 %v3537_v32  ;;  %v3536_v13 = vld [vmem:[%s5739_s0 + $0x70] ss:$8 sps:$4 sm:$0xff]   ;;  %v4335_v15 = vld [vmem:[%s5740_s1 + $0x20] sm:$0xff]  }
  0x1c   :  { %3236 = vmatprep.subr.bf16.mxu0 %v3496_v18 }
  0x1e   :  { %832 = vmatpush1.bf16.msra.mxu1 %v3539_v33 }
  0x1f   :  { %3237 = vmatpush3.bf16.msra.mxu0 %v3497_v21  ;;  %833 = vmatprep.subr.bf16.mxu1 %v3540_v34 }
  0x20   :  { %3382 = vmatprep.subr.bf16.mxu0 %v3571_v41 }
  0x22   :  { %383 = vmatmul.mubr.bf16.vlgmr.msra.gmra.mxu0 %v3498_v23  ;;  %834 = vmatpush1.bf16.msra.mxu1 %v3542_v37 }
  0x23   :  { %390 = vmatprep.mubr.bf16.mxu0 %v3501_v25  ;;  %835 = vmatprep.subr.bf16.mxu1 %v3546_v38 }
  0x24   :  { %3383 = vmatpush3.bf16.msra.mxu0 %v3571_v41 }
  0x25   :  { %3384 = vmatprep.subr.bf16.mxu0 %v3583_v48 }
  0x26   :  { %836 = vmatpush1.bf16.msra.mxu1 %v3548_v39 }
  0x27   :  { %1351 = vmatprep.subr.bf16.mxu1 %v3555_v40 }
  0x28   :  { %3385 = vmatpush3.bf16.msra.mxu0 %v3583_v48 }
  0x29   :  { %854 = vmatmul.mubr.bf16.vlgmr.msra.gmra.mxu1 %v4212_v43  ;;  %3386 = vmatprep.subr.bf16.mxu0 %v3588_v52 }
  0x2a   :  { %391 = vmatmul.mubr.bf16.gmra.mxu0 %v3503_v29  ;;  %1352 = vmatpush1.bf16.msra.mxu1 %v3553_v44 }
  0x2b   :  { %398 = vmatprep.mubr.bf16.mxu0 %v3504_v30  ;;  %863 = vmatprep.mubr.bf16.mxu1 %v5749_v2 }
  0x2c   :  { %1353 = vmatprep.subr.bf16.mxu1 %v3566_v46  ;;  %3387 = vmatpush3.bf16.msra.mxu0 %v3588_v52 }
  0x2d   :  { %3388 = vmatprep.subr.bf16.mxu0 %v3593_v56 }
  0x2e   :  { %1354 = vmatpush1.bf16.msra.mxu1 %v3564_v47 }
  0x2f   :  { %1355 = vmatprep.subr.bf16.mxu1 %v3578_v49 }
  0x30   :  { %3389 = vmatpush3.bf16.msra.mxu0 %v3593_v56 }
  0x31   :  { %864 = vmatmul.mubr.bf16.gmra.mxu1 %v4240_v51  ;;  %3390 = vmatprep.subr.bf16.mxu0 %v3594_v57 }
  0x32   :  { %399 = vmatmul.mubr.bf16.gmra.mxu0 %v3506_v35  ;;  %873 = vmatprep.mubr.bf16.mxu1 %v5749_v2 }
  0x33   :  { %406 = vmatprep.mubr.bf16.mxu0 %v3507_v36  ;;  %1356 = vmatpush1.bf16.msra.mxu1 %v3576_v54 }
  0x34   :  { %1357 = vmatprep.subr.bf16.mxu1 %v3591_v55  ;;  %3391 = vmatpush3.bf16.msra.mxu0 %v3594_v57 }
  0x35   :  { %3392 = vmatprep.subr.bf16.mxu0 %v3596_v63 }
  0x37   :  { %1358 = vmatpush1.bf16.msra.mxu1 %v3589_v58 }
  0x38   :  { %1359 = vmatprep.subr.bf16.mxu1 %v3600_v62  ;;  %3393 = vmatpush3.bf16.msra.mxu0 %v3596_v63 }
  0x39   :  { %874 = vmatmul.mubr.bf16.gmra.mxu1 %v4271_v60  ;;  %3394 = vmatprep.subr.bf16.mxu0 %v3597_v1 }
  0x3a   :  { %407 = vmatmul.mubr.bf16.gmra.mxu0 %v3509_v42  ;;  %883 = vmatprep.mubr.bf16.mxu1 %v5749_v2 }
  0x3b   :  { %414 = vmatprep.mubr.bf16.mxu0 %v3510_v45  ;;  %1360 = vmatpush1.bf16.msra.mxu1 %v3598_v0 }
  0x3c   :  { %1361 = vmatprep.subr.bf16.mxu1 %v3606_v3  ;;  %3395 = vmatpush3.bf16.msra.mxu0 %v3597_v1 }
  0x3d   :  { %3396 = vmatprep.subr.bf16.mxu0 %v3602_v8 }
  0x3f   :  { %1362 = vmatpush1.bf16.msra.mxu1 %v3604_v5 }
  0x40   :  { %1363 = vmatprep.subr.bf16.mxu1 %v3611_v9  ;;  %3397 = vmatpush3.bf16.msra.mxu0 %v3602_v8 }
  0x41   :  { %884 = vmatmul.mubr.bf16.gmra.mxu1 %v4302_v6  ;;  %3430 = vmatprep.subr.bf16.mxu0 %v4321_v11 }
  0x42   :  { %415 = vmatmul.mubr.bf16.gmra.mxu0 %v3512_v50  ;;  %893 = vmatprep.mubr.bf16.mxu1 %v5749_v2 }
  0x43   :  { %422 = vmatprep.mubr.bf16.mxu0 %v3516_v53  ;;  %1364 = vmatpush1.bf16.msra.mxu1 %v3609_v10 }
  0x44   :  { %1365 = vmatprep.subr.bf16.mxu1 %v3618_v12 }
  0x49   :  { %894 = vmatmul.mubr.bf16.gmra.mxu1 %v4335_v15 }
  0x4a   :  { %423 = vmatmul.mubr.bf16.gmra.mxu0 %v3518_v59 }
  0x4b   :  { %430 = vmatprep.mubr.bf16.mxu0 %v3525_v61 }
  0x52   :  { %431 = vmatmul.mubr.bf16.gmra.mxu0 %v3527_v4 }
  0x53   :  { %438 = vmatprep.mubr.bf16.mxu0 %v3534_v7 }
  0x54   :  { %14 = vsyncpa [#allocation3], 0  ;;  %903 = vmatprep.mubr.bf16.mxu1 %v5749_v2  ;;  %1366 = vmatpush1.bf16.msra.mxu1 %v3616_v16  ;;  %v4346_v17 = vld [vmem:[%s5740_s1 + $0x28] sm:$0xff]   ;;  %v3550_v19 = vld [vmem:[%s5739_s0 + $0x94] ss:$8 sps:$4 sm:$0xff]   ;;  %s4034_s19 = smov [#allocation2]  }
  0x55   :  { %v3545_v18 = vld [vmem:[%s5739_s0 + $0x80] ss:$8 sps:$4 sm:$0xff]   ;;  %904 = vmatmul.mubr.bf16.gmra.mxu1 %v4346_v17  ;;  %v4359_v20 = vld [vmem:[%s5740_s1 + $0x30] sm:$0xff]   ;;  %v3557_v22 = vld [vmem:[%s5739_s0 + $0xa4] ss:$8 sps:$4 sm:$0xff]   ;;  %s2869_s20 = sshll.u32 %s4034_s19, 4  ;;  %s2870_s20 = int_to_ptr.vmem [resolvable:$true] %s2869_s20 }
  0x56   :  { %913 = vmatprep.mubr.bf16.mxu1 %v5749_v2  ;;  %v3552_v21 = vld [vmem:[%s5739_s0 + $0x90] ss:$8 sps:$4 sm:$0xff]   ;;  %v3559_v24 = vld [vmem:[%s5739_s0 + $0xa0] ss:$8 sps:$4 sm:$0xff]   ;;  %v3561_v25 = vld [vmem:[%s5739_s0 + $0xb4] ss:$8 sps:$4 sm:$0xff]   ;;  %p4016_p1 = scmp.lt.s32.totalorder %s2870_s20, %s2870_s20 }
  0x57   :  { %v4372_v23 = vld [vmem:[%s5740_s1 + $0x38] sm:$0xff]   ;;  %v4385_v26 = vld [vmem:[%s5740_s1 + $0x40] sm:$0xff]   ;;  %v4398_v29 = vld [vmem:[%s5740_s1 + $0x48] sm:$0xff]   ;;  %s4011_s22 = scalar_lea.vmem %s2870_s20, 2048 }
  0x58   :  { %v3563_v27 = vld [vmem:[%s5739_s0 + $0xb0] ss:$8 sps:$4 sm:$0xff]   ;;  %v3568_v28 = vld [vmem:[%s5739_s0 + $0xc4] ss:$8 sps:$4 sm:$0xff]   ;;  %v3570_v30 = vld [vmem:[%s5739_s0 + $0xc0] ss:$8 sps:$4 sm:$0xff]   ;;  %p4012_p0 = scmp.ne.s32.totalorder %s2870_s20, %s4011_s22  ;;  %p4017_p2 = scmp.lt.s32.totalorder %s4011_s22, %s4011_s22 }
  0x59   :  { %v3573_v31 = vld [vmem:[%s5739_s0 + $0xd4] ss:$8 sps:$4 sm:$0xff]   ;;  %v3575_v33 = vld [vmem:[%s5739_s0 + $0xd0] ss:$8 sps:$4 sm:$0xff]   ;;  %v3580_v34 = vld [vmem:[%s5739_s0 + $0xe4] ss:$8 sps:$4 sm:$0xff]  }
  0x5a   :  { %439 = vmatmul.mubr.bf16.gmra.mxu0 %v3536_v13  ;;  %v3603_v32 = vld [vmem:[%s5740_s1 + $0x50] sm:$0xff]   ;;  %v3607_v35 = vld [vmem:[%s5740_s1 + $0x58] sm:$0xff]   ;;  %v3582_v36 = vld [vmem:[%s5739_s0 + $0xe0] ss:$8 sps:$4 sm:$0xff]   ;;  %p4018_p3 = por %p4017_p2, %p4016_p1 }
  0x5b   :  { %446 = vmatprep.mubr.bf16.mxu0 %v3543_v14  ;;  %v3585_v37 = vld [vmem:[%s5739_s0 + $0xf4] ss:$8 sps:$4 sm:$0xff]   ;;  %v3608_v38 = vld [vmem:[%s5740_s1 + $0x60] sm:$0xff]   ;;  %v3587_v39 = vld [vmem:[%s5739_s0 + $0xf0] ss:$8 sps:$4 sm:$0xff]  }
  0x5c   :  { %v3612_v40 = vld [vmem:[%s5740_s1 + $0x68] sm:$0xff]   ;;  %v3615_v41 = vld [vmem:[%s5743_s4 + $0x98] ss:$12 sps:$4 sm:$0xff]   ;;  %v3622_v45 = vld [vmem:[%s5743_s4 + $0x50] ss:$12 sps:$4 sm:$0xff]   ;;  %p4019_p4 = pnand %p4018_p3, %p4012_p0 }
  0x5d   :  { %914 = vmatmul.mubr.bf16.gmra.mxu1 %v4359_v20  ;;  %v3619_v42 = vld [vmem:[%s5743_s4 + $0x80] ss:$12 sps:$4 sm:$0xff]   ;;  %v3621_v44 = vld [vmem:[%s5743_s4 + $0x68] ss:$12 sps:$4 sm:$0xff]   ;;  %v3620_v46 = vld [vmem:[%s5740_s1 + $0x78] sm:$0xff]  }
  0x5e   :  { %923 = vmatprep.mubr.bf16.mxu1 %v5749_v2  ;;  %v3623_v47 = vld [vmem:[%s5743_s4 + $0x38] ss:$12 sps:$4 sm:$0xff]   ;;  %v3624_v48 = vld [vmem:[%s5743_s4 + $0x20] ss:$12 sps:$4 sm:$0xff]   ;;  %v3625_v49 = vld [vmem:[%s5743_s4 + $0x8] ss:$12 sps:$4 sm:$0xff]  }
  0x62   :  { %447 = vmatmul.mubr.bf16.gmra.mxu0 %v3545_v18 }
  0x63   :  { %454 = vmatprep.mubr.bf16.mxu0 %v3550_v19 }
  0x65   :  { %924 = vmatmul.mubr.bf16.gmra.mxu1 %v4372_v23 }
  0x66   :  { %933 = vmatprep.mubr.bf16.mxu1 %v5749_v2 }
  0x6a   :  { %455 = vmatmul.mubr.bf16.gmra.mxu0 %v3552_v21 }
  0x6b   :  { %462 = vmatprep.mubr.bf16.mxu0 %v3557_v22 }
  0x6d   :  { %934 = vmatmul.mubr.bf16.gmra.mxu1 %v4385_v26 }
  0x6e   :  { %943 = vmatprep.mubr.bf16.mxu1 %v5749_v2 }
  0x72   :  { %463 = vmatmul.mubr.bf16.gmra.mxu0 %v3559_v24 }
  0x73   :  { %470 = vmatprep.mubr.bf16.mxu0 %v3561_v25 }
  0x75   :  { %944 = vmatmul.mubr.bf16.gmra.mxu1 %v4398_v29 }
  0x76   :  { %953 = vmatprep.mubr.bf16.mxu1 %v5749_v2 }
  0x7a   :  { %471 = vmatmul.mubr.bf16.gmra.mxu0 %v3563_v27 }
  0x7b   :  { %478 = vmatprep.mubr.bf16.mxu0 %v3568_v28 }
  0x7d   :  { %954 = vmatmul.mubr.bf16.gmra.mxu1 %v3603_v32 }
  0x7e   :  { %963 = vmatprep.mubr.bf16.mxu1 %v5749_v2 }
  0x82   :  { %479 = vmatmul.mubr.bf16.gmra.mxu0 %v3570_v30 }
  0x83   :  { %486 = vmatprep.mubr.bf16.mxu0 %v3573_v31 }
  0x85   :  { %964 = vmatmul.mubr.bf16.gmra.mxu1 %v3607_v35 }
  0x86   :  { %973 = vmatprep.mubr.bf16.mxu1 %v5749_v2 }
  0x8a   :  { %487 = vmatmul.mubr.bf16.gmra.mxu0 %v3575_v33 }
  0x8b   :  { %494 = vmatprep.mubr.bf16.mxu0 %v3580_v34 }
  0x8d   :  { %974 = vmatmul.mubr.bf16.gmra.mxu1 %v3608_v38 }
  0x8e   :  { %983 = vmatprep.mubr.bf16.mxu1 %v5749_v2 }
  0x92   :  { %495 = vmatmul.mubr.bf16.gmra.mxu0 %v3582_v36 }
  0x93   :  { %502 = vmatprep.mubr.bf16.mxu0 %v3585_v37 }
  0x95   :  { %984 = vmatmul.mubr.bf16.gmra.mxu1 %v3612_v40 }
  0x96   :  { %993 = vmatprep.mubr.bf16.mxu1 %v5749_v2 }
  0x9a   :  { %503 = vmatmul.mubr.bf16.gmra.mxu0 %v3587_v39 }
  0x9b   :  { %3398 = vmatprep.mubr.bf16.mxu0 %v4212_v43  ;;  %v3614_v43 = vld [vmem:[%s5740_s1 + $0x70] sm:$0xff]  }
  0x9d   :  { %994 = vmatmul.mubr.bf16.gmra.mxu1 %v3614_v43 }
  0x9e   :  { %1003 = vmatprep.mubr.bf16.mxu1 %v5749_v2 }
  0xa2   :  { %3399 = vmatmul.mubr.bf16.vlgmr.msra.gmra.mxu0 %v4240_v51 }
  0xa3   :  { %3402 = vmatprep.mubr.bf16.mxu0 %v4271_v60  ;;  %3431 = vmatpush3.bf16.msra.mxu0 %v4321_v11 }
  0xa4   :  { %3432 = vmatprep.subr.bf16.mxu0 %v3615_v41 }
  0xa5   :  { %1004 = vmatmul.mubr.bf16.gmra.mxu1 %v3620_v46 }
  0xa6   :  { %1383 = vmatprep.mubr.bf16.mxu1 %v5749_v2 }
  0xa7   :  { %3433 = vmatpush3.bf16.msra.mxu0 %v3615_v41 }
  0xa8   :  { %3434 = vmatprep.subr.bf16.mxu0 %v3619_v42 }
  0xaa   :  { %3403 = vmatmul.mubr.bf16.gmra.mxu0 %v4302_v6 }
  0xab   :  { %3406 = vmatprep.mubr.bf16.mxu0 %v4335_v15  ;;  %3435 = vmatpush3.bf16.msra.mxu0 %v3619_v42 }
  0xac   :  { %3436 = vmatprep.subr.bf16.mxu0 %v3621_v44 }
  0xaf   :  { %3437 = vmatpush3.bf16.msra.mxu0 %v3621_v44 }
  0xb0   :  { %3438 = vmatprep.subr.bf16.mxu0 %v3622_v45 }
  0xb2   :  { %3407 = vmatmul.mubr.bf16.gmra.mxu0 %v4346_v17 }
  0xb3   :  { %3410 = vmatprep.mubr.bf16.mxu0 %v4359_v20  ;;  %3439 = vmatpush3.bf16.msra.mxu0 %v3622_v45 }
  0xb4   :  { %3440 = vmatprep.subr.bf16.mxu0 %v3623_v47 }
  0xb7   :  { %3441 = vmatpush3.bf16.msra.mxu0 %v3623_v47 }
  0xb8   :  { %3442 = vmatprep.subr.bf16.mxu0 %v3624_v48 }
  0xba   :  { %3411 = vmatmul.mubr.bf16.gmra.mxu0 %v4372_v23 }
  0xbb   :  { %3414 = vmatprep.mubr.bf16.mxu0 %v4385_v26  ;;  %3443 = vmatpush3.bf16.msra.mxu0 %v3624_v48 }
  0xbc   :  { %3444 = vmatprep.subr.bf16.mxu0 %v3625_v49 }
  0xbf   :  { %3445 = vmatpush3.bf16.msra.mxu0 %v3625_v49 }
  0xc2   :  { %3415 = vmatmul.mubr.bf16.gmra.mxu0 %v4398_v29 }
  0xc3   :  { %3418 = vmatprep.mubr.bf16.mxu0 %v3603_v32 }
  0xca   :  { %3419 = vmatmul.mubr.bf16.gmra.mxu0 %v3607_v35 }
  0xcb   :  { %3422 = vmatprep.mubr.bf16.mxu0 %v3608_v38 }
  0xd2   :  { %3423 = vmatmul.mubr.bf16.gmra.mxu0 %v3612_v40 }
  0xd3   :  { %3426 = vmatprep.mubr.bf16.mxu0 %v3614_v43 }
  0xda   :  { %3427 = vmatmul.mubr.bf16.gmra.mxu0 %v3620_v46 }
  0xe2   :  { %v3238_v50 = vpop.f32.mrf.mxu0 }
  0xe4   :  { %v3239_v51 = vpop.f32.mrf.mxu0 }
  0xe5   :  { %v4479_v54 = vadd.f32 %v3239_v51, %v3238_v50 }
  0xe6   :  { %v3241_v52 = vpop.f32.mrf.mxu0 }
  0xe7   :  { %5782 = vst [vmem:[#allocation5_spill] sm:$0xff] %v4479_v54 }
  0xe8   :  { %v3242_v53 = vpop.f32.mrf.mxu0 }
  0xe9   :  { %v4481_v55 = vadd.f32 %v3242_v53, %v3241_v52  ;;  %v4497_v7 = vpop.f32.mrf.mxu1 }
  0xea   :  { %v3244_v56 = vpop.f32.mrf.mxu0 }
  0xeb   :  { %5783 = vst [vmem:[#allocation6_spill] sm:$0xff] %v4481_v55  ;;  %v1175_v57 = vpack.c.bf16 %v4481_v55, %v4479_v54  ;;  %v4501_v10 = vpop.f32.mrf.mxu1 }
  0xec   :  { %v3245_v58 = vpop.f32.mrf.mxu0 }
  0xed   :  { %1384 = vmatmul.mubr.bf16.vlgmr.msra.gmra.mxu1 %v1175_v57  ;;  %3446 = vmatprep.mubr.bf16.mxu0 %v1175_v57  ;;  %v4486_v61 = vadd.f32 %v3245_v58, %v3244_v56  ;;  %v4503_v12 = vpop.f32.mrf.mxu1 }
  0xee   :  { %v3247_v59 = vpop.f32.mrf.mxu0  ;;  %1393 = vmatprep.mubr.bf16.mxu1 %v5749_v2 }
  0xef   :  { %5784 = vst [vmem:[#allocation7_spill] sm:$0xff] %v4486_v61  ;;  %v4506_v14 = vpop.f32.mrf.mxu1 }
  0xf0   :  { %v3248_v60 = vpop.f32.mrf.mxu0 }
  0xf1   :  { %v4488_v62 = vadd.f32 %v3248_v60, %v3247_v59  ;;  %v4512_v18 = vpop.f32.mrf.mxu1 }
  0xf2   :  { %v3250_v63 = vpop.f32.mrf.mxu0 }
  0xf3   :  { %5785 = vst [vmem:[#allocation8_spill] sm:$0xff] %v4488_v62  ;;  %v1176_v0 = vpack.c.bf16 %v4488_v62, %v4486_v61  ;;  %v4516_v21 = vpop.f32.mrf.mxu1 }
  0xf4   :  { %v3251_v1 = vpop.f32.mrf.mxu0 }
  0xf5   :  { %1394 = vmatmul.mubr.bf16.gmra.mxu1 %v1176_v0  ;;  %3447 = vmatmul.mubr.bf16.vlgmr.msra.gmra.mxu0 %v1176_v0  ;;  %v4493_v5 = vadd.f32 %v3251_v1, %v3250_v63  ;;  %v4518_v23 = vpop.f32.mrf.mxu1 }
  0xf6   :  { %v3253_v3 = vpop.f32.mrf.mxu0  ;;  %1403 = vmatprep.mubr.bf16.mxu1 %v5749_v2 }
  0xf7   :  { %5786 = vst [vmem:[#allocation9_spill] sm:$0xff] %v4493_v5  ;;  %v4521_v25 = vpop.f32.mrf.mxu1 }
  0xf8   :  { %v3254_v4 = vpop.f32.mrf.mxu0 }
  0xf9   :  { %v4495_v6 = vadd.f32 %v3254_v4, %v3253_v3  ;;  %v4527_v29 = vpop.f32.mrf.mxu1 }
  0xfa   :  { %v3256_v8 = vpop.f32.mrf.mxu0 }
  0xfb   :  { %5787 = vst [vmem:[#allocation10_spill] sm:$0xff] %v4495_v6  ;;  %v1177_v9 = vpack.c.bf16 %v4495_v6, %v4493_v5  ;;  %v4531_v32 = vpop.f32.mrf.mxu1 }
  0xfc   :  { %v3257_v11 = vpop.f32.mrf.mxu0 }
  0xfd   :  { %1404 = vmatmul.mubr.bf16.gmra.mxu1 %v1177_v9  ;;  %3450 = vmatprep.mubr.bf16.mxu0 %v1177_v9  ;;  %v4508_v16 = vadd.f32 %v3257_v11, %v3256_v8  ;;  %v4533_v34 = vpop.f32.mrf.mxu1 }
  0xfe   :  { %v3259_v13 = vpop.f32.mrf.mxu0  ;;  %1413 = vmatprep.mubr.bf16.mxu1 %v5749_v2 }
  0xff   :  { %5788 = vst [vmem:[#allocation11_spill] sm:$0xff] %v4508_v16  ;;  %v4536_v36 = vpop.f32.mrf.mxu1 }
 0x100   :  { %v3260_v15 = vpop.f32.mrf.mxu0 }
 0x101   :  { %v4510_v17 = vadd.f32 %v3260_v15, %v3259_v13  ;;  %v4542_v40 = vpop.f32.mrf.mxu1 }
 0x102   :  { %v3262_v19 = vpop.f32.mrf.mxu0 }
 0x103   :  { %5789 = vst [vmem:[#allocation12_spill] sm:$0xff] %v4510_v17  ;;  %v1178_v20 = vpack.c.bf16 %v4510_v17, %v4508_v16  ;;  %v4546_v43 = vpop.f32.mrf.mxu1 }
 0x104   :  { %v3263_v22 = vpop.f32.mrf.mxu0 }
 0x105   :  { %1414 = vmatmul.mubr.bf16.gmra.mxu1 %v1178_v20  ;;  %3451 = vmatmul.mubr.bf16.gmra.mxu0 %v1178_v20  ;;  %v4523_v27 = vadd.f32 %v3263_v22, %v3262_v19  ;;  %v4548_v45 = vpop.f32.mrf.mxu1 }
 0x106   :  { %v3265_v24 = vpop.f32.mrf.mxu0  ;;  %1423 = vmatprep.mubr.bf16.mxu1 %v5749_v2 }
 0x107   :  { %5790 = vst [vmem:[#allocation13_spill] sm:$0xff] %v4523_v27  ;;  %v4551_v47 = vpop.f32.mrf.mxu1 }
 0x108   :  { %v3266_v26 = vpop.f32.mrf.mxu0 }
 0x109   :  { %v4525_v28 = vadd.f32 %v3266_v26, %v3265_v24  ;;  %v4557_v51 = vpop.f32.mrf.mxu1 }
 0x10a   :  { %v3268_v30 = vpop.f32.mrf.mxu0 }
 0x10b   :  { %5791 = vst [vmem:[#allocation14_spill] sm:$0xff] %v4525_v28  ;;  %v1179_v31 = vpack.c.bf16 %v4525_v28, %v4523_v27  ;;  %v4561_v56 = vpop.f32.mrf.mxu1 }
 0x10c   :  { %v3269_v33 = vpop.f32.mrf.mxu0 }
 0x10d   :  { %1424 = vmatmul.mubr.bf16.gmra.mxu1 %v1179_v31  ;;  %3454 = vmatprep.mubr.bf16.mxu0 %v1179_v31  ;;  %v4538_v38 = vadd.f32 %v3269_v33, %v3268_v30  ;;  %v4563_v58 = vpop.f32.mrf.mxu1 }
 0x10e   :  { %v3271_v35 = vpop.f32.mrf.mxu0  ;;  %1433 = vmatprep.mubr.bf16.mxu1 %v5749_v2 }
 0x10f   :  { %5792 = vst [vmem:[#allocation15_spill] sm:$0xff] %v4538_v38  ;;  %v4566_v60 = vpop.f32.mrf.mxu1 }
 0x110   :  { %v3272_v37 = vpop.f32.mrf.mxu0 }
 0x111   :  { %v4540_v39 = vadd.f32 %v3272_v37, %v3271_v35 }
 0x112   :  { %v3274_v41 = vpop.f32.mrf.mxu0 }
 0x113   :  { %5793 = vst [vmem:[#allocation16_spill] sm:$0xff] %v4540_v39  ;;  %v1180_v42 = vpack.c.bf16 %v4540_v39, %v4538_v38 }
 0x114   :  { %v3275_v44 = vpop.f32.mrf.mxu0 }
 0x115   :  { %1434 = vmatmul.mubr.bf16.gmra.mxu1 %v1180_v42  ;;  %3455 = vmatmul.mubr.bf16.gmra.mxu0 %v1180_v42  ;;  %v4553_v49 = vadd.f32 %v3275_v44, %v3274_v41  ;;  %v4572_v3 = vpop.f32.mrf.mxu1 }
 0x116   :  { %v3277_v46 = vpop.f32.mrf.mxu0  ;;  %1443 = vmatprep.mubr.bf16.mxu1 %v5749_v2 }
 0x117   :  { %5794 = vst [vmem:[#allocation17_spill] sm:$0xff] %v4553_v49  ;;  %v4576_v9 = vpop.f32.mrf.mxu1 }
 0x118   :  { %v3278_v48 = vpop.f32.mrf.mxu0 }
 0x119   :  { %v4555_v50 = vadd.f32 %v3278_v48, %v3277_v46  ;;  %v4578_v13 = vpop.f32.mrf.mxu1 }
 0x11a   :  { %v3280_v52 = vpop.f32.mrf.mxu0 }
 0x11b   :  { %5795 = vst [vmem:[#allocation18_spill] sm:$0xff] %v4555_v50  ;;  %v1181_v53 = vpack.c.bf16 %v4555_v50, %v4553_v49  ;;  %v4581_v19 = vpop.f32.mrf.mxu1 }
 0x11c   :  { %v3281_v57 = vpop.f32.mrf.mxu0 }
 0x11d   :  { %1444 = vmatmul.mubr.bf16.gmra.mxu1 %v1181_v53  ;;  %3458 = vmatprep.mubr.bf16.mxu0 %v1181_v53  ;;  %v4568_v0 = vadd.f32 %v3281_v57, %v3280_v52  ;;  %v4587_v26 = vpop.f32.mrf.mxu1 }
 0x11e   :  { %v3283_v59 = vpop.f32.mrf.mxu0  ;;  %1453 = vmatprep.mubr.bf16.mxu1 %v5749_v2 }
 0x11f   :  { %5796 = vst [vmem:[#allocation19_spill] sm:$0xff] %v4568_v0  ;;  %v4591_v33 = vpop.f32.mrf.mxu1 }
 0x120   :  { %v3284_v63 = vpop.f32.mrf.mxu0 }
 0x121   :  { %v4570_v1 = vadd.f32 %v3284_v63, %v3283_v59  ;;  %v4593_v37 = vpop.f32.mrf.mxu1 }
 0x122   :  { %v3286_v4 = vpop.f32.mrf.mxu0 }
 0x123   :  { %5797 = vst [vmem:[#allocation20_spill] sm:$0xff] %v4570_v1  ;;  %v1182_v8 = vpack.c.bf16 %v4570_v1, %v4568_v0  ;;  %v4596_v42 = vpop.f32.mrf.mxu1 }
 0x124   :  { %v3287_v11 = vpop.f32.mrf.mxu0 }
 0x125   :  { %1454 = vmatmul.mubr.bf16.gmra.mxu1 %v1182_v8  ;;  %3459 = vmatmul.mubr.bf16.gmra.mxu0 %v1182_v8  ;;  %v4583_v22 = vadd.f32 %v3287_v11, %v3286_v4  ;;  %v4602_v52 = vpop.f32.mrf.mxu1 }
 0x126   :  { %v3289_v15 = vpop.f32.mrf.mxu0  ;;  %1463 = vmatprep.mubr.bf16.mxu1 %v5749_v2 }
 0x127   :  { %5798 = vst [vmem:[#allocation21_spill] sm:$0xff] %v4583_v22  ;;  %v4606_v59 = vpop.f32.mrf.mxu1 }
 0x128   :  { %v3290_v20 = vpop.f32.mrf.mxu0 }
 0x129   :  { %v4585_v24 = vadd.f32 %v3290_v20, %v3289_v15  ;;  %v4608_v4 = vpop.f32.mrf.mxu1 }
 0x12a   :  { %v3292_v30 = vpop.f32.mrf.mxu0 }
 0x12b   :  { %5799 = vst [vmem:[#allocation22_spill] sm:$0xff] %v4585_v24  ;;  %v1183_v31 = vpack.c.bf16 %v4585_v24, %v4583_v22  ;;  %v4611_v11 = vpop.f32.mrf.mxu1 }
 0x12c   :  { %v3293_v35 = vpop.f32.mrf.mxu0 }
 0x12d   :  { %1464 = vmatmul.mubr.bf16.gmra.mxu1 %v1183_v31  ;;  %3462 = vmatprep.mubr.bf16.mxu0 %v1183_v31  ;;  %v4598_v46 = vadd.f32 %v3293_v35, %v3292_v30  ;;  %v4617_v31 = vpop.f32.mrf.mxu1 }
 0x12e   :  { %v3295_v41 = vpop.f32.mrf.mxu0  ;;  %1473 = vmatprep.mubr.bf16.mxu1 %v5749_v2 }
 0x12f   :  { %5800 = vst [vmem:[#allocation23_spill] sm:$0xff] %v4598_v46 }
 0x130   :  { %v3296_v44 = vpop.f32.mrf.mxu0 }
 0x131   :  { %v4600_v48 = vadd.f32 %v3296_v44, %v3295_v41  ;;  %v4621_v44 = vpop.f32.mrf.mxu1 }
 0x132   :  { %v3298_v53 = vpop.f32.mrf.mxu0 }
 0x133   :  { %5801 = vst [vmem:[#allocation24_spill] sm:$0xff] %v4600_v48  ;;  %v1184_v57 = vpack.c.bf16 %v4600_v48, %v4598_v46  ;;  %v4623_v48 = vpop.f32.mrf.mxu1  ;;  %v5804_v46 = vmov 0  }
 0x134   :  { %v3299_v63 = vpop.f32.mrf.mxu0 }
 0x135   :  { %1474 = vmatmul.mubr.bf16.gmra.mxu1 %v1184_v57  ;;  %3463 = vmatmul.mubr.bf16.gmra.mxu0 %v1184_v57  ;;  %v4613_v20 = vadd.f32 %v3299_v63, %v3298_v53  ;;  %v4626_v53 = vpop.f32.mrf.mxu1 }
 0x136   :  { %v3301_v8 = vpop.f32.mrf.mxu0  ;;  %1483 = vmatprep.mubr.bf16.mxu1 %v5749_v2 }
 0x137   :  { %5802 = vst [vmem:[#allocation25_spill] sm:$0xff] %v4613_v20  ;;  %v4632_v24 = vpop.f32.mrf.mxu1 }
 0x138   :  { %v3302_v15 = vpop.f32.mrf.mxu0 }
 0x139   :  { %v4615_v30 = vadd.f32 %v3302_v15, %v3301_v8  ;;  %v4636_v22 = vpop.f32.mrf.mxu1 }
 0x13a   :  { %v3304_v35 = vpop.f32.mrf.mxu0 }
 0x13b   :  { %5803 = vst [vmem:[#allocation26_spill] sm:$0xff] %v4615_v30  ;;  %v1185_v41 = vpack.c.bf16 %v4615_v30, %v4613_v20  ;;  %v4639_v0 = vpop.f32.mrf.mxu1 }
 0x13c   :  { %v3305_v57 = vpop.f32.mrf.mxu0 }
 0x13d   :  { %1484 = vmatmul.mubr.bf16.gmra.mxu1 %v1185_v41  ;;  %3466 = vmatprep.mubr.bf16.mxu0 %v1185_v41  ;;  %v4628_v8 = vadd.f32 %v3305_v57, %v3304_v35 }
 0x13e   :  { %v3307_v2 = vpop.f32.mrf.mxu0  ;;  %1493 = vmatprep.mubr.bf16.mxu1 %v5804_v46 }
 0x13f   :  { %5805 = vst [vmem:[#allocation27_spill] sm:$0xff] %v4628_v8 }
 0x140   :  { %v3308_v63 = vpop.f32.mrf.mxu0 }
 0x141   :  { %v4630_v15 = vadd.f32 %v3308_v63, %v3307_v2 }
 0x142   :  { %v3310_v30 = vpop.f32.mrf.mxu0 }
 0x143   :  { %5806 = vst [vmem:[#allocation28_spill] sm:$0xff] %v4630_v15  ;;  %v1186_v20 = vpack.c.bf16 %v4630_v15, %v4628_v8  ;;  %v4647_v15 = vpop.f32.mrf.mxu1 }
 0x144   :  { %v3311_v41 = vpop.f32.mrf.mxu0 }
 0x145   :  { %1494 = vmatmul.mubr.bf16.gmra.mxu1 %v1186_v20  ;;  %3467 = vmatmul.mubr.bf16.gmra.mxu0 %v1186_v20  ;;  %v4641_v57 = vadd.f32 %v3311_v41, %v3310_v30  ;;  %v4650_v49 = vpop.f32.mrf.mxu1 }
 0x146   :  { %v3313_v1 = vpop.f32.mrf.mxu0  ;;  %1503 = vmatprep.mubr.bf16.mxu1 %v5804_v46 }
 0x147   :  { %5807 = vst [vmem:[#allocation29_spill] sm:$0xff] %v4641_v57 }
 0x148   :  { %v3314_v35 = vpop.f32.mrf.mxu0 }
 0x149   :  { %v4643_v2 = vadd.f32 %v3314_v35, %v3313_v1  ;;  %v4658_v35 = vpop.f32.mrf.mxu1 }
 0x14a   :  { %v3316_v63 = vpop.f32.mrf.mxu0 }
 0x14b   :  { %5808 = vst [vmem:[#allocation30_spill] sm:$0xff] %v4643_v2  ;;  %v1187_v50 = vpack.c.bf16 %v4643_v2, %v4641_v57  ;;  %v4661_v57 = vpop.f32.mrf.mxu1 }
 0x14c   :  { %v3317_v8 = vpop.f32.mrf.mxu0 }
 0x14d   :  { %1504 = vmatmul.mubr.bf16.gmra.mxu1 %v1187_v50  ;;  %3470 = vmatprep.mubr.bf16.mxu0 %v1187_v50  ;;  %v4652_v38 = vadd.f32 %v3317_v8, %v3316_v63 }
 0x14e   :  { %v3319_v20 = vpop.f32.mrf.mxu0  ;;  %1513 = vmatprep.mubr.bf16.mxu1 %v5804_v46 }
 0x14f   :  { %5809 = vst [vmem:[#allocation31_spill] sm:$0xff] %v4652_v38 }
 0x150   :  { %v3320_v39 = vpop.f32.mrf.mxu0 }
 0x151   :  { %v4654_v30 = vadd.f32 %v3320_v39, %v3319_v20  ;;  %v4669_v20 = vpop.f32.mrf.mxu1 }
 0x152   :  { %v3322_v1 = vpop.f32.mrf.mxu0 }
 0x153   :  { %5810 = vst [vmem:[#allocation32_spill] sm:$0xff] %v4654_v30  ;;  %v1188_v41 = vpack.c.bf16 %v4654_v30, %v4652_v38  ;;  %v4672_v38 = vpop.f32.mrf.mxu1 }
 0x154   :  { %v3323_v2 = vpop.f32.mrf.mxu0 }
 0x155   :  { %1514 = vmatmul.mubr.bf16.gmra.mxu1 %v1188_v41  ;;  %3471 = vmatmul.mubr.bf16.gmra.mxu0 %v1188_v41  ;;  %v4663_v27 = vadd.f32 %v3323_v2, %v3322_v1 }
 0x156   :  { %v3325_v50 = vpop.f32.mrf.mxu0  ;;  %1523 = vmatprep.mubr.bf16.mxu1 %v5804_v46 }
 0x157   :  { %5811 = vst [vmem:[#allocation33_spill] sm:$0xff] %v4663_v27 }
 0x158   :  { %v3326_v28 = vpop.f32.mrf.mxu0 }
 0x159   :  { %v4665_v8 = vadd.f32 %v3326_v28, %v3325_v50  ;;  %v4682_v50 = vpop.f32.mrf.mxu1 }
 0x15a   :  { %v3328_v39 = vpop.f32.mrf.mxu0 }
 0x15b   :  { %5812 = vst [vmem:[#allocation34_spill] sm:$0xff] %v4665_v8  ;;  %v1189_v63 = vpack.c.bf16 %v4665_v8, %v4663_v27 }
 0x15c   :  { %v3329_v30 = vpop.f32.mrf.mxu0 }
 0x15d   :  { %1524 = vmatmul.mubr.bf16.gmra.mxu1 %v1189_v63  ;;  %3474 = vmatprep.mubr.bf16.mxu0 %v1189_v63  ;;  %v4674_v16 = vadd.f32 %v3329_v30, %v3328_v39 }
 0x15e   :  { %v3331_v41 = vpop.f32.mrf.mxu0  ;;  %1533 = vmatprep.mubr.bf16.mxu1 %v5804_v46  ;;  %v4688_v46 = vpop.f32.mrf.mxu1 }
 0x15f   :  { %5813 = vst [vmem:[#allocation35_spill] sm:$0xff] %v4674_v16  ;;  %5817 = vst [vmem:[#allocation39_spill] sm:$0xff] %v4688_v46 }
 0x160   :  { %v3332_v17 = vpop.f32.mrf.mxu0 }
 0x161   :  { %v4676_v2 = vadd.f32 %v3332_v17, %v3331_v41  ;;  %v4694_v17 = vpop.f32.mrf.mxu1 }
 0x162   :  { %v4678_v28 = vpop.f32.mrf.mxu0  ;;  %5819 = vst [vmem:[#allocation41_spill] sm:$0xff] %v4694_v17 }
 0x163   :  { %5814 = vst [vmem:[#allocation36_spill] sm:$0xff] %v4676_v2  ;;  %5815 = vst [vmem:[#allocation37_spill] sm:$0xff] %v4678_v28  ;;  %v1190_v1 = vpack.c.bf16 %v4676_v2, %v4674_v16  ;;  %v582_v2 = vlaneseq  ;;  %v4700_v16 = vpop.f32.mrf.mxu1 }
 0x164   :  { %v4684_v8 = vpop.f32.mrf.mxu0  ;;  %5822 = vst [vmem:[#allocation44_spill] sm:$0xff] %v4700_v16 }
 0x165   :  { %1534 = vmatmul.mubr.bf16.gmra.mxu1 %v1190_v1  ;;  %3475 = vmatmul.mubr.bf16.gmra.mxu0 %v1190_v1  ;;  %v4706_v5 = vshrl.u32 %v582_v2, 7  ;;  %v4708_v62 = vpop.f32.mrf.mxu1 }
 0x166   :  { %v4686_v63 = vpop.f32.mrf.mxu0  ;;  %5825 = vst [vmem:[#allocation47_spill] sm:$0xff] %v4708_v62 }
 0x167   :  { %5816 = vst [vmem:[#allocation38_spill] sm:$0xff] %v4686_v63  ;;  %v592_v55 = vsub.s32 2, %v4706_v5 }
 0x168   :  { %v4690_v27 = vpop.f32.mrf.mxu0 }
 0x16a   :  { %v4692_v30 = vpop.f32.mrf.mxu0 }
 0x16b   :  { %5818 = vst [vmem:[#allocation40_spill] sm:$0xff] %v4692_v30 }
 0x16c   :  { %v4696_v39 = vpop.f32.mrf.mxu0 }
 0x16d   :  { %5820 = vst [vmem:[#allocation42_spill] sm:$0xff] %v4696_v39  ;;  %v4715_v39 = vpop.f32.mrf.mxu1 }
 0x16e   :  { %v4698_v41 = vpop.f32.mrf.mxu0  ;;  %5828 = vst [vmem:[#allocation50_spill] sm:$0xff] %v4715_v39 }
 0x16f   :  { %5821 = vst [vmem:[#allocation43_spill] sm:$0xff] %v4698_v41  ;;  %v580_v41 = vld [vmem:[%s5744_s5] sm:$0x7] }
 0x170   :  { %v4702_v6 = vpop.f32.mrf.mxu0 }
 0x171   :  { %5823 = vst [vmem:[#allocation45_spill] sm:$0xff] %v4702_v6  ;;  %v4722_v6 = vrot.slane %v580_v41, %v592_v55 }
 0x172   :  { %v4704_v1 = vpop.f32.mrf.mxu0 }
 0x173   :  { %5824 = vst [vmem:[#allocation46_spill] sm:$0xff] %v4704_v1  ;;  %v4724_v1 = vpop.f32.mrf.mxu1 }
 0x174   :  { %v4710_v61 = vpop.f32.mrf.mxu0  ;;  %5830 = vst [vmem:[#allocation52_spill] sm:$0xff] %v4724_v1 }
 0x175   :  { %5826 = vst [vmem:[#allocation48_spill] sm:$0xff] %v4710_v61 }
 0x176   :  { %v4713_v54 = vpop.f32.mrf.mxu0 }
 0x177   :  { %5827 = vst [vmem:[#allocation49_spill] sm:$0xff] %v4713_v54  ;;  %v4731_v54 = vpop.f32.mrf.mxu1 }
 0x178   :  { %v4720_v30 = vpop.f32.mrf.mxu0  ;;  %5833 = vst [vmem:[#allocation55_spill] sm:$0xff] %v4731_v54 }
 0x179   :  { %5829 = vst [vmem:[#allocation51_spill] sm:$0xff] %v4720_v30  ;;  %v4738_v30 = vpop.f32.mrf.mxu1 }
 0x17a   :  { %v3412_v2 = vpop.f32.mrf.mxu0  ;;  %5836 = vst [vmem:[#allocation58_spill] sm:$0xff] %v4738_v30 }
 0x17b   :  { %v4727_v63 = vadd.f32 %v3412_v2, %v4722_v6 }
 0x17c   :  { %v4729_v61 = vpop.f32.mrf.mxu0 }
 0x17d   :  { %5831 = vst [vmem:[#allocation53_spill] sm:$0xff] %v4727_v63  ;;  %5832 = vst [vmem:[#allocation54_spill] sm:$0xff] %v4729_v61  ;;  %v4746_v61 = vpop.f32.mrf.mxu1 }
 0x17e   :  { %v3413_v62 = vpop.f32.mrf.mxu0  ;;  %5839 = vst [vmem:[#allocation61_spill] sm:$0xff] %v4746_v61 }
 0x17f   :  { %v4734_v39 = vadd.f32 %v3413_v62, %v4722_v6  ;;  %v4754_v17 = vpop.f32.mrf.mxu1 }
 0x180   :  { %v4736_v28 = vpop.f32.mrf.mxu0  ;;  %5842 = vst [vmem:[#allocation64_spill] sm:$0xff] %v4754_v17 }
 0x181   :  { %5834 = vst [vmem:[#allocation56_spill] sm:$0xff] %v4734_v39  ;;  %5835 = vst [vmem:[#allocation57_spill] sm:$0xff] %v4736_v28 }
 0x182   :  { %v3416_v16 = vpop.f32.mrf.mxu0 }
 0x183   :  { %v4741_v55 = vadd.f32 %v3416_v16, %v4722_v6 }
 0x184   :  { %v1112_v1 = vpop.f32.mrf.mxu0 }
 0x185   :  { %5837 = vst [vmem:[#allocation59_spill] sm:$0xff] %v4741_v55  ;;  %v4744_v2 = vadd.f32 %v1112_v1, %v4722_v6 }
 0x186   :  { %v3417_v63 = vpop.f32.mrf.mxu0 }
 0x187   :  { %5838 = vst [vmem:[#allocation60_spill] sm:$0xff] %v4744_v2  ;;  %v4749_v54 = vadd.f32 %v3417_v63, %v4722_v6  ;;  %v4762_v2 = vpop.f32.mrf.mxu1 }
 0x188   :  { %v1115_v62 = vpop.f32.mrf.mxu0  ;;  %5845 = vst [vmem:[#allocation67_spill] sm:$0xff] %v4762_v2 }
 0x189   :  { %5840 = vst [vmem:[#allocation62_spill] sm:$0xff] %v4749_v54  ;;  %v4752_v39 = vadd.f32 %v1115_v62, %v4722_v6 }
 0x18a   :  { %v3420_v28 = vpop.f32.mrf.mxu0 }
 0x18b   :  { %5841 = vst [vmem:[#allocation63_spill] sm:$0xff] %v4752_v39  ;;  %v4757_v16 = vadd.f32 %v3420_v28, %v4722_v6  ;;  %v4770_v39 = vpop.f32.mrf.mxu1 }
 0x18c   :  { %v1128_v55 = vpop.f32.mrf.mxu0  ;;  %5848 = vst [vmem:[#allocation70_spill] sm:$0xff] %v4770_v39 }
 0x18d   :  { %5843 = vst [vmem:[#allocation65_spill] sm:$0xff] %v4757_v16  ;;  %v4760_v1 = vadd.f32 %v1128_v55, %v4722_v6  ;;  %v4778_v17 = vpop.f32.mrf.mxu1 }
 0x18e   :  { %v3421_v30 = vpop.f32.mrf.mxu0  ;;  %5851 = vst [vmem:[#allocation73_spill] sm:$0xff] %v4778_v17 }
 0x18f   :  { %5844 = vst [vmem:[#allocation66_spill] sm:$0xff] %v4760_v1  ;;  %v4765_v63 = vadd.f32 %v3421_v30, %v4722_v6  ;;  %v4786_v2 = vpop.f32.mrf.mxu1 }
 0x190   :  { %v1131_v54 = vpop.f32.mrf.mxu0  ;;  %5854 = vst [vmem:[#allocation76_spill] sm:$0xff] %v4786_v2  ;;  %v584_v2 = vsub.s32 0, %v4706_v5 }
 0x191   :  { %5846 = vst [vmem:[#allocation68_spill] sm:$0xff] %v4765_v63  ;;  %v4768_v62 = vadd.f32 %v1131_v54, %v4722_v6  ;;  %v4794_v39 = vpop.f32.mrf.mxu1 }
 0x192   :  { %v3424_v61 = vpop.f32.mrf.mxu0  ;;  %5857 = vst [vmem:[#allocation79_spill] sm:$0xff] %v4794_v39 }
 0x193   :  { %5847 = vst [vmem:[#allocation69_spill] sm:$0xff] %v4768_v62  ;;  %v4773_v28 = vadd.f32 %v3424_v61, %v4722_v6 }
 0x194   :  { %v1144_v16 = vpop.f32.mrf.mxu0 }
 0x195   :  { %5849 = vst [vmem:[#allocation71_spill] sm:$0xff] %v4773_v28  ;;  %v4776_v55 = vadd.f32 %v1144_v16, %v4722_v6 }
 0x196   :  { %v3425_v1 = vpop.f32.mrf.mxu0 }
 0x197   :  { %5850 = vst [vmem:[#allocation72_spill] sm:$0xff] %v4776_v55  ;;  %v4781_v30 = vadd.f32 %v3425_v1, %v4722_v6 }
 0x198   :  { %v1147_v63 = vpop.f32.mrf.mxu0 }
 0x199   :  { %5852 = vst [vmem:[#allocation74_spill] sm:$0xff] %v4781_v30  ;;  %v4784_v54 = vadd.f32 %v1147_v63, %v4722_v6 }
 0x19a   :  { %v3428_v62 = vpop.f32.mrf.mxu0 }
 0x19b   :  { %5853 = vst [vmem:[#allocation75_spill] sm:$0xff] %v4784_v54  ;;  %v4789_v61 = vadd.f32 %v3428_v62, %v4722_v6  ;;  %v4802_v54 = vpop.f32.mrf.mxu1  ;;  %v588_v62 = vsub.s32 1, %v4706_v5 }
 0x19c   :  { %v1160_v28 = vpop.f32.mrf.mxu0  ;;  %5860 = vst [vmem:[#allocation82_spill] sm:$0xff] %v4802_v54 }
 0x19d   :  { %5855 = vst [vmem:[#allocation77_spill] sm:$0xff] %v4789_v61  ;;  %v4792_v16 = vadd.f32 %v1160_v28, %v4722_v6  ;;  %v4806_v61 = vpop.f32.mrf.mxu1  ;;  %v4808_v28 = vrot.slane %v580_v41, %v584_v2 }
 0x19e   :  { %v3429_v55 = vpop.f32.mrf.mxu0  ;;  %5861 = vst [vmem:[#allocation83_spill] sm:$0xff] %v4806_v61 }
 0x19f   :  { %5856 = vst [vmem:[#allocation78_spill] sm:$0xff] %v4792_v16  ;;  %v4797_v1 = vadd.f32 %v3429_v55, %v4722_v6  ;;  %v4810_v16 = vrot.slane %v580_v41, %v588_v62  ;;  %v4812_v39 = vpop.f32.mrf.mxu1  ;;  %v856_v55 = vadd.f32 %v4497_v7, %v4808_v28  ;;  %v860_v5 = vadd.f32 %v4503_v12, %v4808_v28 }
 0x1a0   :  { %v1163_v30 = vpop.f32.mrf.mxu0  ;;  %5862 = vst [vmem:[#allocation84_spill] sm:$0xff] %v4812_v39  ;;  %v866_v7 = vadd.f32 %v4512_v18, %v4808_v28 }
 0x1a1   :  { %5858 = vst [vmem:[#allocation80_spill] sm:$0xff] %v4797_v1  ;;  %v4800_v63 = vadd.f32 %v1163_v30, %v4722_v6  ;;  %v858_v30 = vadd.f32 %v4501_v10, %v4810_v16  ;;  %v862_v41 = vadd.f32 %v4506_v14, %v4810_v16  ;;  %v868_v12 = vadd.f32 %v4516_v21, %v4810_v16 }
 0x1a2   :  { %v870_v14 = vadd.f32 %v4518_v23, %v4808_v28  ;;  %v872_v18 = vadd.f32 %v4521_v25, %v4810_v16  ;;  %v876_v21 = vadd.f32 %v4527_v29, %v4808_v28  ;;  %v878_v23 = vadd.f32 %v4531_v32, %v4810_v16 }
 0x1a3   :  { %5859 = vst [vmem:[#allocation81_spill] sm:$0xff] %v4800_v63  ;;  %v890_v32 = vadd.f32 %v4548_v45, %v4808_v28  ;;  %v4858_v45 = vadd.f32 %v4563_v58, %v4808_v28  ;;  %v4874_v58 = vadd.f32 %v4578_v13, %v4808_v28  ;;  %v4888_v13 = vadd.f32 %v4591_v33, %v4810_v16 }
 0x1a4   :  { %v4904_v33 = vadd.f32 %v4606_v59, %v4810_v16  ;;  %v4916_v59 = vadd.f32 %v4617_v31, %v4808_v28  ;;  %v4932_v31 = vadd.f32 %v4632_v24, %v4808_v28  ;;  %v4947_v24 = vadd.f32 %v4647_v15, %v4810_v16 }
 0x1a5   :  { %v4962_v15 = vadd.f32 %v4658_v35, %v4810_v16 }
 0x1ad   :  { %v1385_v1 = vpop.f32.mrf.mxu1 }
 0x1ae   :  { %v1705_v63 = vadd.f32 %v1385_v1, %v856_v55 }
 0x1af   :  { %v1387_v54 = vpop.f32.mrf.mxu1 }
 0x1b0   :  { %v2998_v17 = vmul.f32 -1.442695, %v1705_v63  ;;  %v1929_v61 = vadd.f32 %v1387_v54, %v858_v30 }
 0x1b1   :  { %v1389_v2 = vpop.f32.mrf.mxu1 }
 0x1b2   :  { %3626 = vpow2.f32 %v2998_v17  ;;  %v3030_v62 = vmul.f32 -1.442695, %v1929_v61  ;;  %v1706_v39 = vadd.f32 %v1389_v2, %v860_v5 }
 0x1b3   :  { %v1391_v46 = vpop.f32.mrf.mxu1 }
 0x1b4   :  { %3628 = vpow2.f32 %v3030_v62  ;;  %v2999_v10 = vmul.f32 -1.442695, %v1706_v39  ;;  %v1930_v1 = vadd.f32 %v1391_v46, %v862_v41 }
 0x1b5   :  { %v1395_v55 = vpop.f32.mrf.mxu1 }
 0x1b6   :  { %3630 = vpow2.f32 %v2999_v10  ;;  %v3031_v54 = vmul.f32 -1.442695, %v1930_v1  ;;  %v1707_v63 = vadd.f32 %v1395_v55, %v866_v7  ;;  %v880_v7 = vadd.f32 %v4533_v34, %v4808_v28 }
 0x1b7   :  { %v1397_v30 = vpop.f32.mrf.mxu1  ;;  %v882_v10 = vadd.f32 %v4536_v36, %v4810_v16  ;;  %v886_v1 = vadd.f32 %v4542_v40, %v4808_v28  ;;  %v4846_v34 = vadd.f32 %v4551_v47, %v4810_v16  ;;  %v4850_v36 = vadd.f32 %v4557_v51, %v4808_v28 }
 0x1b8   :  { %3632 = vpow2.f32 %v3031_v54  ;;  %v3000_v17 = vmul.f32 -1.442695, %v1707_v63  ;;  %v1931_v61 = vadd.f32 %v1397_v30, %v868_v12  ;;  %v888_v54 = vadd.f32 %v4546_v43, %v4810_v16 }
 0x1b9   :  { %v1399_v5 = vpop.f32.mrf.mxu1  ;;  %v4854_v40 = vadd.f32 %v4561_v56, %v4810_v16  ;;  %v4862_v47 = vadd.f32 %v4566_v60, %v4810_v16  ;;  %v4866_v51 = vadd.f32 %v4572_v3, %v4808_v28  ;;  %v4878_v60 = vadd.f32 %v4581_v19, %v4810_v16  ;;  %v4880_v3 = vpop.f32.mrf.mxu0 }
 0x1ba   :  { %3634 = vpow2.f32 %v3000_v17  ;;  %v3032_v46 = vmul.f32 -1.442695, %v1931_v61  ;;  %v1708_v39 = vadd.f32 %v1399_v5, %v870_v14  ;;  %v4892_v19 = vadd.f32 %v4593_v37, %v4808_v28 }
 0x1bb   :  { %v1401_v2 = vpop.f32.mrf.mxu1  ;;  %v1578_v37 = vpop.f32.mrf.mxu0 }
 0x1bc   :  { %3636 = vpow2.f32 %v3032_v46  ;;  %v3001_v41 = vmul.f32 -1.442695, %v1708_v39  ;;  %v1932_v62 = vadd.f32 %v1401_v2, %v872_v18  ;;  %v4870_v39 = vadd.f32 %v4576_v9, %v4810_v16 }
 0x1bd   :  { %v1405_v25 = vpop.f32.mrf.mxu1  ;;  %v4884_v9 = vadd.f32 %v4587_v26, %v4808_v28  ;;  %v4900_v26 = vadd.f32 %v4602_v52, %v4808_v28  ;;  %v4912_v52 = vadd.f32 %v4611_v11, %v4810_v16  ;;  %v4928_v11 = vadd.f32 %v4626_v53, %v4810_v16 }
 0x1be   :  { %3638 = vpow2.f32 %v3001_v41  ;;  %v3033_v55 = vmul.f32 -1.442695, %v1932_v62  ;;  %v1709_v12 = vadd.f32 %v1405_v25, %v876_v21  ;;  %v4943_v53 = vadd.f32 %v4639_v0, %v4808_v28 }
 0x1bf   :  { %v3627_v29 = vpop.eup %3626  ;;  %v1407_v63 = vpop.f32.mrf.mxu1 }
 0x1c0   :  { %v1833_v30 = vadd.f32 1.0, %v3627_v29  ;;  %v3002_v14 = vmul.f32 -1.442695, %v1709_v12  ;;  %v1933_v17 = vadd.f32 %v1407_v63, %v878_v23  ;;  %3640 = vpow2.f32 %v3033_v55 }
 0x1c1   :  { %v3629_v43 = vpop.eup %3628  ;;  %v1409_v61 = vpop.f32.mrf.mxu1  ;;  %v4896_v29 = vadd.f32 %v4596_v42, %v4810_v16  ;;  %v4908_v42 = vadd.f32 %v4608_v4, %v4808_v28  ;;  %v4924_v4 = vadd.f32 %v4623_v48, %v4808_v28  ;;  %v4939_v48 = vadd.f32 %v4636_v22, %v4810_v16 }
 0x1c2   :  { %3642 = vrcp.f32 %v1833_v30  ;;  %v2057_v56 = vadd.f32 1.0, %v3629_v43  ;;  %v3034_v5 = vmul.f32 -1.442695, %v1933_v17  ;;  %v1710_v18 = vadd.f32 %v1409_v61, %v880_v7 }
 0x1c3   :  { %v3631_v46 = vpop.eup %3630  ;;  %3644 = vpow2.f32 %v3002_v14  ;;  %v1411_v2 = vpop.f32.mrf.mxu1  ;;  %v4920_v61 = vadd.f32 %v4621_v44, %v4810_v16 }
 0x1c4   :  { %3646 = vrcp.f32 %v2057_v56  ;;  %v1834_v21 = vadd.f32 1.0, %v3631_v46  ;;  %v3003_v41 = vmul.f32 -1.442695, %v1710_v18  ;;  %v1934_v62 = vadd.f32 %v1411_v2, %v882_v10  ;;  %v4934_v18 = vpop.f32.mrf.mxu0 }
 0x1c5   :  { %v3633_v23 = vpop.eup %3632  ;;  %3648 = vpow2.f32 %v3034_v5  ;;  %v1415_v7 = vpop.f32.mrf.mxu1 }
 0x1c6   :  { %3650 = vrcp.f32 %v1834_v21  ;;  %v2058_v25 = vadd.f32 1.0, %v3633_v23  ;;  %v3035_v55 = vmul.f32 -1.442695, %v1934_v62  ;;  %v1711_v12 = vadd.f32 %v1415_v7, %v886_v1 }
 0x1c7   :  { %v3635_v10 = vpop.eup %3634  ;;  %3652 = vpow2.f32 %v3003_v41  ;;  %v1417_v63 = vpop.f32.mrf.mxu1  ;;  %v4952_v41 = vld [vmem:[%s5745_s6] ss:$0 sm:$0xff] }
 0x1c8   :  { %3654 = vrcp.f32 %v2058_v25  ;;  %v1835_v30 = vadd.f32 1.0, %v3635_v10  ;;  %v3004_v14 = vmul.f32 -1.442695, %v1711_v12  ;;  %v1935_v1 = vadd.f32 %v1417_v63, %v888_v54  ;;  %v1581_v12 = vpop.f32.mrf.mxu0 }
 0x1c9   :  { %v3637_v17 = vpop.eup %3636  ;;  %3656 = vpow2.f32 %v3035_v55  ;;  %v1419_v43 = vpop.f32.mrf.mxu1  ;;  %v2160_v23 = vadd.f32 %v4952_v41, %v1578_v37  ;;  %v4958_v25 = vadd.f32 %v4650_v49, %v4808_v28  ;;  %v4966_v55 = vadd.f32 %v4661_v57, %v4808_v28 }
 0x1ca   :  { %3658 = vrcp.f32 %v1835_v30  ;;  %v3036_v54 = vmul.f32 -1.442695, %v1935_v1  ;;  %v1712_v56 = vadd.f32 %v1419_v43, %v890_v32  ;;  %v2059_v46 = vadd.f32 1.0, %v3637_v17 }
 0x1cb   :  { %v3639_v5 = vpop.eup %3638  ;;  %3660 = vpow2.f32 %v3004_v14  ;;  %v1421_v44 = vpop.f32.mrf.mxu1 }
 0x1cc   :  { %v1836_v2 = vadd.f32 1.0, %v3639_v5  ;;  %v3005_v32 = vmul.f32 -1.442695, %v1712_v56  ;;  %v1936_v21 = vadd.f32 %v1421_v44, %v4846_v34  ;;  %3662 = vpow2.f32 %v3036_v54  ;;  %v4974_v56 = vpop.f32.mrf.mxu0 }
 0x1cd   :  { %v1425_v62 = vpop.f32.mrf.mxu1  ;;  %v3641_v34 = vpop.eup %3640  ;;  %v2161_v54 = vadd.f32 %v4952_v41, %v1581_v12  ;;  %v4979_v44 = vadd.f32 %v4669_v20, %v4810_v16  ;;  %v2162_v20 = vadd.f32 %v4880_v3, %v4952_v41  ;;  %v5865_v3 = vld [vmem:[#allocation44_spill] sm:$0xff] }
 0x1ce   :  { %3664 = vrcp.f32 %v1836_v2  ;;  %v3037_v22 = vmul.f32 -1.442695, %v1936_v21  ;;  %v1713_v7 = vadd.f32 %v1425_v62, %v4850_v36  ;;  %v1049_v36 = vadd.f32 %v4684_v8, %v4722_v6  ;;  %v1594_v12 = vpop.f32.mrf.mxu0 }
 0x1cf   :  { %v3643_v0 = vpop.eup %3642  ;;  %3666 = vpow2.f32 %v3005_v32  ;;  %v1427_v10 = vpop.f32.mrf.mxu1  ;;  %v2060_v14 = vadd.f32 1.0, %v3641_v34  ;;  %v1052_v21 = vadd.f32 %v4690_v27, %v4722_v6  ;;  %v4989_v62 = vadd.f32 %v4682_v50, %v4810_v16 }
 0x1d0   :  { %v3645_v37 = vpop.eup %3644  ;;  %3668 = vrcp.f32 %v2059_v46  ;;  %v2192_v63 = vmul.f32 %v3643_v0, %v2160_v23  ;;  %v3006_v30 = vmul.f32 -1.442695, %v1713_v7  ;;  %v1937_v35 = vadd.f32 %v1427_v10, %v4854_v40 }
 0x1d1   :  { %v4970_v49 = vpop.eup %3646  ;;  %v1837_v1 = vadd.f32 1.0, %v3645_v37  ;;  %3670 = vpow2.f32 %v3037_v22  ;;  %v1429_v17 = vpop.f32.mrf.mxu1  ;;  %v4983_v46 = vadd.f32 %v4672_v38, %v4808_v28  ;;  %v5863_v37 = vld [vmem:[#allocation39_spill] sm:$0xff] }
 0x1d2   :  { %v3649_v57 = vpop.eup %3648  ;;  %v2224_v43 = vadd.f32 %v2192_v63, %v1049_v36  ;;  %3672 = vpow2.f32 %v3006_v30  ;;  %v1714_v8 = vadd.f32 %v1429_v17, %v4858_v45  ;;  %v3038_v23 = vmul.f32 -1.442695, %v1937_v35  ;;  %v5864_v63 = vld [vmem:[#allocation41_spill] sm:$0xff] }
 0x1d3   :  { %v3651_v5 = vpop.eup %3650  ;;  %3674 = vrcp.f32 %v1837_v1  ;;  %v2061_v40 = vadd.f32 1.0, %v3649_v57  ;;  %v1431_v2 = vpop.f32.mrf.mxu1  ;;  %v4998_v36 = vadd.f32 %v5863_v37, %v4808_v28  ;;  %v5002_v30 = vadd.f32 %v5864_v63, %v4810_v16  ;;  %v5866_v17 = vld [vmem:[#allocation37_spill] sm:$0xff] }
 0x1d4   :  { %v3653_v32 = vpop.eup %3652  ;;  %3676 = vtanh.f32 %v2224_v43  ;;  %v2193_v45 = vmul.f32 %v3651_v5, %v2161_v54  ;;  %v3007_v27 = vmul.f32 -1.442695, %v1714_v8  ;;  %v1938_v10 = vadd.f32 %v1431_v2, %v4862_v47  ;;  %v5867_v47 = vld [vmem:[#allocation47_spill] sm:$0xff]  ;;  %v5869_v8 = vld [vmem:[#allocation38_spill] sm:$0xff]  ;;  %v3453_v37 = vpop.f32.mrf.mxu0 }
 0x1d5   :  { %v4991_v34 = vpop.eup %3654  ;;  %3678 = vrcp.f32 %v2060_v14  ;;  %v1838_v38 = vadd.f32 1.0, %v3653_v32  ;;  %v1435_v22 = vpop.f32.mrf.mxu1  ;;  %v5006_v14 = vadd.f32 %v5865_v3, %v4808_v28  ;;  %v1057_v57 = vadd.f32 %v5866_v17, %v4722_v6  ;;  %v5870_v17 = vld [vmem:[#allocation40_spill] sm:$0xff] }
 0x1d6   :  { %v3657_v7 = vpop.eup %3656  ;;  %v2225_v0 = vadd.f32 %v2193_v45, %v1052_v21  ;;  %3680 = vrcp.f32 %v2061_v40  ;;  %v5012_v43 = vadd.f32 %v5867_v47, %v4810_v16  ;;  %v1060_v5 = vadd.f32 %v5869_v8, %v4722_v6 }
 0x1d7   :  { %v3659_v50 = vpop.eup %3658  ;;  %3682 = vrcp.f32 %v1838_v38  ;;  %v1437_v1 = vpop.f32.mrf.mxu1  ;;  %v2062_v40 = vadd.f32 1.0, %v3657_v7  ;;  %v2163_v38 = vadd.f32 %v4934_v18, %v4952_v41  ;;  %v3039_v63 = vmul.f32 -1.442695, %v1938_v10 }
 0x1d8   :  { %v3661_v35 = vpop.eup %3660  ;;  %5868 = vst [vmem:[#allocation39_spill] sm:$0xff] %v5012_v43  ;;  %v2194_v54 = vmul.f32 %v3659_v50, %v2162_v20  ;;  %3684 = vtanh.f32 %v2225_v0  ;;  %v5020_v20 = vadd.f32 %v5870_v17, %v4722_v6  ;;  %v5871_v0 = vld [vmem:[#allocation42_spill] sm:$0xff]  ;;  %v2166_v43 = vadd.f32 %v4974_v56, %v4952_v41 }
 0x1d9   :  { %v1839_v2 = vadd.f32 1.0, %v3661_v35  ;;  %3686 = vpow2.f32 %v3038_v23  ;;  %v1439_v32 = vpop.f32.mrf.mxu1  ;;  %v3663_v21 = vpop.eup %3662  ;;  %v1065_v50 = vadd.f32 %v5871_v0, %v4722_v6  ;;  %v1715_v23 = vadd.f32 %v1435_v22, %v4866_v51 }
 0x1da   :  { %v2226_v45 = vadd.f32 %v2194_v54, %v1057_v57  ;;  %3688 = vpow2.f32 %v3007_v27  ;;  %v5872_v57 = vld [vmem:[#allocation43_spill] sm:$0xff]  ;;  %v1939_v27 = vadd.f32 %v1437_v1, %v4870_v39  ;;  %v5873_v54 = vld [vmem:[#allocation45_spill] sm:$0xff]  ;;  %v2063_v17 = vadd.f32 1.0, %v3663_v21 }
 0x1db   :  { %v3665_v3 = vpop.eup %3664  ;;  %3690 = vrcp.f32 %v1839_v2  ;;  %v1441_v7 = vpop.f32.mrf.mxu1  ;;  %v5027_v47 = vadd.f32 %v5872_v57, %v4722_v6  ;;  %v1068_v8 = vadd.f32 %v5873_v54, %v4722_v6  ;;  %v2164_v57 = vadd.f32 %v4952_v41, %v1594_v12 }
 0x1dc   :  { %v3667_v35 = vpop.eup %3666  ;;  %3692 = vtanh.f32 %v2226_v45  ;;  %v2195_v18 = vmul.f32 %v3665_v3, %v2163_v38  ;;  %v1597_v45 = vpop.f32.mrf.mxu0  ;;  %v3008_v39 = vmul.f32 -1.442695, %v1715_v23  ;;  %v1716_v1 = vadd.f32 %v1439_v32, %v4874_v58 }
 0x1dd   :  { %v5030_v10 = vpop.eup %3668  ;;  %3694 = vrcp.f32 %v2062_v40  ;;  %v1840_v2 = vadd.f32 1.0, %v3667_v35  ;;  %v1445_v0 = vpop.f32.mrf.mxu1  ;;  %v2288_v40 = vsub.f32 1.0, %v4970_v49  ;;  %v3040_v54 = vmul.f32 -1.442695, %v1939_v27 }
 0x1de   :  { %v3671_v51 = vpop.eup %3670  ;;  %v2227_v22 = vadd.f32 %v2195_v18, %v1060_v5  ;;  %3696 = vpow2.f32 %v3039_v63  ;;  %v1940_v5 = vadd.f32 %v1441_v7, %v4878_v60  ;;  %v5041_v12 = vadd.f32 %v3453_v37, %v4952_v41 }
 0x1df   :  { %v3673_v38 = vpop.eup %3672  ;;  %3698 = vrcp.f32 %v1840_v2  ;;  %v1447_v3 = vpop.f32.mrf.mxu1  ;;  %v2165_v63 = vadd.f32 %v4952_v41, %v1597_v45  ;;  %v2064_v58 = vadd.f32 1.0, %v3671_v51  ;;  %v1717_v32 = vadd.f32 %v1445_v0, %v4884_v9 }
 0x1e0   :  { %v3675_v21 = vpop.eup %3674  ;;  %3700 = vtanh.f32 %v2227_v22  ;;  %v1841_v35 = vadd.f32 1.0, %v3673_v38  ;;  %v3009_v60 = vmul.f32 -1.442695, %v1716_v1  ;;  %v3041_v45 = vmul.f32 -1.442695, %v1940_v5 }
 0x1e1   :  { %v3677_v18 = vpop.eup %3676  ;;  %3702 = vrcp.f32 %v2063_v17  ;;  %v2196_v56 = vmul.f32 %v3675_v21, %v2164_v57  ;;  %v1449_v23 = vpop.f32.mrf.mxu1  ;;  %v5874_v17 = vld [vmem:[#allocation5_spill] sm:$0xff]  ;;  %v1941_v21 = vadd.f32 %v1447_v3, %v4888_v13  ;;  %v2289_v51 = vsub.f32 1.0, %v4991_v34 }
 0x1e2   :  { %v5044_v2 = vpop.eup %3678  ;;  %3704 = vrcp.f32 %v1841_v35  ;;  %v2320_v22 = vmul.f32 %v3677_v18, %v2288_v40  ;;  %v2352_v37 = vmul.f32 %v4970_v49, %v5874_v17  ;;  %v5057_v18 = vpop.f32.mrf.mxu0  ;;  %v3010_v49 = vmul.f32 -1.442695, %v1717_v32 }
 0x1e3   :  { %v5047_v38 = vpop.eup %3680  ;;  %v2228_v27 = vadd.f32 %v2196_v56, %v1065_v50  ;;  %3706 = vpow2.f32 %v3008_v39  ;;  %v1451_v7 = vpop.f32.mrf.mxu1  ;;  %v5875_v50 = vld [vmem:[#allocation6_spill] sm:$0xff]  ;;  %v2290_v13 = vsub.f32 1.0, %v5030_v10 }
 0x1e4   :  { %v3683_v57 = vpop.eup %3682  ;;  %3708 = vpow2.f32 %v3040_v54  ;;  %v5053_v40 = vadd.f32 %v2352_v37, %v2320_v22  ;;  %v2353_v39 = vmul.f32 %v4991_v34, %v5875_v50  ;;  %v1718_v54 = vadd.f32 %v1449_v23, %v4892_v19 }
 0x1e5   :  { %v3685_v35 = vpop.eup %3684  ;;  %3710 = vtanh.f32 %v2228_v27  ;;  %v2197_v9 = vmul.f32 %v3683_v57, %v2165_v63  ;;  %v1455_v0 = vpop.f32.mrf.mxu1  ;;  %v3042_v34 = vmul.f32 -1.442695, %v1941_v21 }
 0x1e6   :  { %v3687_v1 = vpop.eup %3686  ;;  %3712 = vrcp.f32 %v2064_v58  ;;  %v2416_v63 = vmul.f32 %v5053_v40, %v5053_v40  ;;  %v2321_v22 = vmul.f32 %v3685_v35, %v2289_v51  ;;  %v1942_v58 = vadd.f32 %v1451_v7, %v4896_v29  ;;  %v1610_v51 = vpop.f32.mrf.mxu0 }
 0x1e7   :  { %v3689_v3 = vpop.eup %3688  ;;  %v2229_v5 = vadd.f32 %v2197_v9, %v1068_v8  ;;  %3714 = vpow2.f32 %v3009_v60  ;;  %v1457_v56 = vpop.f32.mrf.mxu1  ;;  %v5876_v8 = vld [vmem:[#allocation7_spill] sm:$0xff]  ;;  %v2065_v9 = vadd.f32 1.0, %v3687_v1  ;;  %v3011_v35 = vmul.f32 -1.442695, %v1718_v54 }
 0x1e8   :  { %v3691_v27 = vpop.eup %3690  ;;  %v1842_v17 = vadd.f32 1.0, %v3689_v3  ;;  %3716 = vpow2.f32 %v3041_v45  ;;  %2448 = vadd.xlane.f32.xlu0 %v2416_v63  ;;  %v5064_v23 = vadd.f32 %v2353_v39, %v2321_v22  ;;  %v2354_v60 = vmul.f32 %v5030_v10, %v5876_v8  ;;  %v5877_v10 = vld [vmem:[#allocation48_spill] sm:$0xff] }
 0x1e9   :  { %v3693_v37 = vpop.eup %3692  ;;  %v2198_v32 = vmul.f32 %v3691_v27, %v2166_v43  ;;  %3718 = vtanh.f32 %v2229_v5  ;;  %v1459_v19 = vpop.f32.mrf.mxu1  ;;  %v1719_v45 = vadd.f32 %v1455_v0, %v4900_v26  ;;  %v1081_v3 = vadd.f32 %v5877_v10, %v4722_v6 }
 0x1ea   :  { %v5068_v57 = vpop.eup %3694  ;;  %3720 = vrcp.f32 %v1842_v17  ;;  %v2417_v7 = vmul.f32 %v5064_v23, %v5064_v23  ;;  %v2322_v50 = vmul.f32 %v3693_v37, %v2290_v13  ;;  %v3043_v1 = vmul.f32 -1.442695, %v1942_v58  ;;  %v5085_v58 = vpop.f32.mrf.mxu0 }
 0x1eb   :  { %v3697_v21 = vpop.eup %3696  ;;  %v2230_v29 = vadd.f32 %v2198_v32, %v5020_v20  ;;  %3722 = vpow2.f32 %v3010_v49  ;;  %v1461_v43 = vpop.f32.mrf.mxu1  ;;  %v2291_v5 = vsub.f32 1.0, %v5044_v2  ;;  %v2168_v20 = vadd.f32 %v4952_v41, %v1610_v51  ;;  %v5878_v32 = vld [vmem:[#allocation8_spill] sm:$0xff] }
 0x1ec   :  { %v3699_v39 = vpop.eup %3698  ;;  %3724 = vpow2.f32 %v3042_v34  ;;  %2450 = vadd.xlane.f32.xlu0 %v2417_v7  ;;  %v5079_v49 = vadd.f32 %v2354_v60, %v2322_v50  ;;  %v3012_v13 = vmul.f32 -1.442695, %v1719_v45  ;;  %v1943_v22 = vadd.f32 %v1457_v56, %v4904_v33  ;;  %v1613_v10 = vpop.f32.mrf.mxu0 }
 0x1ed   :  { %v3701_v54 = vpop.eup %3700  ;;  %3726 = vtanh.f32 %v2230_v29  ;;  %v2199_v26 = vmul.f32 %v3699_v39, %v5041_v12  ;;  %v1465_v0 = vpop.f32.mrf.mxu1  ;;  %v2355_v8 = vmul.f32 %v5044_v2, %v5878_v32  ;;  %v2066_v51 = vadd.f32 1.0, %v3697_v21 }
 0x1ee   :  { %v5081_v63 = vpop.eup %3702  ;;  %3728 = vrcp.f32 %v2065_v9  ;;  %v2323_v27 = vmul.f32 %v3701_v54, %v2291_v5  ;;  %v2418_v37 = vmul.f32 %v5079_v49, %v5079_v49  ;;  %v1720_v33 = vadd.f32 %v1459_v19, %v4908_v42  ;;  %v5879_v5 = vld [vmem:[#allocation9_spill] sm:$0xff] }
 0x1ef   :  { %v3705_v17 = vpop.eup %3704  ;;  %v2231_v34 = vadd.f32 %v2199_v26, %v5027_v47  ;;  %3730 = vpow2.f32 %v3011_v35  ;;  %v1467_v12 = vpop.f32.mrf.mxu1  ;;  %v2292_v35 = vsub.f32 1.0, %v5047_v38  ;;  %v3044_v39 = vmul.f32 -1.442695, %v1943_v22 }
 0x1f0   :  { %v3707_v60 = vpop.eup %3706  ;;  %v2200_v9 = vmul.f32 %v3705_v17, %v2168_v20  ;;  %3732 = vpow2.f32 %v3043_v1  ;;  %2452 = vadd.xlane.f32.xlu1 %v2418_v37  ;;  %v5092_v29 = vadd.f32 %v2355_v8, %v2323_v27  ;;  %v1944_v2 = vadd.f32 %v1461_v43, %v4912_v52 }
 0x1f1   :  { %v3709_v56 = vpop.eup %3708  ;;  %3734 = vtanh.f32 %v2231_v34  ;;  %v1843_v45 = vadd.f32 1.0, %v3707_v60  ;;  %v1469_v47 = vpop.f32.mrf.mxu1  ;;  %v2356_v54 = vmul.f32 %v5047_v38, %v5879_v5  ;;  %v2293_v17 = vsub.f32 1.0, %v5068_v57 }
 0x1f2   :  { %v3711_v7 = vpop.eup %3710  ;;  %v2232_v50 = vadd.f32 %v2200_v9, %v1081_v3  ;;  %3736 = vpow2.f32 %v3012_v13  ;;  %v2419_v19 = vmul.f32 %v5092_v29, %v5092_v29  ;;  %v2067_v20 = vadd.f32 1.0, %v3709_v56  ;;  %v5881_v56 = vld [vmem:[#allocation51_spill] sm:$0xff] }
 0x1f3   :  { %v5096_v21 = vpop.eup %3712  ;;  %3738 = vrcp.f32 %v1843_v45  ;;  %v1471_v42 = vpop.f32.mrf.mxu1  ;;  %v2324_v1 = vmul.f32 %v3711_v7, %v2292_v35  ;;  %v3013_v3 = vmul.f32 -1.442695, %v1720_v33  ;;  %v1721_v13 = vadd.f32 %v1465_v0, %v4916_v59 }
 0x1f4   :  { %v3715_v26 = vpop.eup %3714  ;;  %3740 = vrcp.f32 %v2066_v51  ;;  %2454 = vadd.xlane.f32.xlu1 %v2419_v19  ;;  %v2169_v37 = vadd.f32 %v4952_v41, %v1613_v10  ;;  %v3045_v38 = vmul.f32 -1.442695, %v1944_v2  ;;  %v1945_v32 = vadd.f32 %v1467_v12, %v4920_v61  ;;  %v5880_v51 = vld [vmem:[#allocation10_spill] sm:$0xff] }
 0x1f5   :  { %v3717_v22 = vpop.eup %3716  ;;  %3742 = vtanh.f32 %v2232_v50  ;;  %v1844_v52 = vadd.f32 1.0, %v3715_v26  ;;  %v1475_v43 = vpop.f32.mrf.mxu1  ;;  %v5103_v27 = vadd.f32 %v2356_v54, %v2324_v1  ;;  %v2357_v9 = vmul.f32 %v5068_v57, %v5880_v51  ;;  %v5882_v54 = vld [vmem:[#allocation46_spill] sm:$0xff] }
 0x1f6   :  { %v3719_v34 = vpop.eup %3718  ;;  %3744 = vpow2.f32 %v3044_v39  ;;  %v1084_v45 = vadd.f32 %v5881_v56, %v4722_v6  ;;  %v3014_v7 = vmul.f32 -1.442695, %v1721_v13  ;;  %v2068_v61 = vadd.f32 1.0, %v3717_v22 }
 0x1f7   :  { %v3721_v8 = vpop.eup %3720  ;;  %3746 = vrcp.f32 %v1844_v52  ;;  %v5108_v60 = vpop.f32.mrf.mxu1  ;;  %v2420_v59 = vmul.f32 %v5103_v27, %v5103_v27  ;;  %v2325_v0 = vmul.f32 %v3719_v34, %v2293_v17  ;;  %v1722_v57 = vadd.f32 %v1469_v47, %v4924_v4 }
 0x1f8   :  { %v3723_v33 = vpop.eup %3722  ;;  %3748 = vrcp.f32 %v2067_v20  ;;  %v2201_v35 = vmul.f32 %v3721_v8, %v2169_v37  ;;  %v2294_v1 = vsub.f32 1.0, %v5081_v63  ;;  %v1089_v26 = vadd.f32 %v5882_v54, %v4722_v6  ;;  %v5126_v20 = vpop.f32.mrf.mxu0  ;;  %v5883_v8 = vld [vmem:[#allocation11_spill] sm:$0xff] }
 0x1f9   :  { %v3725_v50 = vpop.eup %3724  ;;  %v1845_v12 = vadd.f32 1.0, %v3723_v33  ;;  %3750 = vpow2.f32 %v3013_v3  ;;  %2456 = vadd.xlane.f32.xlu0 %v2420_v59  ;;  %v5116_v39 = vpop.f32.mrf.mxu1  ;;  %v5118_v2 = vadd.f32 %v2357_v9, %v2325_v0  ;;  %v3046_v3 = vmul.f32 -1.442695, %v1945_v32 }
 0x1fa   :  { %v3727_v10 = vpop.eup %3726  ;;  %v2233_v19 = vadd.f32 %v2201_v35, %v1084_v45  ;;  %3752 = vpow2.f32 %v3045_v38  ;;  %v2069_v17 = vadd.f32 1.0, %v3725_v50  ;;  %v1946_v4 = vadd.f32 %v1471_v42, %v4928_v11  ;;  %v1626_v33 = vpop.f32.mrf.mxu0  ;;  %v5884_v50 = vld [vmem:[#allocation12_spill] sm:$0xff] }
 0x1fb   :  { %v5122_v5 = vpop.eup %3728  ;;  %3754 = vrcp.f32 %v1845_v12  ;;  %v5128_v13 = vpop.f32.mrf.mxu1  ;;  %v2421_v22 = vmul.f32 %v5118_v2, %v5118_v2  ;;  %v2326_v47 = vmul.f32 %v3727_v10, %v2294_v1  ;;  %v2358_v32 = vmul.f32 %v5081_v63, %v5883_v8 }
 0x1fc   :  { %v3731_v52 = vpop.eup %3730  ;;  %3756 = vtanh.f32 %v2233_v19  ;;  %v2295_v59 = vsub.f32 1.0, %v5096_v21  ;;  %v2170_v51 = vadd.f32 %v5057_v18, %v4952_v41  ;;  %v3015_v9 = vmul.f32 -1.442695, %v1722_v57 }
 0x1fd   :  { %v3733_v34 = vpop.eup %3732  ;;  %3758 = vrcp.f32 %v2068_v61  ;;  %v1846_v37 = vadd.f32 1.0, %v3731_v52  ;;  %2458 = vadd.xlane.f32.xlu1 %v2421_v22  ;;  %v5133_v38 = vpop.f32.mrf.mxu1  ;;  %v1723_v11 = vadd.f32 %v1475_v43, %v4932_v31  ;;  %v5143_v45 = vadd.f32 %v2358_v32, %v2326_v47 }
 0x1fe   :  { %v3735_v0 = vpop.eup %3734  ;;  %3760 = vpow2.f32 %v3014_v7  ;;  %v2359_v63 = vmul.f32 %v5096_v21, %v5884_v50  ;;  %v2171_v12 = vadd.f32 %v5085_v58, %v4952_v41  ;;  %v3047_v7 = vmul.f32 -1.442695, %v1946_v4 }
 0x1ff   :  { %v3737_v42 = vpop.eup %3736  ;;  %3762 = vrcp.f32 %v1846_v37  ;;  %v5141_v56 = vpop.f32.mrf.mxu1  ;;  %v2327_v35 = vmul.f32 %v3735_v0, %v2295_v59  ;;  %v2422_v43 = vmul.f32 %v5143_v45, %v5143_v45  ;;  %v2070_v21 = vadd.f32 1.0, %v3733_v34  ;;  %v5885_v34 = vld [vmem:[#allocation49_spill] sm:$0xff] }
 0x200   :  { %v3739_v61 = vpop.eup %3738  ;;  %3764 = vrcp.f32 %v2069_v17  ;;  %v1847_v18 = vadd.f32 1.0, %v3737_v42  ;;  %v3016_v54 = vmul.f32 -1.442695, %v1723_v11  ;;  %v1947_v58 = vadd.f32 %v5108_v60, %v4939_v48  ;;  %v5159_v17 = vpop.f32.mrf.mxu0  ;;  %v5887_v42 = vld [vmem:[#allocation50_spill] sm:$0xff] }
 0x201   :  { %v5149_v10 = vpop.eup %3740  ;;  %v2202_v31 = vmul.f32 %v3739_v61, %v2170_v51  ;;  %3766 = vpow2.f32 %v3046_v3  ;;  %v5153_v19 = vpop.f32.mrf.mxu1  ;;  %v5155_v57 = vadd.f32 %v2359_v63, %v2327_v35  ;;  %2460 = vadd.xlane.f32.xlu0 %v2422_v43  ;;  %v2296_v47 = vsub.f32 1.0, %v5122_v5  ;;  %v5886_v51 = vld [vmem:[#allocation13_spill] sm:$0xff] }
 0x202   :  { %v3743_v1 = vpop.eup %3742  ;;  %3768 = vrcp.f32 %v1847_v18  ;;  %v1092_v8 = vadd.f32 %v5885_v34, %v4722_v6  ;;  %v1724_v48 = vadd.f32 %v5116_v39, %v4943_v53  ;;  %v5178_v35 = vadd.f32 %v5887_v42, %v4808_v28 }
 0x203   :  { %v3745_v22 = vpop.eup %3744  ;;  %v2234_v52 = vadd.f32 %v2202_v31, %v1089_v26  ;;  %3770 = vpow2.f32 %v3015_v9  ;;  %v5161_v3 = vpop.f32.mrf.mxu1  ;;  %v2423_v4 = vmul.f32 %v5155_v57, %v5155_v57  ;;  %v2328_v0 = vmul.f32 %v3743_v1, %v2296_v47 }
 0x204   :  { %v3747_v37 = vpop.eup %3746  ;;  %v2071_v32 = vadd.f32 1.0, %v3745_v22  ;;  %3772 = vpow2.f32 %v3047_v7  ;;  %v2360_v9 = vmul.f32 %v5122_v5, %v5886_v51  ;;  %v2172_v50 = vadd.f32 %v4952_v41, %v1626_v33  ;;  %v5888_v5 = vld [vmem:[#allocation54_spill] sm:$0xff] }
 0x205   :  { %v5170_v60 = vpop.eup %3748  ;;  %3774 = vtanh.f32 %v2234_v52  ;;  %v2203_v26 = vmul.f32 %v3747_v37, %v2171_v12  ;;  %2462 = vadd.xlane.f32.xlu1 %v2423_v4  ;;  %v5172_v59 = vpop.f32.mrf.mxu1  ;;  %v3048_v53 = vmul.f32 -1.442695, %v1947_v58  ;;  %v1097_v43 = vadd.f32 %v5888_v5, %v4722_v6 }
 0x206   :  { %v3751_v11 = vpop.eup %3750  ;;  %3776 = vrcp.f32 %v2070_v21  ;;  %v1629_v12 = vpop.f32.mrf.mxu0  ;;  %v5183_v7 = vadd.f32 %v2360_v9, %v2328_v0  ;;  %v3017_v1 = vmul.f32 -1.442695, %v1724_v48  ;;  %v1725_v21 = vadd.f32 %v5133_v38, %v4958_v25  ;;  %v5889_v48 = vld [vmem:[#allocation14_spill] sm:$0xff] }
 0x207   :  { %v3753_v39 = vpop.eup %3752  ;;  %v2235_v63 = vadd.f32 %v2203_v26, %v1092_v8  ;;  %v1848_v61 = vadd.f32 1.0, %v3751_v11  ;;  %3778 = vpow2.f32 %v3016_v54  ;;  %v5181_v18 = vpop.f32.mrf.mxu1  ;;  %v2297_v52 = vsub.f32 1.0, %v5149_v10 }
 0x208   :  { %v3755_v31 = vpop.eup %3754  ;;  %3780 = vrcp.f32 %v2071_v32  ;;  %v2424_v22 = vmul.f32 %v5183_v7, %v5183_v7  ;;  %v2072_v47 = vadd.f32 1.0, %v3753_v39  ;;  %v2173_v37 = vadd.f32 %v4952_v41, %v1629_v12 }
 0x209   :  { %v3757_v33 = vpop.eup %3756  ;;  %3782 = vtanh.f32 %v2235_v63  ;;  %v2204_v58 = vmul.f32 %v3755_v31, %v2172_v50  ;;  %v5191_v54 = vpop.f32.mrf.mxu1  ;;  %v1948_v34 = vadd.f32 %v5128_v13, %v4947_v24  ;;  %v2361_v26 = vmul.f32 %v5149_v10, %v5889_v48  ;;  %v5890_v24 = vld [vmem:[#allocation57_spill] sm:$0xff] }
 0x20a   :  { %v5194_v4 = vpop.eup %3758  ;;  %3784 = vrcp.f32 %v1848_v61  ;;  %2464 = vadd.xlane.f32.xlu0 %v2424_v22  ;;  %v2329_v32 = vmul.f32 %v3757_v33, %v2297_v52  ;;  %v3018_v9 = vmul.f32 -1.442695, %v1725_v21  ;;  %v1949_v11 = vadd.f32 %v5141_v56, %v4962_v15  ;;  %v5891_v61 = vld [vmem:[#allocation52_spill] sm:$0xff]  ;;  %v5893_v48 = vld [vmem:[#allocation53_spill] sm:$0xff] }
 0x20b   :  { %v3761_v25 = vpop.eup %3760  ;;  %v2236_v38 = vadd.f32 %v2204_v58, %v1097_v43  ;;  %3786 = vpow2.f32 %v3048_v53  ;;  %v5199_v8 = vpop.f32.mrf.mxu1  ;;  %v1100_v13 = vadd.f32 %v5890_v24, %v4722_v6  ;;  %v5217_v12 = vadd.f32 %v5891_v61, %v4810_v16  ;;  %v5892_v6 = vld [vmem:[#allocation55_spill] sm:$0xff] }
 0x20c   :  { %v3763_v0 = vpop.eup %3762  ;;  %v1849_v51 = vadd.f32 1.0, %v3761_v25  ;;  %3788 = vpow2.f32 %v3017_v1  ;;  %v5209_v53 = vpop.f32.mrf.mxu0  ;;  %v5211_v39 = vadd.f32 %v2361_v26, %v2329_v32  ;;  %v2174_v15 = vadd.f32 %v5126_v20, %v4952_v41 }
 0x20d   :  { %v5205_v42 = vpop.eup %3764  ;;  %3790 = vtanh.f32 %v2236_v38  ;;  %v2205_v50 = vmul.f32 %v3763_v0, %v2173_v37  ;;  %v5213_v63 = vpop.f32.mrf.mxu1  ;;  %v3049_v56 = vmul.f32 -1.442695, %v1948_v34  ;;  %v5223_v5 = vadd.f32 %v5892_v6, %v4808_v28 }
 0x20e   :  { %v3767_v10 = vpop.eup %3766  ;;  %3792 = vrcp.f32 %v1849_v51  ;;  %v2425_v1 = vmul.f32 %v5211_v39, %v5211_v39  ;;  %v3050_v22 = vmul.f32 -1.442695, %v1949_v11  ;;  %v1726_v20 = vadd.f32 %v5153_v19, %v4966_v55  ;;  %v1642_v25 = vpop.f32.mrf.mxu0  ;;  %v5894_v11 = vld [vmem:[#allocation15_spill] sm:$0xff] }
 0x20f   :  { %v3769_v31 = vpop.eup %3768  ;;  %3794 = vrcp.f32 %v2072_v47  ;;  %v2237_v43 = vadd.f32 %v2205_v50, %v1100_v13  ;;  %v5227_v21 = vpop.f32.mrf.mxu1  ;;  %v2073_v37 = vadd.f32 1.0, %v3767_v10  ;;  %v2298_v47 = vsub.f32 1.0, %v5170_v60 }
 0x210   :  { %v3771_v33 = vpop.eup %3770  ;;  %v2206_v58 = vmul.f32 %v3769_v31, %v2174_v15  ;;  %3796 = vpow2.f32 %v3018_v9  ;;  %2466 = vadd.xlane.f32.xlu1 %v2425_v1  ;;  %v1950_v0 = vadd.f32 %v5161_v3, %v4979_v44  ;;  %v1727_v55 = vadd.f32 %v5172_v59, %v4983_v46  ;;  %v5251_v59 = vpop.f32.mrf.mxu0 }
 0x211   :  { %v3773_v52 = vpop.eup %3772  ;;  %3798 = vtanh.f32 %v2237_v43  ;;  %v1850_v34 = vadd.f32 1.0, %v3771_v33  ;;  %v5232_v38 = vpop.f32.mrf.mxu1  ;;  %v2175_v51 = vadd.f32 %v5159_v17, %v4952_v41  ;;  %v2362_v24 = vmul.f32 %v5170_v60, %v5894_v11  ;;  %v5895_v33 = vld [vmem:[#allocation16_spill] sm:$0xff] }
 0x212   :  { %v3775_v32 = vpop.eup %3774  ;;  %v2238_v26 = vadd.f32 %v2206_v58, %v5893_v48  ;;  %3800 = vpow2.f32 %v3049_v56  ;;  %v2074_v10 = vadd.f32 1.0, %v3773_v52  ;;  %v3019_v61 = vmul.f32 -1.442695, %v1726_v20 }
 0x213   :  { %v5239_v19 = vpop.eup %3776  ;;  %3802 = vrcp.f32 %v1850_v34  ;;  %v2330_v9 = vmul.f32 %v3775_v32, %v2298_v47  ;;  %v5245_v13 = vpop.f32.mrf.mxu1  ;;  %v1951_v44 = vadd.f32 %v5181_v18, %v4989_v62  ;;  %v2299_v15 = vsub.f32 1.0, %v5194_v4 }
 0x214   :  { %v3779_v50 = vpop.eup %3778  ;;  %3804 = vtanh.f32 %v2238_v26  ;;  %v2176_v31 = vadd.f32 %v4952_v41, %v1642_v25  ;;  %v3051_v6 = vmul.f32 -1.442695, %v1950_v0  ;;  %v3020_v43 = vmul.f32 -1.442695, %v1727_v55  ;;  %v5896_v0 = vld [vmem:[#allocation56_spill] sm:$0xff] }
 0x215   :  { %v5249_v46 = vpop.eup %3780  ;;  %3806 = vrcp.f32 %v2073_v37  ;;  %v1851_v3 = vadd.f32 1.0, %v3779_v50  ;;  %v5253_v17 = vadd.f32 %v2362_v24, %v2330_v9  ;;  %v5256_v60 = vpop.f32.mrf.mxu1  ;;  %v2363_v58 = vmul.f32 %v5194_v4, %v5895_v33  ;;  %v5897_v9 = vld [vmem:[#allocation17_spill] sm:$0xff] }
 0x216   :  { %v3783_v56 = vpop.eup %3782  ;;  %3808 = vpow2.f32 %v3050_v22  ;;  %v3052_v37 = vmul.f32 -1.442695, %v1951_v44  ;;  %v1728_v34 = vadd.f32 %v5191_v54, %v4998_v36  ;;  %v1645_v22 = vpop.f32.mrf.mxu0  ;;  %v1952_v47 = vadd.f32 %v5199_v8, %v5002_v30 }
 0x217   :  { %v3785_v1 = vpop.eup %3784  ;;  %3810 = vrcp.f32 %v1851_v3  ;;  %v2426_v62 = vmul.f32 %v5253_v17, %v5253_v17  ;;  %v2331_v18 = vmul.f32 %v3783_v56, %v2299_v15  ;;  %v5269_v48 = vpop.f32.mrf.mxu1  ;;  %v2300_v4 = vsub.f32 1.0, %v5205_v42 }
 0x218   :  { %v3787_v20 = vpop.eup %3786  ;;  %v2207_v52 = vmul.f32 %v3785_v1, %v2175_v51  ;;  %3812 = vrcp.f32 %v2074_v10  ;;  %v2364_v36 = vmul.f32 %v5205_v42, %v5897_v9  ;;  %v2177_v10 = vadd.f32 %v4952_v41, %v1645_v22 }
 0x219   :  { %v3789_v25 = vpop.eup %3788  ;;  %3814 = vpow2.f32 %v3019_v61  ;;  %2468 = vadd.xlane.f32.xlu0 %v2426_v62  ;;  %v5267_v32 = vadd.f32 %v2363_v58, %v2331_v18  ;;  %v2075_v11 = vadd.f32 1.0, %v3787_v20  ;;  %v1729_v61 = vadd.f32 %v5213_v63, %v5006_v14  ;;  %v5284_v15 = vpop.f32.mrf.mxu1 }
 0x21a   :  { %v3791_v26 = vpop.eup %3790  ;;  %v2239_v55 = vadd.f32 %v2207_v52, %v5896_v0  ;;  %v1852_v51 = vadd.f32 1.0, %v3789_v25  ;;  %3816 = vpow2.f32 %v3051_v6  ;;  %v3021_v3 = vmul.f32 -1.442695, %v1728_v34  ;;  %v5900_v25 = vld [vmem:[#allocation18_spill] sm:$0xff] }
 0x21b   :  { %v3793_v54 = vpop.eup %3792  ;;  %3818 = vpow2.f32 %v3020_v43  ;;  %v2427_v30 = vmul.f32 %v5267_v32, %v5267_v32  ;;  %v2332_v8 = vmul.f32 %v3791_v26, %v2300_v4  ;;  %v2301_v56 = vsub.f32 1.0, %v5239_v19  ;;  %v5898_v43 = vld [vmem:[#allocation60_spill] sm:$0xff] }
 0x21c   :  { %v5277_v24 = vpop.eup %3794  ;;  %3820 = vtanh.f32 %v2239_v55  ;;  %v2208_v50 = vmul.f32 %v3793_v54, %v2176_v31  ;;  %v5899_v31 = vld [vmem:[#allocation39_spill] sm:$0xff]  ;;  %v3053_v14 = vmul.f32 -1.442695, %v1952_v47  ;;  %v3022_v52 = vmul.f32 -1.442695, %v1729_v61  ;;  %v5298_v47 = vpop.f32.mrf.mxu1 }
 0x21d   :  { %v3797_v44 = vpop.eup %3796  ;;  %3822 = vrcp.f32 %v1852_v51  ;;  %2470 = vadd.xlane.f32.xlu1 %v2427_v30  ;;  %v5282_v42 = vadd.f32 %v2364_v36, %v2332_v8  ;;  %v1953_v18 = vadd.f32 %v5227_v21, %v5899_v31  ;;  %v1730_v34 = vadd.f32 %v5232_v38, %v5178_v35  ;;  %v5310_v8 = vpop.f32.mrf.mxu0 }
 0x21e   :  { %v3799_v6 = vpop.eup %3798  ;;  %v2240_v1 = vadd.f32 %v2208_v50, %v5898_v43  ;;  %v1853_v62 = vadd.f32 1.0, %v3797_v44  ;;  %3824 = vpow2.f32 %v3052_v37  ;;  %v2365_v22 = vmul.f32 %v5239_v19, %v5900_v25  ;;  %v5901_v19 = vld [vmem:[#allocation63_spill] sm:$0xff]  ;;  %v5904_v44 = vld [vmem:[#allocation61_spill] sm:$0xff] }
 0x21f   :  { %v3801_v33 = vpop.eup %3800  ;;  %3826 = vrcp.f32 %v2075_v11  ;;  %v2428_v63 = vmul.f32 %v5282_v42, %v5282_v42  ;;  %v2333_v58 = vmul.f32 %v3799_v6, %v2301_v56  ;;  %v2178_v21 = vadd.f32 %v5209_v53, %v4952_v41  ;;  %v5902_v41 = vld [vmem:[#allocation19_spill] sm:$0xff]  ;;  %v5903_v11 = vld [vmem:[#allocation58_spill] sm:$0xff]  ;;  %v5318_v6 = vpop.f32.mrf.mxu1 }
 0x220   :  { %v3803_v20 = vpop.eup %3802  ;;  %3828 = vtanh.f32 %v2240_v1  ;;  %v2302_v26 = vsub.f32 1.0, %v5249_v46  ;;  %v2076_v55 = vadd.f32 1.0, %v3801_v33  ;;  %v3054_v51 = vmul.f32 -1.442695, %v1953_v18  ;;  %v5905_v33 = vld [vmem:[#allocation59_spill] sm:$0xff] }
 0x221   :  { %v3805_v37 = vpop.eup %3804  ;;  %v2209_v4 = vmul.f32 %v3803_v20, %v2177_v10  ;;  %3830 = vrcp.f32 %v1853_v62  ;;  %2472 = vadd.xlane.f32.xlu0 %v2428_v63  ;;  %v5303_v35 = vadd.f32 %v2365_v22, %v2333_v58  ;;  %v2366_v53 = vmul.f32 %v5249_v46, %v5902_v41  ;;  %v5907_v25 = vld [vmem:[#allocation67_spill] sm:$0xff]  ;;  %v5339_v22 = vld [vmem:[%s5745_s6] ss:$0 sm:$0xff] }
 0x222   :  { %v5301_v0 = vpop.eup %3806  ;;  %3832 = vpow2.f32 %v3021_v3  ;;  %v2334_v36 = vmul.f32 %v3805_v37, %v2302_v26  ;;  %v988_v30 = vadd.f32 %v5903_v11, %v4810_v16  ;;  %v3023_v50 = vmul.f32 -1.442695, %v1730_v34  ;;  %v5343_v26 = vpop.f32.mrf.mxu1 }
 0x223   :  { %v3809_v38 = vpop.eup %3808  ;;  %v2241_v9 = vadd.f32 %v2209_v4, %v5901_v19  ;;  %3834 = vpow2.f32 %v3053_v14  ;;  %v2429_v10 = vmul.f32 %v5303_v35, %v5303_v35  ;;  %v990_v3 = vadd.f32 %v5904_v44, %v4808_v28  ;;  %v5908_v19 = vld [vmem:[#allocation20_spill] sm:$0xff] }
 0x224   :  { %v3811_v54 = vpop.eup %3810  ;;  %3836 = vpow2.f32 %v3022_v52  ;;  %v5320_v46 = vadd.f32 %v2366_v53, %v2334_v36  ;;  %v2077_v1 = vadd.f32 1.0, %v3809_v38  ;;  %v1954_v62 = vadd.f32 %v5245_v13, %v5217_v12  ;;  %v5906_v52 = vld [vmem:[#allocation64_spill] sm:$0xff]  ;;  %v1658_v13 = vpop.f32.mrf.mxu0 }
 0x225   :  { %v5314_v61 = vpop.eup %3812  ;;  %v2210_v56 = vmul.f32 %v3811_v54, %v2178_v21  ;;  %3838 = vtanh.f32 %v2241_v9  ;;  %v1731_v31 = vadd.f32 %v5256_v60, %v5223_v5  ;;  %2474 = vadd.xlane.f32.xlu1 %v2429_v10  ;;  %v5331_v34 = vadd.f32 %v5906_v52, %v4810_v16  ;;  %v5912_v52 = vld [vmem:[#allocation73_spill] sm:$0xff] }
 0x226   :  { %v3815_v43 = vpop.eup %3814  ;;  %3840 = vrcp.f32 %v2076_v55  ;;  %v2430_v58 = vmul.f32 %v5320_v46, %v5320_v46  ;;  %v996_v12 = vadd.f32 %v5907_v25, %v4808_v28  ;;  %v2303_v5 = vsub.f32 1.0, %v5277_v24 }
 0x227   :  { %v3817_v18 = vpop.eup %3816  ;;  %v2242_v14 = vadd.f32 %v2210_v56, %v5905_v33  ;;  %v1854_v63 = vadd.f32 1.0, %v3815_v43  ;;  %3842 = vpow2.f32 %v3054_v51  ;;  %v2179_v37 = vadd.f32 %v5339_v22, %v5251_v59  ;;  %v5909_v56 = vld [vmem:[#allocation62_spill] sm:$0xff] }
 0x228   :  { %v3819_v20 = vpop.eup %3818  ;;  %3844 = vpow2.f32 %v3023_v50  ;;  %v2078_v21 = vadd.f32 1.0, %v3817_v18  ;;  %2476 = vadd.xlane.f32.xlu0 %v2430_v58  ;;  %v3055_v51 = vmul.f32 -1.442695, %v1954_v62  ;;  %v2367_v9 = vmul.f32 %v5277_v24, %v5908_v19  ;;  %v5355_v62 = vpop.f32.mrf.mxu0  ;;  %v5911_v58 = vld [vmem:[#allocation70_spill] sm:$0xff] }
 0x229   :  { %v3821_v60 = vpop.eup %3820  ;;  %3846 = vtanh.f32 %v2242_v14  ;;  %v1855_v4 = vadd.f32 1.0, %v3819_v20  ;;  %v2180_v53 = vadd.f32 %v5339_v22, %v1658_v13  ;;  %v3024_v54 = vmul.f32 -1.442695, %v1731_v31  ;;  %v1529_v18 = vpop.f32.mrf.mxu1 }
 0x22a   :  { %v3823_v55 = vpop.eup %3822  ;;  %3848 = vrcp.f32 %v1854_v63  ;;  %v2335_v38 = vmul.f32 %v3821_v60, %v2303_v5  ;;  %v1955_v59 = vadd.f32 %v5269_v48, %v988_v30  ;;  %v2304_v10 = vsub.f32 1.0, %v5301_v0  ;;  %v5910_v30 = vld [vmem:[#allocation21_spill] sm:$0xff] }
 0x22b   :  { %v3825_v36 = vpop.eup %3824  ;;  %v2211_v41 = vmul.f32 %v3823_v55, %v2179_v37  ;;  %3850 = vrcp.f32 %v2077_v1  ;;  %v1732_v1 = vadd.f32 %v5284_v15, %v990_v3  ;;  %v2368_v14 = vmul.f32 %v5301_v0, %v5910_v30 }
 0x22c   :  { %v5348_v11 = vpop.eup %3826  ;;  %3852 = vrcp.f32 %v1855_v4  ;;  %v5351_v50 = vadd.f32 %v2367_v9, %v2335_v38  ;;  %v2079_v24 = vadd.f32 1.0, %v3825_v36  ;;  %v998_v20 = vadd.f32 %v5911_v58, %v4810_v16  ;;  %v1661_v4 = vpop.f32.mrf.mxu0 }
 0x22d   :  { %v3829_v44 = vpop.eup %3828  ;;  %v2243_v43 = vadd.f32 %v2211_v41, %v5909_v56  ;;  %3854 = vrcp.f32 %v2078_v21  ;;  %v1000_v25 = vadd.f32 %v5912_v52, %v4808_v28  ;;  %v3056_v5 = vmul.f32 -1.442695, %v1955_v59  ;;  %v5913_v21 = vld [vmem:[#allocation66_spill] sm:$0xff] }
 0x22e   :  { %v3831_v31 = vpop.eup %3830  ;;  %3856 = vpow2.f32 %v3055_v51  ;;  %v2431_v33 = vmul.f32 %v5351_v50, %v5351_v50  ;;  %v2336_v48 = vmul.f32 %v3829_v44, %v2304_v10  ;;  %v3025_v55 = vmul.f32 -1.442695, %v1732_v1  ;;  %v1531_v51 = vpop.f32.mrf.mxu1  ;;  %v5915_v44 = vld [vmem:[#allocation22_spill] sm:$0xff] }
 0x22f   :  { %v3833_v63 = vpop.eup %3832  ;;  %3858 = vtanh.f32 %v2243_v43  ;;  %v2212_v13 = vmul.f32 %v3831_v31, %v2180_v53  ;;  %v2305_v38 = vsub.f32 1.0, %v5314_v61  ;;  %v1733_v36 = vadd.f32 %v5318_v6, %v996_v12 }
 0x230   :  { %v3835_v15 = vpop.eup %3834  ;;  %v1856_v3 = vadd.f32 1.0, %v3833_v63  ;;  %3860 = vpow2.f32 %v3024_v54  ;;  %2478 = vadd.xlane.f32.xlu1 %v2431_v33  ;;  %v5366_v60 = vadd.f32 %v2368_v14, %v2336_v48  ;;  %v5914_v54 = vld [vmem:[#allocation76_spill] sm:$0xff]  ;;  %v2369_v56 = vmul.f32 %v5314_v61, %v5915_v44  ;;  %v5384_v48 = vpop.f32.mrf.mxu0 }
 0x231   :  { %v3837_v37 = vpop.eup %3836  ;;  %3862 = vrcp.f32 %v2079_v24  ;;  %v2244_v0 = vadd.f32 %v2212_v13, %v5913_v21  ;;  %v1002_v59 = vadd.f32 %v5914_v54, %v4810_v16  ;;  %v5916_v24 = vld [vmem:[#allocation79_spill] sm:$0xff]  ;;  %v2181_v31 = vadd.f32 %v5339_v22, %v1661_v4  ;;  %v1535_v30 = vpop.f32.mrf.mxu1 }
 0x232   :  { %v3839_v19 = vpop.eup %3838  ;;  %3864 = vrcp.f32 %v1856_v3  ;;  %v1857_v9 = vadd.f32 1.0, %v3837_v37  ;;  %v2432_v41 = vmul.f32 %v5366_v60, %v5366_v60  ;;  %v1006_v1 = vadd.f32 %v5916_v24, %v4808_v28  ;;  %v5920_v24 = vld [vmem:[#allocation65_spill] sm:$0xff] }
 0x233   :  { %v5373_v53 = vpop.eup %3840  ;;  %3866 = vtanh.f32 %v2244_v0  ;;  %v2337_v10 = vmul.f32 %v3839_v19, %v2305_v38  ;;  %v1956_v6 = vadd.f32 %v5298_v47, %v5331_v34  ;;  %v2080_v33 = vadd.f32 1.0, %v3835_v15  ;;  %v5917_v15 = vld [vmem:[#allocation23_spill] sm:$0xff] }
 0x234   :  { %v3843_v43 = vpop.eup %3842  ;;  %3868 = vpow2.f32 %v3056_v5  ;;  %2480 = vadd.xlane.f32.xlu0 %v2432_v41  ;;  %v2306_v61 = vsub.f32 1.0, %v5348_v11  ;;  %v3026_v52 = vmul.f32 -1.442695, %v1733_v36  ;;  %v1734_v13 = vadd.f32 %v1529_v18, %v1000_v25  ;;  %v5918_v0 = vld [vmem:[#allocation83_spill] sm:$0xff]  ;;  %v1674_v18 = vpop.f32.mrf.mxu0 }
 0x235   :  { %v3845_v12 = vpop.eup %3844  ;;  %3870 = vrcp.f32 %v1857_v9  ;;  %v5386_v14 = vadd.f32 %v2369_v56, %v2337_v10  ;;  %v2081_v5 = vadd.f32 1.0, %v3843_v43  ;;  %v2370_v37 = vmul.f32 %v5348_v11, %v5917_v15  ;;  %v5398_v36 = vpop.f32.mrf.mxu1 }
 0x236   :  { %v3847_v63 = vpop.eup %3846  ;;  %v1858_v58 = vadd.f32 1.0, %v3845_v12  ;;  %3872 = vpow2.f32 %v3025_v55  ;;  %v1010_v4 = vadd.f32 %v5918_v0, %v4808_v28  ;;  %v2182_v38 = vadd.f32 %v5339_v22, %v5310_v8  ;;  %v5919_v28 = vld [vmem:[#allocation69_spill] sm:$0xff] }
 0x237   :  { %v3849_v3 = vpop.eup %3848  ;;  %v2433_v47 = vmul.f32 %v5386_v14, %v5386_v14  ;;  %v2338_v34 = vmul.f32 %v3847_v63, %v2306_v61  ;;  %v3057_v25 = vmul.f32 -1.442695, %v1956_v6  ;;  %v1957_v9 = vadd.f32 %v5343_v26, %v998_v20  ;;  %v5411_v61 = vpop.f32.mrf.mxu0 }
 0x238   :  { %v3851_v21 = vpop.eup %3850  ;;  %v2213_v19 = vmul.f32 %v3849_v3, %v2181_v31  ;;  %3874 = vrcp.f32 %v1858_v58  ;;  %v3027_v8 = vmul.f32 -1.442695, %v1734_v13  ;;  %v1735_v56 = vadd.f32 %v1535_v30, %v1006_v1  ;;  %v1539_v58 = vpop.f32.mrf.mxu1  ;;  %v5921_v30 = vld [vmem:[#allocation24_spill] sm:$0xff] }
 0x239   :  { %v3853_v55 = vpop.eup %3852  ;;  %3876 = vrcp.f32 %v2080_v33  ;;  %2482 = vadd.xlane.f32.xlu1 %v2433_v47  ;;  %v5400_v41 = vadd.f32 %v2370_v37, %v2338_v34  ;;  %v2307_v26 = vsub.f32 1.0, %v5373_v53  ;;  %v2183_v6 = vadd.f32 %v5339_v22, %v5355_v62 }
 0x23a   :  { %v5402_v11 = vpop.eup %3854  ;;  %v2214_v54 = vmul.f32 %v3853_v55, %v2182_v38  ;;  %v2245_v10 = vadd.f32 %v2213_v19, %v5919_v28  ;;  %3878 = vpow2.f32 %v3026_v52  ;;  %v1958_v12 = vadd.f32 %v1531_v51, %v1002_v59  ;;  %v5923_v28 = vld [vmem:[#allocation68_spill] sm:$0xff] }
 0x23b   :  { %v3857_v44 = vpop.eup %3856  ;;  %3880 = vrcp.f32 %v2081_v5  ;;  %v2434_v43 = vmul.f32 %v5400_v41, %v5400_v41  ;;  %v3058_v63 = vmul.f32 -1.442695, %v1957_v9  ;;  %v2371_v52 = vmul.f32 %v5373_v53, %v5921_v30  ;;  %v1677_v53 = vpop.f32.mrf.mxu0  ;;  %v5922_v9 = vld [vmem:[#allocation25_spill] sm:$0xff] }
 0x23c   :  { %v3859_v20 = vpop.eup %3858  ;;  %v2246_v31 = vadd.f32 %v2214_v54, %v5920_v24  ;;  %3882 = vtanh.f32 %v2245_v10  ;;  %v2082_v3 = vadd.f32 1.0, %v3857_v44  ;;  %v2184_v62 = vadd.f32 %v5339_v22, %v1674_v18  ;;  %v5924_v44 = vld [vmem:[#allocation82_spill] sm:$0xff] }
 0x23d   :  { %v3861_v33 = vpop.eup %3860  ;;  %3884 = vpow2.f32 %v3057_v25  ;;  %2484 = vadd.xlane.f32.xlu0 %v2434_v43  ;;  %v2339_v1 = vmul.f32 %v3859_v20, %v2307_v26  ;;  %v3028_v51 = vmul.f32 -1.442695, %v1735_v56  ;;  %v2308_v34 = vsub.f32 1.0, %v3851_v21 }
 0x23e   :  { %v5415_v13 = vpop.eup %3862  ;;  %3886 = vtanh.f32 %v2246_v31  ;;  %v1859_v5 = vadd.f32 1.0, %v3861_v33  ;;  %v3059_v0 = vmul.f32 -1.442695, %v1958_v12  ;;  %v1736_v38 = vadd.f32 %v1539_v58, %v1010_v4 }
 0x23f   :  { %v3865_v47 = vpop.eup %3864  ;;  %3888 = vpow2.f32 %v3027_v8  ;;  %v5418_v59 = vadd.f32 %v2371_v52, %v2339_v1  ;;  %v2372_v18 = vmul.f32 %v3851_v21, %v5922_v9  ;;  %v1008_v56 = vadd.f32 %v5924_v44, %v4810_v16  ;;  %v5925_v21 = vld [vmem:[#allocation72_spill] sm:$0xff]  ;;  %v5926_v52 = vld [vmem:[#allocation75_spill] sm:$0xff] }
 0x240   :  { %v3867_v15 = vpop.eup %3866  ;;  %v2215_v37 = vmul.f32 %v3865_v47, %v2183_v6  ;;  %3890 = vrcp.f32 %v1859_v5  ;;  %v2185_v20 = vadd.f32 %v5339_v22, %v1677_v53  ;;  %v3029_v24 = vmul.f32 -1.442695, %v1736_v38  ;;  %v5928_v53 = vld [vmem:[#allocation26_spill] sm:$0xff] }
 0x241   :  { %v3869_v19 = vpop.eup %3868  ;;  %3892 = vpow2.f32 %v3058_v63  ;;  %v2435_v55 = vmul.f32 %v5418_v59, %v5418_v59  ;;  %v2340_v25 = vmul.f32 %v3867_v15, %v2308_v34  ;;  %v1959_v12 = vadd.f32 %v5398_v36, %v1008_v56  ;;  %v5927_v36 = vld [vmem:[#allocation84_spill] sm:$0xff] }
 0x242   :  { %v3871_v54 = vpop.eup %3870  ;;  %v2247_v10 = vadd.f32 %v2215_v37, %v5923_v28  ;;  %3894 = vrcp.f32 %v2082_v3  ;;  %v2309_v47 = vsub.f32 1.0, %v5402_v11  ;;  %v1012_v34 = vadd.f32 %v5927_v36, %v4810_v16 }
 0x243   :  { %v3873_v8 = vpop.eup %3872  ;;  %v2216_v43 = vmul.f32 %v3871_v54, %v2184_v62  ;;  %3896 = vpow2.f32 %v3028_v51  ;;  %2486 = vadd.xlane.f32.xlu1 %v2435_v55  ;;  %v5426_v4 = vadd.f32 %v2372_v18, %v2340_v25  ;;  %v1541_v62 = vpop.f32.mrf.mxu1  ;;  %v2083_v15 = vadd.f32 1.0, %v3869_v19 }
 0x244   :  { %3898 = vtanh.f32 %v2247_v10  ;;  %v1860_v26 = vadd.f32 1.0, %v3873_v8  ;;  %v3060_v37 = vmul.f32 -1.442695, %v1959_v12  ;;  %v2373_v55 = vmul.f32 %v5402_v11, %v5928_v53  ;;  %v5442_v10 = vpop.f32.mrf.mxu0  ;;  %v5929_v8 = vld [vmem:[#allocation27_spill] sm:$0xff] }
 0x245   :  { %v3875_v31 = vpop.eup %3874  ;;  %v2248_v6 = vadd.f32 %v2216_v43, %v5925_v21  ;;  %3900 = vpow2.f32 %v3059_v0  ;;  %v2436_v33 = vmul.f32 %v5426_v4, %v5426_v4  ;;  %v2310_v25 = vsub.f32 1.0, %v5415_v13  ;;  %v5930_v12 = vld [vmem:[#allocation71_spill] sm:$0xff] }
 0x246   :  { %v3877_v63 = vpop.eup %3876  ;;  %3902 = vrcp.f32 %v1860_v26  ;;  %v2217_v58 = vmul.f32 %v3875_v31, %v2185_v20  ;;  %v1960_v18 = vadd.f32 %v1541_v62, %v1012_v34  ;;  %v2186_v28 = vadd.f32 %v5339_v22, %v5384_v48 }
 0x247   :  { %v3879_v1 = vpop.eup %3878  ;;  %3904 = vtanh.f32 %v2248_v6  ;;  %2488 = vadd.xlane.f32.xlu0 %v2436_v33  ;;  %v2374_v44 = vmul.f32 %v5415_v13, %v5929_v8  ;;  %v2187_v62 = vadd.f32 %v5339_v22, %v5411_v61 }
 0x248   :  { %v3881_v30 = vpop.eup %3880  ;;  %v2249_v3 = vadd.f32 %v2217_v58, %v5926_v52  ;;  %v1861_v5 = vadd.f32 1.0, %v3879_v1  ;;  %3906 = vpow2.f32 %v3029_v24  ;;  %v3061_v21 = vmul.f32 -1.442695, %v1960_v18  ;;  %v1690_v58 = vpop.f32.mrf.mxu0  ;;  %v5932_v18 = vld [vmem:[#allocation29_spill] sm:$0xff] }
 0x249   :  { %v3883_v51 = vpop.eup %3882  ;;  %v2311_v1 = vsub.f32 1.0, %v3877_v63 }
 0x24a   :  { %v3885_v0 = vpop.eup %3884  ;;  %3908 = vtanh.f32 %v2249_v3  ;;  %v2341_v38 = vmul.f32 %v3883_v51, %v2309_v47  ;;  %v5931_v51 = vld [vmem:[#allocation28_spill] sm:$0xff]  ;;  %v3477_v53 = vpop.f32.mrf.mxu0 }
 0x24b   :  { %v3887_v9 = vpop.eup %3886  ;;  %3910 = vrcp.f32 %v1861_v5  ;;  %v2084_v11 = vadd.f32 1.0, %v3885_v0  ;;  %v2375_v36 = vmul.f32 %v3877_v63, %v5931_v51 }
 0x24c   :  { %v3889_v54 = vpop.eup %3888  ;;  %v5444_v16 = vadd.f32 %v2373_v55, %v2341_v38  ;;  %v2342_v19 = vmul.f32 %v3887_v9, %v2310_v25  ;;  %3912 = vrcp.f32 %v2083_v15 }
 0x24d   :  { %v3891_v56 = vpop.eup %3890  ;;  %v1862_v43 = vadd.f32 1.0, %v3889_v54  ;;  %3914 = vpow2.f32 %v3060_v37  ;;  %v2312_v37 = vsub.f32 1.0, %v3881_v30  ;;  %v2376_v54 = vmul.f32 %v3881_v30, %v5932_v18  ;;  %v5934_v30 = vld [vmem:[#allocation30_spill] sm:$0xff] }
 0x24e   :  { %v3893_v26 = vpop.eup %3892  ;;  %v2218_v20 = vmul.f32 %v3891_v56, %v2186_v28  ;;  %v2437_v24 = vmul.f32 %v5444_v16, %v5444_v16  ;;  %v5450_v31 = vadd.f32 %v2374_v44, %v2342_v19  ;;  %v5933_v28 = vld [vmem:[#allocation74_spill] sm:$0xff]  ;;  %v2188_v56 = vadd.f32 %v5339_v22, %v1690_v58 }
 0x24f   :  { %v3895_v48 = vpop.eup %3894  ;;  %3916 = vrcp.f32 %v1862_v43  ;;  %v2085_v15 = vadd.f32 1.0, %v3893_v26  ;;  %v5935_v58 = vld [vmem:[#allocation78_spill] sm:$0xff] }
 0x250   :  { %v3897_v6 = vpop.eup %3896  ;;  %v2250_v33 = vadd.f32 %v2218_v20, %v5930_v12  ;;  %2490 = vadd.xlane.f32.xlu1 %v2437_v24  ;;  %v2438_v13 = vmul.f32 %v5450_v31, %v5450_v31  ;;  %3918 = vrcp.f32 %v2084_v11  ;;  %v2313_v8 = vsub.f32 1.0, %v3895_v48  ;;  %v1693_v20 = vpop.f32.mrf.mxu0 }
 0x251   :  { %v3899_v52 = vpop.eup %3898  ;;  %v1863_v3 = vadd.f32 1.0, %v3897_v6 }
 0x252   :  { %v3901_v5 = vpop.eup %3900  ;;  %3920 = vtanh.f32 %v2250_v33  ;;  %2492 = vadd.xlane.f32.xlu0 %v2438_v13  ;;  %v2343_v47 = vmul.f32 %v3899_v52, %v2311_v1 }
 0x253   :  { %v3903_v34 = vpop.eup %3902  ;;  %3922 = vpow2.f32 %v3061_v21  ;;  %v2086_v26 = vadd.f32 1.0, %v3901_v5  ;;  %v2377_v21 = vmul.f32 %v3895_v48, %v5934_v30  ;;  %v5939_v30 = vld [vmem:[#allocation32_spill] sm:$0xff] }
 0x254   :  { %v3905_v0 = vpop.eup %3904  ;;  %v2219_v38 = vmul.f32 %v3903_v34, %v2187_v62  ;;  %3924 = vrcp.f32 %v1863_v3  ;;  %v5458_v55 = vadd.f32 %v2375_v36, %v2343_v47  ;;  %v2189_v3 = vadd.f32 %v5339_v22, %v1693_v20 }
 0x255   :  { %v3907_v25 = vpop.eup %3906  ;;  %v2344_v9 = vmul.f32 %v3905_v0, %v2312_v37  ;;  %3926 = vrcp.f32 %v2085_v15  ;;  %v5936_v15 = vld [vmem:[#allocation81_spill] sm:$0xff] }
 0x256   :  { %v2251_v61 = vadd.f32 %v2219_v38, %v5933_v28  ;;  %v1864_v19 = vadd.f32 1.0, %v3907_v25  ;;  %v2439_v63 = vmul.f32 %v5458_v55, %v5458_v55  ;;  %v2190_v38 = vadd.f32 %v5339_v22, %v5442_v10 }
 0x257   :  { %v3909_v44 = vpop.eup %3908  ;;  %v5465_v11 = vadd.f32 %v2376_v54, %v2344_v9  ;;  %v5937_v9 = vld [vmem:[#allocation31_spill] sm:$0xff]  ;;  %v2191_v10 = vadd.f32 %v5339_v22, %v3477_v53  ;;  %v5941_v53 = vld [vmem:[#allocation33_spill] sm:$0xff] }
 0x258   :  { %v3911_v43 = vpop.eup %3910  ;;  %3928 = vtanh.f32 %v2251_v61  ;;  %2494 = vadd.xlane.f32.xlu1 %v2439_v63  ;;  %v2345_v24 = vmul.f32 %v3909_v44, %v2313_v8  ;;  %v5938_v8 = vld [vmem:[#allocation77_spill] sm:$0xff] }
 0x259   :  { %v2220_v6 = vmul.f32 %v3911_v43, %v2188_v56  ;;  %3930 = vrcp.f32 %v1864_v19  ;;  %v2440_v12 = vmul.f32 %v5465_v11, %v5465_v11  ;;  %v3913_v33 = vpop.eup %3912 }
 0x25a   :  { %v5470_v13 = vadd.f32 %v2377_v21, %v2345_v24  ;;  %v3915_v1 = vpop.eup %3914  ;;  %3932 = vrcp.f32 %v2086_v26  ;;  %v2314_v36 = vsub.f32 1.0, %v3913_v33  ;;  %v2378_v18 = vmul.f32 %v3913_v33, %v5937_v9 }
 0x25b   :  { %v2252_v52 = vadd.f32 %v2220_v6, %v5935_v58  ;;  %2496 = vadd.xlane.f32.xlu0 %v2440_v12  ;;  %v2087_v51 = vadd.f32 1.0, %v3915_v1  ;;  %v5940_v1 = vld [vmem:[#allocation80_spill] sm:$0xff] }
 0x25c   :  { %v3917_v5 = vpop.eup %3916  ;;  %v2441_v62 = vmul.f32 %v5470_v13, %v5470_v13 }
 0x25d   :  { %3934 = vtanh.f32 %v2252_v52  ;;  %v2221_v48 = vmul.f32 %v3917_v5, %v2189_v3  ;;  %v3919_v47 = vpop.eup %3918 }
 0x25e   :  { %2498 = vadd.xlane.f32.xlu1 %v2441_v62  ;;  %v2315_v43 = vsub.f32 1.0, %v3919_v47  ;;  %v2379_v21 = vmul.f32 %v3919_v47, %v5939_v30 }
 0x25f   :  { %v3921_v34 = vpop.eup %3920  ;;  %v2253_v37 = vadd.f32 %v2221_v48, %v5936_v15 }
 0x260   :  { %v3923_v0 = vpop.eup %3922  ;;  %v2346_v25 = vmul.f32 %v3921_v34, %v2314_v36 }
 0x261   :  { %v3925_v54 = vpop.eup %3924  ;;  %3936 = vtanh.f32 %v2253_v37  ;;  %v2088_v19 = vadd.f32 1.0, %v3923_v0  ;;  %v5942_v37 = vld [vmem:[#allocation34_spill] sm:$0xff] }
 0x262   :  { %v2222_v28 = vmul.f32 %v3925_v54, %v2190_v38  ;;  %3938 = vrcp.f32 %v2087_v51  ;;  %v5480_v61 = vadd.f32 %v2378_v18, %v2346_v25  ;;  %v3927_v63 = vpop.eup %3926 }
 0x263   :  { %v2316_v52 = vsub.f32 1.0, %v3927_v63  ;;  %v2380_v62 = vmul.f32 %v3927_v63, %v5941_v53  ;;  %v2768_v53 = vld [vmem:[%s5741_s2] sm:$0xff] }
 0x264   :  { %v2254_v44 = vadd.f32 %v2222_v28, %v5938_v8  ;;  %v2442_v56 = vmul.f32 %v5480_v61, %v5480_v61  ;;  %v5943_v8 = vld [vmem:[#allocation35_spill] sm:$0xff] }
 0x265   :  { %v3929_v26 = vpop.eup %3928 }
 0x266   :  { %v3931_v20 = vpop.eup %3930  ;;  %3940 = vtanh.f32 %v2254_v44  ;;  %2500 = vadd.xlane.f32.xlu0 %v2442_v56  ;;  %v2347_v24 = vmul.f32 %v3929_v26, %v2315_v43 }
 0x267   :  { %v2223_v6 = vmul.f32 %v3931_v20, %v2191_v10  ;;  %3942 = vrcp.f32 %v2088_v19  ;;  %v3933_v33 = vpop.eup %3932 }
 0x268   :  { %v5487_v12 = vadd.f32 %v2379_v21, %v2347_v24  ;;  %v2317_v47 = vsub.f32 1.0, %v3933_v33  ;;  %v2381_v0 = vmul.f32 %v3933_v33, %v5942_v37  ;;  %v5944_v21 = vld [vmem:[#allocation36_spill] sm:$0xff] }
 0x269   :  { %v2255_v58 = vadd.f32 %v2223_v6, %v5940_v1 }
 0x26a   :  { %v3935_v3 = vpop.eup %3934  ;;  %v2443_v5 = vmul.f32 %v5487_v12, %v5487_v12 }
 0x26b   :  { %3944 = vtanh.f32 %v2255_v58  ;;  %v2348_v22 = vmul.f32 %v3935_v3, %v2316_v52 }
 0x26c   :  { %2502 = vadd.xlane.f32.xlu1 %v2443_v5 }
 0x26d   :  { %v5493_v48 = vadd.f32 %v2380_v62, %v2348_v22 }
 0x26e   :  { %v3937_v51 = vpop.eup %3936 }
 0x26f   :  { %v3939_v36 = vpop.eup %3938  ;;  %v2444_v34 = vmul.f32 %v5493_v48, %v5493_v48  ;;  %v2349_v15 = vmul.f32 %v3937_v51, %v2317_v47 }
 0x270   :  { %v2318_v25 = vsub.f32 1.0, %v3939_v36  ;;  %v2382_v44 = vmul.f32 %v3939_v36, %v5943_v8 }
 0x271   :  { %2504 = vadd.xlane.f32.xlu0 %v2444_v34  ;;  %v5498_v38 = vadd.f32 %v2381_v0, %v2349_v15  ;;  %v2449_v9 = vpop.xlane.xlu0 %2448  ;;  %v2769_v15 = vld [vmem:[%s5741_s2 + $0x8] sm:$0xff] }
 0x272   :  { %v2512_v28 = vmax.f32 %v2449_v9, 1e-24 }
 0x273   :  { %v3941_v18 = vpop.eup %3940  ;;  %v2445_v54 = vmul.f32 %v5498_v38, %v5498_v38 }
 0x274   :  { %v3943_v19 = vpop.eup %3942  ;;  %v2350_v63 = vmul.f32 %v3941_v18, %v2318_v25  ;;  %3946 = vrsqrt.f32 %v2512_v28 }
 0x275   :  { %2506 = vadd.xlane.f32.xlu1 %v2445_v54  ;;  %v2451_v43 = vpop.xlane.xlu0 %2450  ;;  %v2319_v26 = vsub.f32 1.0, %v3943_v19  ;;  %v2383_v6 = vmul.f32 %v3943_v19, %v5944_v21  ;;  %v2770_v54 = vld [vmem:[%s5741_s2 + $0x10] sm:$0xff] }
 0x276   :  { %v5503_v56 = vadd.f32 %v2382_v44, %v2350_v63  ;;  %v2513_v10 = vmax.f32 %v2451_v43, 1e-24  ;;  %v2771_v44 = vld [vmem:[%s5741_s2 + $0x18] sm:$0xff] }
 0x278   :  { %v3945_v20 = vpop.eup %3944  ;;  %v2446_v24 = vmul.f32 %v5503_v56, %v5503_v56  ;;  %3948 = vrsqrt.f32 %v2513_v10 }
 0x279   :  { %v2351_v30 = vmul.f32 %v3945_v20, %v2319_v26  ;;  %v2453_v33 = vpop.xlane.xlu1 %2452 }
 0x27a   :  { %2508 = vadd.xlane.f32.xlu0 %v2446_v24  ;;  %v2514_v58 = vmax.f32 %v2453_v33, 1e-24 }
 0x27b   :  { %v5508_v1 = vadd.f32 %v2383_v6, %v2351_v30  ;;  %v2772_v30 = vld [vmem:[%s5741_s2 + $0x20] sm:$0xff] }
 0x27c   :  { %3950 = vrsqrt.f32 %v2514_v58 }
 0x27d   :  { %v2447_v52 = vmul.f32 %v5508_v1, %v5508_v1  ;;  %v2455_v3 = vpop.xlane.xlu1 %2454 }
 0x27e   :  { %v2515_v5 = vmax.f32 %v2455_v3, 1e-24 }
 0x27f   :  { %2510 = vadd.xlane.f32.xlu1 %v2447_v52  ;;  %v2773_v52 = vld [vmem:[%s5741_s2 + $0x28] sm:$0xff] }
 0x280   :  { %3952 = vrsqrt.f32 %v2515_v5 }
 0x281   :  { %v3947_v22 = vpop.eup %3946 }
 0x282   :  { %v2457_v62 = vpop.xlane.xlu0 %2456  ;;  %v2576_v47 = vmul.f32 %v3947_v22, %v5053_v40 }
 0x283   :  { %v2516_v51 = vmax.f32 %v2457_v62, 1e-24 }
 0x284   :  { %v2800_v36 = vmax.f32 %v2768_v53, %v2576_v47 }
 0x285   :  { %3954 = vrsqrt.f32 %v2516_v51  ;;  %v3949_v34 = vpop.eup %3948 }
 0x286   :  { %v2459_v37 = vpop.xlane.xlu1 %2458  ;;  %2832 = vst [vmem:[%s5747_s8] sm:$0xff] %v2800_v36  ;;  %v2577_v0 = vmul.f32 %v3949_v34, %v5064_v23 }
 0x287   :  { %v2517_v25 = vmax.f32 %v2459_v37, 1e-24 }
 0x288   :  { %v3130_v9 = vpack.c.bf16 %v2577_v0, %v2576_v47  ;;  %v2801_v18 = vmax.f32 %v2769_v15, %v2577_v0  ;;  %v2774_v47 = vld [vmem:[%s5741_s2 + $0x30] sm:$0xff] }
 0x289   :  { %3956 = vrsqrt.f32 %v2517_v25  ;;  %v3951_v40 = vpop.eup %3950 }
 0x28a   :  { %3131 = vst [vmem:[#allocation2] sm:$0xff] %v3130_v9   ;;  %2833 = vst [vmem:[%s5747_s8 + $0x8] sm:$0xff] %v2801_v18  ;;  %v2578_v28 = vmul.f32 %v3951_v40, %v5079_v49  ;;  %v2461_v19 = vpop.xlane.xlu0 %2460  ;;  %v2776_v18 = vld [vmem:[%s5741_s2 + $0x40] sm:$0xff] }
 0x28b   :  { %v2518_v8 = vmax.f32 %v2461_v19, 1e-24 }
 0x28c   :  { %v2802_v63 = vmax.f32 %v2770_v54, %v2578_v28 }
 0x28d   :  { %v3953_v23 = vpop.eup %3952  ;;  %3958 = vrsqrt.f32 %v2518_v8 }
 0x28e   :  { %v2463_v43 = vpop.xlane.xlu1 %2462  ;;  %2834 = vst [vmem:[%s5747_s8 + $0x10] sm:$0xff] %v2802_v63  ;;  %v2579_v26 = vmul.f32 %v3953_v23, %v5092_v29  ;;  %v2777_v63 = vld [vmem:[%s5741_s2 + $0x48] sm:$0xff] }
 0x28f   :  { %v2519_v10 = vmax.f32 %v2463_v43, 1e-24 }
 0x290   :  { %v3135_v20 = vpack.c.bf16 %v2579_v26, %v2578_v28  ;;  %v2803_v24 = vmax.f32 %v2771_v44, %v2579_v26 }
 0x291   :  { %3960 = vrsqrt.f32 %v2519_v10 }
 0x292   :  { %v3955_v49 = vpop.eup %3954  ;;  %3207 = vst [vmem:[#allocation2 + $0x8] sm:$0xff] %v3135_v20   ;;  %2835 = vst [vmem:[%s5747_s8 + $0x18] sm:$0xff] %v2803_v24  ;;  %v2778_v24 = vld [vmem:[%s5741_s2 + $0x50] sm:$0xff] }
 0x293   :  { %v2580_v21 = vmul.f32 %v3955_v49, %v5103_v27  ;;  %v2465_v6 = vpop.xlane.xlu0 %2464 }
 0x294   :  { %v2520_v29 = vmax.f32 %v2465_v6, 1e-24 }
 0x295   :  { %v2804_v33 = vmax.f32 %v2772_v30, %v2580_v21 }
 0x296   :  { %v3957_v58 = vpop.eup %3956  ;;  %3962 = vrsqrt.f32 %v2520_v29 }
 0x297   :  { %2836 = vst [vmem:[%s5747_s8 + $0x20] sm:$0xff] %v2804_v33  ;;  %v2581_v3 = vmul.f32 %v3957_v58, %v5118_v2  ;;  %v2775_v2 = vld [vmem:[%s5741_s2 + $0x38] sm:$0xff] }
 0x298   :  { %v2779_v33 = vld [vmem:[%s5741_s2 + $0x58] sm:$0xff] }
 0x299   :  { %v3140_v5 = vpack.c.bf16 %v2581_v3, %v2580_v21  ;;  %v2805_v22 = vmax.f32 %v2773_v52, %v2581_v3  ;;  %v2467_v53 = vpop.xlane.xlu1 %2466 }
 0x29a   :  { %v2521_v27 = vmax.f32 %v2467_v53, 1e-24  ;;  %v3959_v62 = vpop.eup %3958 }
 0x29b   :  { %3208 = vst [vmem:[#allocation2 + $0x10] sm:$0xff] %v3140_v5   ;;  %2837 = vst [vmem:[%s5747_s8 + $0x28] sm:$0xff] %v2805_v22  ;;  %v2582_v51 = vmul.f32 %v3959_v62, %v5143_v45 }
 0x29c   :  { %3964 = vrsqrt.f32 %v2521_v27 }
 0x29d   :  { %v2806_v34 = vmax.f32 %v2774_v47, %v2582_v51 }
 0x29e   :  { %v3961_v36 = vpop.eup %3960 }
 0x29f   :  { %v2583_v15 = vmul.f32 %v3961_v36, %v5155_v57  ;;  %2838 = vst [vmem:[%s5747_s8 + $0x30] sm:$0xff] %v2806_v34 }
 0x2a1   :  { %v3145_v37 = vpack.c.bf16 %v2583_v15, %v2582_v51  ;;  %v2807_v0 = vmax.f32 %v2775_v2, %v2583_v15  ;;  %v2781_v51 = vld [vmem:[%s5741_s2 + $0x68] sm:$0xff] }
 0x2a2   :  { %v2469_v25 = vpop.xlane.xlu0 %2468 }
 0x2a3   :  { %3209 = vst [vmem:[#allocation2 + $0x18] sm:$0xff] %v3145_v37   ;;  %2839 = vst [vmem:[%s5747_s8 + $0x38] sm:$0xff] %v2807_v0  ;;  %v2522_v45 = vmax.f32 %v2469_v25, 1e-24  ;;  %v3963_v9 = vpop.eup %3962 }
 0x2a4   :  { %v2584_v57 = vmul.f32 %v3963_v9, %v5183_v7 }
 0x2a5   :  { %3966 = vrsqrt.f32 %v2522_v45 }
 0x2a6   :  { %v2471_v40 = vpop.xlane.xlu1 %2470  ;;  %v2808_v54 = vmax.f32 %v2776_v18, %v2584_v57 }
 0x2a7   :  { %v2523_v28 = vmax.f32 %v2471_v40, 1e-24 }
 0x2a8   :  { %2840 = vst [vmem:[%s5747_s8 + $0x40] sm:$0xff] %v2808_v54 }
 0x2a9   :  { %3968 = vrsqrt.f32 %v2523_v28  ;;  %v3965_v19 = vpop.eup %3964 }
 0x2aa   :  { %v2473_v8 = vpop.xlane.xlu0 %2472  ;;  %v2585_v23 = vmul.f32 %v3965_v19, %v5211_v39 }
 0x2ab   :  { %v2524_v44 = vmax.f32 %v2473_v8, 1e-24 }
 0x2ac   :  { %v3150_v43 = vpack.c.bf16 %v2585_v23, %v2584_v57  ;;  %v2809_v7 = vmax.f32 %v2777_v63, %v2585_v23  ;;  %v2783_v57 = vld [vmem:[%s5741_s2 + $0x78] sm:$0xff]  ;;  %v2784_v63 = vld [vmem:[%s5741_s2 + $0x80] sm:$0xff] }
 0x2ad   :  { %3970 = vrsqrt.f32 %v2524_v44 }
 0x2ae   :  { %3210 = vst [vmem:[#allocation2 + $0x20] sm:$0xff] %v3150_v43   ;;  %2841 = vst [vmem:[%s5747_s8 + $0x48] sm:$0xff] %v2809_v7  ;;  %v2475_v26 = vpop.xlane.xlu1 %2474 }
 0x2af   :  { %v2525_v10 = vmax.f32 %v2475_v26, 1e-24  ;;  %v2785_v26 = vld [vmem:[%s5741_s2 + $0x88] sm:$0xff] }
 0x2b1   :  { %3972 = vrsqrt.f32 %v2525_v10  ;;  %v2477_v49 = vpop.xlane.xlu0 %2476 }
 0x2b2   :  { %v3967_v20 = vpop.eup %3966  ;;  %v2526_v30 = vmax.f32 %v2477_v49, 1e-24 }
 0x2b3   :  { %v2586_v39 = vmul.f32 %v3967_v20, %v5253_v17  ;;  %v2780_v17 = vld [vmem:[%s5741_s2 + $0x60] sm:$0xff] }
 0x2b4   :  { %3974 = vrsqrt.f32 %v2526_v30 }
 0x2b5   :  { %v2810_v21 = vmax.f32 %v2778_v24, %v2586_v39 }
 0x2b6   :  { %v3969_v6 = vpop.eup %3968 }
 0x2b7   :  { %2842 = vst [vmem:[%s5747_s8 + $0x50] sm:$0xff] %v2810_v21  ;;  %v2587_v29 = vmul.f32 %v3969_v6, %v5267_v32 }
 0x2b9   :  { %v3155_v58 = vpack.c.bf16 %v2587_v29, %v2586_v39  ;;  %v2811_v52 = vmax.f32 %v2779_v33, %v2587_v29  ;;  %v2479_v3 = vpop.xlane.xlu1 %2478  ;;  %v2787_v29 = vld [vmem:[%s5741_s2 + $0x98] sm:$0xff] }
 0x2ba   :  { %v3971_v5 = vpop.eup %3970  ;;  %v2527_v22 = vmax.f32 %v2479_v3, 1e-24 }
 0x2bb   :  { %3211 = vst [vmem:[#allocation2 + $0x28] sm:$0xff] %v3155_v58   ;;  %2843 = vst [vmem:[%s5747_s8 + $0x58] sm:$0xff] %v2811_v52  ;;  %v2588_v53 = vmul.f32 %v3971_v5, %v5282_v42  ;;  %v2782_v42 = vld [vmem:[%s5741_s2 + $0x70] sm:$0xff] }
 0x2bc   :  { %3976 = vrsqrt.f32 %v2527_v22 }
 0x2bd   :  { %v2812_v27 = vmax.f32 %v2780_v17, %v2588_v53  ;;  %v2481_v62 = vpop.xlane.xlu0 %2480  ;;  %v2788_v17 = vld [vmem:[%s5741_s2 + $0xa0] sm:$0xff] }
 0x2be   :  { %v2528_v32 = vmax.f32 %v2481_v62, 1e-24  ;;  %v3973_v47 = vpop.eup %3972 }
 0x2bf   :  { %2844 = vst [vmem:[%s5747_s8 + $0x60] sm:$0xff] %v2812_v27  ;;  %v2589_v36 = vmul.f32 %v3973_v47, %v5303_v35 }
 0x2c0   :  { %3978 = vrsqrt.f32 %v2528_v32 }
 0x2c1   :  { %v3975_v2 = vpop.eup %3974  ;;  %v3160_v34 = vpack.c.bf16 %v2589_v36, %v2588_v53  ;;  %v2813_v15 = vmax.f32 %v2781_v51, %v2589_v36 }
 0x2c2   :  { %v2483_v37 = vpop.xlane.xlu1 %2482  ;;  %v2590_v0 = vmul.f32 %v3975_v2, %v5320_v46  ;;  %v2789_v2 = vld [vmem:[%s5741_s2 + $0xa8] sm:$0xff] }
 0x2c3   :  { %v2529_v25 = vmax.f32 %v2483_v37, 1e-24  ;;  %3212 = vst [vmem:[#allocation2 + $0x30] sm:$0xff] %v3160_v34   ;;  %2845 = vst [vmem:[%s5747_s8 + $0x68] sm:$0xff] %v2813_v15  ;;  %v2790_v15 = vld [vmem:[%s5741_s2 + $0xb0] sm:$0xff] }
 0x2c4   :  { %v2814_v45 = vmax.f32 %v2782_v42, %v2590_v0 }
 0x2c5   :  { %3980 = vrsqrt.f32 %v2529_v25 }
 0x2c6   :  { %v2485_v35 = vpop.xlane.xlu0 %2484  ;;  %2846 = vst [vmem:[%s5747_s8 + $0x70] sm:$0xff] %v2814_v45 }
 0x2c7   :  { %v2530_v9 = vmax.f32 %v2485_v35, 1e-24 }
 0x2c9   :  { %v3977_v18 = vpop.eup %3976  ;;  %3982 = vrsqrt.f32 %v2530_v9  ;;  %v2791_v9 = vld [vmem:[%s5741_s2 + $0xb8] sm:$0xff] }
 0x2ca   :  { %v2591_v46 = vmul.f32 %v3977_v18, %v5351_v50 }
 0x2cc   :  { %v3165_v40 = vpack.c.bf16 %v2591_v46, %v2590_v0  ;;  %v2815_v54 = vmax.f32 %v2783_v57, %v2591_v46  ;;  %v2487_v28 = vpop.xlane.xlu1 %2486 }
 0x2cd   :  { %v3979_v19 = vpop.eup %3978  ;;  %v2531_v8 = vmax.f32 %v2487_v28, 1e-24 }
 0x2ce   :  { %3213 = vst [vmem:[#allocation2 + $0x38] sm:$0xff] %v3165_v40   ;;  %2847 = vst [vmem:[%s5747_s8 + $0x78] sm:$0xff] %v2815_v54  ;;  %v2592_v23 = vmul.f32 %v3979_v19, %v5366_v60  ;;  %v2786_v60 = vld [vmem:[%s5741_s2 + $0x90] sm:$0xff]  ;;  %v2792_v40 = vld [vmem:[%s5741_s2 + $0xc0] sm:$0xff] }
 0x2cf   :  { %3984 = vrsqrt.f32 %v2531_v8 }
 0x2d0   :  { %v2816_v44 = vmax.f32 %v2784_v63, %v2592_v23  ;;  %v2489_v43 = vpop.xlane.xlu0 %2488 }
 0x2d1   :  { %v2532_v50 = vmax.f32 %v2489_v43, 1e-24 }
 0x2d2   :  { %v3981_v7 = vpop.eup %3980  ;;  %2848 = vst [vmem:[%s5747_s8 + $0x80] sm:$0xff] %v2816_v44 }
 0x2d3   :  { %v2593_v10 = vmul.f32 %v3981_v7, %v5386_v14  ;;  %3986 = vrsqrt.f32 %v2532_v50 }
 0x2d5   :  { %v3170_v20 = vpack.c.bf16 %v2593_v10, %v2592_v23  ;;  %v2817_v24 = vmax.f32 %v2785_v26, %v2593_v10 }
 0x2d6   :  { %v3983_v49 = vpop.eup %3982 }
 0x2d7   :  { %3214 = vst [vmem:[#allocation2 + $0x40] sm:$0xff] %v3170_v20   ;;  %2849 = vst [vmem:[%s5747_s8 + $0x88] sm:$0xff] %v2817_v24  ;;  %v2594_v39 = vmul.f32 %v3983_v49, %v5400_v41 }
 0x2d9   :  { %v2818_v30 = vmax.f32 %v2786_v60, %v2594_v39  ;;  %v2491_v21 = vpop.xlane.xlu1 %2490 }
 0x2da   :  { %v2533_v6 = vmax.f32 %v2491_v21, 1e-24 }
 0x2db   :  { %2850 = vst [vmem:[%s5747_s8 + $0x90] sm:$0xff] %v2818_v30  ;;  %v2493_v14 = vpop.xlane.xlu0 %2492  ;;  %v2795_v30 = vld [vmem:[%s5741_s2 + $0xd8] sm:$0xff] }
 0x2dc   :  { %v3985_v33 = vpop.eup %3984  ;;  %3988 = vrsqrt.f32 %v2533_v6  ;;  %v2534_v58 = vmax.f32 %v2493_v14, 1e-24 }
 0x2dd   :  { %v2595_v52 = vmul.f32 %v3985_v33, %v5418_v59 }
 0x2de   :  { %3990 = vrsqrt.f32 %v2534_v58  ;;  %v2796_v58 = vld [vmem:[%s5741_s2 + $0xe0] sm:$0xff] }
 0x2df   :  { %v3175_v3 = vpack.c.bf16 %v2595_v52, %v2594_v39  ;;  %v2819_v41 = vmax.f32 %v2787_v29, %v2595_v52 }
 0x2e0   :  { %v3987_v5 = vpop.eup %3986 }
 0x2e1   :  { %3215 = vst [vmem:[#allocation2 + $0x48] sm:$0xff] %v3175_v3   ;;  %2851 = vst [vmem:[%s5747_s8 + $0x98] sm:$0xff] %v2819_v41  ;;  %v2596_v22 = vmul.f32 %v3987_v5, %v5426_v4  ;;  %v2495_v53 = vpop.xlane.xlu1 %2494  ;;  %v2797_v41 = vld [vmem:[%s5741_s2 + $0xe8] sm:$0xff] }
 0x2e2   :  { %v2535_v27 = vmax.f32 %v2495_v53, 1e-24 }
 0x2e3   :  { %v2820_v62 = vmax.f32 %v2788_v17, %v2596_v22 }
 0x2e4   :  { %3992 = vrsqrt.f32 %v2535_v27  ;;  %v2497_v59 = vpop.xlane.xlu0 %2496 }
 0x2e5   :  { %2852 = vst [vmem:[%s5747_s8 + $0xa0] sm:$0xff] %v2820_v62  ;;  %v2536_v32 = vmax.f32 %v2497_v59, 1e-24 }
 0x2e7   :  { %3994 = vrsqrt.f32 %v2536_v32  ;;  %v2499_v47 = vpop.xlane.xlu1 %2498 }
 0x2e8   :  { %v2537_v51 = vmax.f32 %v2499_v47, 1e-24 }
 0x2e9   :  { %v3989_v36 = vpop.eup %3988 }
 0x2ea   :  { %v2597_v4 = vmul.f32 %v3989_v36, %v5444_v16  ;;  %3996 = vrsqrt.f32 %v2537_v51 }
 0x2eb   :  { %v3991_v34 = vpop.eup %3990 }
 0x2ec   :  { %v3180_v42 = vpack.c.bf16 %v2597_v4, %v2596_v22  ;;  %v2821_v37 = vmax.f32 %v2789_v2, %v2597_v4  ;;  %v2598_v0 = vmul.f32 %v3991_v34, %v5450_v31 }
 0x2ee   :  { %3216 = vst [vmem:[#allocation2 + $0x50] sm:$0xff] %v3180_v42   ;;  %2853 = vst [vmem:[%s5747_s8 + $0xa8] sm:$0xff] %v2821_v37  ;;  %v2822_v25 = vmax.f32 %v2790_v15, %v2598_v0 }
 0x2ef   :  { %v2501_v45 = vpop.xlane.xlu0 %2500 }
 0x2f0   :  { %2854 = vst [vmem:[%s5747_s8 + $0xb0] sm:$0xff] %v2822_v25  ;;  %v2538_v16 = vmax.f32 %v2501_v45, 1e-24 }
 0x2f1   :  { %v3993_v35 = vpop.eup %3992 }
 0x2f2   :  { %v2599_v18 = vmul.f32 %v3993_v35, %v5458_v55  ;;  %3998 = vrsqrt.f32 %v2538_v16  ;;  %v2793_v55 = vld [vmem:[%s5741_s2 + $0xc8] sm:$0xff] }
 0x2f4   :  { %v3995_v31 = vpop.eup %3994  ;;  %v3185_v57 = vpack.c.bf16 %v2599_v18, %v2598_v0  ;;  %v2823_v46 = vmax.f32 %v2791_v9, %v2599_v18 }
 0x2f5   :  { %v2600_v54 = vmul.f32 %v3995_v31, %v5465_v11  ;;  %v2503_v28 = vpop.xlane.xlu1 %2502 }
 0x2f6   :  { %3217 = vst [vmem:[#allocation2 + $0x58] sm:$0xff] %v3185_v57   ;;  %2855 = vst [vmem:[%s5747_s8 + $0xb8] sm:$0xff] %v2823_v46  ;;  %v2539_v19 = vmax.f32 %v2503_v28, 1e-24 }
 0x2f7   :  { %v3997_v63 = vpop.eup %3996  ;;  %v2824_v8 = vmax.f32 %v2792_v40, %v2600_v54 }
 0x2f8   :  { %v2601_v23 = vmul.f32 %v3997_v63, %v5470_v13  ;;  %4000 = vrsqrt.f32 %v2539_v19  ;;  %v2794_v13 = vld [vmem:[%s5741_s2 + $0xd0] sm:$0xff] }
 0x2f9   :  { %2856 = vst [vmem:[%s5747_s8 + $0xc0] sm:$0xff] %v2824_v8 }
 0x2fa   :  { %v3190_v11 = vpack.c.bf16 %v2601_v23, %v2600_v54  ;;  %v2825_v44 = vmax.f32 %v2793_v55, %v2601_v23  ;;  %v2505_v43 = vpop.xlane.xlu0 %2504 }
 0x2fb   :  { %v2540_v50 = vmax.f32 %v2505_v43, 1e-24 }
 0x2fc   :  { %3218 = vst [vmem:[#allocation2 + $0x60] sm:$0xff] %v3190_v11   ;;  %2857 = vst [vmem:[%s5747_s8 + $0xc8] sm:$0xff] %v2825_v44 }
 0x2fd   :  { %4002 = vrsqrt.f32 %v2540_v50 }
 0x2fe   :  { %v2507_v7 = vpop.xlane.xlu1 %2506 }
 0x2ff   :  { %v3999_v26 = vpop.eup %3998  ;;  %v2541_v10 = vmax.f32 %v2507_v7, 1e-24 }
 0x300   :  { %v2602_v20 = vmul.f32 %v3999_v26, %v5480_v61 }
 0x301   :  { %4004 = vrsqrt.f32 %v2541_v10 }
 0x302   :  { %v2826_v24 = vmax.f32 %v2794_v13, %v2602_v20 }
 0x303   :  { %v2509_v49 = vpop.xlane.xlu0 %2508 }
 0x304   :  { %2858 = vst [vmem:[%s5747_s8 + $0xd0] sm:$0xff] %v2826_v24  ;;  %v2542_v60 = vmax.f32 %v2509_v49, 1e-24 }
 0x305   :  { %v4001_v39 = vpop.eup %4000 }
 0x306   :  { %v2603_v21 = vmul.f32 %v4001_v39, %v5487_v12  ;;  %4006 = vrsqrt.f32 %v2542_v60 }
 0x308   :  { %v3195_v6 = vpack.c.bf16 %v2603_v21, %v2602_v20  ;;  %v2827_v14 = vmax.f32 %v2795_v30, %v2603_v21  ;;  %v2511_v33 = vpop.xlane.xlu1 %2510 }
 0x309   :  { %v2543_v61 = vmax.f32 %v2511_v33, 1e-24 }
 0x30a   :  { %v4003_v29 = vpop.eup %4002  ;;  %3219 = vst [vmem:[#allocation2 + $0x68] sm:$0xff] %v3195_v6   ;;  %2859 = vst [vmem:[%s5747_s8 + $0xd8] sm:$0xff] %v2827_v14 }
 0x30b   :  { %v2604_v52 = vmul.f32 %v4003_v29, %v5493_v48  ;;  %4008 = vrsqrt.f32 %v2543_v61  ;;  %v2798_v48 = vld [vmem:[%s5741_s2 + $0xf0] sm:$0xff] }
 0x30d   :  { %v2828_v3 = vmax.f32 %v2796_v58, %v2604_v52 }
 0x30e   :  { %v4005_v12 = vpop.eup %4004 }
 0x30f   :  { %2860 = vst [vmem:[%s5747_s8 + $0xe0] sm:$0xff] %v2828_v3  ;;  %v2605_v5 = vmul.f32 %v4005_v12, %v5498_v38  ;;  %v2799_v38 = vld [vmem:[%s5741_s2 + $0xf8] sm:$0xff] }
 0x311   :  { %v3200_v17 = vpack.c.bf16 %v2605_v5, %v2604_v52  ;;  %v2829_v22 = vmax.f32 %v2797_v41, %v2605_v5 }
 0x313   :  { %v4007_v53 = vpop.eup %4006  ;;  %3220 = vst [vmem:[#allocation2 + $0x70] sm:$0xff] %v3200_v17   ;;  %2861 = vst [vmem:[%s5747_s8 + $0xe8] sm:$0xff] %v2829_v22 }
 0x314   :  { %v2606_v27 = vmul.f32 %v4007_v53, %v5503_v56 }
 0x316   :  { %v2830_v62 = vmax.f32 %v2798_v48, %v2606_v27 }
 0x318   :  { %v4009_v59 = vpop.eup %4008  ;;  %2862 = vst [vmem:[%s5747_s8 + $0xf0] sm:$0xff] %v2830_v62 }
 0x319   :  { %v2607_v32 = vmul.f32 %v4009_v59, %v5508_v1 }
 0x31b   :  { %v3205_v47 = vpack.c.bf16 %v2607_v32, %v2606_v27  ;;  %v2831_v51 = vmax.f32 %v2799_v38, %v2607_v32 }
 0x31d   :  { %3221 = vst [vmem:[#allocation2 + $0x78] sm:$0xff] %v3205_v47   ;;  %2863 = vst [vmem:[%s5747_s8 + $0xf8] sm:$0xff] %v2831_v51 }
 0x31e   :  { %4022 = shalt.err (!%p4019_p4)
}
 0x31f   :  { %s4035_s2 = smov 64   ;;  %s4036_s23 = smov 4  }
 0x320   :  { %2875 = dma.vmem_to_hbm [thread:$0]  %s2870_s20, 2048, %s5746_s7, [#allocation3], %s4035_s2, %s4035_s2, %s4036_s23  }
 0x321   :  { %4031 = dma.done.wait [#allocation3], 2048  }
 0x322   :  { %4032 = vsyncadd [#allocation3], 4294965248 }
 0x323   :  { %2883 = vsyncpa [#allocation3], 1 }

</bundles_post_ra>
